<compile_context>
chip_gen: v6e
topology: v6e:2x2x1
jax: 0.10.0
libtpu: 0.0.40
codegen_flags: <defaults>
</compile_context>

<pallas_src>
import functools

import numpy as np

import jax
import jax.numpy as jnp
from jax.experimental import pallas as pl
from jax.experimental.pallas import tpu as pltpu


# ----------------------------- in-kernel conv helper -------------------------

def _conv3x3_im2col(x, w_packed, tap_masks, shifts, ones_row, relu):
    """3x3 same-padding conv in flat-lane layout; bias folded into the matmul.

    x        : [Cin, N] f32   (N = B*H*W on lanes, batch-major)
    w_packed : [Cout, 9*Cin + 1] bf16 (tap-major, Cin-minor; last column = bias)
    tap_masks: 9 entries, each [1, N] f32 or None (center tap is all-valid)
    """
    parts = []
    for t in range(9):
        s = shifts[t]
        tap = x if s == 0 else pltpu.roll(x, shift=s, axis=1)
        m = tap_masks[t]
        if m is not None:
            tap = tap * m                    # zero out-of-image / cross-batch taps (f32 VPU)
        parts.append(tap.astype(jnp.bfloat16))
    parts.append(ones_row)                   # constant-1 row -> bias column of w_packed
    slab = jnp.concatenate(parts, axis=0)    # [9*Cin+1, N] bf16 im2col slab
    out = jnp.dot(w_packed, slab, preferred_element_type=jnp.float32)  # single MXU pass
    if relu:
        out = jnp.maximum(out, 0.0)
    return out                               # [Cout, N] f32 (lane-dense)


# ------------------------------- fused kernel --------------------------------

def _admm_fused_kernel(gammas_ref, x_ref, phi_ref, masks_ref,
                       w1_ref, w2_ref, w3_ref, out_ref, *, shifts, n_stage):
    x0 = x_ref[...]                                     # [T, N]
    phi = phi_ref[...]                                  # [T, N]
    masks = masks_ref[...]                              # [9, N]
    N = phi.shape[1]
    tap_masks = [None if t == 4 else masks[t:t + 1, :] for t in range(9)]
    ones_row = jnp.ones((1, N), jnp.bfloat16)

    # y = sum_T(mask(x)), Phi_s = sum_T(Phi), theta0 = At(y, Phi), b0 = 0.
    y = jnp.sum(x0 * phi, axis=0, keepdims=True)        # [1, N]
    phi_s = jnp.sum(phi, axis=0, keepdims=True)         # [1, N]
    theta = y * phi                                     # [T, N]
    b = jnp.zeros_like(theta)

    for k in range(n_stage):                            # statically unrolled stages
        gamma = gammas_ref[k]                           # scalar from SMEM

        # ADMM data-consistency step:
        #   x = theta + b + At((y - A(theta+b)) / (Phi_s + gamma), Phi)
        tb = theta + b
        yb = jnp.sum(tb * phi, axis=0, keepdims=True)
        corr = (y - yb) * pl.reciprocal(phi_s + gamma, approx=True)   # EUP reciprocal
        xk = tb + corr * phi
        x1 = xk - b

        # Unet stand-in: conv 16->32 (ReLU), 32->32 (ReLU), 32->16.
        h1 = _conv3x3_im2col(x1, w1_ref[k], tap_masks, shifts, ones_row, relu=True)
        h2 = _conv3x3_im2col(h1, w2_ref[k], tap_masks, shifts, ones_row, relu=True)
        theta = _conv3x3_im2col(h2, w3_ref[k], tap_masks, shifts, ones_row, relu=False)

        b = b - (xk - theta)                            # fused b update
        out_ref[k] = theta                              # x_list[k]


# --------------------------------- wrapper ------------------------------------

def _prep_conv_w(w, bias):
    """[3,3,Cin,Cout] HWIO + [Cout] -> [Cout, 9*Cin + 1] bf16 (tap-major, bias column)."""
    cin, cout = w.shape[2], w.shape[3]
    wt = jnp.transpose(w.reshape(9, cin, cout), (2, 0, 1)).reshape(cout, 9 * cin)
    return jnp.concatenate([wt, bias.reshape(cout, 1)], axis=1).astype(jnp.bfloat16)


def _tap_masks_and_shifts(B, H, W):
    """9 destination-lane validity masks [9, N] (numpy, compile-time) + static lane shifts."""
    N = B * H * W
    lane = np.arange(N)
    hw = lane % (H * W)
    hh = hw // W
    ww = hw % W
    masks = np.zeros((9, N), np.float32)
    shifts = []
    i = 0
    for dy in (-1, 0, 1):
        for dx in (-1, 0, 1):
            valid = ((hh + dy >= 0) & (hh + dy < H) &
                     (ww + dx >= 0) & (ww + dx < W))
            masks[i] = valid.astype(np.float32)
            shifts.append(int((-(dy * W + dx)) % N))    # rolled[n] = x[n + dy*W + dx]
            i += 1
    return jnp.asarray(masks), tuple(shifts)


def admm_net_forward(x, params):
    B, T, H, W = x.shape
    N = B * H * W
    assert N % 128 == 0, "B*H*W must be a multiple of 128 for the lane-dense layout"
    f32 = jnp.float32

    # TODO(synk): LearnableMask / generate_mask_s not provided; binary = (weight > 0),
    # guarded so every pixel is covered (Phi_s > 0) since gammas init to 0 like PyTorch.
    mask_w = params["mask_weight"]
    binary = (mask_w > 0.0).astype(f32)                          # [T, H, W]
    covered = jnp.sum(binary, axis=0) > 0.0
    binary = binary.at[0].set(jnp.where(covered, binary[0], 1.0))

    phi = jnp.tile(binary.reshape(T, H * W), (1, B))             # [T, B*HW], batch-major lanes
    xf = jnp.transpose(x, (1, 0, 2, 3)).reshape(T, N).astype(f32)
    tap_masks, shifts = _tap_masks_and_shifts(B, H, W)

    unets = params["unets"]
    W1 = jnp.stack([_prep_conv_w(u["w1"], u["b1"]) for u in unets])  # [9, C1, 9*T+1]  bf16
    W2 = jnp.stack([_prep_conv_w(u["w2"], u["b2"]) for u in unets])  # [9, C2, 9*C1+1] bf16
    W3 = jnp.stack([_prep_conv_w(u["w3"], u["b3"]) for u in unets])  # [9, T,  9*C2+1] bf16
    gammas = params["gammas"].astype(f32)                            # [9]
    n_stage = int(gammas.shape[0])

    vmem = pl.BlockSpec(memory_space=pltpu.MemorySpace.VMEM)
    out = pl.pallas_call(
        functools.partial(_admm_fused_kernel, shifts=shifts, n_stage=n_stage),
        out_shape=jax.ShapeDtypeStruct((n_stage, T, N), f32),
        in_specs=[
            pl.BlockSpec(memory_space=pltpu.MemorySpace.SMEM),   # gammas (scalars)
            vmem,                                                # x
            vmem,                                                # Phi
            vmem,                                                # tap validity masks
            vmem, vmem, vmem,                                    # packed W1 / W2 / W3 (all stages)
        ],
        out_specs=vmem,
    )(gammas, xf, phi, tap_masks, W1, W2, W3)

    # [9, T, B*HW] -> list of 9 x [B, T, H, W]
    outs = out.reshape(n_stage, T, B, H, W).transpose(0, 2, 1, 3, 4)
    return [outs[k] for k in range(n_stage)]


# ------------------------------ parameter init --------------------------------

def init_params(key, t=16, s=8):
    keys = jax.random.split(key, 64)
    ki = iter(keys)
    params = {"mask_weight": jax.random.normal(next(ki), (t, s, s), jnp.float32)}
    chans = [t, 32, 32, t]
    unets = []
    for _ in range(9):
        layer = {}
        for li in range(3):
            cin, cout = chans[li], chans[li + 1]
            scale = 1.0 / jnp.sqrt(9.0 * cin)
            layer[f"w{li+1}"] = (jax.random.normal(next(ki), (3, 3, cin, cout),
                                                   jnp.float32) * scale)
            layer[f"b{li+1}"] = jnp.zeros((cout,), jnp.float32)
        unets.append(layer)
    params["unets"] = unets
    # Matches PyTorch init (gamma_i = 0); safe because Phi_s > 0 is guaranteed above.
    params["gammas"] = jnp.zeros((9,), jnp.float32)
    return params


# ----------------------------------- main --------------------------------------

if __name__ == "__main__":
    key = jax.random.PRNGKey(0)
    pkey, xkey = jax.random.split(key)
    params = init_params(pkey, t=16, s=8)
    x = jax.random.normal(xkey, (2, 16, 8, 8), jnp.float32)   # [B, T, H, W]

    fwd = jax.jit(admm_net_forward)
    outs = fwd(x, params)
    for o in outs:
        jax.block_until_ready(o)
    assert len(outs) == 9
    assert all(o.shape == (2, 16, 8, 8) for o in outs)
    assert all(bool(jnp.all(jnp.isfinite(o))) for o in outs)
    print("KERNEL_OK")
</pallas_src>

<mosaic_0001>
module attributes {stable_mosaic.version = 11 : i64} {
  func.func @_admm_fused_kernel(%arg0: memref<9xf32, #tpu.memory_space<smem>>, %arg1: memref<16x128xf32, #tpu.memory_space<vmem>>, %arg2: memref<16x128xf32, #tpu.memory_space<vmem>>, %arg3: memref<9x128xf32, #tpu.memory_space<vmem>>, %arg4: memref<9x32x145xbf16, #tpu.memory_space<vmem>>, %arg5: memref<9x32x289xbf16, #tpu.memory_space<vmem>>, %arg6: memref<9x16x289xbf16, #tpu.memory_space<vmem>>, %arg7: memref<9x16x128xf32, #tpu.memory_space<vmem>>) attributes {dimension_semantics = [], scalar_prefetch = 0 : i64, scratch_operands = 0 : i64, tpu.core_type = #tpu.core_type<tc>} {
    %c0 = arith.constant 0 : index
    %c0_0 = arith.constant 0 : index
    %0 = vector.load %arg1[%c0, %c0_0] : memref<16x128xf32, #tpu.memory_space<vmem>>, vector<16x128xf32>
    %c0_1 = arith.constant 0 : index
    %c0_2 = arith.constant 0 : index
    %1 = vector.load %arg2[%c0_1, %c0_2] : memref<16x128xf32, #tpu.memory_space<vmem>>, vector<16x128xf32>
    %c0_3 = arith.constant 0 : index
    %c0_4 = arith.constant 0 : index
    %2 = vector.load %arg3[%c0_3, %c0_4] : memref<9x128xf32, #tpu.memory_space<vmem>>, vector<9x128xf32>
    %3 = vector.extract_strided_slice %2 {offsets = [0, 0], sizes = [1, 128], strides = [1, 1]} : vector<9x128xf32> to vector<1x128xf32>
    %4 = vector.extract_strided_slice %2 {offsets = [1, 0], sizes = [1, 128], strides = [1, 1]} : vector<9x128xf32> to vector<1x128xf32>
    %5 = vector.extract_strided_slice %2 {offsets = [2, 0], sizes = [1, 128], strides = [1, 1]} : vector<9x128xf32> to vector<1x128xf32>
    %6 = vector.extract_strided_slice %2 {offsets = [3, 0], sizes = [1, 128], strides = [1, 1]} : vector<9x128xf32> to vector<1x128xf32>
    %7 = vector.extract_strided_slice %2 {offsets = [5, 0], sizes = [1, 128], strides = [1, 1]} : vector<9x128xf32> to vector<1x128xf32>
    %8 = vector.extract_strided_slice %2 {offsets = [6, 0], sizes = [1, 128], strides = [1, 1]} : vector<9x128xf32> to vector<1x128xf32>
    %9 = vector.extract_strided_slice %2 {offsets = [7, 0], sizes = [1, 128], strides = [1, 1]} : vector<9x128xf32> to vector<1x128xf32>
    %10 = vector.extract_strided_slice %2 {offsets = [8, 0], sizes = [1, 128], strides = [1, 1]} : vector<9x128xf32> to vector<1x128xf32>
    %cst = arith.constant 1.000000e+00 : bf16
    %11 = vector.broadcast %cst : bf16 to vector<1x128xbf16>
    %12 = arith.mulf %0, %1 : vector<16x128xf32>
    %cst_5 = arith.constant dense<0.000000e+00> : vector<128xf32>
    %13 = vector.multi_reduction <add>, %12, %cst_5 [0] : vector<16x128xf32> to vector<128xf32>
    %14 = vector.shape_cast %13 : vector<128xf32> to vector<1x128xf32>
    %cst_6 = arith.constant dense<0.000000e+00> : vector<128xf32>
    %15 = vector.multi_reduction <add>, %1, %cst_6 [0] : vector<16x128xf32> to vector<128xf32>
    %16 = vector.shape_cast %15 : vector<128xf32> to vector<1x128xf32>
    %17 = vector.broadcast %14 : vector<1x128xf32> to vector<16x128xf32>
    %18 = arith.mulf %17, %1 : vector<16x128xf32>
    %cst_7 = arith.constant 0.000000e+00 : f32
    %19 = vector.broadcast %cst_7 : f32 to vector<16x128xf32>
    %c0_8 = arith.constant 0 : index
    %20 = memref.load %arg0[%c0_8] : memref<9xf32, #tpu.memory_space<smem>>
    %21 = arith.addf %18, %19 : vector<16x128xf32>
    %22 = arith.mulf %21, %1 : vector<16x128xf32>
    %cst_9 = arith.constant dense<0.000000e+00> : vector<128xf32>
    %23 = vector.multi_reduction <add>, %22, %cst_9 [0] : vector<16x128xf32> to vector<128xf32>
    %24 = vector.shape_cast %23 : vector<128xf32> to vector<1x128xf32>
    %25 = arith.subf %14, %24 : vector<1x128xf32>
    %26 = vector.broadcast %20 : f32 to vector<1x128xf32>
    %27 = arith.addf %16, %26 : vector<1x128xf32>
    %28 = tpu.reciprocal %27 {approx = true} : vector<1x128xf32> -> vector<1x128xf32>
    %29 = arith.mulf %25, %28 : vector<1x128xf32>
    %30 = vector.broadcast %29 : vector<1x128xf32> to vector<16x128xf32>
    %31 = arith.mulf %30, %1 : vector<16x128xf32>
    %32 = arith.addf %21, %31 : vector<16x128xf32>
    %33 = arith.subf %32, %19 : vector<16x128xf32>
    %c0_10 = arith.constant 0 : index
    %c0_11 = arith.constant 0 : index
    %c0_12 = arith.constant 0 : index
    %34 = vector.load %arg4[%c0_10, %c0_11, %c0_12] : memref<9x32x145xbf16, #tpu.memory_space<vmem>>, vector<1x32x145xbf16>
    %35 = vector.shape_cast %34 : vector<1x32x145xbf16> to vector<32x145xbf16>
    %c9_i32 = arith.constant 9 : i32
    %36 = tpu.dynamic_rotate %33 by %c9_i32 dim 1 : vector<16x128xf32>, i32 -> vector<16x128xf32>
    %37 = vector.broadcast %3 : vector<1x128xf32> to vector<16x128xf32>
    %38 = arith.mulf %36, %37 : vector<16x128xf32>
    %39 = arith.truncf %38 : vector<16x128xf32> to vector<16x128xbf16>
    %c8_i32 = arith.constant 8 : i32
    %40 = tpu.dynamic_rotate %33 by %c8_i32 dim 1 : vector<16x128xf32>, i32 -> vector<16x128xf32>
    %41 = vector.broadcast %4 : vector<1x128xf32> to vector<16x128xf32>
    %42 = arith.mulf %40, %41 : vector<16x128xf32>
    %43 = arith.truncf %42 : vector<16x128xf32> to vector<16x128xbf16>
    %c7_i32 = arith.constant 7 : i32
    %44 = tpu.dynamic_rotate %33 by %c7_i32 dim 1 : vector<16x128xf32>, i32 -> vector<16x128xf32>
    %45 = vector.broadcast %5 : vector<1x128xf32> to vector<16x128xf32>
    %46 = arith.mulf %44, %45 : vector<16x128xf32>
    %47 = arith.truncf %46 : vector<16x128xf32> to vector<16x128xbf16>
    %c1_i32 = arith.constant 1 : i32
    %48 = tpu.dynamic_rotate %33 by %c1_i32 dim 1 : vector<16x128xf32>, i32 -> vector<16x128xf32>
    %49 = vector.broadcast %6 : vector<1x128xf32> to vector<16x128xf32>
    %50 = arith.mulf %48, %49 : vector<16x128xf32>
    %51 = arith.truncf %50 : vector<16x128xf32> to vector<16x128xbf16>
    %52 = arith.truncf %33 : vector<16x128xf32> to vector<16x128xbf16>
    %c127_i32 = arith.constant 127 : i32
    %53 = tpu.dynamic_rotate %33 by %c127_i32 dim 1 : vector<16x128xf32>, i32 -> vector<16x128xf32>
    %54 = vector.broadcast %7 : vector<1x128xf32> to vector<16x128xf32>
    %55 = arith.mulf %53, %54 : vector<16x128xf32>
    %56 = arith.truncf %55 : vector<16x128xf32> to vector<16x128xbf16>
    %c121_i32 = arith.constant 121 : i32
    %57 = tpu.dynamic_rotate %33 by %c121_i32 dim 1 : vector<16x128xf32>, i32 -> vector<16x128xf32>
    %58 = vector.broadcast %8 : vector<1x128xf32> to vector<16x128xf32>
    %59 = arith.mulf %57, %58 : vector<16x128xf32>
    %60 = arith.truncf %59 : vector<16x128xf32> to vector<16x128xbf16>
    %c120_i32 = arith.constant 120 : i32
    %61 = tpu.dynamic_rotate %33 by %c120_i32 dim 1 : vector<16x128xf32>, i32 -> vector<16x128xf32>
    %62 = vector.broadcast %9 : vector<1x128xf32> to vector<16x128xf32>
    %63 = arith.mulf %61, %62 : vector<16x128xf32>
    %64 = arith.truncf %63 : vector<16x128xf32> to vector<16x128xbf16>
    %c119_i32 = arith.constant 119 : i32
    %65 = tpu.dynamic_rotate %33 by %c119_i32 dim 1 : vector<16x128xf32>, i32 -> vector<16x128xf32>
    %66 = vector.broadcast %10 : vector<1x128xf32> to vector<16x128xf32>
    %67 = arith.mulf %65, %66 : vector<16x128xf32>
    %68 = arith.truncf %67 : vector<16x128xf32> to vector<16x128xbf16>
    %69 = tpu.concatenate %39, %43, %47, %51, %52, %56, %60, %64, %68, %11 in 0 : vector<16x128xbf16>, vector<16x128xbf16>, vector<16x128xbf16>, vector<16x128xbf16>, vector<16x128xbf16>, vector<16x128xbf16>, vector<16x128xbf16>, vector<16x128xbf16>, vector<16x128xbf16>, vector<1x128xbf16> -> vector<145x128xbf16>
    %cst_13 = arith.constant dense<0.000000e+00> : vector<32x128xf32>
    %70 = tpu.matmul %35, %69, %cst_13 {dimension_numbers = #tpu.dot_dimension_numbers<[1], [0], [0], [1], [0, 0, 1, 1], [], []>} : vector<32x145xbf16>, vector<145x128xbf16>, vector<32x128xf32> -> vector<32x128xf32>
    %cst_14 = arith.constant 0.000000e+00 : f32
    %71 = vector.broadcast %cst_14 : f32 to vector<32x128xf32>
    %72 = arith.maximumf %70, %71 : vector<32x128xf32>
    %c0_15 = arith.constant 0 : index
    %c0_16 = arith.constant 0 : index
    %c0_17 = arith.constant 0 : index
    %73 = vector.load %arg5[%c0_15, %c0_16, %c0_17] : memref<9x32x289xbf16, #tpu.memory_space<vmem>>, vector<1x32x289xbf16>
    %74 = vector.shape_cast %73 : vector<1x32x289xbf16> to vector<32x289xbf16>
    %c9_i32_18 = arith.constant 9 : i32
    %75 = tpu.dynamic_rotate %72 by %c9_i32_18 dim 1 : vector<32x128xf32>, i32 -> vector<32x128xf32>
    %76 = vector.broadcast %3 : vector<1x128xf32> to vector<32x128xf32>
    %77 = arith.mulf %75, %76 : vector<32x128xf32>
    %78 = arith.truncf %77 : vector<32x128xf32> to vector<32x128xbf16>
    %c8_i32_19 = arith.constant 8 : i32
    %79 = tpu.dynamic_rotate %72 by %c8_i32_19 dim 1 : vector<32x128xf32>, i32 -> vector<32x128xf32>
    %80 = vector.broadcast %4 : vector<1x128xf32> to vector<32x128xf32>
    %81 = arith.mulf %79, %80 : vector<32x128xf32>
    %82 = arith.truncf %81 : vector<32x128xf32> to vector<32x128xbf16>
    %c7_i32_20 = arith.constant 7 : i32
    %83 = tpu.dynamic_rotate %72 by %c7_i32_20 dim 1 : vector<32x128xf32>, i32 -> vector<32x128xf32>
    %84 = vector.broadcast %5 : vector<1x128xf32> to vector<32x128xf32>
    %85 = arith.mulf %83, %84 : vector<32x128xf32>
    %86 = arith.truncf %85 : vector<32x128xf32> to vector<32x128xbf16>
    %c1_i32_21 = arith.constant 1 : i32
    %87 = tpu.dynamic_rotate %72 by %c1_i32_21 dim 1 : vector<32x128xf32>, i32 -> vector<32x128xf32>
    %88 = vector.broadcast %6 : vector<1x128xf32> to vector<32x128xf32>
    %89 = arith.mulf %87, %88 : vector<32x128xf32>
    %90 = arith.truncf %89 : vector<32x128xf32> to vector<32x128xbf16>
    %91 = arith.truncf %72 : vector<32x128xf32> to vector<32x128xbf16>
    %c127_i32_22 = arith.constant 127 : i32
    %92 = tpu.dynamic_rotate %72 by %c127_i32_22 dim 1 : vector<32x128xf32>, i32 -> vector<32x128xf32>
    %93 = vector.broadcast %7 : vector<1x128xf32> to vector<32x128xf32>
    %94 = arith.mulf %92, %93 : vector<32x128xf32>
    %95 = arith.truncf %94 : vector<32x128xf32> to vector<32x128xbf16>
    %c121_i32_23 = arith.constant 121 : i32
    %96 = tpu.dynamic_rotate %72 by %c121_i32_23 dim 1 : vector<32x128xf32>, i32 -> vector<32x128xf32>
    %97 = vector.broadcast %8 : vector<1x128xf32> to vector<32x128xf32>
    %98 = arith.mulf %96, %97 : vector<32x128xf32>
    %99 = arith.truncf %98 : vector<32x128xf32> to vector<32x128xbf16>
    %c120_i32_24 = arith.constant 120 : i32
    %100 = tpu.dynamic_rotate %72 by %c120_i32_24 dim 1 : vector<32x128xf32>, i32 -> vector<32x128xf32>
    %101 = vector.broadcast %9 : vector<1x128xf32> to vector<32x128xf32>
    %102 = arith.mulf %100, %101 : vector<32x128xf32>
    %103 = arith.truncf %102 : vector<32x128xf32> to vector<32x128xbf16>
    %c119_i32_25 = arith.constant 119 : i32
    %104 = tpu.dynamic_rotate %72 by %c119_i32_25 dim 1 : vector<32x128xf32>, i32 -> vector<32x128xf32>
    %105 = vector.broadcast %10 : vector<1x128xf32> to vector<32x128xf32>
    %106 = arith.mulf %104, %105 : vector<32x128xf32>
    %107 = arith.truncf %106 : vector<32x128xf32> to vector<32x128xbf16>
    %108 = tpu.concatenate %78, %82, %86, %90, %91, %95, %99, %103, %107, %11 in 0 : vector<32x128xbf16>, vector<32x128xbf16>, vector<32x128xbf16>, vector<32x128xbf16>, vector<32x128xbf16>, vector<32x128xbf16>, vector<32x128xbf16>, vector<32x128xbf16>, vector<32x128xbf16>, vector<1x128xbf16> -> vector<289x128xbf16>
    %cst_26 = arith.constant dense<0.000000e+00> : vector<32x128xf32>
    %109 = tpu.matmul %74, %108, %cst_26 {dimension_numbers = #tpu.dot_dimension_numbers<[1], [0], [0], [1], [0, 0, 1, 1], [], []>} : vector<32x289xbf16>, vector<289x128xbf16>, vector<32x128xf32> -> vector<32x128xf32>
    %cst_27 = arith.constant 0.000000e+00 : f32
    %110 = vector.broadcast %cst_27 : f32 to vector<32x128xf32>
    %111 = arith.maximumf %109, %110 : vector<32x128xf32>
    %c0_28 = arith.constant 0 : index
    %c0_29 = arith.constant 0 : index
    %c0_30 = arith.constant 0 : index
    %112 = vector.load %arg6[%c0_28, %c0_29, %c0_30] : memref<9x16x289xbf16, #tpu.memory_space<vmem>>, vector<1x16x289xbf16>
    %113 = vector.shape_cast %112 : vector<1x16x289xbf16> to vector<16x289xbf16>
    %c9_i32_31 = arith.constant 9 : i32
    %114 = tpu.dynamic_rotate %111 by %c9_i32_31 dim 1 : vector<32x128xf32>, i32 -> vector<32x128xf32>
    %115 = vector.broadcast %3 : vector<1x128xf32> to vector<32x128xf32>
    %116 = arith.mulf %114, %115 : vector<32x128xf32>
    %117 = arith.truncf %116 : vector<32x128xf32> to vector<32x128xbf16>
    %c8_i32_32 = arith.constant 8 : i32
    %118 = tpu.dynamic_rotate %111 by %c8_i32_32 dim 1 : vector<32x128xf32>, i32 -> vector<32x128xf32>
    %119 = vector.broadcast %4 : vector<1x128xf32> to vector<32x128xf32>
    %120 = arith.mulf %118, %119 : vector<32x128xf32>
    %121 = arith.truncf %120 : vector<32x128xf32> to vector<32x128xbf16>
    %c7_i32_33 = arith.constant 7 : i32
    %122 = tpu.dynamic_rotate %111 by %c7_i32_33 dim 1 : vector<32x128xf32>, i32 -> vector<32x128xf32>
    %123 = vector.broadcast %5 : vector<1x128xf32> to vector<32x128xf32>
    %124 = arith.mulf %122, %123 : vector<32x128xf32>
    %125 = arith.truncf %124 : vector<32x128xf32> to vector<32x128xbf16>
    %c1_i32_34 = arith.constant 1 : i32
    %126 = tpu.dynamic_rotate %111 by %c1_i32_34 dim 1 : vector<32x128xf32>, i32 -> vector<32x128xf32>
    %127 = vector.broadcast %6 : vector<1x128xf32> to vector<32x128xf32>
    %128 = arith.mulf %126, %127 : vector<32x128xf32>
    %129 = arith.truncf %128 : vector<32x128xf32> to vector<32x128xbf16>
    %130 = arith.truncf %111 : vector<32x128xf32> to vector<32x128xbf16>
    %c127_i32_35 = arith.constant 127 : i32
    %131 = tpu.dynamic_rotate %111 by %c127_i32_35 dim 1 : vector<32x128xf32>, i32 -> vector<32x128xf32>
    %132 = vector.broadcast %7 : vector<1x128xf32> to vector<32x128xf32>
    %133 = arith.mulf %131, %132 : vector<32x128xf32>
    %134 = arith.truncf %133 : vector<32x128xf32> to vector<32x128xbf16>
    %c121_i32_36 = arith.constant 121 : i32
    %135 = tpu.dynamic_rotate %111 by %c121_i32_36 dim 1 : vector<32x128xf32>, i32 -> vector<32x128xf32>
    %136 = vector.broadcast %8 : vector<1x128xf32> to vector<32x128xf32>
    %137 = arith.mulf %135, %136 : vector<32x128xf32>
    %138 = arith.truncf %137 : vector<32x128xf32> to vector<32x128xbf16>
    %c120_i32_37 = arith.constant 120 : i32
    %139 = tpu.dynamic_rotate %111 by %c120_i32_37 dim 1 : vector<32x128xf32>, i32 -> vector<32x128xf32>
    %140 = vector.broadcast %9 : vector<1x128xf32> to vector<32x128xf32>
    %141 = arith.mulf %139, %140 : vector<32x128xf32>
    %142 = arith.truncf %141 : vector<32x128xf32> to vector<32x128xbf16>
    %c119_i32_38 = arith.constant 119 : i32
    %143 = tpu.dynamic_rotate %111 by %c119_i32_38 dim 1 : vector<32x128xf32>, i32 -> vector<32x128xf32>
    %144 = vector.broadcast %10 : vector<1x128xf32> to vector<32x128xf32>
    %145 = arith.mulf %143, %144 : vector<32x128xf32>
    %146 = arith.truncf %145 : vector<32x128xf32> to vector<32x128xbf16>
    %147 = tpu.concatenate %117, %121, %125, %129, %130, %134, %138, %142, %146, %11 in 0 : vector<32x128xbf16>, vector<32x128xbf16>, vector<32x128xbf16>, vector<32x128xbf16>, vector<32x128xbf16>, vector<32x128xbf16>, vector<32x128xbf16>, vector<32x128xbf16>, vector<32x128xbf16>, vector<1x128xbf16> -> vector<289x128xbf16>
    %cst_39 = arith.constant dense<0.000000e+00> : vector<16x128xf32>
    %148 = tpu.matmul %113, %147, %cst_39 {dimension_numbers = #tpu.dot_dimension_numbers<[1], [0], [0], [1], [0, 0, 1, 1], [], []>} : vector<16x289xbf16>, vector<289x128xbf16>, vector<16x128xf32> -> vector<16x128xf32>
    %149 = arith.subf %32, %148 : vector<16x128xf32>
    %150 = arith.subf %19, %149 : vector<16x128xf32>
    %c0_40 = arith.constant 0 : index
    %c0_41 = arith.constant 0 : index
    %c0_42 = arith.constant 0 : index
    %151 = vector.load %arg7[%c0_40, %c0_41, %c0_42] : memref<9x16x128xf32, #tpu.memory_space<vmem>>, vector<1x16x128xf32>
    %152 = vector.shape_cast %151 : vector<1x16x128xf32> to vector<16x128xf32>
    %153 = vector.shape_cast %148 : vector<16x128xf32> to vector<1x16x128xf32>
    tpu.vector_store %arg7[%c0_40, %c0_41, %c0_42], %153 {strides = array<i32>} : memref<9x16x128xf32, #tpu.memory_space<vmem>>, vector<1x16x128xf32>,
    %c1 = arith.constant 1 : index
    %154 = memref.load %arg0[%c1] : memref<9xf32, #tpu.memory_space<smem>>
    %155 = arith.addf %148, %150 : vector<16x128xf32>
    %156 = arith.mulf %155, %1 : vector<16x128xf32>
    %cst_43 = arith.constant dense<0.000000e+00> : vector<128xf32>
    %157 = vector.multi_reduction <add>, %156, %cst_43 [0] : vector<16x128xf32> to vector<128xf32>
    %158 = vector.shape_cast %157 : vector<128xf32> to vector<1x128xf32>
    %159 = arith.subf %14, %158 : vector<1x128xf32>
    %160 = vector.broadcast %154 : f32 to vector<1x128xf32>
    %161 = arith.addf %16, %160 : vector<1x128xf32>
    %162 = tpu.reciprocal %161 {approx = true} : vector<1x128xf32> -> vector<1x128xf32>
    %163 = arith.mulf %159, %162 : vector<1x128xf32>
    %164 = vector.broadcast %163 : vector<1x128xf32> to vector<16x128xf32>
    %165 = arith.mulf %164, %1 : vector<16x128xf32>
    %166 = arith.addf %155, %165 : vector<16x128xf32>
    %167 = arith.subf %166, %150 : vector<16x128xf32>
    %c1_44 = arith.constant 1 : index
    %c0_45 = arith.constant 0 : index
    %c0_46 = arith.constant 0 : index
    %168 = vector.load %arg4[%c1_44, %c0_45, %c0_46] : memref<9x32x145xbf16, #tpu.memory_space<vmem>>, vector<1x32x145xbf16>
    %169 = vector.shape_cast %168 : vector<1x32x145xbf16> to vector<32x145xbf16>
    %c9_i32_47 = arith.constant 9 : i32
    %170 = tpu.dynamic_rotate %167 by %c9_i32_47 dim 1 : vector<16x128xf32>, i32 -> vector<16x128xf32>
    %171 = vector.broadcast %3 : vector<1x128xf32> to vector<16x128xf32>
    %172 = arith.mulf %170, %171 : vector<16x128xf32>
    %173 = arith.truncf %172 : vector<16x128xf32> to vector<16x128xbf16>
    %c8_i32_48 = arith.constant 8 : i32
    %174 = tpu.dynamic_rotate %167 by %c8_i32_48 dim 1 : vector<16x128xf32>, i32 -> vector<16x128xf32>
    %175 = vector.broadcast %4 : vector<1x128xf32> to vector<16x128xf32>
    %176 = arith.mulf %174, %175 : vector<16x128xf32>
    %177 = arith.truncf %176 : vector<16x128xf32> to vector<16x128xbf16>
    %c7_i32_49 = arith.constant 7 : i32
    %178 = tpu.dynamic_rotate %167 by %c7_i32_49 dim 1 : vector<16x128xf32>, i32 -> vector<16x128xf32>
    %179 = vector.broadcast %5 : vector<1x128xf32> to vector<16x128xf32>
    %180 = arith.mulf %178, %179 : vector<16x128xf32>
    %181 = arith.truncf %180 : vector<16x128xf32> to vector<16x128xbf16>
    %c1_i32_50 = arith.constant 1 : i32
    %182 = tpu.dynamic_rotate %167 by %c1_i32_50 dim 1 : vector<16x128xf32>, i32 -> vector<16x128xf32>
    %183 = vector.broadcast %6 : vector<1x128xf32> to vector<16x128xf32>
    %184 = arith.mulf %182, %183 : vector<16x128xf32>
    %185 = arith.truncf %184 : vector<16x128xf32> to vector<16x128xbf16>
    %186 = arith.truncf %167 : vector<16x128xf32> to vector<16x128xbf16>
    %c127_i32_51 = arith.constant 127 : i32
    %187 = tpu.dynamic_rotate %167 by %c127_i32_51 dim 1 : vector<16x128xf32>, i32 -> vector<16x128xf32>
    %188 = vector.broadcast %7 : vector<1x128xf32> to vector<16x128xf32>
    %189 = arith.mulf %187, %188 : vector<16x128xf32>
    %190 = arith.truncf %189 : vector<16x128xf32> to vector<16x128xbf16>
    %c121_i32_52 = arith.constant 121 : i32
    %191 = tpu.dynamic_rotate %167 by %c121_i32_52 dim 1 : vector<16x128xf32>, i32 -> vector<16x128xf32>
    %192 = vector.broadcast %8 : vector<1x128xf32> to vector<16x128xf32>
    %193 = arith.mulf %191, %192 : vector<16x128xf32>
    %194 = arith.truncf %193 : vector<16x128xf32> to vector<16x128xbf16>
    %c120_i32_53 = arith.constant 120 : i32
    %195 = tpu.dynamic_rotate %167 by %c120_i32_53 dim 1 : vector<16x128xf32>, i32 -> vector<16x128xf32>
    %196 = vector.broadcast %9 : vector<1x128xf32> to vector<16x128xf32>
    %197 = arith.mulf %195, %196 : vector<16x128xf32>
    %198 = arith.truncf %197 : vector<16x128xf32> to vector<16x128xbf16>
    %c119_i32_54 = arith.constant 119 : i32
    %199 = tpu.dynamic_rotate %167 by %c119_i32_54 dim 1 : vector<16x128xf32>, i32 -> vector<16x128xf32>
    %200 = vector.broadcast %10 : vector<1x128xf32> to vector<16x128xf32>
    %201 = arith.mulf %199, %200 : vector<16x128xf32>
    %202 = arith.truncf %201 : vector<16x128xf32> to vector<16x128xbf16>
    %203 = tpu.concatenate %173, %177, %181, %185, %186, %190, %194, %198, %202, %11 in 0 : vector<16x128xbf16>, vector<16x128xbf16>, vector<16x128xbf16>, vector<16x128xbf16>, vector<16x128xbf16>, vector<16x128xbf16>, vector<16x128xbf16>, vector<16x128xbf16>, vector<16x128xbf16>, vector<1x128xbf16> -> vector<145x128xbf16>
    %cst_55 = arith.constant dense<0.000000e+00> : vector<32x128xf32>
    %204 = tpu.matmul %169, %203, %cst_55 {dimension_numbers = #tpu.dot_dimension_numbers<[1], [0], [0], [1], [0, 0, 1, 1], [], []>} : vector<32x145xbf16>, vector<145x128xbf16>, vector<32x128xf32> -> vector<32x128xf32>
    %cst_56 = arith.constant 0.000000e+00 : f32
    %205 = vector.broadcast %cst_56 : f32 to vector<32x128xf32>
    %206 = arith.maximumf %204, %205 : vector<32x128xf32>
    %c1_57 = arith.constant 1 : index
    %c0_58 = arith.constant 0 : index
    %c0_59 = arith.constant 0 : index
    %207 = vector.load %arg5[%c1_57, %c0_58, %c0_59] : memref<9x32x289xbf16, #tpu.memory_space<vmem>>, vector<1x32x289xbf16>
    %208 = vector.shape_cast %207 : vector<1x32x289xbf16> to vector<32x289xbf16>
    %c9_i32_60 = arith.constant 9 : i32
    %209 = tpu.dynamic_rotate %206 by %c9_i32_60 dim 1 : vector<32x128xf32>, i32 -> vector<32x128xf32>
    %210 = vector.broadcast %3 : vector<1x128xf32> to vector<32x128xf32>
    %211 = arith.mulf %209, %210 : vector<32x128xf32>
    %212 = arith.truncf %211 : vector<32x128xf32> to vector<32x128xbf16>
    %c8_i32_61 = arith.constant 8 : i32
    %213 = tpu.dynamic_rotate %206 by %c8_i32_61 dim 1 : vector<32x128xf32>, i32 -> vector<32x128xf32>
    %214 = vector.broadcast %4 : vector<1x128xf32> to vector<32x128xf32>
    %215 = arith.mulf %213, %214 : vector<32x128xf32>
    %216 = arith.truncf %215 : vector<32x128xf32> to vector<32x128xbf16>
    %c7_i32_62 = arith.constant 7 : i32
    %217 = tpu.dynamic_rotate %206 by %c7_i32_62 dim 1 : vector<32x128xf32>, i32 -> vector<32x128xf32>
    %218 = vector.broadcast %5 : vector<1x128xf32> to vector<32x128xf32>
    %219 = arith.mulf %217, %218 : vector<32x128xf32>
    %220 = arith.truncf %219 : vector<32x128xf32> to vector<32x128xbf16>
    %c1_i32_63 = arith.constant 1 : i32
    %221 = tpu.dynamic_rotate %206 by %c1_i32_63 dim 1 : vector<32x128xf32>, i32 -> vector<32x128xf32>
    %222 = vector.broadcast %6 : vector<1x128xf32> to vector<32x128xf32>
    %223 = arith.mulf %221, %222 : vector<32x128xf32>
    %224 = arith.truncf %223 : vector<32x128xf32> to vector<32x128xbf16>
    %225 = arith.truncf %206 : vector<32x128xf32> to vector<32x128xbf16>
    %c127_i32_64 = arith.constant 127 : i32
    %226 = tpu.dynamic_rotate %206 by %c127_i32_64 dim 1 : vector<32x128xf32>, i32 -> vector<32x128xf32>
    %227 = vector.broadcast %7 : vector<1x128xf32> to vector<32x128xf32>
    %228 = arith.mulf %226, %227 : vector<32x128xf32>
    %229 = arith.truncf %228 : vector<32x128xf32> to vector<32x128xbf16>
    %c121_i32_65 = arith.constant 121 : i32
    %230 = tpu.dynamic_rotate %206 by %c121_i32_65 dim 1 : vector<32x128xf32>, i32 -> vector<32x128xf32>
    %231 = vector.broadcast %8 : vector<1x128xf32> to vector<32x128xf32>
    %232 = arith.mulf %230, %231 : vector<32x128xf32>
    %233 = arith.truncf %232 : vector<32x128xf32> to vector<32x128xbf16>
    %c120_i32_66 = arith.constant 120 : i32
    %234 = tpu.dynamic_rotate %206 by %c120_i32_66 dim 1 : vector<32x128xf32>, i32 -> vector<32x128xf32>
    %235 = vector.broadcast %9 : vector<1x128xf32> to vector<32x128xf32>
    %236 = arith.mulf %234, %235 : vector<32x128xf32>
    %237 = arith.truncf %236 : vector<32x128xf32> to vector<32x128xbf16>
    %c119_i32_67 = arith.constant 119 : i32
    %238 = tpu.dynamic_rotate %206 by %c119_i32_67 dim 1 : vector<32x128xf32>, i32 -> vector<32x128xf32>
    %239 = vector.broadcast %10 : vector<1x128xf32> to vector<32x128xf32>
    %240 = arith.mulf %238, %239 : vector<32x128xf32>
    %241 = arith.truncf %240 : vector<32x128xf32> to vector<32x128xbf16>
    %242 = tpu.concatenate %212, %216, %220, %224, %225, %229, %233, %237, %241, %11 in 0 : vector<32x128xbf16>, vector<32x128xbf16>, vector<32x128xbf16>, vector<32x128xbf16>, vector<32x128xbf16>, vector<32x128xbf16>, vector<32x128xbf16>, vector<32x128xbf16>, vector<32x128xbf16>, vector<1x128xbf16> -> vector<289x128xbf16>
    %cst_68 = arith.constant dense<0.000000e+00> : vector<32x128xf32>
    %243 = tpu.matmul %208, %242, %cst_68 {dimension_numbers = #tpu.dot_dimension_numbers<[1], [0], [0], [1], [0, 0, 1, 1], [], []>} : vector<32x289xbf16>, vector<289x128xbf16>, vector<32x128xf32> -> vector<32x128xf32>
    %cst_69 = arith.constant 0.000000e+00 : f32
    %244 = vector.broadcast %cst_69 : f32 to vector<32x128xf32>
    %245 = arith.maximumf %243, %244 : vector<32x128xf32>
    %c1_70 = arith.constant 1 : index
    %c0_71 = arith.constant 0 : index
    %c0_72 = arith.constant 0 : index
    %246 = vector.load %arg6[%c1_70, %c0_71, %c0_72] : memref<9x16x289xbf16, #tpu.memory_space<vmem>>, vector<1x16x289xbf16>
    %247 = vector.shape_cast %246 : vector<1x16x289xbf16> to vector<16x289xbf16>
    %c9_i32_73 = arith.constant 9 : i32
    %248 = tpu.dynamic_rotate %245 by %c9_i32_73 dim 1 : vector<32x128xf32>, i32 -> vector<32x128xf32>
    %249 = vector.broadcast %3 : vector<1x128xf32> to vector<32x128xf32>
    %250 = arith.mulf %248, %249 : vector<32x128xf32>
    %251 = arith.truncf %250 : vector<32x128xf32> to vector<32x128xbf16>
    %c8_i32_74 = arith.constant 8 : i32
    %252 = tpu.dynamic_rotate %245 by %c8_i32_74 dim 1 : vector<32x128xf32>, i32 -> vector<32x128xf32>
    %253 = vector.broadcast %4 : vector<1x128xf32> to vector<32x128xf32>
    %254 = arith.mulf %252, %253 : vector<32x128xf32>
    %255 = arith.truncf %254 : vector<32x128xf32> to vector<32x128xbf16>
    %c7_i32_75 = arith.constant 7 : i32
    %256 = tpu.dynamic_rotate %245 by %c7_i32_75 dim 1 : vector<32x128xf32>, i32 -> vector<32x128xf32>
    %257 = vector.broadcast %5 : vector<1x128xf32> to vector<32x128xf32>
    %258 = arith.mulf %256, %257 : vector<32x128xf32>
    %259 = arith.truncf %258 : vector<32x128xf32> to vector<32x128xbf16>
    %c1_i32_76 = arith.constant 1 : i32
    %260 = tpu.dynamic_rotate %245 by %c1_i32_76 dim 1 : vector<32x128xf32>, i32 -> vector<32x128xf32>
    %261 = vector.broadcast %6 : vector<1x128xf32> to vector<32x128xf32>
    %262 = arith.mulf %260, %261 : vector<32x128xf32>
    %263 = arith.truncf %262 : vector<32x128xf32> to vector<32x128xbf16>
    %264 = arith.truncf %245 : vector<32x128xf32> to vector<32x128xbf16>
    %c127_i32_77 = arith.constant 127 : i32
    %265 = tpu.dynamic_rotate %245 by %c127_i32_77 dim 1 : vector<32x128xf32>, i32 -> vector<32x128xf32>
    %266 = vector.broadcast %7 : vector<1x128xf32> to vector<32x128xf32>
    %267 = arith.mulf %265, %266 : vector<32x128xf32>
    %268 = arith.truncf %267 : vector<32x128xf32> to vector<32x128xbf16>
    %c121_i32_78 = arith.constant 121 : i32
    %269 = tpu.dynamic_rotate %245 by %c121_i32_78 dim 1 : vector<32x128xf32>, i32 -> vector<32x128xf32>
    %270 = vector.broadcast %8 : vector<1x128xf32> to vector<32x128xf32>
    %271 = arith.mulf %269, %270 : vector<32x128xf32>
    %272 = arith.truncf %271 : vector<32x128xf32> to vector<32x128xbf16>
    %c120_i32_79 = arith.constant 120 : i32
    %273 = tpu.dynamic_rotate %245 by %c120_i32_79 dim 1 : vector<32x128xf32>, i32 -> vector<32x128xf32>
    %274 = vector.broadcast %9 : vector<1x128xf32> to vector<32x128xf32>
    %275 = arith.mulf %273, %274 : vector<32x128xf32>
    %276 = arith.truncf %275 : vector<32x128xf32> to vector<32x128xbf16>
    %c119_i32_80 = arith.constant 119 : i32
    %277 = tpu.dynamic_rotate %245 by %c119_i32_80 dim 1 : vector<32x128xf32>, i32 -> vector<32x128xf32>
    %278 = vector.broadcast %10 : vector<1x128xf32> to vector<32x128xf32>
    %279 = arith.mulf %277, %278 : vector<32x128xf32>
    %280 = arith.truncf %279 : vector<32x128xf32> to vector<32x128xbf16>
    %281 = tpu.concatenate %251, %255, %259, %263, %264, %268, %272, %276, %280, %11 in 0 : vector<32x128xbf16>, vector<32x128xbf16>, vector<32x128xbf16>, vector<32x128xbf16>, vector<32x128xbf16>, vector<32x128xbf16>, vector<32x128xbf16>, vector<32x128xbf16>, vector<32x128xbf16>, vector<1x128xbf16> -> vector<289x128xbf16>
    %cst_81 = arith.constant dense<0.000000e+00> : vector<16x128xf32>
    %282 = tpu.matmul %247, %281, %cst_81 {dimension_numbers = #tpu.dot_dimension_numbers<[1], [0], [0], [1], [0, 0, 1, 1], [], []>} : vector<16x289xbf16>, vector<289x128xbf16>, vector<16x128xf32> -> vector<16x128xf32>
    %283 = arith.subf %166, %282 : vector<16x128xf32>
    %284 = arith.subf %150, %283 : vector<16x128xf32>
    %c1_82 = arith.constant 1 : index
    %c0_83 = arith.constant 0 : index
    %c0_84 = arith.constant 0 : index
    %285 = vector.load %arg7[%c1_82, %c0_83, %c0_84] : memref<9x16x128xf32, #tpu.memory_space<vmem>>, vector<1x16x128xf32>
    %286 = vector.shape_cast %285 : vector<1x16x128xf32> to vector<16x128xf32>
    %287 = vector.shape_cast %282 : vector<16x128xf32> to vector<1x16x128xf32>
    tpu.vector_store %arg7[%c1_82, %c0_83, %c0_84], %287 {strides = array<i32>} : memref<9x16x128xf32, #tpu.memory_space<vmem>>, vector<1x16x128xf32>,
    %c2 = arith.constant 2 : index
    %288 = memref.load %arg0[%c2] : memref<9xf32, #tpu.memory_space<smem>>
    %289 = arith.addf %282, %284 : vector<16x128xf32>
    %290 = arith.mulf %289, %1 : vector<16x128xf32>
    %cst_85 = arith.constant dense<0.000000e+00> : vector<128xf32>
    %291 = vector.multi_reduction <add>, %290, %cst_85 [0] : vector<16x128xf32> to vector<128xf32>
    %292 = vector.shape_cast %291 : vector<128xf32> to vector<1x128xf32>
    %293 = arith.subf %14, %292 : vector<1x128xf32>
    %294 = vector.broadcast %288 : f32 to vector<1x128xf32>
    %295 = arith.addf %16, %294 : vector<1x128xf32>
    %296 = tpu.reciprocal %295 {approx = true} : vector<1x128xf32> -> vector<1x128xf32>
    %297 = arith.mulf %293, %296 : vector<1x128xf32>
    %298 = vector.broadcast %297 : vector<1x128xf32> to vector<16x128xf32>
    %299 = arith.mulf %298, %1 : vector<16x128xf32>
    %300 = arith.addf %289, %299 : vector<16x128xf32>
    %301 = arith.subf %300, %284 : vector<16x128xf32>
    %c2_86 = arith.constant 2 : index
    %c0_87 = arith.constant 0 : index
    %c0_88 = arith.constant 0 : index
    %302 = vector.load %arg4[%c2_86, %c0_87, %c0_88] : memref<9x32x145xbf16, #tpu.memory_space<vmem>>, vector<1x32x145xbf16>
    %303 = vector.shape_cast %302 : vector<1x32x145xbf16> to vector<32x145xbf16>
    %c9_i32_89 = arith.constant 9 : i32
    %304 = tpu.dynamic_rotate %301 by %c9_i32_89 dim 1 : vector<16x128xf32>, i32 -> vector<16x128xf32>
    %305 = vector.broadcast %3 : vector<1x128xf32> to vector<16x128xf32>
    %306 = arith.mulf %304, %305 : vector<16x128xf32>
    %307 = arith.truncf %306 : vector<16x128xf32> to vector<16x128xbf16>
    %c8_i32_90 = arith.constant 8 : i32
    %308 = tpu.dynamic_rotate %301 by %c8_i32_90 dim 1 : vector<16x128xf32>, i32 -> vector<16x128xf32>
    %309 = vector.broadcast %4 : vector<1x128xf32> to vector<16x128xf32>
    %310 = arith.mulf %308, %309 : vector<16x128xf32>
    %311 = arith.truncf %310 : vector<16x128xf32> to vector<16x128xbf16>
    %c7_i32_91 = arith.constant 7 : i32
    %312 = tpu.dynamic_rotate %301 by %c7_i32_91 dim 1 : vector<16x128xf32>, i32 -> vector<16x128xf32>
    %313 = vector.broadcast %5 : vector<1x128xf32> to vector<16x128xf32>
    %314 = arith.mulf %312, %313 : vector<16x128xf32>
    %315 = arith.truncf %314 : vector<16x128xf32> to vector<16x128xbf16>
    %c1_i32_92 = arith.constant 1 : i32
    %316 = tpu.dynamic_rotate %301 by %c1_i32_92 dim 1 : vector<16x128xf32>, i32 -> vector<16x128xf32>
    %317 = vector.broadcast %6 : vector<1x128xf32> to vector<16x128xf32>
    %318 = arith.mulf %316, %317 : vector<16x128xf32>
    %319 = arith.truncf %318 : vector<16x128xf32> to vector<16x128xbf16>
    %320 = arith.truncf %301 : vector<16x128xf32> to vector<16x128xbf16>
    %c127_i32_93 = arith.constant 127 : i32
    %321 = tpu.dynamic_rotate %301 by %c127_i32_93 dim 1 : vector<16x128xf32>, i32 -> vector<16x128xf32>
    %322 = vector.broadcast %7 : vector<1x128xf32> to vector<16x128xf32>
    %323 = arith.mulf %321, %322 : vector<16x128xf32>
    %324 = arith.truncf %323 : vector<16x128xf32> to vector<16x128xbf16>
    %c121_i32_94 = arith.constant 121 : i32
    %325 = tpu.dynamic_rotate %301 by %c121_i32_94 dim 1 : vector<16x128xf32>, i32 -> vector<16x128xf32>
    %326 = vector.broadcast %8 : vector<1x128xf32> to vector<16x128xf32>
    %327 = arith.mulf %325, %326 : vector<16x128xf32>
    %328 = arith.truncf %327 : vector<16x128xf32> to vector<16x128xbf16>
    %c120_i32_95 = arith.constant 120 : i32
    %329 = tpu.dynamic_rotate %301 by %c120_i32_95 dim 1 : vector<16x128xf32>, i32 -> vector<16x128xf32>
    %330 = vector.broadcast %9 : vector<1x128xf32> to vector<16x128xf32>
    %331 = arith.mulf %329, %330 : vector<16x128xf32>
    %332 = arith.truncf %331 : vector<16x128xf32> to vector<16x128xbf16>
    %c119_i32_96 = arith.constant 119 : i32
    %333 = tpu.dynamic_rotate %301 by %c119_i32_96 dim 1 : vector<16x128xf32>, i32 -> vector<16x128xf32>
    %334 = vector.broadcast %10 : vector<1x128xf32> to vector<16x128xf32>
    %335 = arith.mulf %333, %334 : vector<16x128xf32>
    %336 = arith.truncf %335 : vector<16x128xf32> to vector<16x128xbf16>
    %337 = tpu.concatenate %307, %311, %315, %319, %320, %324, %328, %332, %336, %11 in 0 : vector<16x128xbf16>, vector<16x128xbf16>, vector<16x128xbf16>, vector<16x128xbf16>, vector<16x128xbf16>, vector<16x128xbf16>, vector<16x128xbf16>, vector<16x128xbf16>, vector<16x128xbf16>, vector<1x128xbf16> -> vector<145x128xbf16>
    %cst_97 = arith.constant dense<0.000000e+00> : vector<32x128xf32>
    %338 = tpu.matmul %303, %337, %cst_97 {dimension_numbers = #tpu.dot_dimension_numbers<[1], [0], [0], [1], [0, 0, 1, 1], [], []>} : vector<32x145xbf16>, vector<145x128xbf16>, vector<32x128xf32> -> vector<32x128xf32>
    %cst_98 = arith.constant 0.000000e+00 : f32
    %339 = vector.broadcast %cst_98 : f32 to vector<32x128xf32>
    %340 = arith.maximumf %338, %339 : vector<32x128xf32>
    %c2_99 = arith.constant 2 : index
    %c0_100 = arith.constant 0 : index
    %c0_101 = arith.constant 0 : index
    %341 = vector.load %arg5[%c2_99, %c0_100, %c0_101] : memref<9x32x289xbf16, #tpu.memory_space<vmem>>, vector<1x32x289xbf16>
    %342 = vector.shape_cast %341 : vector<1x32x289xbf16> to vector<32x289xbf16>
    %c9_i32_102 = arith.constant 9 : i32
    %343 = tpu.dynamic_rotate %340 by %c9_i32_102 dim 1 : vector<32x128xf32>, i32 -> vector<32x128xf32>
    %344 = vector.broadcast %3 : vector<1x128xf32> to vector<32x128xf32>
    %345 = arith.mulf %343, %344 : vector<32x128xf32>
    %346 = arith.truncf %345 : vector<32x128xf32> to vector<32x128xbf16>
    %c8_i32_103 = arith.constant 8 : i32
    %347 = tpu.dynamic_rotate %340 by %c8_i32_103 dim 1 : vector<32x128xf32>, i32 -> vector<32x128xf32>
    %348 = vector.broadcast %4 : vector<1x128xf32> to vector<32x128xf32>
    %349 = arith.mulf %347, %348 : vector<32x128xf32>
    %350 = arith.truncf %349 : vector<32x128xf32> to vector<32x128xbf16>
    %c7_i32_104 = arith.constant 7 : i32
    %351 = tpu.dynamic_rotate %340 by %c7_i32_104 dim 1 : vector<32x128xf32>, i32 -> vector<32x128xf32>
    %352 = vector.broadcast %5 : vector<1x128xf32> to vector<32x128xf32>
    %353 = arith.mulf %351, %352 : vector<32x128xf32>
    %354 = arith.truncf %353 : vector<32x128xf32> to vector<32x128xbf16>
    %c1_i32_105 = arith.constant 1 : i32
    %355 = tpu.dynamic_rotate %340 by %c1_i32_105 dim 1 : vector<32x128xf32>, i32 -> vector<32x128xf32>
    %356 = vector.broadcast %6 : vector<1x128xf32> to vector<32x128xf32>
    %357 = arith.mulf %355, %356 : vector<32x128xf32>
    %358 = arith.truncf %357 : vector<32x128xf32> to vector<32x128xbf16>
    %359 = arith.truncf %340 : vector<32x128xf32> to vector<32x128xbf16>
    %c127_i32_106 = arith.constant 127 : i32
    %360 = tpu.dynamic_rotate %340 by %c127_i32_106 dim 1 : vector<32x128xf32>, i32 -> vector<32x128xf32>
    %361 = vector.broadcast %7 : vector<1x128xf32> to vector<32x128xf32>
    %362 = arith.mulf %360, %361 : vector<32x128xf32>
    %363 = arith.truncf %362 : vector<32x128xf32> to vector<32x128xbf16>
    %c121_i32_107 = arith.constant 121 : i32
    %364 = tpu.dynamic_rotate %340 by %c121_i32_107 dim 1 : vector<32x128xf32>, i32 -> vector<32x128xf32>
    %365 = vector.broadcast %8 : vector<1x128xf32> to vector<32x128xf32>
    %366 = arith.mulf %364, %365 : vector<32x128xf32>
    %367 = arith.truncf %366 : vector<32x128xf32> to vector<32x128xbf16>
    %c120_i32_108 = arith.constant 120 : i32
    %368 = tpu.dynamic_rotate %340 by %c120_i32_108 dim 1 : vector<32x128xf32>, i32 -> vector<32x128xf32>
    %369 = vector.broadcast %9 : vector<1x128xf32> to vector<32x128xf32>
    %370 = arith.mulf %368, %369 : vector<32x128xf32>
    %371 = arith.truncf %370 : vector<32x128xf32> to vector<32x128xbf16>
    %c119_i32_109 = arith.constant 119 : i32
    %372 = tpu.dynamic_rotate %340 by %c119_i32_109 dim 1 : vector<32x128xf32>, i32 -> vector<32x128xf32>
    %373 = vector.broadcast %10 : vector<1x128xf32> to vector<32x128xf32>
    %374 = arith.mulf %372, %373 : vector<32x128xf32>
    %375 = arith.truncf %374 : vector<32x128xf32> to vector<32x128xbf16>
    %376 = tpu.concatenate %346, %350, %354, %358, %359, %363, %367, %371, %375, %11 in 0 : vector<32x128xbf16>, vector<32x128xbf16>, vector<32x128xbf16>, vector<32x128xbf16>, vector<32x128xbf16>, vector<32x128xbf16>, vector<32x128xbf16>, vector<32x128xbf16>, vector<32x128xbf16>, vector<1x128xbf16> -> vector<289x128xbf16>
    %cst_110 = arith.constant dense<0.000000e+00> : vector<32x128xf32>
    %377 = tpu.matmul %342, %376, %cst_110 {dimension_numbers = #tpu.dot_dimension_numbers<[1], [0], [0], [1], [0, 0, 1, 1], [], []>} : vector<32x289xbf16>, vector<289x128xbf16>, vector<32x128xf32> -> vector<32x128xf32>
    %cst_111 = arith.constant 0.000000e+00 : f32
    %378 = vector.broadcast %cst_111 : f32 to vector<32x128xf32>
    %379 = arith.maximumf %377, %378 : vector<32x128xf32>
    %c2_112 = arith.constant 2 : index
    %c0_113 = arith.constant 0 : index
    %c0_114 = arith.constant 0 : index
    %380 = vector.load %arg6[%c2_112, %c0_113, %c0_114] : memref<9x16x289xbf16, #tpu.memory_space<vmem>>, vector<1x16x289xbf16>
    %381 = vector.shape_cast %380 : vector<1x16x289xbf16> to vector<16x289xbf16>
    %c9_i32_115 = arith.constant 9 : i32
    %382 = tpu.dynamic_rotate %379 by %c9_i32_115 dim 1 : vector<32x128xf32>, i32 -> vector<32x128xf32>
    %383 = vector.broadcast %3 : vector<1x128xf32> to vector<32x128xf32>
    %384 = arith.mulf %382, %383 : vector<32x128xf32>
    %385 = arith.truncf %384 : vector<32x128xf32> to vector<32x128xbf16>
    %c8_i32_116 = arith.constant 8 : i32
    %386 = tpu.dynamic_rotate %379 by %c8_i32_116 dim 1 : vector<32x128xf32>, i32 -> vector<32x128xf32>
    %387 = vector.broadcast %4 : vector<1x128xf32> to vector<32x128xf32>
    %388 = arith.mulf %386, %387 : vector<32x128xf32>
    %389 = arith.truncf %388 : vector<32x128xf32> to vector<32x128xbf16>
    %c7_i32_117 = arith.constant 7 : i32
    %390 = tpu.dynamic_rotate %379 by %c7_i32_117 dim 1 : vector<32x128xf32>, i32 -> vector<32x128xf32>
    %391 = vector.broadcast %5 : vector<1x128xf32> to vector<32x128xf32>
    %392 = arith.mulf %390, %391 : vector<32x128xf32>
    %393 = arith.truncf %392 : vector<32x128xf32> to vector<32x128xbf16>
    %c1_i32_118 = arith.constant 1 : i32
    %394 = tpu.dynamic_rotate %379 by %c1_i32_118 dim 1 : vector<32x128xf32>, i32 -> vector<32x128xf32>
    %395 = vector.broadcast %6 : vector<1x128xf32> to vector<32x128xf32>
    %396 = arith.mulf %394, %395 : vector<32x128xf32>
    %397 = arith.truncf %396 : vector<32x128xf32> to vector<32x128xbf16>
    %398 = arith.truncf %379 : vector<32x128xf32> to vector<32x128xbf16>
    %c127_i32_119 = arith.constant 127 : i32
    %399 = tpu.dynamic_rotate %379 by %c127_i32_119 dim 1 : vector<32x128xf32>, i32 -> vector<32x128xf32>
    %400 = vector.broadcast %7 : vector<1x128xf32> to vector<32x128xf32>
    %401 = arith.mulf %399, %400 : vector<32x128xf32>
    %402 = arith.truncf %401 : vector<32x128xf32> to vector<32x128xbf16>
    %c121_i32_120 = arith.constant 121 : i32
    %403 = tpu.dynamic_rotate %379 by %c121_i32_120 dim 1 : vector<32x128xf32>, i32 -> vector<32x128xf32>
    %404 = vector.broadcast %8 : vector<1x128xf32> to vector<32x128xf32>
    %405 = arith.mulf %403, %404 : vector<32x128xf32>
    %406 = arith.truncf %405 : vector<32x128xf32> to vector<32x128xbf16>
    %c120_i32_121 = arith.constant 120 : i32
    %407 = tpu.dynamic_rotate %379 by %c120_i32_121 dim 1 : vector<32x128xf32>, i32 -> vector<32x128xf32>
    %408 = vector.broadcast %9 : vector<1x128xf32> to vector<32x128xf32>
    %409 = arith.mulf %407, %408 : vector<32x128xf32>
    %410 = arith.truncf %409 : vector<32x128xf32> to vector<32x128xbf16>
    %c119_i32_122 = arith.constant 119 : i32
    %411 = tpu.dynamic_rotate %379 by %c119_i32_122 dim 1 : vector<32x128xf32>, i32 -> vector<32x128xf32>
    %412 = vector.broadcast %10 : vector<1x128xf32> to vector<32x128xf32>
    %413 = arith.mulf %411, %412 : vector<32x128xf32>
    %414 = arith.truncf %413 : vector<32x128xf32> to vector<32x128xbf16>
    %415 = tpu.concatenate %385, %389, %393, %397, %398, %402, %406, %410, %414, %11 in 0 : vector<32x128xbf16>, vector<32x128xbf16>, vector<32x128xbf16>, vector<32x128xbf16>, vector<32x128xbf16>, vector<32x128xbf16>, vector<32x128xbf16>, vector<32x128xbf16>, vector<32x128xbf16>, vector<1x128xbf16> -> vector<289x128xbf16>
    %cst_123 = arith.constant dense<0.000000e+00> : vector<16x128xf32>
    %416 = tpu.matmul %381, %415, %cst_123 {dimension_numbers = #tpu.dot_dimension_numbers<[1], [0], [0], [1], [0, 0, 1, 1], [], []>} : vector<16x289xbf16>, vector<289x128xbf16>, vector<16x128xf32> -> vector<16x128xf32>
    %417 = arith.subf %300, %416 : vector<16x128xf32>
    %418 = arith.subf %284, %417 : vector<16x128xf32>
    %c2_124 = arith.constant 2 : index
    %c0_125 = arith.constant 0 : index
    %c0_126 = arith.constant 0 : index
    %419 = vector.load %arg7[%c2_124, %c0_125, %c0_126] : memref<9x16x128xf32, #tpu.memory_space<vmem>>, vector<1x16x128xf32>
    %420 = vector.shape_cast %419 : vector<1x16x128xf32> to vector<16x128xf32>
    %421 = vector.shape_cast %416 : vector<16x128xf32> to vector<1x16x128xf32>
    tpu.vector_store %arg7[%c2_124, %c0_125, %c0_126], %421 {strides = array<i32>} : memref<9x16x128xf32, #tpu.memory_space<vmem>>, vector<1x16x128xf32>,
    %c3 = arith.constant 3 : index
    %422 = memref.load %arg0[%c3] : memref<9xf32, #tpu.memory_space<smem>>
    %423 = arith.addf %416, %418 : vector<16x128xf32>
    %424 = arith.mulf %423, %1 : vector<16x128xf32>
    %cst_127 = arith.constant dense<0.000000e+00> : vector<128xf32>
    %425 = vector.multi_reduction <add>, %424, %cst_127 [0] : vector<16x128xf32> to vector<128xf32>
    %426 = vector.shape_cast %425 : vector<128xf32> to vector<1x128xf32>
    %427 = arith.subf %14, %426 : vector<1x128xf32>
    %428 = vector.broadcast %422 : f32 to vector<1x128xf32>
    %429 = arith.addf %16, %428 : vector<1x128xf32>
    %430 = tpu.reciprocal %429 {approx = true} : vector<1x128xf32> -> vector<1x128xf32>
    %431 = arith.mulf %427, %430 : vector<1x128xf32>
    %432 = vector.broadcast %431 : vector<1x128xf32> to vector<16x128xf32>
    %433 = arith.mulf %432, %1 : vector<16x128xf32>
    %434 = arith.addf %423, %433 : vector<16x128xf32>
    %435 = arith.subf %434, %418 : vector<16x128xf32>
    %c3_128 = arith.constant 3 : index
    %c0_129 = arith.constant 0 : index
    %c0_130 = arith.constant 0 : index
    %436 = vector.load %arg4[%c3_128, %c0_129, %c0_130] : memref<9x32x145xbf16, #tpu.memory_space<vmem>>, vector<1x32x145xbf16>
    %437 = vector.shape_cast %436 : vector<1x32x145xbf16> to vector<32x145xbf16>
    %c9_i32_131 = arith.constant 9 : i32
    %438 = tpu.dynamic_rotate %435 by %c9_i32_131 dim 1 : vector<16x128xf32>, i32 -> vector<16x128xf32>
    %439 = vector.broadcast %3 : vector<1x128xf32> to vector<16x128xf32>
    %440 = arith.mulf %438, %439 : vector<16x128xf32>
    %441 = arith.truncf %440 : vector<16x128xf32> to vector<16x128xbf16>
    %c8_i32_132 = arith.constant 8 : i32
    %442 = tpu.dynamic_rotate %435 by %c8_i32_132 dim 1 : vector<16x128xf32>, i32 -> vector<16x128xf32>
    %443 = vector.broadcast %4 : vector<1x128xf32> to vector<16x128xf32>
    %444 = arith.mulf %442, %443 : vector<16x128xf32>
    %445 = arith.truncf %444 : vector<16x128xf32> to vector<16x128xbf16>
    %c7_i32_133 = arith.constant 7 : i32
    %446 = tpu.dynamic_rotate %435 by %c7_i32_133 dim 1 : vector<16x128xf32>, i32 -> vector<16x128xf32>
    %447 = vector.broadcast %5 : vector<1x128xf32> to vector<16x128xf32>
    %448 = arith.mulf %446, %447 : vector<16x128xf32>
    %449 = arith.truncf %448 : vector<16x128xf32> to vector<16x128xbf16>
    %c1_i32_134 = arith.constant 1 : i32
    %450 = tpu.dynamic_rotate %435 by %c1_i32_134 dim 1 : vector<16x128xf32>, i32 -> vector<16x128xf32>
    %451 = vector.broadcast %6 : vector<1x128xf32> to vector<16x128xf32>
    %452 = arith.mulf %450, %451 : vector<16x128xf32>
    %453 = arith.truncf %452 : vector<16x128xf32> to vector<16x128xbf16>
    %454 = arith.truncf %435 : vector<16x128xf32> to vector<16x128xbf16>
    %c127_i32_135 = arith.constant 127 : i32
    %455 = tpu.dynamic_rotate %435 by %c127_i32_135 dim 1 : vector<16x128xf32>, i32 -> vector<16x128xf32>
    %456 = vector.broadcast %7 : vector<1x128xf32> to vector<16x128xf32>
    %457 = arith.mulf %455, %456 : vector<16x128xf32>
    %458 = arith.truncf %457 : vector<16x128xf32> to vector<16x128xbf16>
    %c121_i32_136 = arith.constant 121 : i32
    %459 = tpu.dynamic_rotate %435 by %c121_i32_136 dim 1 : vector<16x128xf32>, i32 -> vector<16x128xf32>
    %460 = vector.broadcast %8 : vector<1x128xf32> to vector<16x128xf32>
    %461 = arith.mulf %459, %460 : vector<16x128xf32>
    %462 = arith.truncf %461 : vector<16x128xf32> to vector<16x128xbf16>
    %c120_i32_137 = arith.constant 120 : i32
    %463 = tpu.dynamic_rotate %435 by %c120_i32_137 dim 1 : vector<16x128xf32>, i32 -> vector<16x128xf32>
    %464 = vector.broadcast %9 : vector<1x128xf32> to vector<16x128xf32>
    %465 = arith.mulf %463, %464 : vector<16x128xf32>
    %466 = arith.truncf %465 : vector<16x128xf32> to vector<16x128xbf16>
    %c119_i32_138 = arith.constant 119 : i32
    %467 = tpu.dynamic_rotate %435 by %c119_i32_138 dim 1 : vector<16x128xf32>, i32 -> vector<16x128xf32>
    %468 = vector.broadcast %10 : vector<1x128xf32> to vector<16x128xf32>
    %469 = arith.mulf %467, %468 : vector<16x128xf32>
    %470 = arith.truncf %469 : vector<16x128xf32> to vector<16x128xbf16>
    %471 = tpu.concatenate %441, %445, %449, %453, %454, %458, %462, %466, %470, %11 in 0 : vector<16x128xbf16>, vector<16x128xbf16>, vector<16x128xbf16>, vector<16x128xbf16>, vector<16x128xbf16>, vector<16x128xbf16>, vector<16x128xbf16>, vector<16x128xbf16>, vector<16x128xbf16>, vector<1x128xbf16> -> vector<145x128xbf16>
    %cst_139 = arith.constant dense<0.000000e+00> : vector<32x128xf32>
    %472 = tpu.matmul %437, %471, %cst_139 {dimension_numbers = #tpu.dot_dimension_numbers<[1], [0], [0], [1], [0, 0, 1, 1], [], []>} : vector<32x145xbf16>, vector<145x128xbf16>, vector<32x128xf32> -> vector<32x128xf32>
    %cst_140 = arith.constant 0.000000e+00 : f32
    %473 = vector.broadcast %cst_140 : f32 to vector<32x128xf32>
    %474 = arith.maximumf %472, %473 : vector<32x128xf32>
    %c3_141 = arith.constant 3 : index
    %c0_142 = arith.constant 0 : index
    %c0_143 = arith.constant 0 : index
    %475 = vector.load %arg5[%c3_141, %c0_142, %c0_143] : memref<9x32x289xbf16, #tpu.memory_space<vmem>>, vector<1x32x289xbf16>
    %476 = vector.shape_cast %475 : vector<1x32x289xbf16> to vector<32x289xbf16>
    %c9_i32_144 = arith.constant 9 : i32
    %477 = tpu.dynamic_rotate %474 by %c9_i32_144 dim 1 : vector<32x128xf32>, i32 -> vector<32x128xf32>
    %478 = vector.broadcast %3 : vector<1x128xf32> to vector<32x128xf32>
    %479 = arith.mulf %477, %478 : vector<32x128xf32>
    %480 = arith.truncf %479 : vector<32x128xf32> to vector<32x128xbf16>
    %c8_i32_145 = arith.constant 8 : i32
    %481 = tpu.dynamic_rotate %474 by %c8_i32_145 dim 1 : vector<32x128xf32>, i32 -> vector<32x128xf32>
    %482 = vector.broadcast %4 : vector<1x128xf32> to vector<32x128xf32>
    %483 = arith.mulf %481, %482 : vector<32x128xf32>
    %484 = arith.truncf %483 : vector<32x128xf32> to vector<32x128xbf16>
    %c7_i32_146 = arith.constant 7 : i32
    %485 = tpu.dynamic_rotate %474 by %c7_i32_146 dim 1 : vector<32x128xf32>, i32 -> vector<32x128xf32>
    %486 = vector.broadcast %5 : vector<1x128xf32> to vector<32x128xf32>
    %487 = arith.mulf %485, %486 : vector<32x128xf32>
    %488 = arith.truncf %487 : vector<32x128xf32> to vector<32x128xbf16>
    %c1_i32_147 = arith.constant 1 : i32
    %489 = tpu.dynamic_rotate %474 by %c1_i32_147 dim 1 : vector<32x128xf32>, i32 -> vector<32x128xf32>
    %490 = vector.broadcast %6 : vector<1x128xf32> to vector<32x128xf32>
    %491 = arith.mulf %489, %490 : vector<32x128xf32>
    %492 = arith.truncf %491 : vector<32x128xf32> to vector<32x128xbf16>
    %493 = arith.truncf %474 : vector<32x128xf32> to vector<32x128xbf16>
    %c127_i32_148 = arith.constant 127 : i32
    %494 = tpu.dynamic_rotate %474 by %c127_i32_148 dim 1 : vector<32x128xf32>, i32 -> vector<32x128xf32>
    %495 = vector.broadcast %7 : vector<1x128xf32> to vector<32x128xf32>
    %496 = arith.mulf %494, %495 : vector<32x128xf32>
    %497 = arith.truncf %496 : vector<32x128xf32> to vector<32x128xbf16>
    %c121_i32_149 = arith.constant 121 : i32
    %498 = tpu.dynamic_rotate %474 by %c121_i32_149 dim 1 : vector<32x128xf32>, i32 -> vector<32x128xf32>
    %499 = vector.broadcast %8 : vector<1x128xf32> to vector<32x128xf32>
    %500 = arith.mulf %498, %499 : vector<32x128xf32>
    %501 = arith.truncf %500 : vector<32x128xf32> to vector<32x128xbf16>
    %c120_i32_150 = arith.constant 120 : i32
    %502 = tpu.dynamic_rotate %474 by %c120_i32_150 dim 1 : vector<32x128xf32>, i32 -> vector<32x128xf32>
    %503 = vector.broadcast %9 : vector<1x128xf32> to vector<32x128xf32>
    %504 = arith.mulf %502, %503 : vector<32x128xf32>
    %505 = arith.truncf %504 : vector<32x128xf32> to vector<32x128xbf16>
    %c119_i32_151 = arith.constant 119 : i32
    %506 = tpu.dynamic_rotate %474 by %c119_i32_151 dim 1 : vector<32x128xf32>, i32 -> vector<32x128xf32>
    %507 = vector.broadcast %10 : vector<1x128xf32> to vector<32x128xf32>
    %508 = arith.mulf %506, %507 : vector<32x128xf32>
    %509 = arith.truncf %508 : vector<32x128xf32> to vector<32x128xbf16>
    %510 = tpu.concatenate %480, %484, %488, %492, %493, %497, %501, %505, %509, %11 in 0 : vector<32x128xbf16>, vector<32x128xbf16>, vector<32x128xbf16>, vector<32x128xbf16>, vector<32x128xbf16>, vector<32x128xbf16>, vector<32x128xbf16>, vector<32x128xbf16>, vector<32x128xbf16>, vector<1x128xbf16> -> vector<289x128xbf16>
    %cst_152 = arith.constant dense<0.000000e+00> : vector<32x128xf32>
    %511 = tpu.matmul %476, %510, %cst_152 {dimension_numbers = #tpu.dot_dimension_numbers<[1], [0], [0], [1], [0, 0, 1, 1], [], []>} : vector<32x289xbf16>, vector<289x128xbf16>, vector<32x128xf32> -> vector<32x128xf32>
    %cst_153 = arith.constant 0.000000e+00 : f32
    %512 = vector.broadcast %cst_153 : f32 to vector<32x128xf32>
    %513 = arith.maximumf %511, %512 : vector<32x128xf32>
    %c3_154 = arith.constant 3 : index
    %c0_155 = arith.constant 0 : index
    %c0_156 = arith.constant 0 : index
    %514 = vector.load %arg6[%c3_154, %c0_155, %c0_156] : memref<9x16x289xbf16, #tpu.memory_space<vmem>>, vector<1x16x289xbf16>
    %515 = vector.shape_cast %514 : vector<1x16x289xbf16> to vector<16x289xbf16>
    %c9_i32_157 = arith.constant 9 : i32
    %516 = tpu.dynamic_rotate %513 by %c9_i32_157 dim 1 : vector<32x128xf32>, i32 -> vector<32x128xf32>
    %517 = vector.broadcast %3 : vector<1x128xf32> to vector<32x128xf32>
    %518 = arith.mulf %516, %517 : vector<32x128xf32>
    %519 = arith.truncf %518 : vector<32x128xf32> to vector<32x128xbf16>
    %c8_i32_158 = arith.constant 8 : i32
    %520 = tpu.dynamic_rotate %513 by %c8_i32_158 dim 1 : vector<32x128xf32>, i32 -> vector<32x128xf32>
    %521 = vector.broadcast %4 : vector<1x128xf32> to vector<32x128xf32>
    %522 = arith.mulf %520, %521 : vector<32x128xf32>
    %523 = arith.truncf %522 : vector<32x128xf32> to vector<32x128xbf16>
    %c7_i32_159 = arith.constant 7 : i32
    %524 = tpu.dynamic_rotate %513 by %c7_i32_159 dim 1 : vector<32x128xf32>, i32 -> vector<32x128xf32>
    %525 = vector.broadcast %5 : vector<1x128xf32> to vector<32x128xf32>
    %526 = arith.mulf %524, %525 : vector<32x128xf32>
    %527 = arith.truncf %526 : vector<32x128xf32> to vector<32x128xbf16>
    %c1_i32_160 = arith.constant 1 : i32
    %528 = tpu.dynamic_rotate %513 by %c1_i32_160 dim 1 : vector<32x128xf32>, i32 -> vector<32x128xf32>
    %529 = vector.broadcast %6 : vector<1x128xf32> to vector<32x128xf32>
    %530 = arith.mulf %528, %529 : vector<32x128xf32>
    %531 = arith.truncf %530 : vector<32x128xf32> to vector<32x128xbf16>
    %532 = arith.truncf %513 : vector<32x128xf32> to vector<32x128xbf16>
    %c127_i32_161 = arith.constant 127 : i32
    %533 = tpu.dynamic_rotate %513 by %c127_i32_161 dim 1 : vector<32x128xf32>, i32 -> vector<32x128xf32>
    %534 = vector.broadcast %7 : vector<1x128xf32> to vector<32x128xf32>
    %535 = arith.mulf %533, %534 : vector<32x128xf32>
    %536 = arith.truncf %535 : vector<32x128xf32> to vector<32x128xbf16>
    %c121_i32_162 = arith.constant 121 : i32
    %537 = tpu.dynamic_rotate %513 by %c121_i32_162 dim 1 : vector<32x128xf32>, i32 -> vector<32x128xf32>
    %538 = vector.broadcast %8 : vector<1x128xf32> to vector<32x128xf32>
    %539 = arith.mulf %537, %538 : vector<32x128xf32>
    %540 = arith.truncf %539 : vector<32x128xf32> to vector<32x128xbf16>
    %c120_i32_163 = arith.constant 120 : i32
    %541 = tpu.dynamic_rotate %513 by %c120_i32_163 dim 1 : vector<32x128xf32>, i32 -> vector<32x128xf32>
    %542 = vector.broadcast %9 : vector<1x128xf32> to vector<32x128xf32>
    %543 = arith.mulf %541, %542 : vector<32x128xf32>
    %544 = arith.truncf %543 : vector<32x128xf32> to vector<32x128xbf16>
    %c119_i32_164 = arith.constant 119 : i32
    %545 = tpu.dynamic_rotate %513 by %c119_i32_164 dim 1 : vector<32x128xf32>, i32 -> vector<32x128xf32>
    %546 = vector.broadcast %10 : vector<1x128xf32> to vector<32x128xf32>
    %547 = arith.mulf %545, %546 : vector<32x128xf32>
    %548 = arith.truncf %547 : vector<32x128xf32> to vector<32x128xbf16>
    %549 = tpu.concatenate %519, %523, %527, %531, %532, %536, %540, %544, %548, %11 in 0 : vector<32x128xbf16>, vector<32x128xbf16>, vector<32x128xbf16>, vector<32x128xbf16>, vector<32x128xbf16>, vector<32x128xbf16>, vector<32x128xbf16>, vector<32x128xbf16>, vector<32x128xbf16>, vector<1x128xbf16> -> vector<289x128xbf16>
    %cst_165 = arith.constant dense<0.000000e+00> : vector<16x128xf32>
    %550 = tpu.matmul %515, %549, %cst_165 {dimension_numbers = #tpu.dot_dimension_numbers<[1], [0], [0], [1], [0, 0, 1, 1], [], []>} : vector<16x289xbf16>, vector<289x128xbf16>, vector<16x128xf32> -> vector<16x128xf32>
    %551 = arith.subf %434, %550 : vector<16x128xf32>
    %552 = arith.subf %418, %551 : vector<16x128xf32>
    %c3_166 = arith.constant 3 : index
    %c0_167 = arith.constant 0 : index
    %c0_168 = arith.constant 0 : index
    %553 = vector.load %arg7[%c3_166, %c0_167, %c0_168] : memref<9x16x128xf32, #tpu.memory_space<vmem>>, vector<1x16x128xf32>
    %554 = vector.shape_cast %553 : vector<1x16x128xf32> to vector<16x128xf32>
    %555 = vector.shape_cast %550 : vector<16x128xf32> to vector<1x16x128xf32>
    tpu.vector_store %arg7[%c3_166, %c0_167, %c0_168], %555 {strides = array<i32>} : memref<9x16x128xf32, #tpu.memory_space<vmem>>, vector<1x16x128xf32>,
    %c4 = arith.constant 4 : index
    %556 = memref.load %arg0[%c4] : memref<9xf32, #tpu.memory_space<smem>>
    %557 = arith.addf %550, %552 : vector<16x128xf32>
    %558 = arith.mulf %557, %1 : vector<16x128xf32>
    %cst_169 = arith.constant dense<0.000000e+00> : vector<128xf32>
    %559 = vector.multi_reduction <add>, %558, %cst_169 [0] : vector<16x128xf32> to vector<128xf32>
    %560 = vector.shape_cast %559 : vector<128xf32> to vector<1x128xf32>
    %561 = arith.subf %14, %560 : vector<1x128xf32>
    %562 = vector.broadcast %556 : f32 to vector<1x128xf32>
    %563 = arith.addf %16, %562 : vector<1x128xf32>
    %564 = tpu.reciprocal %563 {approx = true} : vector<1x128xf32> -> vector<1x128xf32>
    %565 = arith.mulf %561, %564 : vector<1x128xf32>
    %566 = vector.broadcast %565 : vector<1x128xf32> to vector<16x128xf32>
    %567 = arith.mulf %566, %1 : vector<16x128xf32>
    %568 = arith.addf %557, %567 : vector<16x128xf32>
    %569 = arith.subf %568, %552 : vector<16x128xf32>
    %c4_170 = arith.constant 4 : index
    %c0_171 = arith.constant 0 : index
    %c0_172 = arith.constant 0 : index
    %570 = vector.load %arg4[%c4_170, %c0_171, %c0_172] : memref<9x32x145xbf16, #tpu.memory_space<vmem>>, vector<1x32x145xbf16>
    %571 = vector.shape_cast %570 : vector<1x32x145xbf16> to vector<32x145xbf16>
    %c9_i32_173 = arith.constant 9 : i32
    %572 = tpu.dynamic_rotate %569 by %c9_i32_173 dim 1 : vector<16x128xf32>, i32 -> vector<16x128xf32>
    %573 = vector.broadcast %3 : vector<1x128xf32> to vector<16x128xf32>
    %574 = arith.mulf %572, %573 : vector<16x128xf32>
    %575 = arith.truncf %574 : vector<16x128xf32> to vector<16x128xbf16>
    %c8_i32_174 = arith.constant 8 : i32
    %576 = tpu.dynamic_rotate %569 by %c8_i32_174 dim 1 : vector<16x128xf32>, i32 -> vector<16x128xf32>
    %577 = vector.broadcast %4 : vector<1x128xf32> to vector<16x128xf32>
    %578 = arith.mulf %576, %577 : vector<16x128xf32>
    %579 = arith.truncf %578 : vector<16x128xf32> to vector<16x128xbf16>
    %c7_i32_175 = arith.constant 7 : i32
    %580 = tpu.dynamic_rotate %569 by %c7_i32_175 dim 1 : vector<16x128xf32>, i32 -> vector<16x128xf32>
    %581 = vector.broadcast %5 : vector<1x128xf32> to vector<16x128xf32>
    %582 = arith.mulf %580, %581 : vector<16x128xf32>
    %583 = arith.truncf %582 : vector<16x128xf32> to vector<16x128xbf16>
    %c1_i32_176 = arith.constant 1 : i32
    %584 = tpu.dynamic_rotate %569 by %c1_i32_176 dim 1 : vector<16x128xf32>, i32 -> vector<16x128xf32>
    %585 = vector.broadcast %6 : vector<1x128xf32> to vector<16x128xf32>
    %586 = arith.mulf %584, %585 : vector<16x128xf32>
    %587 = arith.truncf %586 : vector<16x128xf32> to vector<16x128xbf16>
    %588 = arith.truncf %569 : vector<16x128xf32> to vector<16x128xbf16>
    %c127_i32_177 = arith.constant 127 : i32
    %589 = tpu.dynamic_rotate %569 by %c127_i32_177 dim 1 : vector<16x128xf32>, i32 -> vector<16x128xf32>
    %590 = vector.broadcast %7 : vector<1x128xf32> to vector<16x128xf32>
    %591 = arith.mulf %589, %590 : vector<16x128xf32>
    %592 = arith.truncf %591 : vector<16x128xf32> to vector<16x128xbf16>
    %c121_i32_178 = arith.constant 121 : i32
    %593 = tpu.dynamic_rotate %569 by %c121_i32_178 dim 1 : vector<16x128xf32>, i32 -> vector<16x128xf32>
    %594 = vector.broadcast %8 : vector<1x128xf32> to vector<16x128xf32>
    %595 = arith.mulf %593, %594 : vector<16x128xf32>
    %596 = arith.truncf %595 : vector<16x128xf32> to vector<16x128xbf16>
    %c120_i32_179 = arith.constant 120 : i32
    %597 = tpu.dynamic_rotate %569 by %c120_i32_179 dim 1 : vector<16x128xf32>, i32 -> vector<16x128xf32>
    %598 = vector.broadcast %9 : vector<1x128xf32> to vector<16x128xf32>
    %599 = arith.mulf %597, %598 : vector<16x128xf32>
    %600 = arith.truncf %599 : vector<16x128xf32> to vector<16x128xbf16>
    %c119_i32_180 = arith.constant 119 : i32
    %601 = tpu.dynamic_rotate %569 by %c119_i32_180 dim 1 : vector<16x128xf32>, i32 -> vector<16x128xf32>
    %602 = vector.broadcast %10 : vector<1x128xf32> to vector<16x128xf32>
    %603 = arith.mulf %601, %602 : vector<16x128xf32>
    %604 = arith.truncf %603 : vector<16x128xf32> to vector<16x128xbf16>
    %605 = tpu.concatenate %575, %579, %583, %587, %588, %592, %596, %600, %604, %11 in 0 : vector<16x128xbf16>, vector<16x128xbf16>, vector<16x128xbf16>, vector<16x128xbf16>, vector<16x128xbf16>, vector<16x128xbf16>, vector<16x128xbf16>, vector<16x128xbf16>, vector<16x128xbf16>, vector<1x128xbf16> -> vector<145x128xbf16>
    %cst_181 = arith.constant dense<0.000000e+00> : vector<32x128xf32>
    %606 = tpu.matmul %571, %605, %cst_181 {dimension_numbers = #tpu.dot_dimension_numbers<[1], [0], [0], [1], [0, 0, 1, 1], [], []>} : vector<32x145xbf16>, vector<145x128xbf16>, vector<32x128xf32> -> vector<32x128xf32>
    %cst_182 = arith.constant 0.000000e+00 : f32
    %607 = vector.broadcast %cst_182 : f32 to vector<32x128xf32>
    %608 = arith.maximumf %606, %607 : vector<32x128xf32>
    %c4_183 = arith.constant 4 : index
    %c0_184 = arith.constant 0 : index
    %c0_185 = arith.constant 0 : index
    %609 = vector.load %arg5[%c4_183, %c0_184, %c0_185] : memref<9x32x289xbf16, #tpu.memory_space<vmem>>, vector<1x32x289xbf16>
    %610 = vector.shape_cast %609 : vector<1x32x289xbf16> to vector<32x289xbf16>
    %c9_i32_186 = arith.constant 9 : i32
    %611 = tpu.dynamic_rotate %608 by %c9_i32_186 dim 1 : vector<32x128xf32>, i32 -> vector<32x128xf32>
    %612 = vector.broadcast %3 : vector<1x128xf32> to vector<32x128xf32>
    %613 = arith.mulf %611, %612 : vector<32x128xf32>
    %614 = arith.truncf %613 : vector<32x128xf32> to vector<32x128xbf16>
    %c8_i32_187 = arith.constant 8 : i32
    %615 = tpu.dynamic_rotate %608 by %c8_i32_187 dim 1 : vector<32x128xf32>, i32 -> vector<32x128xf32>
    %616 = vector.broadcast %4 : vector<1x128xf32> to vector<32x128xf32>
    %617 = arith.mulf %615, %616 : vector<32x128xf32>
    %618 = arith.truncf %617 : vector<32x128xf32> to vector<32x128xbf16>
    %c7_i32_188 = arith.constant 7 : i32
    %619 = tpu.dynamic_rotate %608 by %c7_i32_188 dim 1 : vector<32x128xf32>, i32 -> vector<32x128xf32>
    %620 = vector.broadcast %5 : vector<1x128xf32> to vector<32x128xf32>
    %621 = arith.mulf %619, %620 : vector<32x128xf32>
    %622 = arith.truncf %621 : vector<32x128xf32> to vector<32x128xbf16>
    %c1_i32_189 = arith.constant 1 : i32
    %623 = tpu.dynamic_rotate %608 by %c1_i32_189 dim 1 : vector<32x128xf32>, i32 -> vector<32x128xf32>
    %624 = vector.broadcast %6 : vector<1x128xf32> to vector<32x128xf32>
    %625 = arith.mulf %623, %624 : vector<32x128xf32>
    %626 = arith.truncf %625 : vector<32x128xf32> to vector<32x128xbf16>
    %627 = arith.truncf %608 : vector<32x128xf32> to vector<32x128xbf16>
    %c127_i32_190 = arith.constant 127 : i32
    %628 = tpu.dynamic_rotate %608 by %c127_i32_190 dim 1 : vector<32x128xf32>, i32 -> vector<32x128xf32>
    %629 = vector.broadcast %7 : vector<1x128xf32> to vector<32x128xf32>
    %630 = arith.mulf %628, %629 : vector<32x128xf32>
    %631 = arith.truncf %630 : vector<32x128xf32> to vector<32x128xbf16>
    %c121_i32_191 = arith.constant 121 : i32
    %632 = tpu.dynamic_rotate %608 by %c121_i32_191 dim 1 : vector<32x128xf32>, i32 -> vector<32x128xf32>
    %633 = vector.broadcast %8 : vector<1x128xf32> to vector<32x128xf32>
    %634 = arith.mulf %632, %633 : vector<32x128xf32>
    %635 = arith.truncf %634 : vector<32x128xf32> to vector<32x128xbf16>
    %c120_i32_192 = arith.constant 120 : i32
    %636 = tpu.dynamic_rotate %608 by %c120_i32_192 dim 1 : vector<32x128xf32>, i32 -> vector<32x128xf32>
    %637 = vector.broadcast %9 : vector<1x128xf32> to vector<32x128xf32>
    %638 = arith.mulf %636, %637 : vector<32x128xf32>
    %639 = arith.truncf %638 : vector<32x128xf32> to vector<32x128xbf16>
    %c119_i32_193 = arith.constant 119 : i32
    %640 = tpu.dynamic_rotate %608 by %c119_i32_193 dim 1 : vector<32x128xf32>, i32 -> vector<32x128xf32>
    %641 = vector.broadcast %10 : vector<1x128xf32> to vector<32x128xf32>
    %642 = arith.mulf %640, %641 : vector<32x128xf32>
    %643 = arith.truncf %642 : vector<32x128xf32> to vector<32x128xbf16>
    %644 = tpu.concatenate %614, %618, %622, %626, %627, %631, %635, %639, %643, %11 in 0 : vector<32x128xbf16>, vector<32x128xbf16>, vector<32x128xbf16>, vector<32x128xbf16>, vector<32x128xbf16>, vector<32x128xbf16>, vector<32x128xbf16>, vector<32x128xbf16>, vector<32x128xbf16>, vector<1x128xbf16> -> vector<289x128xbf16>
    %cst_194 = arith.constant dense<0.000000e+00> : vector<32x128xf32>
    %645 = tpu.matmul %610, %644, %cst_194 {dimension_numbers = #tpu.dot_dimension_numbers<[1], [0], [0], [1], [0, 0, 1, 1], [], []>} : vector<32x289xbf16>, vector<289x128xbf16>, vector<32x128xf32> -> vector<32x128xf32>
    %cst_195 = arith.constant 0.000000e+00 : f32
    %646 = vector.broadcast %cst_195 : f32 to vector<32x128xf32>
    %647 = arith.maximumf %645, %646 : vector<32x128xf32>
    %c4_196 = arith.constant 4 : index
    %c0_197 = arith.constant 0 : index
    %c0_198 = arith.constant 0 : index
    %648 = vector.load %arg6[%c4_196, %c0_197, %c0_198] : memref<9x16x289xbf16, #tpu.memory_space<vmem>>, vector<1x16x289xbf16>
    %649 = vector.shape_cast %648 : vector<1x16x289xbf16> to vector<16x289xbf16>
    %c9_i32_199 = arith.constant 9 : i32
    %650 = tpu.dynamic_rotate %647 by %c9_i32_199 dim 1 : vector<32x128xf32>, i32 -> vector<32x128xf32>
    %651 = vector.broadcast %3 : vector<1x128xf32> to vector<32x128xf32>
    %652 = arith.mulf %650, %651 : vector<32x128xf32>
    %653 = arith.truncf %652 : vector<32x128xf32> to vector<32x128xbf16>
    %c8_i32_200 = arith.constant 8 : i32
    %654 = tpu.dynamic_rotate %647 by %c8_i32_200 dim 1 : vector<32x128xf32>, i32 -> vector<32x128xf32>
    %655 = vector.broadcast %4 : vector<1x128xf32> to vector<32x128xf32>
    %656 = arith.mulf %654, %655 : vector<32x128xf32>
    %657 = arith.truncf %656 : vector<32x128xf32> to vector<32x128xbf16>
    %c7_i32_201 = arith.constant 7 : i32
    %658 = tpu.dynamic_rotate %647 by %c7_i32_201 dim 1 : vector<32x128xf32>, i32 -> vector<32x128xf32>
    %659 = vector.broadcast %5 : vector<1x128xf32> to vector<32x128xf32>
    %660 = arith.mulf %658, %659 : vector<32x128xf32>
    %661 = arith.truncf %660 : vector<32x128xf32> to vector<32x128xbf16>
    %c1_i32_202 = arith.constant 1 : i32
    %662 = tpu.dynamic_rotate %647 by %c1_i32_202 dim 1 : vector<32x128xf32>, i32 -> vector<32x128xf32>
    %663 = vector.broadcast %6 : vector<1x128xf32> to vector<32x128xf32>
    %664 = arith.mulf %662, %663 : vector<32x128xf32>
    %665 = arith.truncf %664 : vector<32x128xf32> to vector<32x128xbf16>
    %666 = arith.truncf %647 : vector<32x128xf32> to vector<32x128xbf16>
    %c127_i32_203 = arith.constant 127 : i32
    %667 = tpu.dynamic_rotate %647 by %c127_i32_203 dim 1 : vector<32x128xf32>, i32 -> vector<32x128xf32>
    %668 = vector.broadcast %7 : vector<1x128xf32> to vector<32x128xf32>
    %669 = arith.mulf %667, %668 : vector<32x128xf32>
    %670 = arith.truncf %669 : vector<32x128xf32> to vector<32x128xbf16>
    %c121_i32_204 = arith.constant 121 : i32
    %671 = tpu.dynamic_rotate %647 by %c121_i32_204 dim 1 : vector<32x128xf32>, i32 -> vector<32x128xf32>
    %672 = vector.broadcast %8 : vector<1x128xf32> to vector<32x128xf32>
    %673 = arith.mulf %671, %672 : vector<32x128xf32>
    %674 = arith.truncf %673 : vector<32x128xf32> to vector<32x128xbf16>
    %c120_i32_205 = arith.constant 120 : i32
    %675 = tpu.dynamic_rotate %647 by %c120_i32_205 dim 1 : vector<32x128xf32>, i32 -> vector<32x128xf32>
    %676 = vector.broadcast %9 : vector<1x128xf32> to vector<32x128xf32>
    %677 = arith.mulf %675, %676 : vector<32x128xf32>
    %678 = arith.truncf %677 : vector<32x128xf32> to vector<32x128xbf16>
    %c119_i32_206 = arith.constant 119 : i32
    %679 = tpu.dynamic_rotate %647 by %c119_i32_206 dim 1 : vector<32x128xf32>, i32 -> vector<32x128xf32>
    %680 = vector.broadcast %10 : vector<1x128xf32> to vector<32x128xf32>
    %681 = arith.mulf %679, %680 : vector<32x128xf32>
    %682 = arith.truncf %681 : vector<32x128xf32> to vector<32x128xbf16>
    %683 = tpu.concatenate %653, %657, %661, %665, %666, %670, %674, %678, %682, %11 in 0 : vector<32x128xbf16>, vector<32x128xbf16>, vector<32x128xbf16>, vector<32x128xbf16>, vector<32x128xbf16>, vector<32x128xbf16>, vector<32x128xbf16>, vector<32x128xbf16>, vector<32x128xbf16>, vector<1x128xbf16> -> vector<289x128xbf16>
    %cst_207 = arith.constant dense<0.000000e+00> : vector<16x128xf32>
    %684 = tpu.matmul %649, %683, %cst_207 {dimension_numbers = #tpu.dot_dimension_numbers<[1], [0], [0], [1], [0, 0, 1, 1], [], []>} : vector<16x289xbf16>, vector<289x128xbf16>, vector<16x128xf32> -> vector<16x128xf32>
    %685 = arith.subf %568, %684 : vector<16x128xf32>
    %686 = arith.subf %552, %685 : vector<16x128xf32>
    %c4_208 = arith.constant 4 : index
    %c0_209 = arith.constant 0 : index
    %c0_210 = arith.constant 0 : index
    %687 = vector.load %arg7[%c4_208, %c0_209, %c0_210] : memref<9x16x128xf32, #tpu.memory_space<vmem>>, vector<1x16x128xf32>
    %688 = vector.shape_cast %687 : vector<1x16x128xf32> to vector<16x128xf32>
    %689 = vector.shape_cast %684 : vector<16x128xf32> to vector<1x16x128xf32>
    tpu.vector_store %arg7[%c4_208, %c0_209, %c0_210], %689 {strides = array<i32>} : memref<9x16x128xf32, #tpu.memory_space<vmem>>, vector<1x16x128xf32>,
    %c5 = arith.constant 5 : index
    %690 = memref.load %arg0[%c5] : memref<9xf32, #tpu.memory_space<smem>>
    %691 = arith.addf %684, %686 : vector<16x128xf32>
    %692 = arith.mulf %691, %1 : vector<16x128xf32>
    %cst_211 = arith.constant dense<0.000000e+00> : vector<128xf32>
    %693 = vector.multi_reduction <add>, %692, %cst_211 [0] : vector<16x128xf32> to vector<128xf32>
    %694 = vector.shape_cast %693 : vector<128xf32> to vector<1x128xf32>
    %695 = arith.subf %14, %694 : vector<1x128xf32>
    %696 = vector.broadcast %690 : f32 to vector<1x128xf32>
    %697 = arith.addf %16, %696 : vector<1x128xf32>
    %698 = tpu.reciprocal %697 {approx = true} : vector<1x128xf32> -> vector<1x128xf32>
    %699 = arith.mulf %695, %698 : vector<1x128xf32>
    %700 = vector.broadcast %699 : vector<1x128xf32> to vector<16x128xf32>
    %701 = arith.mulf %700, %1 : vector<16x128xf32>
    %702 = arith.addf %691, %701 : vector<16x128xf32>
    %703 = arith.subf %702, %686 : vector<16x128xf32>
    %c5_212 = arith.constant 5 : index
    %c0_213 = arith.constant 0 : index
    %c0_214 = arith.constant 0 : index
    %704 = vector.load %arg4[%c5_212, %c0_213, %c0_214] : memref<9x32x145xbf16, #tpu.memory_space<vmem>>, vector<1x32x145xbf16>
    %705 = vector.shape_cast %704 : vector<1x32x145xbf16> to vector<32x145xbf16>
    %c9_i32_215 = arith.constant 9 : i32
    %706 = tpu.dynamic_rotate %703 by %c9_i32_215 dim 1 : vector<16x128xf32>, i32 -> vector<16x128xf32>
    %707 = vector.broadcast %3 : vector<1x128xf32> to vector<16x128xf32>
    %708 = arith.mulf %706, %707 : vector<16x128xf32>
    %709 = arith.truncf %708 : vector<16x128xf32> to vector<16x128xbf16>
    %c8_i32_216 = arith.constant 8 : i32
    %710 = tpu.dynamic_rotate %703 by %c8_i32_216 dim 1 : vector<16x128xf32>, i32 -> vector<16x128xf32>
    %711 = vector.broadcast %4 : vector<1x128xf32> to vector<16x128xf32>
    %712 = arith.mulf %710, %711 : vector<16x128xf32>
    %713 = arith.truncf %712 : vector<16x128xf32> to vector<16x128xbf16>
    %c7_i32_217 = arith.constant 7 : i32
    %714 = tpu.dynamic_rotate %703 by %c7_i32_217 dim 1 : vector<16x128xf32>, i32 -> vector<16x128xf32>
    %715 = vector.broadcast %5 : vector<1x128xf32> to vector<16x128xf32>
    %716 = arith.mulf %714, %715 : vector<16x128xf32>
    %717 = arith.truncf %716 : vector<16x128xf32> to vector<16x128xbf16>
    %c1_i32_218 = arith.constant 1 : i32
    %718 = tpu.dynamic_rotate %703 by %c1_i32_218 dim 1 : vector<16x128xf32>, i32 -> vector<16x128xf32>
    %719 = vector.broadcast %6 : vector<1x128xf32> to vector<16x128xf32>
    %720 = arith.mulf %718, %719 : vector<16x128xf32>
    %721 = arith.truncf %720 : vector<16x128xf32> to vector<16x128xbf16>
    %722 = arith.truncf %703 : vector<16x128xf32> to vector<16x128xbf16>
    %c127_i32_219 = arith.constant 127 : i32
    %723 = tpu.dynamic_rotate %703 by %c127_i32_219 dim 1 : vector<16x128xf32>, i32 -> vector<16x128xf32>
    %724 = vector.broadcast %7 : vector<1x128xf32> to vector<16x128xf32>
    %725 = arith.mulf %723, %724 : vector<16x128xf32>
    %726 = arith.truncf %725 : vector<16x128xf32> to vector<16x128xbf16>
    %c121_i32_220 = arith.constant 121 : i32
    %727 = tpu.dynamic_rotate %703 by %c121_i32_220 dim 1 : vector<16x128xf32>, i32 -> vector<16x128xf32>
    %728 = vector.broadcast %8 : vector<1x128xf32> to vector<16x128xf32>
    %729 = arith.mulf %727, %728 : vector<16x128xf32>
    %730 = arith.truncf %729 : vector<16x128xf32> to vector<16x128xbf16>
    %c120_i32_221 = arith.constant 120 : i32
    %731 = tpu.dynamic_rotate %703 by %c120_i32_221 dim 1 : vector<16x128xf32>, i32 -> vector<16x128xf32>
    %732 = vector.broadcast %9 : vector<1x128xf32> to vector<16x128xf32>
    %733 = arith.mulf %731, %732 : vector<16x128xf32>
    %734 = arith.truncf %733 : vector<16x128xf32> to vector<16x128xbf16>
    %c119_i32_222 = arith.constant 119 : i32
    %735 = tpu.dynamic_rotate %703 by %c119_i32_222 dim 1 : vector<16x128xf32>, i32 -> vector<16x128xf32>
    %736 = vector.broadcast %10 : vector<1x128xf32> to vector<16x128xf32>
    %737 = arith.mulf %735, %736 : vector<16x128xf32>
    %738 = arith.truncf %737 : vector<16x128xf32> to vector<16x128xbf16>
    %739 = tpu.concatenate %709, %713, %717, %721, %722, %726, %730, %734, %738, %11 in 0 : vector<16x128xbf16>, vector<16x128xbf16>, vector<16x128xbf16>, vector<16x128xbf16>, vector<16x128xbf16>, vector<16x128xbf16>, vector<16x128xbf16>, vector<16x128xbf16>, vector<16x128xbf16>, vector<1x128xbf16> -> vector<145x128xbf16>
    %cst_223 = arith.constant dense<0.000000e+00> : vector<32x128xf32>
    %740 = tpu.matmul %705, %739, %cst_223 {dimension_numbers = #tpu.dot_dimension_numbers<[1], [0], [0], [1], [0, 0, 1, 1], [], []>} : vector<32x145xbf16>, vector<145x128xbf16>, vector<32x128xf32> -> vector<32x128xf32>
    %cst_224 = arith.constant 0.000000e+00 : f32
    %741 = vector.broadcast %cst_224 : f32 to vector<32x128xf32>
    %742 = arith.maximumf %740, %741 : vector<32x128xf32>
    %c5_225 = arith.constant 5 : index
    %c0_226 = arith.constant 0 : index
    %c0_227 = arith.constant 0 : index
    %743 = vector.load %arg5[%c5_225, %c0_226, %c0_227] : memref<9x32x289xbf16, #tpu.memory_space<vmem>>, vector<1x32x289xbf16>
    %744 = vector.shape_cast %743 : vector<1x32x289xbf16> to vector<32x289xbf16>
    %c9_i32_228 = arith.constant 9 : i32
    %745 = tpu.dynamic_rotate %742 by %c9_i32_228 dim 1 : vector<32x128xf32>, i32 -> vector<32x128xf32>
    %746 = vector.broadcast %3 : vector<1x128xf32> to vector<32x128xf32>
    %747 = arith.mulf %745, %746 : vector<32x128xf32>
    %748 = arith.truncf %747 : vector<32x128xf32> to vector<32x128xbf16>
    %c8_i32_229 = arith.constant 8 : i32
    %749 = tpu.dynamic_rotate %742 by %c8_i32_229 dim 1 : vector<32x128xf32>, i32 -> vector<32x128xf32>
    %750 = vector.broadcast %4 : vector<1x128xf32> to vector<32x128xf32>
    %751 = arith.mulf %749, %750 : vector<32x128xf32>
    %752 = arith.truncf %751 : vector<32x128xf32> to vector<32x128xbf16>
    %c7_i32_230 = arith.constant 7 : i32
    %753 = tpu.dynamic_rotate %742 by %c7_i32_230 dim 1 : vector<32x128xf32>, i32 -> vector<32x128xf32>
    %754 = vector.broadcast %5 : vector<1x128xf32> to vector<32x128xf32>
    %755 = arith.mulf %753, %754 : vector<32x128xf32>
    %756 = arith.truncf %755 : vector<32x128xf32> to vector<32x128xbf16>
    %c1_i32_231 = arith.constant 1 : i32
    %757 = tpu.dynamic_rotate %742 by %c1_i32_231 dim 1 : vector<32x128xf32>, i32 -> vector<32x128xf32>
    %758 = vector.broadcast %6 : vector<1x128xf32> to vector<32x128xf32>
    %759 = arith.mulf %757, %758 : vector<32x128xf32>
    %760 = arith.truncf %759 : vector<32x128xf32> to vector<32x128xbf16>
    %761 = arith.truncf %742 : vector<32x128xf32> to vector<32x128xbf16>
    %c127_i32_232 = arith.constant 127 : i32
    %762 = tpu.dynamic_rotate %742 by %c127_i32_232 dim 1 : vector<32x128xf32>, i32 -> vector<32x128xf32>
    %763 = vector.broadcast %7 : vector<1x128xf32> to vector<32x128xf32>
    %764 = arith.mulf %762, %763 : vector<32x128xf32>
    %765 = arith.truncf %764 : vector<32x128xf32> to vector<32x128xbf16>
    %c121_i32_233 = arith.constant 121 : i32
    %766 = tpu.dynamic_rotate %742 by %c121_i32_233 dim 1 : vector<32x128xf32>, i32 -> vector<32x128xf32>
    %767 = vector.broadcast %8 : vector<1x128xf32> to vector<32x128xf32>
    %768 = arith.mulf %766, %767 : vector<32x128xf32>
    %769 = arith.truncf %768 : vector<32x128xf32> to vector<32x128xbf16>
    %c120_i32_234 = arith.constant 120 : i32
    %770 = tpu.dynamic_rotate %742 by %c120_i32_234 dim 1 : vector<32x128xf32>, i32 -> vector<32x128xf32>
    %771 = vector.broadcast %9 : vector<1x128xf32> to vector<32x128xf32>
    %772 = arith.mulf %770, %771 : vector<32x128xf32>
    %773 = arith.truncf %772 : vector<32x128xf32> to vector<32x128xbf16>
    %c119_i32_235 = arith.constant 119 : i32
    %774 = tpu.dynamic_rotate %742 by %c119_i32_235 dim 1 : vector<32x128xf32>, i32 -> vector<32x128xf32>
    %775 = vector.broadcast %10 : vector<1x128xf32> to vector<32x128xf32>
    %776 = arith.mulf %774, %775 : vector<32x128xf32>
    %777 = arith.truncf %776 : vector<32x128xf32> to vector<32x128xbf16>
    %778 = tpu.concatenate %748, %752, %756, %760, %761, %765, %769, %773, %777, %11 in 0 : vector<32x128xbf16>, vector<32x128xbf16>, vector<32x128xbf16>, vector<32x128xbf16>, vector<32x128xbf16>, vector<32x128xbf16>, vector<32x128xbf16>, vector<32x128xbf16>, vector<32x128xbf16>, vector<1x128xbf16> -> vector<289x128xbf16>
    %cst_236 = arith.constant dense<0.000000e+00> : vector<32x128xf32>
    %779 = tpu.matmul %744, %778, %cst_236 {dimension_numbers = #tpu.dot_dimension_numbers<[1], [0], [0], [1], [0, 0, 1, 1], [], []>} : vector<32x289xbf16>, vector<289x128xbf16>, vector<32x128xf32> -> vector<32x128xf32>
    %cst_237 = arith.constant 0.000000e+00 : f32
    %780 = vector.broadcast %cst_237 : f32 to vector<32x128xf32>
    %781 = arith.maximumf %779, %780 : vector<32x128xf32>
    %c5_238 = arith.constant 5 : index
    %c0_239 = arith.constant 0 : index
    %c0_240 = arith.constant 0 : index
    %782 = vector.load %arg6[%c5_238, %c0_239, %c0_240] : memref<9x16x289xbf16, #tpu.memory_space<vmem>>, vector<1x16x289xbf16>
    %783 = vector.shape_cast %782 : vector<1x16x289xbf16> to vector<16x289xbf16>
    %c9_i32_241 = arith.constant 9 : i32
    %784 = tpu.dynamic_rotate %781 by %c9_i32_241 dim 1 : vector<32x128xf32>, i32 -> vector<32x128xf32>
    %785 = vector.broadcast %3 : vector<1x128xf32> to vector<32x128xf32>
    %786 = arith.mulf %784, %785 : vector<32x128xf32>
    %787 = arith.truncf %786 : vector<32x128xf32> to vector<32x128xbf16>
    %c8_i32_242 = arith.constant 8 : i32
    %788 = tpu.dynamic_rotate %781 by %c8_i32_242 dim 1 : vector<32x128xf32>, i32 -> vector<32x128xf32>
    %789 = vector.broadcast %4 : vector<1x128xf32> to vector<32x128xf32>
    %790 = arith.mulf %788, %789 : vector<32x128xf32>
    %791 = arith.truncf %790 : vector<32x128xf32> to vector<32x128xbf16>
    %c7_i32_243 = arith.constant 7 : i32
    %792 = tpu.dynamic_rotate %781 by %c7_i32_243 dim 1 : vector<32x128xf32>, i32 -> vector<32x128xf32>
    %793 = vector.broadcast %5 : vector<1x128xf32> to vector<32x128xf32>
    %794 = arith.mulf %792, %793 : vector<32x128xf32>
    %795 = arith.truncf %794 : vector<32x128xf32> to vector<32x128xbf16>
    %c1_i32_244 = arith.constant 1 : i32
    %796 = tpu.dynamic_rotate %781 by %c1_i32_244 dim 1 : vector<32x128xf32>, i32 -> vector<32x128xf32>
    %797 = vector.broadcast %6 : vector<1x128xf32> to vector<32x128xf32>
    %798 = arith.mulf %796, %797 : vector<32x128xf32>
    %799 = arith.truncf %798 : vector<32x128xf32> to vector<32x128xbf16>
    %800 = arith.truncf %781 : vector<32x128xf32> to vector<32x128xbf16>
    %c127_i32_245 = arith.constant 127 : i32
    %801 = tpu.dynamic_rotate %781 by %c127_i32_245 dim 1 : vector<32x128xf32>, i32 -> vector<32x128xf32>
    %802 = vector.broadcast %7 : vector<1x128xf32> to vector<32x128xf32>
    %803 = arith.mulf %801, %802 : vector<32x128xf32>
    %804 = arith.truncf %803 : vector<32x128xf32> to vector<32x128xbf16>
    %c121_i32_246 = arith.constant 121 : i32
    %805 = tpu.dynamic_rotate %781 by %c121_i32_246 dim 1 : vector<32x128xf32>, i32 -> vector<32x128xf32>
    %806 = vector.broadcast %8 : vector<1x128xf32> to vector<32x128xf32>
    %807 = arith.mulf %805, %806 : vector<32x128xf32>
    %808 = arith.truncf %807 : vector<32x128xf32> to vector<32x128xbf16>
    %c120_i32_247 = arith.constant 120 : i32
    %809 = tpu.dynamic_rotate %781 by %c120_i32_247 dim 1 : vector<32x128xf32>, i32 -> vector<32x128xf32>
    %810 = vector.broadcast %9 : vector<1x128xf32> to vector<32x128xf32>
    %811 = arith.mulf %809, %810 : vector<32x128xf32>
    %812 = arith.truncf %811 : vector<32x128xf32> to vector<32x128xbf16>
    %c119_i32_248 = arith.constant 119 : i32
    %813 = tpu.dynamic_rotate %781 by %c119_i32_248 dim 1 : vector<32x128xf32>, i32 -> vector<32x128xf32>
    %814 = vector.broadcast %10 : vector<1x128xf32> to vector<32x128xf32>
    %815 = arith.mulf %813, %814 : vector<32x128xf32>
    %816 = arith.truncf %815 : vector<32x128xf32> to vector<32x128xbf16>
    %817 = tpu.concatenate %787, %791, %795, %799, %800, %804, %808, %812, %816, %11 in 0 : vector<32x128xbf16>, vector<32x128xbf16>, vector<32x128xbf16>, vector<32x128xbf16>, vector<32x128xbf16>, vector<32x128xbf16>, vector<32x128xbf16>, vector<32x128xbf16>, vector<32x128xbf16>, vector<1x128xbf16> -> vector<289x128xbf16>
    %cst_249 = arith.constant dense<0.000000e+00> : vector<16x128xf32>
    %818 = tpu.matmul %783, %817, %cst_249 {dimension_numbers = #tpu.dot_dimension_numbers<[1], [0], [0], [1], [0, 0, 1, 1], [], []>} : vector<16x289xbf16>, vector<289x128xbf16>, vector<16x128xf32> -> vector<16x128xf32>
    %819 = arith.subf %702, %818 : vector<16x128xf32>
    %820 = arith.subf %686, %819 : vector<16x128xf32>
    %c5_250 = arith.constant 5 : index
    %c0_251 = arith.constant 0 : index
    %c0_252 = arith.constant 0 : index
    %821 = vector.load %arg7[%c5_250, %c0_251, %c0_252] : memref<9x16x128xf32, #tpu.memory_space<vmem>>, vector<1x16x128xf32>
    %822 = vector.shape_cast %821 : vector<1x16x128xf32> to vector<16x128xf32>
    %823 = vector.shape_cast %818 : vector<16x128xf32> to vector<1x16x128xf32>
    tpu.vector_store %arg7[%c5_250, %c0_251, %c0_252], %823 {strides = array<i32>} : memref<9x16x128xf32, #tpu.memory_space<vmem>>, vector<1x16x128xf32>,
    %c6 = arith.constant 6 : index
    %824 = memref.load %arg0[%c6] : memref<9xf32, #tpu.memory_space<smem>>
    %825 = arith.addf %818, %820 : vector<16x128xf32>
    %826 = arith.mulf %825, %1 : vector<16x128xf32>
    %cst_253 = arith.constant dense<0.000000e+00> : vector<128xf32>
    %827 = vector.multi_reduction <add>, %826, %cst_253 [0] : vector<16x128xf32> to vector<128xf32>
    %828 = vector.shape_cast %827 : vector<128xf32> to vector<1x128xf32>
    %829 = arith.subf %14, %828 : vector<1x128xf32>
    %830 = vector.broadcast %824 : f32 to vector<1x128xf32>
    %831 = arith.addf %16, %830 : vector<1x128xf32>
    %832 = tpu.reciprocal %831 {approx = true} : vector<1x128xf32> -> vector<1x128xf32>
    %833 = arith.mulf %829, %832 : vector<1x128xf32>
    %834 = vector.broadcast %833 : vector<1x128xf32> to vector<16x128xf32>
    %835 = arith.mulf %834, %1 : vector<16x128xf32>
    %836 = arith.addf %825, %835 : vector<16x128xf32>
    %837 = arith.subf %836, %820 : vector<16x128xf32>
    %c6_254 = arith.constant 6 : index
    %c0_255 = arith.constant 0 : index
    %c0_256 = arith.constant 0 : index
    %838 = vector.load %arg4[%c6_254, %c0_255, %c0_256] : memref<9x32x145xbf16, #tpu.memory_space<vmem>>, vector<1x32x145xbf16>
    %839 = vector.shape_cast %838 : vector<1x32x145xbf16> to vector<32x145xbf16>
    %c9_i32_257 = arith.constant 9 : i32
    %840 = tpu.dynamic_rotate %837 by %c9_i32_257 dim 1 : vector<16x128xf32>, i32 -> vector<16x128xf32>
    %841 = vector.broadcast %3 : vector<1x128xf32> to vector<16x128xf32>
    %842 = arith.mulf %840, %841 : vector<16x128xf32>
    %843 = arith.truncf %842 : vector<16x128xf32> to vector<16x128xbf16>
    %c8_i32_258 = arith.constant 8 : i32
    %844 = tpu.dynamic_rotate %837 by %c8_i32_258 dim 1 : vector<16x128xf32>, i32 -> vector<16x128xf32>
    %845 = vector.broadcast %4 : vector<1x128xf32> to vector<16x128xf32>
    %846 = arith.mulf %844, %845 : vector<16x128xf32>
    %847 = arith.truncf %846 : vector<16x128xf32> to vector<16x128xbf16>
    %c7_i32_259 = arith.constant 7 : i32
    %848 = tpu.dynamic_rotate %837 by %c7_i32_259 dim 1 : vector<16x128xf32>, i32 -> vector<16x128xf32>
    %849 = vector.broadcast %5 : vector<1x128xf32> to vector<16x128xf32>
    %850 = arith.mulf %848, %849 : vector<16x128xf32>
    %851 = arith.truncf %850 : vector<16x128xf32> to vector<16x128xbf16>
    %c1_i32_260 = arith.constant 1 : i32
    %852 = tpu.dynamic_rotate %837 by %c1_i32_260 dim 1 : vector<16x128xf32>, i32 -> vector<16x128xf32>
    %853 = vector.broadcast %6 : vector<1x128xf32> to vector<16x128xf32>
    %854 = arith.mulf %852, %853 : vector<16x128xf32>
    %855 = arith.truncf %854 : vector<16x128xf32> to vector<16x128xbf16>
    %856 = arith.truncf %837 : vector<16x128xf32> to vector<16x128xbf16>
    %c127_i32_261 = arith.constant 127 : i32
    %857 = tpu.dynamic_rotate %837 by %c127_i32_261 dim 1 : vector<16x128xf32>, i32 -> vector<16x128xf32>
    %858 = vector.broadcast %7 : vector<1x128xf32> to vector<16x128xf32>
    %859 = arith.mulf %857, %858 : vector<16x128xf32>
    %860 = arith.truncf %859 : vector<16x128xf32> to vector<16x128xbf16>
    %c121_i32_262 = arith.constant 121 : i32
    %861 = tpu.dynamic_rotate %837 by %c121_i32_262 dim 1 : vector<16x128xf32>, i32 -> vector<16x128xf32>
    %862 = vector.broadcast %8 : vector<1x128xf32> to vector<16x128xf32>
    %863 = arith.mulf %861, %862 : vector<16x128xf32>
    %864 = arith.truncf %863 : vector<16x128xf32> to vector<16x128xbf16>
    %c120_i32_263 = arith.constant 120 : i32
    %865 = tpu.dynamic_rotate %837 by %c120_i32_263 dim 1 : vector<16x128xf32>, i32 -> vector<16x128xf32>
    %866 = vector.broadcast %9 : vector<1x128xf32> to vector<16x128xf32>
    %867 = arith.mulf %865, %866 : vector<16x128xf32>
    %868 = arith.truncf %867 : vector<16x128xf32> to vector<16x128xbf16>
    %c119_i32_264 = arith.constant 119 : i32
    %869 = tpu.dynamic_rotate %837 by %c119_i32_264 dim 1 : vector<16x128xf32>, i32 -> vector<16x128xf32>
    %870 = vector.broadcast %10 : vector<1x128xf32> to vector<16x128xf32>
    %871 = arith.mulf %869, %870 : vector<16x128xf32>
    %872 = arith.truncf %871 : vector<16x128xf32> to vector<16x128xbf16>
    %873 = tpu.concatenate %843, %847, %851, %855, %856, %860, %864, %868, %872, %11 in 0 : vector<16x128xbf16>, vector<16x128xbf16>, vector<16x128xbf16>, vector<16x128xbf16>, vector<16x128xbf16>, vector<16x128xbf16>, vector<16x128xbf16>, vector<16x128xbf16>, vector<16x128xbf16>, vector<1x128xbf16> -> vector<145x128xbf16>
    %cst_265 = arith.constant dense<0.000000e+00> : vector<32x128xf32>
    %874 = tpu.matmul %839, %873, %cst_265 {dimension_numbers = #tpu.dot_dimension_numbers<[1], [0], [0], [1], [0, 0, 1, 1], [], []>} : vector<32x145xbf16>, vector<145x128xbf16>, vector<32x128xf32> -> vector<32x128xf32>
    %cst_266 = arith.constant 0.000000e+00 : f32
    %875 = vector.broadcast %cst_266 : f32 to vector<32x128xf32>
    %876 = arith.maximumf %874, %875 : vector<32x128xf32>
    %c6_267 = arith.constant 6 : index
    %c0_268 = arith.constant 0 : index
    %c0_269 = arith.constant 0 : index
    %877 = vector.load %arg5[%c6_267, %c0_268, %c0_269] : memref<9x32x289xbf16, #tpu.memory_space<vmem>>, vector<1x32x289xbf16>
    %878 = vector.shape_cast %877 : vector<1x32x289xbf16> to vector<32x289xbf16>
    %c9_i32_270 = arith.constant 9 : i32
    %879 = tpu.dynamic_rotate %876 by %c9_i32_270 dim 1 : vector<32x128xf32>, i32 -> vector<32x128xf32>
    %880 = vector.broadcast %3 : vector<1x128xf32> to vector<32x128xf32>
    %881 = arith.mulf %879, %880 : vector<32x128xf32>
    %882 = arith.truncf %881 : vector<32x128xf32> to vector<32x128xbf16>
    %c8_i32_271 = arith.constant 8 : i32
    %883 = tpu.dynamic_rotate %876 by %c8_i32_271 dim 1 : vector<32x128xf32>, i32 -> vector<32x128xf32>
    %884 = vector.broadcast %4 : vector<1x128xf32> to vector<32x128xf32>
    %885 = arith.mulf %883, %884 : vector<32x128xf32>
    %886 = arith.truncf %885 : vector<32x128xf32> to vector<32x128xbf16>
    %c7_i32_272 = arith.constant 7 : i32
    %887 = tpu.dynamic_rotate %876 by %c7_i32_272 dim 1 : vector<32x128xf32>, i32 -> vector<32x128xf32>
    %888 = vector.broadcast %5 : vector<1x128xf32> to vector<32x128xf32>
    %889 = arith.mulf %887, %888 : vector<32x128xf32>
    %890 = arith.truncf %889 : vector<32x128xf32> to vector<32x128xbf16>
    %c1_i32_273 = arith.constant 1 : i32
    %891 = tpu.dynamic_rotate %876 by %c1_i32_273 dim 1 : vector<32x128xf32>, i32 -> vector<32x128xf32>
    %892 = vector.broadcast %6 : vector<1x128xf32> to vector<32x128xf32>
    %893 = arith.mulf %891, %892 : vector<32x128xf32>
    %894 = arith.truncf %893 : vector<32x128xf32> to vector<32x128xbf16>
    %895 = arith.truncf %876 : vector<32x128xf32> to vector<32x128xbf16>
    %c127_i32_274 = arith.constant 127 : i32
    %896 = tpu.dynamic_rotate %876 by %c127_i32_274 dim 1 : vector<32x128xf32>, i32 -> vector<32x128xf32>
    %897 = vector.broadcast %7 : vector<1x128xf32> to vector<32x128xf32>
    %898 = arith.mulf %896, %897 : vector<32x128xf32>
    %899 = arith.truncf %898 : vector<32x128xf32> to vector<32x128xbf16>
    %c121_i32_275 = arith.constant 121 : i32
    %900 = tpu.dynamic_rotate %876 by %c121_i32_275 dim 1 : vector<32x128xf32>, i32 -> vector<32x128xf32>
    %901 = vector.broadcast %8 : vector<1x128xf32> to vector<32x128xf32>
    %902 = arith.mulf %900, %901 : vector<32x128xf32>
    %903 = arith.truncf %902 : vector<32x128xf32> to vector<32x128xbf16>
    %c120_i32_276 = arith.constant 120 : i32
    %904 = tpu.dynamic_rotate %876 by %c120_i32_276 dim 1 : vector<32x128xf32>, i32 -> vector<32x128xf32>
    %905 = vector.broadcast %9 : vector<1x128xf32> to vector<32x128xf32>
    %906 = arith.mulf %904, %905 : vector<32x128xf32>
    %907 = arith.truncf %906 : vector<32x128xf32> to vector<32x128xbf16>
    %c119_i32_277 = arith.constant 119 : i32
    %908 = tpu.dynamic_rotate %876 by %c119_i32_277 dim 1 : vector<32x128xf32>, i32 -> vector<32x128xf32>
    %909 = vector.broadcast %10 : vector<1x128xf32> to vector<32x128xf32>
    %910 = arith.mulf %908, %909 : vector<32x128xf32>
    %911 = arith.truncf %910 : vector<32x128xf32> to vector<32x128xbf16>
    %912 = tpu.concatenate %882, %886, %890, %894, %895, %899, %903, %907, %911, %11 in 0 : vector<32x128xbf16>, vector<32x128xbf16>, vector<32x128xbf16>, vector<32x128xbf16>, vector<32x128xbf16>, vector<32x128xbf16>, vector<32x128xbf16>, vector<32x128xbf16>, vector<32x128xbf16>, vector<1x128xbf16> -> vector<289x128xbf16>
    %cst_278 = arith.constant dense<0.000000e+00> : vector<32x128xf32>
    %913 = tpu.matmul %878, %912, %cst_278 {dimension_numbers = #tpu.dot_dimension_numbers<[1], [0], [0], [1], [0, 0, 1, 1], [], []>} : vector<32x289xbf16>, vector<289x128xbf16>, vector<32x128xf32> -> vector<32x128xf32>
    %cst_279 = arith.constant 0.000000e+00 : f32
    %914 = vector.broadcast %cst_279 : f32 to vector<32x128xf32>
    %915 = arith.maximumf %913, %914 : vector<32x128xf32>
    %c6_280 = arith.constant 6 : index
    %c0_281 = arith.constant 0 : index
    %c0_282 = arith.constant 0 : index
    %916 = vector.load %arg6[%c6_280, %c0_281, %c0_282] : memref<9x16x289xbf16, #tpu.memory_space<vmem>>, vector<1x16x289xbf16>
    %917 = vector.shape_cast %916 : vector<1x16x289xbf16> to vector<16x289xbf16>
    %c9_i32_283 = arith.constant 9 : i32
    %918 = tpu.dynamic_rotate %915 by %c9_i32_283 dim 1 : vector<32x128xf32>, i32 -> vector<32x128xf32>
    %919 = vector.broadcast %3 : vector<1x128xf32> to vector<32x128xf32>
    %920 = arith.mulf %918, %919 : vector<32x128xf32>
    %921 = arith.truncf %920 : vector<32x128xf32> to vector<32x128xbf16>
    %c8_i32_284 = arith.constant 8 : i32
    %922 = tpu.dynamic_rotate %915 by %c8_i32_284 dim 1 : vector<32x128xf32>, i32 -> vector<32x128xf32>
    %923 = vector.broadcast %4 : vector<1x128xf32> to vector<32x128xf32>
    %924 = arith.mulf %922, %923 : vector<32x128xf32>
    %925 = arith.truncf %924 : vector<32x128xf32> to vector<32x128xbf16>
    %c7_i32_285 = arith.constant 7 : i32
    %926 = tpu.dynamic_rotate %915 by %c7_i32_285 dim 1 : vector<32x128xf32>, i32 -> vector<32x128xf32>
    %927 = vector.broadcast %5 : vector<1x128xf32> to vector<32x128xf32>
    %928 = arith.mulf %926, %927 : vector<32x128xf32>
    %929 = arith.truncf %928 : vector<32x128xf32> to vector<32x128xbf16>
    %c1_i32_286 = arith.constant 1 : i32
    %930 = tpu.dynamic_rotate %915 by %c1_i32_286 dim 1 : vector<32x128xf32>, i32 -> vector<32x128xf32>
    %931 = vector.broadcast %6 : vector<1x128xf32> to vector<32x128xf32>
    %932 = arith.mulf %930, %931 : vector<32x128xf32>
    %933 = arith.truncf %932 : vector<32x128xf32> to vector<32x128xbf16>
    %934 = arith.truncf %915 : vector<32x128xf32> to vector<32x128xbf16>
    %c127_i32_287 = arith.constant 127 : i32
    %935 = tpu.dynamic_rotate %915 by %c127_i32_287 dim 1 : vector<32x128xf32>, i32 -> vector<32x128xf32>
    %936 = vector.broadcast %7 : vector<1x128xf32> to vector<32x128xf32>
    %937 = arith.mulf %935, %936 : vector<32x128xf32>
    %938 = arith.truncf %937 : vector<32x128xf32> to vector<32x128xbf16>
    %c121_i32_288 = arith.constant 121 : i32
    %939 = tpu.dynamic_rotate %915 by %c121_i32_288 dim 1 : vector<32x128xf32>, i32 -> vector<32x128xf32>
    %940 = vector.broadcast %8 : vector<1x128xf32> to vector<32x128xf32>
    %941 = arith.mulf %939, %940 : vector<32x128xf32>
    %942 = arith.truncf %941 : vector<32x128xf32> to vector<32x128xbf16>
    %c120_i32_289 = arith.constant 120 : i32
    %943 = tpu.dynamic_rotate %915 by %c120_i32_289 dim 1 : vector<32x128xf32>, i32 -> vector<32x128xf32>
    %944 = vector.broadcast %9 : vector<1x128xf32> to vector<32x128xf32>
    %945 = arith.mulf %943, %944 : vector<32x128xf32>
    %946 = arith.truncf %945 : vector<32x128xf32> to vector<32x128xbf16>
    %c119_i32_290 = arith.constant 119 : i32
    %947 = tpu.dynamic_rotate %915 by %c119_i32_290 dim 1 : vector<32x128xf32>, i32 -> vector<32x128xf32>
    %948 = vector.broadcast %10 : vector<1x128xf32> to vector<32x128xf32>
    %949 = arith.mulf %947, %948 : vector<32x128xf32>
    %950 = arith.truncf %949 : vector<32x128xf32> to vector<32x128xbf16>
    %951 = tpu.concatenate %921, %925, %929, %933, %934, %938, %942, %946, %950, %11 in 0 : vector<32x128xbf16>, vector<32x128xbf16>, vector<32x128xbf16>, vector<32x128xbf16>, vector<32x128xbf16>, vector<32x128xbf16>, vector<32x128xbf16>, vector<32x128xbf16>, vector<32x128xbf16>, vector<1x128xbf16> -> vector<289x128xbf16>
    %cst_291 = arith.constant dense<0.000000e+00> : vector<16x128xf32>
    %952 = tpu.matmul %917, %951, %cst_291 {dimension_numbers = #tpu.dot_dimension_numbers<[1], [0], [0], [1], [0, 0, 1, 1], [], []>} : vector<16x289xbf16>, vector<289x128xbf16>, vector<16x128xf32> -> vector<16x128xf32>
    %953 = arith.subf %836, %952 : vector<16x128xf32>
    %954 = arith.subf %820, %953 : vector<16x128xf32>
    %c6_292 = arith.constant 6 : index
    %c0_293 = arith.constant 0 : index
    %c0_294 = arith.constant 0 : index
    %955 = vector.load %arg7[%c6_292, %c0_293, %c0_294] : memref<9x16x128xf32, #tpu.memory_space<vmem>>, vector<1x16x128xf32>
    %956 = vector.shape_cast %955 : vector<1x16x128xf32> to vector<16x128xf32>
    %957 = vector.shape_cast %952 : vector<16x128xf32> to vector<1x16x128xf32>
    tpu.vector_store %arg7[%c6_292, %c0_293, %c0_294], %957 {strides = array<i32>} : memref<9x16x128xf32, #tpu.memory_space<vmem>>, vector<1x16x128xf32>,
    %c7 = arith.constant 7 : index
    %958 = memref.load %arg0[%c7] : memref<9xf32, #tpu.memory_space<smem>>
    %959 = arith.addf %952, %954 : vector<16x128xf32>
    %960 = arith.mulf %959, %1 : vector<16x128xf32>
    %cst_295 = arith.constant dense<0.000000e+00> : vector<128xf32>
    %961 = vector.multi_reduction <add>, %960, %cst_295 [0] : vector<16x128xf32> to vector<128xf32>
    %962 = vector.shape_cast %961 : vector<128xf32> to vector<1x128xf32>
    %963 = arith.subf %14, %962 : vector<1x128xf32>
    %964 = vector.broadcast %958 : f32 to vector<1x128xf32>
    %965 = arith.addf %16, %964 : vector<1x128xf32>
    %966 = tpu.reciprocal %965 {approx = true} : vector<1x128xf32> -> vector<1x128xf32>
    %967 = arith.mulf %963, %966 : vector<1x128xf32>
    %968 = vector.broadcast %967 : vector<1x128xf32> to vector<16x128xf32>
    %969 = arith.mulf %968, %1 : vector<16x128xf32>
    %970 = arith.addf %959, %969 : vector<16x128xf32>
    %971 = arith.subf %970, %954 : vector<16x128xf32>
    %c7_296 = arith.constant 7 : index
    %c0_297 = arith.constant 0 : index
    %c0_298 = arith.constant 0 : index
    %972 = vector.load %arg4[%c7_296, %c0_297, %c0_298] : memref<9x32x145xbf16, #tpu.memory_space<vmem>>, vector<1x32x145xbf16>
    %973 = vector.shape_cast %972 : vector<1x32x145xbf16> to vector<32x145xbf16>
    %c9_i32_299 = arith.constant 9 : i32
    %974 = tpu.dynamic_rotate %971 by %c9_i32_299 dim 1 : vector<16x128xf32>, i32 -> vector<16x128xf32>
    %975 = vector.broadcast %3 : vector<1x128xf32> to vector<16x128xf32>
    %976 = arith.mulf %974, %975 : vector<16x128xf32>
    %977 = arith.truncf %976 : vector<16x128xf32> to vector<16x128xbf16>
    %c8_i32_300 = arith.constant 8 : i32
    %978 = tpu.dynamic_rotate %971 by %c8_i32_300 dim 1 : vector<16x128xf32>, i32 -> vector<16x128xf32>
    %979 = vector.broadcast %4 : vector<1x128xf32> to vector<16x128xf32>
    %980 = arith.mulf %978, %979 : vector<16x128xf32>
    %981 = arith.truncf %980 : vector<16x128xf32> to vector<16x128xbf16>
    %c7_i32_301 = arith.constant 7 : i32
    %982 = tpu.dynamic_rotate %971 by %c7_i32_301 dim 1 : vector<16x128xf32>, i32 -> vector<16x128xf32>
    %983 = vector.broadcast %5 : vector<1x128xf32> to vector<16x128xf32>
    %984 = arith.mulf %982, %983 : vector<16x128xf32>
    %985 = arith.truncf %984 : vector<16x128xf32> to vector<16x128xbf16>
    %c1_i32_302 = arith.constant 1 : i32
    %986 = tpu.dynamic_rotate %971 by %c1_i32_302 dim 1 : vector<16x128xf32>, i32 -> vector<16x128xf32>
    %987 = vector.broadcast %6 : vector<1x128xf32> to vector<16x128xf32>
    %988 = arith.mulf %986, %987 : vector<16x128xf32>
    %989 = arith.truncf %988 : vector<16x128xf32> to vector<16x128xbf16>
    %990 = arith.truncf %971 : vector<16x128xf32> to vector<16x128xbf16>
    %c127_i32_303 = arith.constant 127 : i32
    %991 = tpu.dynamic_rotate %971 by %c127_i32_303 dim 1 : vector<16x128xf32>, i32 -> vector<16x128xf32>
    %992 = vector.broadcast %7 : vector<1x128xf32> to vector<16x128xf32>
    %993 = arith.mulf %991, %992 : vector<16x128xf32>
    %994 = arith.truncf %993 : vector<16x128xf32> to vector<16x128xbf16>
    %c121_i32_304 = arith.constant 121 : i32
    %995 = tpu.dynamic_rotate %971 by %c121_i32_304 dim 1 : vector<16x128xf32>, i32 -> vector<16x128xf32>
    %996 = vector.broadcast %8 : vector<1x128xf32> to vector<16x128xf32>
    %997 = arith.mulf %995, %996 : vector<16x128xf32>
    %998 = arith.truncf %997 : vector<16x128xf32> to vector<16x128xbf16>
    %c120_i32_305 = arith.constant 120 : i32
    %999 = tpu.dynamic_rotate %971 by %c120_i32_305 dim 1 : vector<16x128xf32>, i32 -> vector<16x128xf32>
    %1000 = vector.broadcast %9 : vector<1x128xf32> to vector<16x128xf32>
    %1001 = arith.mulf %999, %1000 : vector<16x128xf32>
    %1002 = arith.truncf %1001 : vector<16x128xf32> to vector<16x128xbf16>
    %c119_i32_306 = arith.constant 119 : i32
    %1003 = tpu.dynamic_rotate %971 by %c119_i32_306 dim 1 : vector<16x128xf32>, i32 -> vector<16x128xf32>
    %1004 = vector.broadcast %10 : vector<1x128xf32> to vector<16x128xf32>
    %1005 = arith.mulf %1003, %1004 : vector<16x128xf32>
    %1006 = arith.truncf %1005 : vector<16x128xf32> to vector<16x128xbf16>
    %1007 = tpu.concatenate %977, %981, %985, %989, %990, %994, %998, %1002, %1006, %11 in 0 : vector<16x128xbf16>, vector<16x128xbf16>, vector<16x128xbf16>, vector<16x128xbf16>, vector<16x128xbf16>, vector<16x128xbf16>, vector<16x128xbf16>, vector<16x128xbf16>, vector<16x128xbf16>, vector<1x128xbf16> -> vector<145x128xbf16>
    %cst_307 = arith.constant dense<0.000000e+00> : vector<32x128xf32>
    %1008 = tpu.matmul %973, %1007, %cst_307 {dimension_numbers = #tpu.dot_dimension_numbers<[1], [0], [0], [1], [0, 0, 1, 1], [], []>} : vector<32x145xbf16>, vector<145x128xbf16>, vector<32x128xf32> -> vector<32x128xf32>
    %cst_308 = arith.constant 0.000000e+00 : f32
    %1009 = vector.broadcast %cst_308 : f32 to vector<32x128xf32>
    %1010 = arith.maximumf %1008, %1009 : vector<32x128xf32>
    %c7_309 = arith.constant 7 : index
    %c0_310 = arith.constant 0 : index
    %c0_311 = arith.constant 0 : index
    %1011 = vector.load %arg5[%c7_309, %c0_310, %c0_311] : memref<9x32x289xbf16, #tpu.memory_space<vmem>>, vector<1x32x289xbf16>
    %1012 = vector.shape_cast %1011 : vector<1x32x289xbf16> to vector<32x289xbf16>
    %c9_i32_312 = arith.constant 9 : i32
    %1013 = tpu.dynamic_rotate %1010 by %c9_i32_312 dim 1 : vector<32x128xf32>, i32 -> vector<32x128xf32>
    %1014 = vector.broadcast %3 : vector<1x128xf32> to vector<32x128xf32>
    %1015 = arith.mulf %1013, %1014 : vector<32x128xf32>
    %1016 = arith.truncf %1015 : vector<32x128xf32> to vector<32x128xbf16>
    %c8_i32_313 = arith.constant 8 : i32
    %1017 = tpu.dynamic_rotate %1010 by %c8_i32_313 dim 1 : vector<32x128xf32>, i32 -> vector<32x128xf32>
    %1018 = vector.broadcast %4 : vector<1x128xf32> to vector<32x128xf32>
    %1019 = arith.mulf %1017, %1018 : vector<32x128xf32>
    %1020 = arith.truncf %1019 : vector<32x128xf32> to vector<32x128xbf16>
    %c7_i32_314 = arith.constant 7 : i32
    %1021 = tpu.dynamic_rotate %1010 by %c7_i32_314 dim 1 : vector<32x128xf32>, i32 -> vector<32x128xf32>
    %1022 = vector.broadcast %5 : vector<1x128xf32> to vector<32x128xf32>
    %1023 = arith.mulf %1021, %1022 : vector<32x128xf32>
    %1024 = arith.truncf %1023 : vector<32x128xf32> to vector<32x128xbf16>
    %c1_i32_315 = arith.constant 1 : i32
    %1025 = tpu.dynamic_rotate %1010 by %c1_i32_315 dim 1 : vector<32x128xf32>, i32 -> vector<32x128xf32>
    %1026 = vector.broadcast %6 : vector<1x128xf32> to vector<32x128xf32>
    %1027 = arith.mulf %1025, %1026 : vector<32x128xf32>
    %1028 = arith.truncf %1027 : vector<32x128xf32> to vector<32x128xbf16>
    %1029 = arith.truncf %1010 : vector<32x128xf32> to vector<32x128xbf16>
    %c127_i32_316 = arith.constant 127 : i32
    %1030 = tpu.dynamic_rotate %1010 by %c127_i32_316 dim 1 : vector<32x128xf32>, i32 -> vector<32x128xf32>
    %1031 = vector.broadcast %7 : vector<1x128xf32> to vector<32x128xf32>
    %1032 = arith.mulf %1030, %1031 : vector<32x128xf32>
    %1033 = arith.truncf %1032 : vector<32x128xf32> to vector<32x128xbf16>
    %c121_i32_317 = arith.constant 121 : i32
    %1034 = tpu.dynamic_rotate %1010 by %c121_i32_317 dim 1 : vector<32x128xf32>, i32 -> vector<32x128xf32>
    %1035 = vector.broadcast %8 : vector<1x128xf32> to vector<32x128xf32>
    %1036 = arith.mulf %1034, %1035 : vector<32x128xf32>
    %1037 = arith.truncf %1036 : vector<32x128xf32> to vector<32x128xbf16>
    %c120_i32_318 = arith.constant 120 : i32
    %1038 = tpu.dynamic_rotate %1010 by %c120_i32_318 dim 1 : vector<32x128xf32>, i32 -> vector<32x128xf32>
    %1039 = vector.broadcast %9 : vector<1x128xf32> to vector<32x128xf32>
    %1040 = arith.mulf %1038, %1039 : vector<32x128xf32>
    %1041 = arith.truncf %1040 : vector<32x128xf32> to vector<32x128xbf16>
    %c119_i32_319 = arith.constant 119 : i32
    %1042 = tpu.dynamic_rotate %1010 by %c119_i32_319 dim 1 : vector<32x128xf32>, i32 -> vector<32x128xf32>
    %1043 = vector.broadcast %10 : vector<1x128xf32> to vector<32x128xf32>
    %1044 = arith.mulf %1042, %1043 : vector<32x128xf32>
    %1045 = arith.truncf %1044 : vector<32x128xf32> to vector<32x128xbf16>
    %1046 = tpu.concatenate %1016, %1020, %1024, %1028, %1029, %1033, %1037, %1041, %1045, %11 in 0 : vector<32x128xbf16>, vector<32x128xbf16>, vector<32x128xbf16>, vector<32x128xbf16>, vector<32x128xbf16>, vector<32x128xbf16>, vector<32x128xbf16>, vector<32x128xbf16>, vector<32x128xbf16>, vector<1x128xbf16> -> vector<289x128xbf16>
    %cst_320 = arith.constant dense<0.000000e+00> : vector<32x128xf32>
    %1047 = tpu.matmul %1012, %1046, %cst_320 {dimension_numbers = #tpu.dot_dimension_numbers<[1], [0], [0], [1], [0, 0, 1, 1], [], []>} : vector<32x289xbf16>, vector<289x128xbf16>, vector<32x128xf32> -> vector<32x128xf32>
    %cst_321 = arith.constant 0.000000e+00 : f32
    %1048 = vector.broadcast %cst_321 : f32 to vector<32x128xf32>
    %1049 = arith.maximumf %1047, %1048 : vector<32x128xf32>
    %c7_322 = arith.constant 7 : index
    %c0_323 = arith.constant 0 : index
    %c0_324 = arith.constant 0 : index
    %1050 = vector.load %arg6[%c7_322, %c0_323, %c0_324] : memref<9x16x289xbf16, #tpu.memory_space<vmem>>, vector<1x16x289xbf16>
    %1051 = vector.shape_cast %1050 : vector<1x16x289xbf16> to vector<16x289xbf16>
    %c9_i32_325 = arith.constant 9 : i32
    %1052 = tpu.dynamic_rotate %1049 by %c9_i32_325 dim 1 : vector<32x128xf32>, i32 -> vector<32x128xf32>
    %1053 = vector.broadcast %3 : vector<1x128xf32> to vector<32x128xf32>
    %1054 = arith.mulf %1052, %1053 : vector<32x128xf32>
    %1055 = arith.truncf %1054 : vector<32x128xf32> to vector<32x128xbf16>
    %c8_i32_326 = arith.constant 8 : i32
    %1056 = tpu.dynamic_rotate %1049 by %c8_i32_326 dim 1 : vector<32x128xf32>, i32 -> vector<32x128xf32>
    %1057 = vector.broadcast %4 : vector<1x128xf32> to vector<32x128xf32>
    %1058 = arith.mulf %1056, %1057 : vector<32x128xf32>
    %1059 = arith.truncf %1058 : vector<32x128xf32> to vector<32x128xbf16>
    %c7_i32_327 = arith.constant 7 : i32
    %1060 = tpu.dynamic_rotate %1049 by %c7_i32_327 dim 1 : vector<32x128xf32>, i32 -> vector<32x128xf32>
    %1061 = vector.broadcast %5 : vector<1x128xf32> to vector<32x128xf32>
    %1062 = arith.mulf %1060, %1061 : vector<32x128xf32>
    %1063 = arith.truncf %1062 : vector<32x128xf32> to vector<32x128xbf16>
    %c1_i32_328 = arith.constant 1 : i32
    %1064 = tpu.dynamic_rotate %1049 by %c1_i32_328 dim 1 : vector<32x128xf32>, i32 -> vector<32x128xf32>
    %1065 = vector.broadcast %6 : vector<1x128xf32> to vector<32x128xf32>
    %1066 = arith.mulf %1064, %1065 : vector<32x128xf32>
    %1067 = arith.truncf %1066 : vector<32x128xf32> to vector<32x128xbf16>
    %1068 = arith.truncf %1049 : vector<32x128xf32> to vector<32x128xbf16>
    %c127_i32_329 = arith.constant 127 : i32
    %1069 = tpu.dynamic_rotate %1049 by %c127_i32_329 dim 1 : vector<32x128xf32>, i32 -> vector<32x128xf32>
    %1070 = vector.broadcast %7 : vector<1x128xf32> to vector<32x128xf32>
    %1071 = arith.mulf %1069, %1070 : vector<32x128xf32>
    %1072 = arith.truncf %1071 : vector<32x128xf32> to vector<32x128xbf16>
    %c121_i32_330 = arith.constant 121 : i32
    %1073 = tpu.dynamic_rotate %1049 by %c121_i32_330 dim 1 : vector<32x128xf32>, i32 -> vector<32x128xf32>
    %1074 = vector.broadcast %8 : vector<1x128xf32> to vector<32x128xf32>
    %1075 = arith.mulf %1073, %1074 : vector<32x128xf32>
    %1076 = arith.truncf %1075 : vector<32x128xf32> to vector<32x128xbf16>
    %c120_i32_331 = arith.constant 120 : i32
    %1077 = tpu.dynamic_rotate %1049 by %c120_i32_331 dim 1 : vector<32x128xf32>, i32 -> vector<32x128xf32>
    %1078 = vector.broadcast %9 : vector<1x128xf32> to vector<32x128xf32>
    %1079 = arith.mulf %1077, %1078 : vector<32x128xf32>
    %1080 = arith.truncf %1079 : vector<32x128xf32> to vector<32x128xbf16>
    %c119_i32_332 = arith.constant 119 : i32
    %1081 = tpu.dynamic_rotate %1049 by %c119_i32_332 dim 1 : vector<32x128xf32>, i32 -> vector<32x128xf32>
    %1082 = vector.broadcast %10 : vector<1x128xf32> to vector<32x128xf32>
    %1083 = arith.mulf %1081, %1082 : vector<32x128xf32>
    %1084 = arith.truncf %1083 : vector<32x128xf32> to vector<32x128xbf16>
    %1085 = tpu.concatenate %1055, %1059, %1063, %1067, %1068, %1072, %1076, %1080, %1084, %11 in 0 : vector<32x128xbf16>, vector<32x128xbf16>, vector<32x128xbf16>, vector<32x128xbf16>, vector<32x128xbf16>, vector<32x128xbf16>, vector<32x128xbf16>, vector<32x128xbf16>, vector<32x128xbf16>, vector<1x128xbf16> -> vector<289x128xbf16>
    %cst_333 = arith.constant dense<0.000000e+00> : vector<16x128xf32>
    %1086 = tpu.matmul %1051, %1085, %cst_333 {dimension_numbers = #tpu.dot_dimension_numbers<[1], [0], [0], [1], [0, 0, 1, 1], [], []>} : vector<16x289xbf16>, vector<289x128xbf16>, vector<16x128xf32> -> vector<16x128xf32>
    %1087 = arith.subf %970, %1086 : vector<16x128xf32>
    %1088 = arith.subf %954, %1087 : vector<16x128xf32>
    %c7_334 = arith.constant 7 : index
    %c0_335 = arith.constant 0 : index
    %c0_336 = arith.constant 0 : index
    %1089 = vector.load %arg7[%c7_334, %c0_335, %c0_336] : memref<9x16x128xf32, #tpu.memory_space<vmem>>, vector<1x16x128xf32>
    %1090 = vector.shape_cast %1089 : vector<1x16x128xf32> to vector<16x128xf32>
    %1091 = vector.shape_cast %1086 : vector<16x128xf32> to vector<1x16x128xf32>
    tpu.vector_store %arg7[%c7_334, %c0_335, %c0_336], %1091 {strides = array<i32>} : memref<9x16x128xf32, #tpu.memory_space<vmem>>, vector<1x16x128xf32>,
    %c8 = arith.constant 8 : index
    %1092 = memref.load %arg0[%c8] : memref<9xf32, #tpu.memory_space<smem>>
    %1093 = arith.addf %1086, %1088 : vector<16x128xf32>
    %1094 = arith.mulf %1093, %1 : vector<16x128xf32>
    %cst_337 = arith.constant dense<0.000000e+00> : vector<128xf32>
    %1095 = vector.multi_reduction <add>, %1094, %cst_337 [0] : vector<16x128xf32> to vector<128xf32>
    %1096 = vector.shape_cast %1095 : vector<128xf32> to vector<1x128xf32>
    %1097 = arith.subf %14, %1096 : vector<1x128xf32>
    %1098 = vector.broadcast %1092 : f32 to vector<1x128xf32>
    %1099 = arith.addf %16, %1098 : vector<1x128xf32>
    %1100 = tpu.reciprocal %1099 {approx = true} : vector<1x128xf32> -> vector<1x128xf32>
    %1101 = arith.mulf %1097, %1100 : vector<1x128xf32>
    %1102 = vector.broadcast %1101 : vector<1x128xf32> to vector<16x128xf32>
    %1103 = arith.mulf %1102, %1 : vector<16x128xf32>
    %1104 = arith.addf %1093, %1103 : vector<16x128xf32>
    %1105 = arith.subf %1104, %1088 : vector<16x128xf32>
    %c8_338 = arith.constant 8 : index
    %c0_339 = arith.constant 0 : index
    %c0_340 = arith.constant 0 : index
    %1106 = vector.load %arg4[%c8_338, %c0_339, %c0_340] : memref<9x32x145xbf16, #tpu.memory_space<vmem>>, vector<1x32x145xbf16>
    %1107 = vector.shape_cast %1106 : vector<1x32x145xbf16> to vector<32x145xbf16>
    %c9_i32_341 = arith.constant 9 : i32
    %1108 = tpu.dynamic_rotate %1105 by %c9_i32_341 dim 1 : vector<16x128xf32>, i32 -> vector<16x128xf32>
    %1109 = vector.broadcast %3 : vector<1x128xf32> to vector<16x128xf32>
    %1110 = arith.mulf %1108, %1109 : vector<16x128xf32>
    %1111 = arith.truncf %1110 : vector<16x128xf32> to vector<16x128xbf16>
    %c8_i32_342 = arith.constant 8 : i32
    %1112 = tpu.dynamic_rotate %1105 by %c8_i32_342 dim 1 : vector<16x128xf32>, i32 -> vector<16x128xf32>
    %1113 = vector.broadcast %4 : vector<1x128xf32> to vector<16x128xf32>
    %1114 = arith.mulf %1112, %1113 : vector<16x128xf32>
    %1115 = arith.truncf %1114 : vector<16x128xf32> to vector<16x128xbf16>
    %c7_i32_343 = arith.constant 7 : i32
    %1116 = tpu.dynamic_rotate %1105 by %c7_i32_343 dim 1 : vector<16x128xf32>, i32 -> vector<16x128xf32>
    %1117 = vector.broadcast %5 : vector<1x128xf32> to vector<16x128xf32>
    %1118 = arith.mulf %1116, %1117 : vector<16x128xf32>
    %1119 = arith.truncf %1118 : vector<16x128xf32> to vector<16x128xbf16>
    %c1_i32_344 = arith.constant 1 : i32
    %1120 = tpu.dynamic_rotate %1105 by %c1_i32_344 dim 1 : vector<16x128xf32>, i32 -> vector<16x128xf32>
    %1121 = vector.broadcast %6 : vector<1x128xf32> to vector<16x128xf32>
    %1122 = arith.mulf %1120, %1121 : vector<16x128xf32>
    %1123 = arith.truncf %1122 : vector<16x128xf32> to vector<16x128xbf16>
    %1124 = arith.truncf %1105 : vector<16x128xf32> to vector<16x128xbf16>
    %c127_i32_345 = arith.constant 127 : i32
    %1125 = tpu.dynamic_rotate %1105 by %c127_i32_345 dim 1 : vector<16x128xf32>, i32 -> vector<16x128xf32>
    %1126 = vector.broadcast %7 : vector<1x128xf32> to vector<16x128xf32>
    %1127 = arith.mulf %1125, %1126 : vector<16x128xf32>
    %1128 = arith.truncf %1127 : vector<16x128xf32> to vector<16x128xbf16>
    %c121_i32_346 = arith.constant 121 : i32
    %1129 = tpu.dynamic_rotate %1105 by %c121_i32_346 dim 1 : vector<16x128xf32>, i32 -> vector<16x128xf32>
    %1130 = vector.broadcast %8 : vector<1x128xf32> to vector<16x128xf32>
    %1131 = arith.mulf %1129, %1130 : vector<16x128xf32>
    %1132 = arith.truncf %1131 : vector<16x128xf32> to vector<16x128xbf16>
    %c120_i32_347 = arith.constant 120 : i32
    %1133 = tpu.dynamic_rotate %1105 by %c120_i32_347 dim 1 : vector<16x128xf32>, i32 -> vector<16x128xf32>
    %1134 = vector.broadcast %9 : vector<1x128xf32> to vector<16x128xf32>
    %1135 = arith.mulf %1133, %1134 : vector<16x128xf32>
    %1136 = arith.truncf %1135 : vector<16x128xf32> to vector<16x128xbf16>
    %c119_i32_348 = arith.constant 119 : i32
    %1137 = tpu.dynamic_rotate %1105 by %c119_i32_348 dim 1 : vector<16x128xf32>, i32 -> vector<16x128xf32>
    %1138 = vector.broadcast %10 : vector<1x128xf32> to vector<16x128xf32>
    %1139 = arith.mulf %1137, %1138 : vector<16x128xf32>
    %1140 = arith.truncf %1139 : vector<16x128xf32> to vector<16x128xbf16>
    %1141 = tpu.concatenate %1111, %1115, %1119, %1123, %1124, %1128, %1132, %1136, %1140, %11 in 0 : vector<16x128xbf16>, vector<16x128xbf16>, vector<16x128xbf16>, vector<16x128xbf16>, vector<16x128xbf16>, vector<16x128xbf16>, vector<16x128xbf16>, vector<16x128xbf16>, vector<16x128xbf16>, vector<1x128xbf16> -> vector<145x128xbf16>
    %cst_349 = arith.constant dense<0.000000e+00> : vector<32x128xf32>
    %1142 = tpu.matmul %1107, %1141, %cst_349 {dimension_numbers = #tpu.dot_dimension_numbers<[1], [0], [0], [1], [0, 0, 1, 1], [], []>} : vector<32x145xbf16>, vector<145x128xbf16>, vector<32x128xf32> -> vector<32x128xf32>
    %cst_350 = arith.constant 0.000000e+00 : f32
    %1143 = vector.broadcast %cst_350 : f32 to vector<32x128xf32>
    %1144 = arith.maximumf %1142, %1143 : vector<32x128xf32>
    %c8_351 = arith.constant 8 : index
    %c0_352 = arith.constant 0 : index
    %c0_353 = arith.constant 0 : index
    %1145 = vector.load %arg5[%c8_351, %c0_352, %c0_353] : memref<9x32x289xbf16, #tpu.memory_space<vmem>>, vector<1x32x289xbf16>
    %1146 = vector.shape_cast %1145 : vector<1x32x289xbf16> to vector<32x289xbf16>
    %c9_i32_354 = arith.constant 9 : i32
    %1147 = tpu.dynamic_rotate %1144 by %c9_i32_354 dim 1 : vector<32x128xf32>, i32 -> vector<32x128xf32>
    %1148 = vector.broadcast %3 : vector<1x128xf32> to vector<32x128xf32>
    %1149 = arith.mulf %1147, %1148 : vector<32x128xf32>
    %1150 = arith.truncf %1149 : vector<32x128xf32> to vector<32x128xbf16>
    %c8_i32_355 = arith.constant 8 : i32
    %1151 = tpu.dynamic_rotate %1144 by %c8_i32_355 dim 1 : vector<32x128xf32>, i32 -> vector<32x128xf32>
    %1152 = vector.broadcast %4 : vector<1x128xf32> to vector<32x128xf32>
    %1153 = arith.mulf %1151, %1152 : vector<32x128xf32>
    %1154 = arith.truncf %1153 : vector<32x128xf32> to vector<32x128xbf16>
    %c7_i32_356 = arith.constant 7 : i32
    %1155 = tpu.dynamic_rotate %1144 by %c7_i32_356 dim 1 : vector<32x128xf32>, i32 -> vector<32x128xf32>
    %1156 = vector.broadcast %5 : vector<1x128xf32> to vector<32x128xf32>
    %1157 = arith.mulf %1155, %1156 : vector<32x128xf32>
    %1158 = arith.truncf %1157 : vector<32x128xf32> to vector<32x128xbf16>
    %c1_i32_357 = arith.constant 1 : i32
    %1159 = tpu.dynamic_rotate %1144 by %c1_i32_357 dim 1 : vector<32x128xf32>, i32 -> vector<32x128xf32>
    %1160 = vector.broadcast %6 : vector<1x128xf32> to vector<32x128xf32>
    %1161 = arith.mulf %1159, %1160 : vector<32x128xf32>
    %1162 = arith.truncf %1161 : vector<32x128xf32> to vector<32x128xbf16>
    %1163 = arith.truncf %1144 : vector<32x128xf32> to vector<32x128xbf16>
    %c127_i32_358 = arith.constant 127 : i32
    %1164 = tpu.dynamic_rotate %1144 by %c127_i32_358 dim 1 : vector<32x128xf32>, i32 -> vector<32x128xf32>
    %1165 = vector.broadcast %7 : vector<1x128xf32> to vector<32x128xf32>
    %1166 = arith.mulf %1164, %1165 : vector<32x128xf32>
    %1167 = arith.truncf %1166 : vector<32x128xf32> to vector<32x128xbf16>
    %c121_i32_359 = arith.constant 121 : i32
    %1168 = tpu.dynamic_rotate %1144 by %c121_i32_359 dim 1 : vector<32x128xf32>, i32 -> vector<32x128xf32>
    %1169 = vector.broadcast %8 : vector<1x128xf32> to vector<32x128xf32>
    %1170 = arith.mulf %1168, %1169 : vector<32x128xf32>
    %1171 = arith.truncf %1170 : vector<32x128xf32> to vector<32x128xbf16>
    %c120_i32_360 = arith.constant 120 : i32
    %1172 = tpu.dynamic_rotate %1144 by %c120_i32_360 dim 1 : vector<32x128xf32>, i32 -> vector<32x128xf32>
    %1173 = vector.broadcast %9 : vector<1x128xf32> to vector<32x128xf32>
    %1174 = arith.mulf %1172, %1173 : vector<32x128xf32>
    %1175 = arith.truncf %1174 : vector<32x128xf32> to vector<32x128xbf16>
    %c119_i32_361 = arith.constant 119 : i32
    %1176 = tpu.dynamic_rotate %1144 by %c119_i32_361 dim 1 : vector<32x128xf32>, i32 -> vector<32x128xf32>
    %1177 = vector.broadcast %10 : vector<1x128xf32> to vector<32x128xf32>
    %1178 = arith.mulf %1176, %1177 : vector<32x128xf32>
    %1179 = arith.truncf %1178 : vector<32x128xf32> to vector<32x128xbf16>
    %1180 = tpu.concatenate %1150, %1154, %1158, %1162, %1163, %1167, %1171, %1175, %1179, %11 in 0 : vector<32x128xbf16>, vector<32x128xbf16>, vector<32x128xbf16>, vector<32x128xbf16>, vector<32x128xbf16>, vector<32x128xbf16>, vector<32x128xbf16>, vector<32x128xbf16>, vector<32x128xbf16>, vector<1x128xbf16> -> vector<289x128xbf16>
    %cst_362 = arith.constant dense<0.000000e+00> : vector<32x128xf32>
    %1181 = tpu.matmul %1146, %1180, %cst_362 {dimension_numbers = #tpu.dot_dimension_numbers<[1], [0], [0], [1], [0, 0, 1, 1], [], []>} : vector<32x289xbf16>, vector<289x128xbf16>, vector<32x128xf32> -> vector<32x128xf32>
    %cst_363 = arith.constant 0.000000e+00 : f32
    %1182 = vector.broadcast %cst_363 : f32 to vector<32x128xf32>
    %1183 = arith.maximumf %1181, %1182 : vector<32x128xf32>
    %c8_364 = arith.constant 8 : index
    %c0_365 = arith.constant 0 : index
    %c0_366 = arith.constant 0 : index
    %1184 = vector.load %arg6[%c8_364, %c0_365, %c0_366] : memref<9x16x289xbf16, #tpu.memory_space<vmem>>, vector<1x16x289xbf16>
    %1185 = vector.shape_cast %1184 : vector<1x16x289xbf16> to vector<16x289xbf16>
    %c9_i32_367 = arith.constant 9 : i32
    %1186 = tpu.dynamic_rotate %1183 by %c9_i32_367 dim 1 : vector<32x128xf32>, i32 -> vector<32x128xf32>
    %1187 = vector.broadcast %3 : vector<1x128xf32> to vector<32x128xf32>
    %1188 = arith.mulf %1186, %1187 : vector<32x128xf32>
    %1189 = arith.truncf %1188 : vector<32x128xf32> to vector<32x128xbf16>
    %c8_i32_368 = arith.constant 8 : i32
    %1190 = tpu.dynamic_rotate %1183 by %c8_i32_368 dim 1 : vector<32x128xf32>, i32 -> vector<32x128xf32>
    %1191 = vector.broadcast %4 : vector<1x128xf32> to vector<32x128xf32>
    %1192 = arith.mulf %1190, %1191 : vector<32x128xf32>
    %1193 = arith.truncf %1192 : vector<32x128xf32> to vector<32x128xbf16>
    %c7_i32_369 = arith.constant 7 : i32
    %1194 = tpu.dynamic_rotate %1183 by %c7_i32_369 dim 1 : vector<32x128xf32>, i32 -> vector<32x128xf32>
    %1195 = vector.broadcast %5 : vector<1x128xf32> to vector<32x128xf32>
    %1196 = arith.mulf %1194, %1195 : vector<32x128xf32>
    %1197 = arith.truncf %1196 : vector<32x128xf32> to vector<32x128xbf16>
    %c1_i32_370 = arith.constant 1 : i32
    %1198 = tpu.dynamic_rotate %1183 by %c1_i32_370 dim 1 : vector<32x128xf32>, i32 -> vector<32x128xf32>
    %1199 = vector.broadcast %6 : vector<1x128xf32> to vector<32x128xf32>
    %1200 = arith.mulf %1198, %1199 : vector<32x128xf32>
    %1201 = arith.truncf %1200 : vector<32x128xf32> to vector<32x128xbf16>
    %1202 = arith.truncf %1183 : vector<32x128xf32> to vector<32x128xbf16>
    %c127_i32_371 = arith.constant 127 : i32
    %1203 = tpu.dynamic_rotate %1183 by %c127_i32_371 dim 1 : vector<32x128xf32>, i32 -> vector<32x128xf32>
    %1204 = vector.broadcast %7 : vector<1x128xf32> to vector<32x128xf32>
    %1205 = arith.mulf %1203, %1204 : vector<32x128xf32>
    %1206 = arith.truncf %1205 : vector<32x128xf32> to vector<32x128xbf16>
    %c121_i32_372 = arith.constant 121 : i32
    %1207 = tpu.dynamic_rotate %1183 by %c121_i32_372 dim 1 : vector<32x128xf32>, i32 -> vector<32x128xf32>
    %1208 = vector.broadcast %8 : vector<1x128xf32> to vector<32x128xf32>
    %1209 = arith.mulf %1207, %1208 : vector<32x128xf32>
    %1210 = arith.truncf %1209 : vector<32x128xf32> to vector<32x128xbf16>
    %c120_i32_373 = arith.constant 120 : i32
    %1211 = tpu.dynamic_rotate %1183 by %c120_i32_373 dim 1 : vector<32x128xf32>, i32 -> vector<32x128xf32>
    %1212 = vector.broadcast %9 : vector<1x128xf32> to vector<32x128xf32>
    %1213 = arith.mulf %1211, %1212 : vector<32x128xf32>
    %1214 = arith.truncf %1213 : vector<32x128xf32> to vector<32x128xbf16>
    %c119_i32_374 = arith.constant 119 : i32
    %1215 = tpu.dynamic_rotate %1183 by %c119_i32_374 dim 1 : vector<32x128xf32>, i32 -> vector<32x128xf32>
    %1216 = vector.broadcast %10 : vector<1x128xf32> to vector<32x128xf32>
    %1217 = arith.mulf %1215, %1216 : vector<32x128xf32>
    %1218 = arith.truncf %1217 : vector<32x128xf32> to vector<32x128xbf16>
    %1219 = tpu.concatenate %1189, %1193, %1197, %1201, %1202, %1206, %1210, %1214, %1218, %11 in 0 : vector<32x128xbf16>, vector<32x128xbf16>, vector<32x128xbf16>, vector<32x128xbf16>, vector<32x128xbf16>, vector<32x128xbf16>, vector<32x128xbf16>, vector<32x128xbf16>, vector<32x128xbf16>, vector<1x128xbf16> -> vector<289x128xbf16>
    %cst_375 = arith.constant dense<0.000000e+00> : vector<16x128xf32>
    %1220 = tpu.matmul %1185, %1219, %cst_375 {dimension_numbers = #tpu.dot_dimension_numbers<[1], [0], [0], [1], [0, 0, 1, 1], [], []>} : vector<16x289xbf16>, vector<289x128xbf16>, vector<16x128xf32> -> vector<16x128xf32>
    %c8_376 = arith.constant 8 : index
    %c0_377 = arith.constant 0 : index
    %c0_378 = arith.constant 0 : index
    %1221 = vector.load %arg7[%c8_376, %c0_377, %c0_378] : memref<9x16x128xf32, #tpu.memory_space<vmem>>, vector<1x16x128xf32>
    %1222 = vector.shape_cast %1221 : vector<1x16x128xf32> to vector<16x128xf32>
    %1223 = vector.shape_cast %1220 : vector<16x128xf32> to vector<1x16x128xf32>
    tpu.vector_store %arg7[%c8_376, %c0_377, %c0_378], %1223 {strides = array<i32>} : memref<9x16x128xf32, #tpu.memory_space<vmem>>, vector<1x16x128xf32>,
    return
  }
}

</mosaic_0001>

<bundles_post_ra>
// kernel: tile.7
= control target key start
LH: loop header
LB: loop body
LE: loop exit
PB: predicated region body
PF: predicated region fallthrough
CT: control target
= control target key end

     0   :  { %vm83_vm0 = vcmask 1047556   ;;  %vm85_vm1 = vcmask 523264   ;;  %vm104_vm2 = vcmask 1048064   ;;  %s226_s0 = inlined_call_operand.vmem [shape: f32[16,2,64], index: 0, kind: input, shape index: {}]   ;;  %s227_s1 = inlined_call_operand.vmem [shape: f32[16,128], index: 1, kind: output, shape index: {}]  }
   0x1   :  { %v139_v0 = vld [vmem:[%s226_s0 + $0xe] sm:$0x3]  ;;  %v140_v1 = vld [vmem:[%s226_s0 + $0xc] sm:$0x3]  ;;  %v141_v2 = vld [vmem:[%s226_s0 + $0xa] sm:$0x3] }
   0x2   :  { %49 = vst [vmem:[#allocation0 + $0x38] sm:$0x3] %v139_v0  ;;  %54 = vst [vmem:[#allocation0 + $0x30] sm:$0x3] %v140_v1  ;;  %v142_v3 = vld [vmem:[%s226_s0 + $0x8] sm:$0x3] }
   0x3   :  { %59 = vst [vmem:[#allocation0 + $0x28] sm:$0x3] %v141_v2  ;;  %v143_v4 = vld [vmem:[%s226_s0 + $0x6] sm:$0x3]  ;;  %v144_v5 = vld [vmem:[%s226_s0 + $0x4] sm:$0x3] }
   0x4   :  { %64 = vst [vmem:[#allocation0 + $0x20] sm:$0x3] %v142_v3  ;;  %69 = vst [vmem:[#allocation0 + $0x18] sm:$0x3] %v143_v4  ;;  %v145_v6 = vld [vmem:[%s226_s0 + $0x2] sm:$0x3] }
   0x5   :  { %74 = vst [vmem:[#allocation0 + $0x10] sm:$0x3] %v144_v5  ;;  %v79_v7 = vld [vmem:[%s226_s0] sm:$0x3]  ;;  %78 = vst [vmem:[#allocation0 + $0x8] sm:$0x3] %v145_v6 }
   0x6   :  { %80 = vst [vmem:[#allocation0] sm:$0x3] %v79_v7  ;;  %v131_v8 = vld [vmem:[%s226_s0 + $0x1e] sm:$0x3]  ;;  %v132_v9 = vld [vmem:[%s226_s0 + $0x1c] sm:$0x3] }
   0x7   :  { %v133_v10 = vld [vmem:[%s226_s0 + $0x1a] sm:$0x3]  ;;  %9 = vst [vmem:[#allocation0 + $0x78] sm:$0x3] %v131_v8  ;;  %14 = vst [vmem:[#allocation0 + $0x70] sm:$0x3] %v132_v9 }
   0x8   :  { %19 = vst [vmem:[#allocation0 + $0x68] sm:$0x3] %v133_v10  ;;  %v134_v11 = vld [vmem:[%s226_s0 + $0x18] sm:$0x3]  ;;  %v135_v12 = vld [vmem:[%s226_s0 + $0x16] sm:$0x3] }
   0x9   :  { %v136_v13 = vld [vmem:[%s226_s0 + $0x14] sm:$0x3]  ;;  %24 = vst [vmem:[#allocation0 + $0x60] sm:$0x3] %v134_v11  ;;  %29 = vst [vmem:[#allocation0 + $0x58] sm:$0x3] %v135_v12 }
   0xa   :  { %34 = vst [vmem:[#allocation0 + $0x50] sm:$0x3] %v136_v13  ;;  %v137_v14 = vld [vmem:[%s226_s0 + $0x12] sm:$0x3]  ;;  %v138_v15 = vld [vmem:[%s226_s0 + $0x10] sm:$0x3] }
   0xb   :  { %39 = vst [vmem:[#allocation0 + $0x48] sm:$0x3] %v137_v14  ;;  %44 = vst [vmem:[#allocation0 + $0x40] sm:$0x3] %v138_v15  ;;  %s149_s0 = smov 64  }
   0xc   :  { %v99_v16 = vld [vmem:[#allocation0 + $0x1] ss:$8 sm:$0xf0]   ;;  %v82_v17 = vld [vmem:[#allocation0] ss:$8 sm:$0xf0]  }
   0xd   :  { %v97_v18 = vld [vmem:[#allocation0 + $0x1] ss:$8 sm:$0xf]   ;;  %v81_v19 = vld [vmem:[#allocation0] ss:$8 sm:$0xf]  }
   0xe   :  { %v101_v20 = vsel %vm83_vm0, %v99_v16, %v97_v18  ;;  %v84_v21 = vsel %vm83_vm0, %v82_v17, %v81_v19 }
   0xf   :  { %102 = vrot.lane.b32.xlu0 %v101_v20, %s149_s0  ;;  %86 = vst.msk [vmem:[%s227_s1] sm:$0xff] %vm85_vm1, %v84_v21  }
  0x10   :  { %v109_v22 = vld [vmem:[#allocation0 + $0x41] ss:$8 sm:$0xf0]   ;;  %v90_v23 = vld [vmem:[#allocation0 + $0x40] ss:$8 sm:$0xf0]  }
  0x12   :  { %v107_v24 = vld [vmem:[#allocation0 + $0x41] ss:$8 sm:$0xf]   ;;  %v88_v25 = vld [vmem:[#allocation0 + $0x40] ss:$8 sm:$0xf]  }
  0x13   :  { %v111_v26 = vsel %vm83_vm0, %v109_v22, %v107_v24  ;;  %v92_v27 = vsel %vm83_vm0, %v90_v23, %v88_v25 }
  0x14   :  { %146 = vst.msk [vmem:[%s227_s1 + $0x8] sm:$0xff] %vm85_vm1, %v92_v27   ;;  %112 = vrot.lane.b32.xlu0 %v111_v26, %s149_s0 }
  0x81   :  { %v103_v28 = vpop.permute.xlu0 %102  }
  0x82   :  { %105 = vst.msk [vmem:[%s227_s1] sm:$0xff] %vm104_vm2, %v103_v28  }
  0x86   :  { %v113_v29 = vpop.permute.xlu0 %112  }
  0x87   :  { %147 = vst.msk [vmem:[%s227_s1 + $0x8] sm:$0xff] %vm104_vm2, %v113_v29  }

// kernel: admm_net_forward.1
= control target key start
LH: loop header
LB: loop body
LE: loop exit
PB: predicated region body
PF: predicated region fallthrough
CT: control target
= control target key end

     0   :  { %12 = vsyncpa [#allocation3], 0  ;;  %s10516_s0 = inlined_call_operand.vmem [shape: f32[9], index: 0, kind: input, shape index: {}]   ;;  %s10517_s1 = inlined_call_operand.vmem [shape: f32[16,128], index: 1, kind: input, shape index: {}]   ;;  %s10518_s2 = inlined_call_operand.vmem [shape: f32[16,128], index: 2, kind: input, shape index: {}]   ;;  %s10519_s3 = inlined_call_operand.vmem [shape: f32[9,128], index: 3, kind: input, shape index: {}]   ;;  %s10520_s4 = inlined_call_operand.vmem [shape: bf16[9,32,145], index: 4, kind: input, shape index: {}]   ;;  %s10521_s5 = inlined_call_operand.vmem [shape: bf16[9,32,289], index: 5, kind: input, shape index: {}]   ;;  %s10522_s6 = inlined_call_operand.vmem [shape: bf16[9,16,289], index: 6, kind: input, shape index: {}]   ;;  %s10523_s7 = inlined_call_operand.vmem [shape: f32[9,16,128], index: 7, kind: output, shape index: {}]  }
   0x1   :  { %s19_s26 = sshll.u32 %s10516_s0, 4  ;;  %s20_s26 = int_to_ptr.vmem [resolvable:$true] %s19_s26 }
   0x2   :  { %s7173_s27 = scalar_lea.vmem %s20_s26, 16  ;;  %p7178_p1 = scmp.lt.s32.totalorder %s20_s26, %s20_s26 }
   0x3   :  { %p7174_p0 = scmp.ne.s32.totalorder %s20_s26, %s7173_s27  ;;  %p7179_p2 = scmp.lt.s32.totalorder %s7173_s27, %s7173_s27 }
   0x5   :  { %p7180_p3 = por %p7179_p2, %p7178_p1 }
   0x7   :  { %p7181_p4 = pnand %p7180_p3, %p7174_p0 }
   0x9   :  { %7184 = shalt.err (!%p7181_p4)
}
   0xa   :  { %s7187_s28 = smov [#allocation2]  }
   0xb   :  { %22 = dma.vmem_to_smem %s20_s26, 16, %s7187_s28, [#allocation3]  }
   0xc   :  { %7185 = dma.done.wait [#allocation3], 16  }
   0xd   :  { %7186 = vsyncadd [#allocation3], 4294967280 }
   0xe   :  { %38 = sfence }
   0xf   :  { %v41_v0 = vld [vmem:[%s10517_s1] sm:$0xff]  ;;  %v42_v1 = vld [vmem:[%s10517_s1 + $0x8] sm:$0xff]  ;;  %s65_s13 = sld [smem:[#allocation2]]  ;;  %v7188_v36 = vmov 0   ;;  %s7189_s1 = smov 121   ;;  %vm197_vm0 = vcmask 138240   ;;  %v94_v42 = vlaneseq }
  0x10   :  { %v43_v2 = vld [vmem:[%s10518_s2] sm:$0xff]  ;;  %v44_v3 = vld [vmem:[%s10518_s2 + $0x8] sm:$0xff]  ;;  %210 = vmatprep.subr.bf16.mxu0 %v7188_v36  ;;  %s7190_s14 = smov 120   ;;  %s7191_s15 = smov 127   ;;  %vm204_vm1 = vcmask 1040384   ;;  %vm415_vm2 = vcmask 269312  }
  0x11   :  { %v47_v4 = vmul.f32 %v43_v2, %v41_v0  ;;  %v48_v5 = vmul.f32 %v44_v3, %v42_v1  ;;  %v56_v6 = vadd.f32 %v44_v3, %v43_v2  ;;  %s7192_s16 = smov 1   ;;  %s7193_s17 = smov 7   ;;  %v6981_v41 = vld [vmem:[%s10520_s4 + $0x4] ss:$8 sps:$4 sm:$0xff]   ;;  %v95_v43 = vshrl.u32 %v94_v42, 7 }
  0x12   :  { %s7194_s18 = smov 8   ;;  %s7195_s19 = smov 9   ;;  %5946 = vmatprep.mubr.msk.bf16.mxu0 %vm197_vm0, %v6981_v41  ;;  %v45_v45 = vld [vmem:[%s10519_s3] sm:$0xff]  ;;  %vm7198_vm3 = vmmov 0  }
  0x13   :  { %v49_v7 = vadd.f32 %v48_v5, %v47_v4  ;;  %v57_v8 = vrot.slane %v56_v6, 4  ;;  %s7196_s20 = smov 119   ;;  %v163_v44 = vsub.s32 7, %v95_v43  ;;  %v152_v46 = vsub.s32 6, %v95_v43  ;;  %s5960_s10 = sld [smem:[#allocation2 + $0x1]] }
  0x14   :  { %v141_v50 = vsub.s32 5, %v95_v43  ;;  %v129_v0 = vsub.s32 3, %v95_v43  ;;  %s6034_s12 = sld [smem:[#allocation2 + $0x3]] }
  0x15   :  { %v50_v9 = vrot.slane %v49_v7, 4  ;;  %v58_v10 = vadd.f32 %v57_v8, %v56_v6  ;;  %v78_v19 = vstv %s65_s13  ;;  %v7306_v49 = vrot.slane %v45_v45, %v163_v44  ;;  %v6979_v44 = vld [vmem:[%s10520_s4] ss:$8 sps:$4 sm:$0xff]   ;;  %s5997_s13 = sld [smem:[#allocation2 + $0x2]] }
  0x16   :  { %v7308_v51 = vrot.slane %v45_v45, %v152_v46  ;;  %v7312_v56 = vrot.slane %v45_v45, %v141_v50  ;;  %v7319_v5 = vrot.slane %v45_v45, %v129_v0  ;;  %v118_v6 = vsub.s32 2, %v95_v43  ;;  %v6984_v46 = vld [vmem:[%s10520_s4 + $0x10] ss:$8 sps:$4 sm:$0xff]   ;;  %s6145_s22 = sld [smem:[#allocation2 + $0x6]] }
  0x17   :  { %v51_v11 = vadd.f32 %v50_v9, %v49_v7  ;;  %v59_v12 = vrot.slane %v58_v10, 2  ;;  %v107_v9 = vsub.s32 1, %v95_v43  ;;  %v6987_v0 = vld [vmem:[%s10521_s5 + $0x4] ss:$12 sps:$4 sm:$0xff]   ;;  %s6182_s21 = sld [smem:[#allocation2 + $0x7]] }
  0x18   :  { %454 = vmatprep.mubr.bf16.mxu1 %v6987_v0 }
  0x19   :  { %v52_v13 = vrot.slane %v51_v11, 2  ;;  %v60_v14 = vadd.f32 %v59_v12, %v58_v10 }
  0x1b   :  { %v53_v15 = vadd.f32 %v52_v13, %v51_v11  ;;  %v61_v16 = vrot.slane %v60_v14, 1  ;;  %v7326_v13 = vrot.slane %v45_v45, %v118_v6 }
  0x1d   :  { %v54_v17 = vrot.slane %v53_v15, 1  ;;  %v7254_v18 = vadd.f32 %v61_v16, %v60_v14  ;;  %v7329_v14 = vrot.slane %v45_v45, %v107_v9 }
  0x1f   :  { %v7256_v20 = vadd.f32 %v54_v17, %v53_v15  ;;  %v79_v23 = vadd.f32 %v78_v19, %v7254_v18 }
  0x21   :  { %v63_v21 = vmul.f32 %v7256_v20, %v43_v2  ;;  %v64_v22 = vmul.f32 %v7256_v20, %v44_v3  ;;  %7141 = vrcp.f32 %v79_v23 }
  0x23   :  { %v68_v24 = vmul.f32 %v63_v21, %v43_v2  ;;  %v69_v25 = vmul.f32 %v64_v22, %v44_v3 }
  0x25   :  { %v70_v26 = vadd.f32 %v69_v25, %v68_v24 }
  0x27   :  { %v71_v27 = vrot.slane %v70_v26, 4 }
  0x29   :  { %v72_v28 = vadd.f32 %v71_v27, %v70_v26 }
  0x2b   :  { %v73_v29 = vrot.slane %v72_v28, 2 }
  0x2d   :  { %v74_v30 = vadd.f32 %v73_v29, %v72_v28 }
  0x2e   :  { %v7142_v33 = vpop.eup %7141 }
  0x2f   :  { %v75_v31 = vrot.slane %v74_v30, 1 }
  0x31   :  { %v76_v32 = vadd.f32 %v75_v31, %v74_v30 }
  0x33   :  { %v77_v34 = vsub.f32 %v7256_v20, %v76_v32 }
  0x35   :  { %v81_v35 = vmul.f32 %v7142_v33, %v77_v34  ;;  %v7346_v33 = vld [vmem:[%s10519_s3 + $0x8] ss:$0 sm:$0xff] }
  0x37   :  { %v82_v37 = vmul.f32 %v81_v35, %v43_v2  ;;  %v83_v38 = vmul.f32 %v81_v35, %v44_v3 }
  0x39   :  { %v7263_v39 = vadd.f32 %v82_v37, %v63_v21  ;;  %v7269_v40 = vadd.f32 %v83_v38, %v64_v22  ;;  %v96_v22 = vsub.s32 0, %v95_v43  ;;  %v206_v37 = vsel %vm204_vm1, 65535, %v7188_v36 }
  0x3a   :  { %v7351_v42 = vand.u32 1065369472, %v206_v37 }
  0x3b   :  { %146 = vrot.lane.b32.xlu1 %v7263_v39, %s7189_s1  ;;  %157 = vrot.lane.b32.xlu0 %v7263_v39, %s7190_s14  ;;  %v134_v12 = vpack.c.bf16 %v7269_v40, %v7263_v39  ;;  %v7336_v26 = vrot.slane %v45_v45, %v96_v22  ;;  %v6982_v45 = vld [vmem:[%s10520_s4 + $0x14] ss:$8 sps:$4 sm:$0xff]  }
  0x3f   :  { %148 = vrot.lane.b32.xlu1 %v7269_v40, %s7189_s1  ;;  %159 = vrot.lane.b32.xlu0 %v7269_v40, %s7190_s14 }
  0x43   :  { %137 = vrot.lane.b32.xlu1 %v7269_v40, %s7191_s15  ;;  %135 = vrot.lane.b32.xlu0 %v7263_v39, %s7191_s15 }
  0x47   :  { %125 = vrot.lane.b32.xlu1 %v7269_v40, %s7192_s16  ;;  %123 = vrot.lane.b32.xlu0 %v7263_v39, %s7192_s16 }
  0x4b   :  { %114 = vrot.lane.b32.xlu1 %v7269_v40, %s7193_s17  ;;  %112 = vrot.lane.b32.xlu0 %v7263_v39, %s7193_s17 }
  0x4f   :  { %103 = vrot.lane.b32.xlu1 %v7269_v40, %s7194_s18  ;;  %101 = vrot.lane.b32.xlu0 %v7263_v39, %s7194_s18 }
  0x53   :  { %92 = vrot.lane.b32.xlu1 %v7269_v40, %s7195_s19  ;;  %90 = vrot.lane.b32.xlu0 %v7263_v39, %s7195_s19 }
  0x57   :  { %170 = vrot.lane.b32.xlu1 %v7269_v40, %s7196_s20  ;;  %168 = vrot.lane.b32.xlu0 %v7263_v39, %s7196_s20 }
  0xad   :  { %v147_v47 = vpop.permute.xlu1 %146  ;;  %v158_v48 = vpop.permute.xlu0 %157 }
  0xae   :  { %v165_v54 = vmul.f32 %v7306_v49, %v158_v48  ;;  %v154_v57 = vmul.f32 %v7308_v51, %v147_v47 }
  0xb1   :  { %v149_v52 = vpop.permute.xlu1 %148  ;;  %v160_v53 = vpop.permute.xlu0 %159 }
  0xb2   :  { %v166_v55 = vmul.f32 %v7306_v49, %v160_v53  ;;  %v155_v58 = vmul.f32 %v7308_v51, %v149_v52 }
  0xb4   :  { %v167_v59 = vpack.c.bf16 %v166_v55, %v165_v54  ;;  %v156_v1 = vpack.c.bf16 %v155_v58, %v154_v57 }
  0xb5   :  { %v138_v60 = vpop.permute.xlu1 %137  ;;  %v136_v61 = vpop.permute.xlu0 %135 }
  0xb6   :  { %211 = vmatpush1.bf16.msra.mxu0 %v167_v59  ;;  %v144_v62 = vmul.f32 %v7312_v56, %v138_v60  ;;  %v143_v63 = vmul.f32 %v7312_v56, %v136_v61 }
  0xb7   :  { %212 = vmatprep.subr.bf16.mxu0 %v7188_v36 }
  0xb8   :  { %v145_v4 = vpack.c.bf16 %v144_v62, %v143_v63 }
  0xb9   :  { %v126_v2 = vpop.permute.xlu1 %125  ;;  %v124_v3 = vpop.permute.xlu0 %123 }
  0xba   :  { %213 = vmatpush1.bf16.msra.mxu0 %v156_v1  ;;  %v132_v10 = vmul.f32 %v7319_v5, %v126_v2  ;;  %v131_v11 = vmul.f32 %v7319_v5, %v124_v3 }
  0xbb   :  { %214 = vmatprep.subr.bf16.mxu0 %v7188_v36 }
  0xbc   :  { %v133_v17 = vpack.c.bf16 %v132_v10, %v131_v11 }
  0xbd   :  { %v115_v7 = vpop.permute.xlu1 %114  ;;  %v113_v8 = vpop.permute.xlu0 %112 }
  0xbe   :  { %215 = vmatpush1.bf16.msra.mxu0 %v145_v4  ;;  %v121_v19 = vmul.f32 %v7326_v13, %v115_v7  ;;  %v120_v21 = vmul.f32 %v7326_v13, %v113_v8 }
  0xbf   :  { %216 = vmatprep.subr.bf16.mxu0 %v7188_v36 }
  0xc0   :  { %v122_v23 = vpack.c.bf16 %v121_v19, %v120_v21 }
  0xc1   :  { %v104_v15 = vpop.permute.xlu1 %103  ;;  %v102_v16 = vpop.permute.xlu0 %101 }
  0xc2   :  { %217 = vmatpush1.bf16.msra.mxu0 %v134_v12  ;;  %v110_v24 = vmul.f32 %v7329_v14, %v104_v15  ;;  %v109_v25 = vmul.f32 %v7329_v14, %v102_v16 }
  0xc3   :  { %218 = vmatprep.subr.bf16.mxu0 %v7188_v36 }
  0xc4   :  { %v111_v29 = vpack.c.bf16 %v110_v24, %v109_v25 }
  0xc5   :  { %v93_v27 = vpop.permute.xlu1 %92  ;;  %v91_v28 = vpop.permute.xlu0 %90 }
  0xc6   :  { %219 = vmatpush1.bf16.msra.mxu0 %v133_v17  ;;  %v99_v30 = vmul.f32 %v7336_v26, %v93_v27  ;;  %v98_v31 = vmul.f32 %v7336_v26, %v91_v28 }
  0xc7   :  { %220 = vmatprep.subr.bf16.mxu0 %v7188_v36 }
  0xc8   :  { %v100_v32 = vpack.c.bf16 %v99_v30, %v98_v31 }
  0xc9   :  { %v171_v34 = vpop.permute.xlu1 %170  ;;  %v169_v35 = vpop.permute.xlu0 %168 }
  0xca   :  { %221 = vmatpush1.bf16.msra.mxu0 %v122_v23  ;;  %v177_v38 = vmul.f32 %v7346_v33, %v171_v34  ;;  %v176_v41 = vmul.f32 %v7346_v33, %v169_v35 }
  0xcb   :  { %222 = vmatprep.subr.bf16.mxu0 %v7188_v36 }
  0xcc   :  { %v178_v43 = vpack.c.bf16 %v177_v38, %v176_v41 }
  0xce   :  { %223 = vmatpush1.bf16.msra.mxu0 %v111_v29 }
  0xcf   :  { %224 = vmatprep.subr.bf16.mxu0 %v7188_v36 }
  0xd2   :  { %225 = vmatpush1.bf16.msra.mxu0 %v100_v32 }
  0xd3   :  { %238 = vmatprep.subr.bf16.mxu0 %v7188_v36 }
  0xd6   :  { %239 = vmatpush2.bf16.msra.mxu0 %v7351_v42 }
  0xd7   :  { %240 = vmatprep.subr.bf16.mxu0 %v7188_v36 }
  0xda   :  { %241 = vmatpush2.bf16.msra.mxu0 %v178_v43 }
  0xdd   :  { %243 = vmatmul.mubr.bf16.vlgmr.msra.gmra.mxu0 %v6979_v44 }
  0xde   :  { %5947 = vmatprep.mubr.msk.bf16.mxu0 %vm197_vm0, %v6982_v45 }
  0xe5   :  { %251 = vmatmul.mubr.bf16.gmra.mxu0 %v6984_v46 }
 0x19d   :  { %v244_v47 = vpop.f32.mrf.mxu0 }
 0x19e   :  { %v7366_v48 = vmax.f32 %v244_v47, 0.0 }
 0x19f   :  { %v246_v50 = vpop.f32.mrf.mxu0 }
 0x1a0   :  { %357 = vrot.lane.b32.xlu0 %v7366_v48, %s7190_s14 }
 0x1a1   :  { %v247_v52 = vpop.f32.mrf.mxu0 }
 0x1a2   :  { %v7370_v53 = vmax.f32 %v247_v52, 0.0 }
 0x1a3   :  { %v249_v54 = vpop.f32.mrf.mxu0 }
 0x1a4   :  { %313 = vrot.lane.b32.xlu0 %v7366_v48, %s7192_s16  ;;  %359 = vrot.lane.b32.xlu1 %v7370_v53, %s7190_s14  ;;  %v327_v55 = vpack.c.bf16 %v7370_v53, %v7366_v48 }
 0x1a5   :  { %v252_v57 = vpop.f32.mrf.mxu0 }
 0x1a6   :  { %v7382_v59 = vmax.f32 %v252_v57, 0.0 }
 0x1a7   :  { %v254_v58 = vpop.f32.mrf.mxu0 }
 0x1a8   :  { %343 = vrot.lane.b32.xlu0 %v7366_v48, %s7189_s1  ;;  %315 = vrot.lane.b32.xlu1 %v7370_v53, %s7192_s16 }
 0x1a9   :  { %v255_v60 = vpop.f32.mrf.mxu0 }
 0x1aa   :  { %v7384_v61 = vmax.f32 %v255_v60, 0.0 }
 0x1ab   :  { %v257_v62 = vpop.f32.mrf.mxu0 }
 0x1ac   :  { %299 = vrot.lane.b32.xlu0 %v7366_v48, %s7193_s17  ;;  %345 = vrot.lane.b32.xlu1 %v7370_v53, %s7189_s1  ;;  %v328_v63 = vpack.c.bf16 %v7384_v61, %v7382_v59 }
 0x1b0   :  { %329 = vrot.lane.b32.xlu0 %v7366_v48, %s7191_s15  ;;  %301 = vrot.lane.b32.xlu1 %v7370_v53, %s7193_s17 }
 0x1b4   :  { %331 = vrot.lane.b32.xlu1 %v7370_v53, %s7191_s15  ;;  %361 = vrot.lane.b32.xlu0 %v7382_v59, %s7190_s14 }
 0x1b8   :  { %317 = vrot.lane.b32.xlu0 %v7382_v59, %s7192_s16  ;;  %363 = vrot.lane.b32.xlu1 %v7384_v61, %s7190_s14 }
 0x1bc   :  { %347 = vrot.lane.b32.xlu0 %v7382_v59, %s7189_s1  ;;  %319 = vrot.lane.b32.xlu1 %v7384_v61, %s7192_s16 }
 0x1c0   :  { %303 = vrot.lane.b32.xlu0 %v7382_v59, %s7193_s17  ;;  %349 = vrot.lane.b32.xlu1 %v7384_v61, %s7189_s1 }
 0x1c4   :  { %333 = vrot.lane.b32.xlu0 %v7382_v59, %s7191_s15  ;;  %305 = vrot.lane.b32.xlu1 %v7384_v61, %s7193_s17 }
 0x1c8   :  { %289 = vrot.lane.b32.xlu0 %v7382_v59, %s7194_s18  ;;  %335 = vrot.lane.b32.xlu1 %v7384_v61, %s7191_s15 }
 0x1cc   :  { %285 = vrot.lane.b32.xlu0 %v7366_v48, %s7194_s18  ;;  %291 = vrot.lane.b32.xlu1 %v7384_v61, %s7194_s18 }
 0x1d0   :  { %275 = vrot.lane.b32.xlu0 %v7382_v59, %s7195_s19  ;;  %287 = vrot.lane.b32.xlu1 %v7370_v53, %s7194_s18 }
 0x1d4   :  { %271 = vrot.lane.b32.xlu0 %v7366_v48, %s7195_s19  ;;  %277 = vrot.lane.b32.xlu1 %v7384_v61, %s7195_s19 }
 0x1d8   :  { %375 = vrot.lane.b32.xlu0 %v7382_v59, %s7196_s20  ;;  %273 = vrot.lane.b32.xlu1 %v7370_v53, %s7195_s19 }
 0x1dc   :  { %371 = vrot.lane.b32.xlu0 %v7366_v48, %s7196_s20  ;;  %377 = vrot.lane.b32.xlu1 %v7384_v61, %s7196_s20 }
 0x1e0   :  { %373 = vrot.lane.b32.xlu1 %v7370_v53, %s7196_s20 }
 0x212   :  { %v358_v1 = vpop.permute.xlu0 %357 }
 0x213   :  { %v365_v28 = vmul.f32 %v358_v1, %v7306_v49 }
 0x216   :  { %v314_v2 = vpop.permute.xlu0 %313  ;;  %v360_v3 = vpop.permute.xlu1 %359 }
 0x217   :  { %v366_v22 = vmul.f32 %v360_v3, %v7306_v49  ;;  %v321_v35 = vmul.f32 %v314_v2, %v7319_v5 }
 0x219   :  { %v369_v31 = vpack.c.bf16 %v366_v22, %v365_v28 }
 0x21a   :  { %v344_v4 = vpop.permute.xlu0 %343  ;;  %v316_v6 = vpop.permute.xlu1 %315 }
 0x21b   :  { %v322_v29 = vmul.f32 %v316_v6, %v7319_v5  ;;  %v351_v52 = vmul.f32 %v344_v4, %v7308_v51 }
 0x21d   :  { %v325_v41 = vpack.c.bf16 %v322_v29, %v321_v35 }
 0x21e   :  { %v300_v7 = vpop.permute.xlu0 %299  ;;  %v346_v8 = vpop.permute.xlu1 %345 }
 0x21f   :  { %v352_v44 = vmul.f32 %v346_v8, %v7308_v51  ;;  %v307_v0 = vmul.f32 %v300_v7, %v7326_v13 }
 0x221   :  { %v355_v58 = vpack.c.bf16 %v352_v44, %v351_v52  ;;  %v6990_v44 = vld [vmem:[%s10521_s5 + $0x18] ss:$12 sps:$4 sm:$0xff]  }
 0x222   :  { %v330_v9 = vpop.permute.xlu0 %329  ;;  %v302_v10 = vpop.permute.xlu1 %301 }
 0x223   :  { %v308_v54 = vmul.f32 %v302_v10, %v7326_v13 }
 0x225   :  { %v311_v3 = vpack.c.bf16 %v308_v54, %v307_v0 }
 0x226   :  { %v332_v11 = vpop.permute.xlu1 %331  ;;  %v362_v12 = vpop.permute.xlu0 %361 }
 0x227   :  { %v367_v17 = vmul.f32 %v362_v12, %v7306_v49  ;;  %v338_v8 = vmul.f32 %v332_v11, %v7312_v56 }
 0x22a   :  { %v318_v15 = vpop.permute.xlu0 %317  ;;  %v364_v16 = vpop.permute.xlu1 %363 }
 0x22b   :  { %v368_v19 = vmul.f32 %v364_v16, %v7306_v49  ;;  %v323_v25 = vmul.f32 %v318_v15, %v7319_v5  ;;  %v337_v16 = vmul.f32 %v330_v9, %v7312_v56 }
 0x22d   :  { %v370_v21 = vpack.c.bf16 %v368_v19, %v367_v17  ;;  %v341_v17 = vpack.c.bf16 %v338_v8, %v337_v16 }
 0x22e   :  { %v348_v23 = vpop.permute.xlu0 %347  ;;  %v320_v24 = vpop.permute.xlu1 %319 }
 0x22f   :  { %v324_v27 = vmul.f32 %v320_v24, %v7319_v5  ;;  %6256 = vmatprep.subr.bf16.mxu1 %v370_v21  ;;  %v353_v37 = vmul.f32 %v348_v23, %v7308_v51 }
 0x231   :  { %v326_v30 = vpack.c.bf16 %v324_v27, %v323_v25 }
 0x232   :  { %v304_v32 = vpop.permute.xlu0 %303  ;;  %v350_v34 = vpop.permute.xlu1 %349 }
 0x233   :  { %v354_v38 = vmul.f32 %v350_v34, %v7308_v51  ;;  %6257 = vmatpush3.bf16.msra.mxu1 %v326_v30  ;;  %v309_v47 = vmul.f32 %v304_v32, %v7326_v13 }
 0x234   :  { %6258 = vmatprep.subr.bf16.mxu1 %v369_v31 }
 0x235   :  { %v356_v43 = vpack.c.bf16 %v354_v38, %v353_v37  ;;  %v6985_v37 = vld [vmem:[%s10521_s5] ss:$12 sps:$4 sm:$0xff]  }
 0x236   :  { %v334_v45 = vpop.permute.xlu0 %333  ;;  %v306_v46 = vpop.permute.xlu1 %305 }
 0x237   :  { %v310_v50 = vmul.f32 %v306_v46, %v7326_v13  ;;  %6259 = vmatpush3.bf16.msra.mxu1 %v325_v41  ;;  %v339_v1 = vmul.f32 %v334_v45, %v7312_v56  ;;  %v6991_v45 = vld [vmem:[%s10521_s5 + $0x8] ss:$12 sps:$4 sm:$0xff]   ;;  %v6992_v46 = vld [vmem:[%s10521_s5 + $0x20] ss:$12 sps:$4 sm:$0xff]  }
 0x238   :  { %6260 = vmatprep.subr.bf16.mxu1 %v356_v43 }
 0x239   :  { %v312_v57 = vpack.c.bf16 %v310_v50, %v309_v47 }
 0x23a   :  { %v290_v60 = vpop.permute.xlu0 %289  ;;  %v336_v62 = vpop.permute.xlu1 %335 }
 0x23b   :  { %v340_v2 = vmul.f32 %v336_v62, %v7312_v56  ;;  %6261 = vmatpush3.bf16.msra.mxu1 %v312_v57  ;;  %v295_v10 = vmul.f32 %v290_v60, %v7329_v14 }
 0x23c   :  { %6262 = vmatprep.subr.bf16.mxu1 %v355_v58 }
 0x23d   :  { %v342_v6 = vpack.c.bf16 %v340_v2, %v339_v1 }
 0x23e   :  { %v286_v4 = vpop.permute.xlu0 %285  ;;  %v292_v12 = vpop.permute.xlu1 %291 }
 0x23f   :  { %v296_v15 = vmul.f32 %v292_v12, %v7329_v14  ;;  %6263 = vmatpush3.bf16.msra.mxu1 %v311_v3  ;;  %v293_v22 = vmul.f32 %v286_v4, %v7329_v14 }
 0x240   :  { %6264 = vmatprep.subr.bf16.mxu1 %v342_v6 }
 0x241   :  { %v298_v7 = vpack.c.bf16 %v296_v15, %v295_v10 }
 0x242   :  { %v276_v19 = vpop.permute.xlu0 %275  ;;  %v288_v21 = vpop.permute.xlu1 %287 }
 0x243   :  { %v294_v23 = vmul.f32 %v288_v21, %v7329_v14  ;;  %6265 = vmatpush3.bf16.msra.mxu1 %v298_v7  ;;  %v281_v27 = vmul.f32 %v276_v19, %v7336_v26 }
 0x244   :  { %6266 = vmatprep.subr.bf16.mxu1 %v341_v17 }
 0x245   :  { %v297_v11 = vpack.c.bf16 %v294_v23, %v293_v22 }
 0x246   :  { %v272_v24 = vpop.permute.xlu0 %271  ;;  %v278_v25 = vpop.permute.xlu1 %277 }
 0x247   :  { %v282_v28 = vmul.f32 %v278_v25, %v7336_v26  ;;  %6267 = vmatpush3.bf16.msra.mxu1 %v297_v11  ;;  %v279_v31 = vmul.f32 %v272_v24, %v7336_v26  ;;  %v7197_v24 = vmov 0.0   ;;  %v6995_v25 = vld [vmem:[%s10522_s6 + $0x4] ss:$12 sps:$4 sm:$0xff]  }
 0x248   :  { %6268 = vmatprep.subr.bf16.mxu1 %v328_v63  ;;  %v6988_v63 = vld [vmem:[%s10521_s5 + $0x1c] ss:$12 sps:$4 sm:$0xff]   ;;  %692 = vmatprep.mubr.bf16.mxu0 %v6995_v25 }
 0x249   :  { %v284_v9 = vpack.c.bf16 %v282_v28, %v281_v27 }
 0x24a   :  { %v376_v29 = vpop.permute.xlu0 %375  ;;  %v274_v30 = vpop.permute.xlu1 %273 }
 0x24b   :  { %v280_v32 = vmul.f32 %v274_v30, %v7336_v26  ;;  %6269 = vmatpush3.bf16.msra.mxu1 %v284_v9  ;;  %v381_v59 = vmul.f32 %v7346_v33, %v376_v29 }
 0x24c   :  { %6270 = vmatprep.subr.bf16.mxu1 %v327_v55 }
 0x24d   :  { %v283_v34 = vpack.c.bf16 %v280_v32, %v279_v31 }
 0x24e   :  { %v378_v35 = vpop.permute.xlu1 %377  ;;  %v372_v38 = vpop.permute.xlu0 %371 }
 0x24f   :  { %v382_v61 = vmul.f32 %v7346_v33, %v378_v35  ;;  %6271 = vmatpush3.bf16.msra.mxu1 %v283_v34  ;;  %v379_v55 = vmul.f32 %v7346_v33, %v372_v38 }
 0x250   :  { %6787 = vmatprep.subr.bf16.mxu1 %v7351_v42 }
 0x251   :  { %v384_v48 = vpack.c.bf16 %v382_v61, %v381_v59 }
 0x252   :  { %v374_v53 = vpop.permute.xlu1 %373  ;;  %455 = vmatmul.mubr.bf16.vlgmr.msra.gmra.mxu1 %v6985_v37 }
 0x253   :  { %v380_v41 = vmul.f32 %v7346_v33, %v374_v53  ;;  %6788 = vmatpush3.bf16.msra.mxu1 %v7351_v42  ;;  %462 = vmatprep.mubr.bf16.mxu1 %v6988_v63 }
 0x254   :  { %6789 = vmatprep.subr.bf16.mxu1 %v384_v48 }
 0x255   :  { %v383_v43 = vpack.c.bf16 %v380_v41, %v379_v55 }
 0x257   :  { %6790 = vmatpush3.bf16.msra.mxu1 %v384_v48 }
 0x258   :  { %6791 = vmatprep.subr.bf16.mxu1 %v383_v43 }
 0x25a   :  { %463 = vmatmul.mubr.bf16.gmra.mxu1 %v6990_v44 }
 0x25b   :  { %6792 = vmatpush3.bf16.msra.mxu1 %v383_v43  ;;  %6793 = vmatprep.mubr.msk.bf16.mxu1 %vm415_vm2, %v6991_v45 }
 0x25c   :  { %6797 = vmatprep.subr.bf16.mxu1 %v7197_v24 }
 0x262   :  { %6794 = vmatmul.mubr.msk.bf16.vlgmr.msra.gmra.mxu1 %vm415_vm2, %v6992_v46 }
 0x263   :  { %6798 = vmatpush3.bf16.msra.mxu1 %v7351_v42  ;;  %6803 = vmatprep.mubr.msk.bf16.mxu1 %vm7198_vm3, %v7197_v24 }
 0x264   :  { %6799 = vmatprep.subr.bf16.mxu1 %v7197_v24 }
 0x312   :  { %v6272_v47 = vpop.f32.mrf.mxu1 }
 0x314   :  { %v6273_v50 = vpop.f32.mrf.mxu1 }
 0x315   :  { %v6274_v6 = vadd.f32 %v6273_v50, %v6272_v47 }
 0x316   :  { %v6275_v52 = vpop.f32.mrf.mxu1 }
 0x318   :  { %v6276_v54 = vpop.f32.mrf.mxu1 }
 0x319   :  { %v6277_v10 = vadd.f32 %v6276_v54, %v6275_v52 }
 0x31a   :  { %v6278_v57 = vpop.f32.mrf.mxu1 }
 0x31c   :  { %v6279_v58 = vpop.f32.mrf.mxu1 }
 0x31d   :  { %v6280_v0 = vadd.f32 %v6279_v58, %v6278_v57 }
 0x31e   :  { %v6281_v60 = vpop.f32.mrf.mxu1 }
 0x320   :  { %v6282_v62 = vpop.f32.mrf.mxu1 }
 0x321   :  { %v6283_v8 = vadd.f32 %v6282_v62, %v6281_v60 }
 0x322   :  { %v6795_v1 = vpop.f32.mrf.mxu1 }
 0x323   :  { %v514_v2 = vadd.f32 %v6795_v1, %v6280_v0 }
 0x324   :  { %v505_v3 = vpop.f32.mrf.mxu1 }
 0x325   :  { %v7502_v4 = vmax.f32 %v514_v2, 0.0  ;;  %v506_v15 = vadd.f32 %v6274_v6, %v505_v3 }
 0x326   :  { %v6796_v12 = vpop.f32.mrf.mxu1 }
 0x327   :  { %v517_v16 = vadd.f32 %v6796_v12, %v6283_v8  ;;  %618 = vrot.lane.b32.xlu0 %v7502_v4, %s7190_s14  ;;  %v7508_v21 = vmax.f32 %v506_v15, 0.0 }
 0x328   :  { %v508_v7 = vpop.f32.mrf.mxu1 }
 0x329   :  { %v7506_v17 = vmax.f32 %v517_v16, 0.0  ;;  %v509_v19 = vadd.f32 %v6277_v10, %v508_v7 }
 0x32b   :  { %v7510_v22 = vmax.f32 %v509_v19, 0.0  ;;  %620 = vrot.lane.b32.xlu1 %v7506_v17, %s7190_s14  ;;  %574 = vrot.lane.b32.xlu0 %v7502_v4, %s7192_s16  ;;  %v585_v23 = vpack.c.bf16 %v7506_v17, %v7502_v4 }
 0x32d   :  { %v584_v11 = vpack.c.bf16 %v7510_v22, %v7508_v21 }
 0x32f   :  { %576 = vrot.lane.b32.xlu1 %v7506_v17, %s7192_s16  ;;  %604 = vrot.lane.b32.xlu0 %v7502_v4, %s7189_s1 }
 0x333   :  { %606 = vrot.lane.b32.xlu1 %v7506_v17, %s7189_s1  ;;  %560 = vrot.lane.b32.xlu0 %v7502_v4, %s7193_s17 }
 0x337   :  { %562 = vrot.lane.b32.xlu1 %v7506_v17, %s7193_s17  ;;  %590 = vrot.lane.b32.xlu0 %v7502_v4, %s7191_s15 }
 0x33b   :  { %592 = vrot.lane.b32.xlu1 %v7506_v17, %s7191_s15  ;;  %546 = vrot.lane.b32.xlu0 %v7502_v4, %s7194_s18 }
 0x33f   :  { %548 = vrot.lane.b32.xlu1 %v7506_v17, %s7194_s18  ;;  %532 = vrot.lane.b32.xlu0 %v7502_v4, %s7195_s19 }
 0x343   :  { %534 = vrot.lane.b32.xlu1 %v7506_v17, %s7195_s19  ;;  %614 = vrot.lane.b32.xlu0 %v7508_v21, %s7190_s14 }
 0x347   :  { %616 = vrot.lane.b32.xlu1 %v7510_v22, %s7190_s14  ;;  %570 = vrot.lane.b32.xlu0 %v7508_v21, %s7192_s16 }
 0x34b   :  { %572 = vrot.lane.b32.xlu1 %v7510_v22, %s7192_s16  ;;  %600 = vrot.lane.b32.xlu0 %v7508_v21, %s7189_s1 }
 0x34f   :  { %602 = vrot.lane.b32.xlu1 %v7510_v22, %s7189_s1  ;;  %556 = vrot.lane.b32.xlu0 %v7508_v21, %s7193_s17 }
 0x353   :  { %558 = vrot.lane.b32.xlu1 %v7510_v22, %s7193_s17  ;;  %586 = vrot.lane.b32.xlu0 %v7508_v21, %s7191_s15 }
 0x357   :  { %588 = vrot.lane.b32.xlu1 %v7510_v22, %s7191_s15  ;;  %542 = vrot.lane.b32.xlu0 %v7508_v21, %s7194_s18 }
 0x35b   :  { %544 = vrot.lane.b32.xlu1 %v7510_v22, %s7194_s18  ;;  %632 = vrot.lane.b32.xlu0 %v7502_v4, %s7196_s20  ;;  %v6993_v4 = vld [vmem:[%s10522_s6] ss:$12 sps:$4 sm:$0xff]  }
 0x35f   :  { %634 = vrot.lane.b32.xlu1 %v7506_v17, %s7196_s20  ;;  %528 = vrot.lane.b32.xlu0 %v7508_v21, %s7195_s19 }
 0x363   :  { %530 = vrot.lane.b32.xlu1 %v7510_v22, %s7195_s19  ;;  %628 = vrot.lane.b32.xlu0 %v7508_v21, %s7196_s20  ;;  %v6996_v21 = vld [vmem:[%s10522_s6 + $0x8] ss:$12 sps:$4 sm:$0xff]  }
 0x367   :  { %630 = vrot.lane.b32.xlu1 %v7510_v22, %s7196_s20 }
 0x399   :  { %v619_v27 = vpop.permute.xlu0 %618 }
 0x39a   :  { %v624_v29 = vmul.f32 %v619_v27, %v7306_v49 }
 0x39d   :  { %v621_v28 = vpop.permute.xlu1 %620  ;;  %v575_v9 = vpop.permute.xlu0 %574 }
 0x39e   :  { %v625_v30 = vmul.f32 %v621_v28, %v7306_v49  ;;  %v580_v35 = vmul.f32 %v575_v9, %v7319_v5 }
 0x3a0   :  { %v627_v31 = vpack.c.bf16 %v625_v30, %v624_v29 }
 0x3a1   :  { %v577_v32 = vpop.permute.xlu1 %576  ;;  %v605_v34 = vpop.permute.xlu0 %604 }
 0x3a2   :  { %v581_v37 = vmul.f32 %v577_v32, %v7319_v5  ;;  %6289 = vmatprep.subr.bf16.mxu0 %v627_v31  ;;  %v610_v1 = vmul.f32 %v605_v34, %v7308_v51 }
 0x3a4   :  { %v583_v59 = vpack.c.bf16 %v581_v37, %v580_v35 }
 0x3a5   :  { %v607_v61 = vpop.permute.xlu1 %606  ;;  %v561_v63 = vpop.permute.xlu0 %560 }
 0x3a6   :  { %6290 = vmatpush3.bf16.msra.mxu0 %v583_v59  ;;  %v611_v57 = vmul.f32 %v607_v61, %v7308_v51  ;;  %v566_v10 = vmul.f32 %v561_v63, %v7326_v13 }
 0x3a8   :  { %v613_v6 = vpack.c.bf16 %v611_v57, %v610_v1 }
 0x3a9   :  { %v563_v38 = vpop.permute.xlu1 %562  ;;  %v591_v48 = vpop.permute.xlu0 %590 }
 0x3aa   :  { %v567_v2 = vmul.f32 %v563_v38, %v7326_v13  ;;  %v596_v30 = vmul.f32 %v591_v48, %v7312_v56 }
 0x3ac   :  { %v569_v7 = vpack.c.bf16 %v567_v2, %v566_v10 }
 0x3ad   :  { %v593_v53 = vpop.permute.xlu1 %592  ;;  %v547_v55 = vpop.permute.xlu0 %546 }
 0x3ae   :  { %v597_v25 = vmul.f32 %v593_v53, %v7312_v56  ;;  %v552_v59 = vmul.f32 %v547_v55, %v7329_v14 }
 0x3b0   :  { %v599_v34 = vpack.c.bf16 %v597_v25, %v596_v30 }
 0x3b1   :  { %v549_v41 = vpop.permute.xlu1 %548  ;;  %v533_v43 = vpop.permute.xlu0 %532 }
 0x3b2   :  { %v553_v31 = vmul.f32 %v549_v41, %v7329_v14 }
 0x3b4   :  { %v555_v38 = vpack.c.bf16 %v553_v31, %v552_v59  ;;  %v761_v31 = vstv %s5960_s10  ;;  %v7657_v59 = vld [vmem:[%s10518_s2 + $0x8] sm:$0xff] }
 0x3b5   :  { %v535_v44 = vpop.permute.xlu1 %534  ;;  %v615_v45 = vpop.permute.xlu0 %614 }
 0x3b6   :  { %v622_v50 = vmul.f32 %v615_v45, %v7306_v49 }
 0x3b9   :  { %v617_v46 = vpop.permute.xlu1 %616  ;;  %v571_v47 = vpop.permute.xlu0 %570 }
 0x3ba   :  { %v623_v52 = vmul.f32 %v617_v46, %v7306_v49  ;;  %v578_v62 = vmul.f32 %v571_v47, %v7319_v5  ;;  %v539_v47 = vmul.f32 %v535_v44, %v7336_v26 }
 0x3bc   :  { %v626_v54 = vpack.c.bf16 %v623_v52, %v622_v50 }
 0x3bd   :  { %v573_v58 = vpop.permute.xlu1 %572  ;;  %v601_v60 = vpop.permute.xlu0 %600 }
 0x3be   :  { %v579_v0 = vmul.f32 %v573_v58, %v7319_v5  ;;  %6291 = vmatprep.subr.bf16.mxu0 %v626_v54  ;;  %v608_v15 = vmul.f32 %v601_v60, %v7308_v51  ;;  %v538_v54 = vmul.f32 %v533_v43, %v7336_v26 }
 0x3c0   :  { %v582_v3 = vpack.c.bf16 %v579_v0, %v578_v62  ;;  %v541_v60 = vpack.c.bf16 %v539_v47, %v538_v54 }
 0x3c1   :  { %v603_v8 = vpop.permute.xlu1 %602  ;;  %v557_v12 = vpop.permute.xlu0 %556 }
 0x3c2   :  { %v609_v16 = vmul.f32 %v603_v8, %v7308_v51  ;;  %6292 = vmatpush3.bf16.msra.mxu0 %v582_v3  ;;  %v564_v9 = vmul.f32 %v557_v12, %v7326_v13 }
 0x3c3   :  { %6293 = vmatprep.subr.bf16.mxu0 %v613_v6 }
 0x3c4   :  { %v612_v19 = vpack.c.bf16 %v609_v16, %v608_v15 }
 0x3c5   :  { %v559_v27 = vpop.permute.xlu1 %558  ;;  %v587_v28 = vpop.permute.xlu0 %586 }
 0x3c6   :  { %v565_v29 = vmul.f32 %v559_v27, %v7326_v13  ;;  %6294 = vmatpush3.bf16.msra.mxu0 %v569_v7  ;;  %v594_v61 = vmul.f32 %v587_v28, %v7312_v56 }
 0x3c7   :  { %6295 = vmatprep.subr.bf16.mxu0 %v612_v19 }
 0x3c8   :  { %v568_v32 = vpack.c.bf16 %v565_v29, %v564_v9 }
 0x3c9   :  { %v589_v35 = vpop.permute.xlu1 %588  ;;  %v543_v37 = vpop.permute.xlu0 %542 }
 0x3ca   :  { %v595_v63 = vmul.f32 %v589_v35, %v7312_v56  ;;  %6296 = vmatpush3.bf16.msra.mxu0 %v568_v32  ;;  %v550_v48 = vmul.f32 %v543_v37, %v7329_v14  ;;  %v762_v35 = vadd.f32 %v761_v31, %v7254_v18  ;;  %v7651_v37 = vld [vmem:[%s10518_s2] sm:$0xff] }
 0x3cb   :  { %6297 = vmatprep.subr.bf16.mxu0 %v599_v34 }
 0x3cc   :  { %v598_v53 = vpack.c.bf16 %v595_v63, %v594_v61  ;;  %7143 = vrcp.f32 %v762_v35 }
 0x3cd   :  { %v545_v45 = vpop.permute.xlu1 %544  ;;  %v633_v46 = vpop.permute.xlu0 %632 }
 0x3ce   :  { %v551_v41 = vmul.f32 %v545_v45, %v7329_v14  ;;  %6298 = vmatpush3.bf16.msra.mxu0 %v555_v38  ;;  %v638_v57 = vmul.f32 %v7346_v33, %v633_v46 }
 0x3cf   :  { %6299 = vmatprep.subr.bf16.mxu0 %v598_v53 }
 0x3d0   :  { %v554_v50 = vpack.c.bf16 %v551_v41, %v550_v48 }
 0x3d1   :  { %v635_v55 = vpop.permute.xlu1 %634  ;;  %v529_v52 = vpop.permute.xlu0 %528 }
 0x3d2   :  { %v639_v58 = vmul.f32 %v7346_v33, %v635_v55  ;;  %6300 = vmatpush3.bf16.msra.mxu0 %v554_v50  ;;  %v536_v1 = vmul.f32 %v529_v52, %v7336_v26 }
 0x3d3   :  { %6301 = vmatprep.subr.bf16.mxu0 %v585_v23 }
 0x3d4   :  { %v641_v62 = vpack.c.bf16 %v639_v58, %v638_v57 }
 0x3d5   :  { %v531_v0 = vpop.permute.xlu1 %530  ;;  %v629_v2 = vpop.permute.xlu0 %628 }
 0x3d6   :  { %v537_v44 = vmul.f32 %v531_v0, %v7336_v26  ;;  %6302 = vmatpush3.bf16.msra.mxu0 %v541_v60  ;;  %6800 = vmatpush3.bf16.msra.mxu1 %v641_v62  ;;  %v636_v17 = vmul.f32 %v7346_v33, %v629_v2 }
 0x3d7   :  { %6303 = vmatprep.subr.bf16.mxu0 %v584_v11  ;;  %6801 = vmatprep.subr.bf16.mxu1 %v7197_v24 }
 0x3d8   :  { %v540_v43 = vpack.c.bf16 %v537_v44, %v536_v1  ;;  %v6997_v1 = vld [vmem:[%s10520_s4 + $0x24] ss:$8 sps:$4 sm:$0xff]  }
 0x3d9   :  { %v631_v3 = vpop.permute.xlu1 %630  ;;  %v7144_v47 = vpop.eup %7143 }
 0x3da   :  { %v637_v23 = vmul.f32 %v7346_v33, %v631_v3  ;;  %6304 = vmatpush3.bf16.msra.mxu0 %v540_v43 }
 0x3dc   :  { %v640_v6 = vpack.c.bf16 %v637_v23, %v636_v17 }
 0x3dd   :  { %693 = vmatmul.mubr.bf16.vlgmr.msra.gmra.mxu0 %v6993_v4 }
 0x3de   :  { %6802 = vmatpush3.bf16.msra.mxu1 %v640_v6 }
 0x3df   :  { %857 = vmatprep.subr.bf16.mxu1 %v7188_v36 }
 0x3e1   :  { %6804 = vmatmul.mubr.msk.bf16.vlgmr.msra.gmra.mxu1 %vm415_vm2, %v6996_v21 }
 0x3e2   :  { %5969 = vmatprep.mubr.msk.bf16.mxu1 %vm197_vm0, %v6997_v1 }
 0x49d   :  { %v6305_v22 = vpop.f32.mrf.mxu0 }
 0x49f   :  { %v6306_v11 = vpop.f32.mrf.mxu0 }
 0x4a0   :  { %v6307_v8 = vadd.f32 %v6306_v11, %v6305_v22 }
 0x4a1   :  { %v6308_v12 = vpop.f32.mrf.mxu0  ;;  %v735_v10 = vpop.f32.mrf.mxu1 }
 0x4a2   :  { %v736_v15 = vadd.f32 %v6307_v8, %v735_v10 }
 0x4a3   :  { %v6309_v16 = vpop.f32.mrf.mxu0  ;;  %v6805_v7 = vpop.f32.mrf.mxu1 }
 0x4a4   :  { %v742_v19 = vsub.f32 %v7263_v39, %v736_v15  ;;  %746 = vst [vmem:[%s10523_s7] sm:$0xff] %v736_v15  ;;  %v6310_v25 = vadd.f32 %v6309_v16, %v6308_v12 }
 0x4a5   :  { %v738_v27 = vpop.f32.mrf.mxu1 }
 0x4a6   :  { %v7637_v28 = vsub.f32 0.0, %v742_v19  ;;  %v739_v9 = vadd.f32 %v6310_v25, %v738_v27 }
 0x4a7   :  { %v6806_v29 = vpop.f32.mrf.mxu1 }
 0x4a8   :  { %v743_v30 = vsub.f32 %v7269_v40, %v739_v9  ;;  %747 = vst [vmem:[%s10523_s7 + $0x8] sm:$0xff] %v739_v9  ;;  %v749_v32 = vadd.f32 %v7637_v28, %v736_v15 }
 0x4aa   :  { %v7644_v39 = vsub.f32 0.0, %v743_v30  ;;  %v751_v40 = vmul.f32 %v7651_v37, %v749_v32 }
 0x4ac   :  { %v750_v34 = vadd.f32 %v7644_v39, %v739_v9 }
 0x4ae   :  { %v752_v61 = vmul.f32 %v7657_v59, %v750_v34 }
 0x4b0   :  { %v753_v63 = vadd.f32 %v752_v61, %v751_v40 }
 0x4b2   :  { %v754_v38 = vrot.slane %v753_v63, 4 }
 0x4b4   :  { %v755_v53 = vadd.f32 %v754_v38, %v753_v63 }
 0x4b6   :  { %v756_v45 = vrot.slane %v755_v53, 2 }
 0x4b8   :  { %v757_v46 = vadd.f32 %v756_v45, %v755_v53 }
 0x4ba   :  { %v758_v48 = vrot.slane %v757_v46, 1 }
 0x4bc   :  { %v759_v41 = vadd.f32 %v758_v48, %v757_v46 }
 0x4be   :  { %v760_v50 = vsub.f32 %v7256_v20, %v759_v41 }
 0x4c0   :  { %v764_v55 = vmul.f32 %v7144_v47, %v760_v50 }
 0x4c2   :  { %v765_v52 = vmul.f32 %v7651_v37, %v764_v55  ;;  %v766_v54 = vmul.f32 %v7657_v59, %v764_v55 }
 0x4c4   :  { %v7663_v57 = vadd.f32 %v765_v52, %v749_v32  ;;  %v7665_v58 = vadd.f32 %v766_v54, %v750_v34  ;;  %v6999_v54 = vld [vmem:[%s10520_s4 + $0x20] ss:$8 sps:$4 sm:$0xff]  }
 0x4c6   :  { %v769_v60 = vsub.f32 %v7663_v57, %v7637_v28  ;;  %v770_v62 = vsub.f32 %v7665_v58, %v7644_v39 }
 0x4c8   :  { %821 = vrot.lane.b32.xlu1 %v770_v62, %s7190_s14  ;;  %819 = vrot.lane.b32.xlu0 %v769_v60, %s7190_s14  ;;  %v804_v0 = vpack.c.bf16 %v770_v62, %v769_v60 }
 0x4cc   :  { %814 = vrot.lane.b32.xlu1 %v770_v62, %s7189_s1  ;;  %812 = vrot.lane.b32.xlu0 %v769_v60, %s7189_s1 }
 0x4d0   :  { %807 = vrot.lane.b32.xlu1 %v770_v62, %s7191_s15  ;;  %805 = vrot.lane.b32.xlu0 %v769_v60, %s7191_s15 }
 0x4d4   :  { %799 = vrot.lane.b32.xlu1 %v770_v62, %s7192_s16  ;;  %797 = vrot.lane.b32.xlu0 %v769_v60, %s7192_s16 }
 0x4d8   :  { %792 = vrot.lane.b32.xlu1 %v770_v62, %s7193_s17  ;;  %790 = vrot.lane.b32.xlu0 %v769_v60, %s7193_s17 }
 0x4dc   :  { %785 = vrot.lane.b32.xlu1 %v770_v62, %s7194_s18  ;;  %783 = vrot.lane.b32.xlu0 %v769_v60, %s7194_s18 }
 0x4e0   :  { %778 = vrot.lane.b32.xlu1 %v770_v62, %s7195_s19  ;;  %776 = vrot.lane.b32.xlu0 %v769_v60, %s7195_s19 }
 0x4e4   :  { %828 = vrot.lane.b32.xlu1 %v770_v62, %s7196_s20  ;;  %826 = vrot.lane.b32.xlu0 %v769_v60, %s7196_s20  ;;  %v7000_v60 = vld [vmem:[%s10520_s4 + $0x34] ss:$8 sps:$4 sm:$0xff]  }
 0x53a   :  { %v822_v44 = vpop.permute.xlu1 %821  ;;  %v820_v2 = vpop.permute.xlu0 %819 }
 0x53b   :  { %v824_v43 = vmul.f32 %v822_v44, %v7306_v49  ;;  %v823_v3 = vmul.f32 %v820_v2, %v7306_v49 }
 0x53d   :  { %v825_v4 = vpack.c.bf16 %v824_v43, %v823_v3 }
 0x53e   :  { %v815_v17 = vpop.permute.xlu1 %814  ;;  %v813_v23 = vpop.permute.xlu0 %812 }
 0x53f   :  { %v817_v6 = vmul.f32 %v815_v17, %v7308_v51  ;;  %v816_v21 = vmul.f32 %v813_v23, %v7308_v51  ;;  %858 = vmatpush1.bf16.msra.mxu1 %v825_v4 }
 0x540   :  { %859 = vmatprep.subr.bf16.mxu1 %v7188_v36 }
 0x541   :  { %v818_v22 = vpack.c.bf16 %v817_v6, %v816_v21 }
 0x542   :  { %v808_v11 = vpop.permute.xlu1 %807  ;;  %v806_v8 = vpop.permute.xlu0 %805 }
 0x543   :  { %v810_v12 = vmul.f32 %v808_v11, %v7312_v56  ;;  %v809_v10 = vmul.f32 %v806_v8, %v7312_v56  ;;  %860 = vmatpush1.bf16.msra.mxu1 %v818_v22  ;;  %v7005_v8 = vld [vmem:[%s10521_s5 + $0x34] ss:$12 sps:$4 sm:$0xff]  }
 0x544   :  { %861 = vmatprep.subr.bf16.mxu1 %v7188_v36  ;;  %1101 = vmatprep.mubr.bf16.mxu0 %v7005_v8 }
 0x545   :  { %v811_v15 = vpack.c.bf16 %v810_v12, %v809_v10  ;;  %v7009_v12 = vld [vmem:[%s10521_s5 + $0x38] ss:$12 sps:$4 sm:$0xff]  }
 0x546   :  { %v800_v16 = vpop.permute.xlu1 %799  ;;  %v798_v7 = vpop.permute.xlu0 %797 }
 0x547   :  { %862 = vmatpush1.bf16.msra.mxu1 %v811_v15  ;;  %v802_v19 = vmul.f32 %v800_v16, %v7319_v5  ;;  %v801_v25 = vmul.f32 %v798_v7, %v7319_v5 }
 0x548   :  { %863 = vmatprep.subr.bf16.mxu1 %v7188_v36 }
 0x549   :  { %v803_v29 = vpack.c.bf16 %v802_v19, %v801_v25 }
 0x54a   :  { %v793_v27 = vpop.permute.xlu1 %792  ;;  %v791_v9 = vpop.permute.xlu0 %790 }
 0x54b   :  { %864 = vmatpush1.bf16.msra.mxu1 %v804_v0  ;;  %v795_v30 = vmul.f32 %v793_v27, %v7326_v13  ;;  %v794_v31 = vmul.f32 %v791_v9, %v7326_v13 }
 0x54c   :  { %865 = vmatprep.subr.bf16.mxu1 %v7188_v36 }
 0x54d   :  { %v796_v35 = vpack.c.bf16 %v795_v30, %v794_v31 }
 0x54e   :  { %v786_v32 = vpop.permute.xlu1 %785  ;;  %v784_v34 = vpop.permute.xlu0 %783 }
 0x54f   :  { %866 = vmatpush1.bf16.msra.mxu1 %v803_v29  ;;  %v788_v40 = vmul.f32 %v786_v32, %v7329_v14  ;;  %v787_v61 = vmul.f32 %v784_v34, %v7329_v14 }
 0x550   :  { %867 = vmatprep.subr.bf16.mxu1 %v7188_v36 }
 0x551   :  { %v789_v53 = vpack.c.bf16 %v788_v40, %v787_v61 }
 0x552   :  { %v779_v63 = vpop.permute.xlu1 %778  ;;  %v777_v38 = vpop.permute.xlu0 %776 }
 0x553   :  { %868 = vmatpush1.bf16.msra.mxu1 %v796_v35  ;;  %v781_v45 = vmul.f32 %v779_v63, %v7336_v26  ;;  %v780_v46 = vmul.f32 %v777_v38, %v7336_v26 }
 0x554   :  { %869 = vmatprep.subr.bf16.mxu1 %v7188_v36 }
 0x555   :  { %v782_v48 = vpack.c.bf16 %v781_v45, %v780_v46 }
 0x556   :  { %v829_v41 = vpop.permute.xlu1 %828  ;;  %v827_v47 = vpop.permute.xlu0 %826 }
 0x557   :  { %870 = vmatpush1.bf16.msra.mxu1 %v789_v53  ;;  %v831_v50 = vmul.f32 %v7346_v33, %v829_v41  ;;  %v830_v55 = vmul.f32 %v7346_v33, %v827_v47  ;;  %v7002_v33 = vld [vmem:[%s10520_s4 + $0x30] ss:$8 sps:$4 sm:$0xff]  }
 0x558   :  { %871 = vmatprep.subr.bf16.mxu1 %v7188_v36 }
 0x559   :  { %v832_v52 = vpack.c.bf16 %v831_v50, %v830_v55 }
 0x55b   :  { %872 = vmatpush1.bf16.msra.mxu1 %v782_v48 }
 0x55c   :  { %885 = vmatprep.subr.bf16.mxu1 %v7188_v36 }
 0x55f   :  { %886 = vmatpush2.bf16.msra.mxu1 %v7351_v42 }
 0x560   :  { %887 = vmatprep.subr.bf16.mxu1 %v7188_v36 }
 0x563   :  { %888 = vmatpush2.bf16.msra.mxu1 %v832_v52 }
 0x564   :  { %6807 = vmatprep.subr.bf16.mxu1 %v7351_v42 }
 0x566   :  { %890 = vmatmul.mubr.bf16.vlgmr.msra.gmra.mxu1 %v6999_v54 }
 0x567   :  { %5970 = vmatprep.mubr.msk.bf16.mxu1 %vm197_vm0, %v7000_v60  ;;  %6808 = vmatpush3.bf16.msra.mxu1 %v7351_v42 }
 0x56e   :  { %898 = vmatmul.mubr.bf16.gmra.mxu1 %v7002_v33 }
 0x56f   :  { %6813 = vmatprep.mubr.msk.bf16.mxu1 %vm415_vm2, %v7009_v12 }
 0x626   :  { %v891_v62 = vpop.f32.mrf.mxu1 }
 0x627   :  { %v7729_v0 = vmax.f32 %v891_v62, 0.0 }
 0x628   :  { %v893_v1 = vpop.f32.mrf.mxu1 }
 0x629   :  { %1005 = vrot.lane.b32.xlu0 %v7729_v0, %s7190_s14 }
 0x62a   :  { %v894_v44 = vpop.f32.mrf.mxu1 }
 0x62b   :  { %v7733_v2 = vmax.f32 %v894_v44, 0.0 }
 0x62c   :  { %v896_v43 = vpop.f32.mrf.mxu1 }
 0x62d   :  { %961 = vrot.lane.b32.xlu0 %v7729_v0, %s7192_s16  ;;  %1007 = vrot.lane.b32.xlu1 %v7733_v2, %s7190_s14  ;;  %v975_v3 = vpack.c.bf16 %v7733_v2, %v7729_v0 }
 0x62e   :  { %v899_v4 = vpop.f32.mrf.mxu1 }
 0x62f   :  { %v7745_v23 = vmax.f32 %v899_v4, 0.0 }
 0x630   :  { %v901_v17 = vpop.f32.mrf.mxu1 }
 0x631   :  { %991 = vrot.lane.b32.xlu0 %v7729_v0, %s7189_s1  ;;  %963 = vrot.lane.b32.xlu1 %v7733_v2, %s7192_s16 }
 0x632   :  { %v902_v6 = vpop.f32.mrf.mxu1 }
 0x633   :  { %v7747_v21 = vmax.f32 %v902_v6, 0.0 }
 0x634   :  { %v904_v22 = vpop.f32.mrf.mxu1 }
 0x635   :  { %947 = vrot.lane.b32.xlu0 %v7729_v0, %s7193_s17  ;;  %993 = vrot.lane.b32.xlu1 %v7733_v2, %s7189_s1  ;;  %v976_v11 = vpack.c.bf16 %v7747_v21, %v7745_v23 }
 0x639   :  { %977 = vrot.lane.b32.xlu0 %v7729_v0, %s7191_s15  ;;  %949 = vrot.lane.b32.xlu1 %v7733_v2, %s7193_s17 }
 0x63d   :  { %979 = vrot.lane.b32.xlu1 %v7733_v2, %s7191_s15  ;;  %1009 = vrot.lane.b32.xlu0 %v7745_v23, %s7190_s14 }
 0x641   :  { %965 = vrot.lane.b32.xlu0 %v7745_v23, %s7192_s16  ;;  %1011 = vrot.lane.b32.xlu1 %v7747_v21, %s7190_s14 }
 0x645   :  { %995 = vrot.lane.b32.xlu0 %v7745_v23, %s7189_s1  ;;  %967 = vrot.lane.b32.xlu1 %v7747_v21, %s7192_s16 }
 0x649   :  { %951 = vrot.lane.b32.xlu0 %v7745_v23, %s7193_s17  ;;  %997 = vrot.lane.b32.xlu1 %v7747_v21, %s7189_s1 }
 0x64d   :  { %981 = vrot.lane.b32.xlu0 %v7745_v23, %s7191_s15  ;;  %953 = vrot.lane.b32.xlu1 %v7747_v21, %s7193_s17 }
 0x651   :  { %937 = vrot.lane.b32.xlu0 %v7745_v23, %s7194_s18  ;;  %983 = vrot.lane.b32.xlu1 %v7747_v21, %s7191_s15 }
 0x655   :  { %933 = vrot.lane.b32.xlu0 %v7729_v0, %s7194_s18  ;;  %939 = vrot.lane.b32.xlu1 %v7747_v21, %s7194_s18 }
 0x659   :  { %923 = vrot.lane.b32.xlu0 %v7745_v23, %s7195_s19  ;;  %935 = vrot.lane.b32.xlu1 %v7733_v2, %s7194_s18 }
 0x65d   :  { %919 = vrot.lane.b32.xlu0 %v7729_v0, %s7195_s19  ;;  %925 = vrot.lane.b32.xlu1 %v7747_v21, %s7195_s19 }
 0x661   :  { %1023 = vrot.lane.b32.xlu0 %v7745_v23, %s7196_s20  ;;  %921 = vrot.lane.b32.xlu1 %v7733_v2, %s7195_s19  ;;  %v7852_v23 = vld [vmem:[%s10519_s3 + $0x8] ss:$0 sm:$0xff] }
 0x665   :  { %1019 = vrot.lane.b32.xlu0 %v7729_v0, %s7196_s20  ;;  %1025 = vrot.lane.b32.xlu1 %v7747_v21, %s7196_s20  ;;  %v7006_v0 = vld [vmem:[%s10521_s5 + $0x4c] ss:$12 sps:$4 sm:$0xff]  }
 0x669   :  { %1021 = vrot.lane.b32.xlu1 %v7733_v2, %s7196_s20 }
 0x69b   :  { %v1006_v10 = vpop.permute.xlu0 %1005 }
 0x69c   :  { %v1013_v48 = vmul.f32 %v1006_v10, %v7306_v49 }
 0x69f   :  { %v962_v15 = vpop.permute.xlu0 %961  ;;  %v1008_v16 = vpop.permute.xlu1 %1007 }
 0x6a0   :  { %v1014_v63 = vmul.f32 %v1008_v16, %v7306_v49  ;;  %v969_v54 = vmul.f32 %v962_v15, %v7319_v5 }
 0x6a2   :  { %v1017_v50 = vpack.c.bf16 %v1014_v63, %v1013_v48 }
 0x6a3   :  { %v992_v7 = vpop.permute.xlu0 %991  ;;  %v964_v19 = vpop.permute.xlu1 %963 }
 0x6a4   :  { %v970_v41 = vmul.f32 %v964_v19, %v7319_v5  ;;  %v999_v22 = vmul.f32 %v992_v7, %v7308_v51 }
 0x6a6   :  { %v973_v62 = vpack.c.bf16 %v970_v41, %v969_v54 }
 0x6a7   :  { %v948_v25 = vpop.permute.xlu0 %947  ;;  %v994_v27 = vpop.permute.xlu1 %993 }
 0x6a8   :  { %v1000_v44 = vmul.f32 %v994_v27, %v7308_v51  ;;  %v955_v19 = vmul.f32 %v948_v25, %v7326_v13 }
 0x6aa   :  { %v1003_v10 = vpack.c.bf16 %v1000_v44, %v999_v22  ;;  %v7003_v44 = vld [vmem:[%s10521_s5 + $0x30] ss:$12 sps:$4 sm:$0xff]   ;;  %v7008_v22 = vld [vmem:[%s10521_s5 + $0x48] ss:$12 sps:$4 sm:$0xff]  }
 0x6ab   :  { %v978_v9 = vpop.permute.xlu0 %977  ;;  %v950_v29 = vpop.permute.xlu1 %949 }
 0x6ac   :  { %v956_v8 = vmul.f32 %v950_v29, %v7326_v13  ;;  %v985_v63 = vmul.f32 %v978_v9, %v7312_v56 }
 0x6af   :  { %v980_v30 = vpop.permute.xlu1 %979  ;;  %v1010_v31 = vpop.permute.xlu0 %1009 }
 0x6b0   :  { %v1015_v35 = vmul.f32 %v1010_v31, %v7306_v49 }
 0x6b3   :  { %v966_v32 = vpop.permute.xlu0 %965  ;;  %v1012_v34 = vpop.permute.xlu1 %1011 }
 0x6b4   :  { %v1016_v40 = vmul.f32 %v1012_v34, %v7306_v49  ;;  %v971_v45 = vmul.f32 %v966_v32, %v7319_v5  ;;  %v959_v32 = vpack.c.bf16 %v956_v8, %v955_v19  ;;  %v7010_v8 = vld [vmem:[%s10521_s5 + $0x50] ss:$12 sps:$4 sm:$0xff]  }
 0x6b6   :  { %v1018_v61 = vpack.c.bf16 %v1016_v40, %v1015_v35  ;;  %v986_v35 = vmul.f32 %v980_v30, %v7312_v56 }
 0x6b7   :  { %v996_v38 = vpop.permute.xlu0 %995  ;;  %v968_v53 = vpop.permute.xlu1 %967 }
 0x6b8   :  { %v972_v46 = vmul.f32 %v968_v53, %v7319_v5  ;;  %6315 = vmatprep.subr.bf16.mxu0 %v1018_v61  ;;  %v1001_v60 = vmul.f32 %v996_v38, %v7308_v51  ;;  %v989_v38 = vpack.c.bf16 %v986_v35, %v985_v63 }
 0x6ba   :  { %v974_v47 = vpack.c.bf16 %v972_v46, %v971_v45 }
 0x6bb   :  { %v952_v55 = vpop.permute.xlu0 %951  ;;  %v998_v52 = vpop.permute.xlu1 %997 }
 0x6bc   :  { %v1002_v33 = vmul.f32 %v998_v52, %v7308_v51  ;;  %6316 = vmatpush3.bf16.msra.mxu0 %v974_v47  ;;  %v957_v17 = vmul.f32 %v952_v55, %v7326_v13 }
 0x6bd   :  { %6317 = vmatprep.subr.bf16.mxu0 %v1017_v50 }
 0x6be   :  { %v1004_v1 = vpack.c.bf16 %v1002_v33, %v1001_v60 }
 0x6bf   :  { %v982_v43 = vpop.permute.xlu0 %981  ;;  %v954_v4 = vpop.permute.xlu1 %953 }
 0x6c0   :  { %v958_v6 = vmul.f32 %v954_v4, %v7326_v13  ;;  %6318 = vmatpush3.bf16.msra.mxu0 %v973_v62  ;;  %v987_v27 = vmul.f32 %v982_v43, %v7312_v56 }
 0x6c1   :  { %6319 = vmatprep.subr.bf16.mxu0 %v1004_v1 }
 0x6c2   :  { %v960_v12 = vpack.c.bf16 %v958_v6, %v957_v17 }
 0x6c3   :  { %v938_v15 = vpop.permute.xlu0 %937  ;;  %v984_v16 = vpop.permute.xlu1 %983 }
 0x6c4   :  { %v988_v31 = vmul.f32 %v984_v16, %v7312_v56  ;;  %6320 = vmatpush3.bf16.msra.mxu0 %v960_v12  ;;  %v943_v29 = vmul.f32 %v938_v15, %v7329_v14 }
 0x6c5   :  { %6321 = vmatprep.subr.bf16.mxu0 %v1003_v10 }
 0x6c6   :  { %v990_v34 = vpack.c.bf16 %v988_v31, %v987_v27 }
 0x6c7   :  { %v934_v7 = vpop.permute.xlu0 %933  ;;  %v940_v40 = vpop.permute.xlu1 %939 }
 0x6c8   :  { %v944_v61 = vmul.f32 %v940_v40, %v7329_v14  ;;  %6322 = vmatpush3.bf16.msra.mxu0 %v959_v32  ;;  %v941_v46 = vmul.f32 %v934_v7, %v7329_v14 }
 0x6c9   :  { %6323 = vmatprep.subr.bf16.mxu0 %v990_v34 }
 0x6ca   :  { %v946_v25 = vpack.c.bf16 %v944_v61, %v943_v29 }
 0x6cb   :  { %v924_v53 = vpop.permute.xlu0 %923  ;;  %v936_v45 = vpop.permute.xlu1 %935 }
 0x6cc   :  { %v942_v48 = vmul.f32 %v936_v45, %v7329_v14  ;;  %6324 = vmatpush3.bf16.msra.mxu0 %v946_v25  ;;  %v929_v50 = vmul.f32 %v924_v53, %v7336_v26 }
 0x6cd   :  { %6325 = vmatprep.subr.bf16.mxu0 %v989_v38 }
 0x6ce   :  { %v945_v30 = vpack.c.bf16 %v942_v48, %v941_v46 }
 0x6cf   :  { %v920_v41 = vpop.permute.xlu0 %919  ;;  %v926_v47 = vpop.permute.xlu1 %925 }
 0x6d0   :  { %v930_v55 = vmul.f32 %v926_v47, %v7336_v26  ;;  %6326 = vmatpush3.bf16.msra.mxu0 %v945_v30  ;;  %v927_v60 = vmul.f32 %v920_v41, %v7336_v26 }
 0x6d1   :  { %6327 = vmatprep.subr.bf16.mxu0 %v976_v11 }
 0x6d2   :  { %v932_v9 = vpack.c.bf16 %v930_v55, %v929_v50 }
 0x6d3   :  { %v1024_v52 = vpop.permute.xlu0 %1023  ;;  %v922_v54 = vpop.permute.xlu1 %921 }
 0x6d4   :  { %v928_v33 = vmul.f32 %v922_v54, %v7336_v26  ;;  %6328 = vmatpush3.bf16.msra.mxu0 %v932_v9  ;;  %v1029_v21 = vmul.f32 %v7852_v23, %v1024_v52  ;;  %v7013_v9 = vld [vmem:[%s10522_s6 + $0x1c] ss:$12 sps:$4 sm:$0xff]  }
 0x6d5   :  { %6329 = vmatprep.subr.bf16.mxu0 %v975_v3 }
 0x6d6   :  { %v931_v62 = vpack.c.bf16 %v928_v33, %v927_v60 }
 0x6d7   :  { %v1026_v1 = vpop.permute.xlu1 %1025  ;;  %v1020_v2 = vpop.permute.xlu0 %1019 }
 0x6d8   :  { %v1030_v11 = vmul.f32 %v7852_v23, %v1026_v1  ;;  %6330 = vmatpush3.bf16.msra.mxu0 %v931_v62  ;;  %v1027_v4 = vmul.f32 %v7852_v23, %v1020_v2 }
 0x6da   :  { %v1032_v3 = vpack.c.bf16 %v1030_v11, %v1029_v21 }
 0x6db   :  { %v1022_v43 = vpop.permute.xlu1 %1021  ;;  %1102 = vmatmul.mubr.bf16.vlgmr.msra.gmra.mxu0 %v7003_v44 }
 0x6dc   :  { %v1028_v17 = vmul.f32 %v7852_v23, %v1022_v43  ;;  %6809 = vmatprep.subr.bf16.mxu1 %v1032_v3  ;;  %1109 = vmatprep.mubr.bf16.mxu0 %v7006_v0 }
 0x6dd   :  { %6810 = vmatpush3.bf16.msra.mxu1 %v1032_v3 }
 0x6de   :  { %v1031_v6 = vpack.c.bf16 %v1028_v17, %v1027_v4 }
 0x6e0   :  { %6811 = vmatprep.subr.bf16.mxu1 %v1031_v6 }
 0x6e1   :  { %6812 = vmatpush3.bf16.msra.mxu1 %v1031_v6 }
 0x6e2   :  { %6817 = vmatprep.subr.bf16.mxu1 %v7197_v24 }
 0x6e3   :  { %1110 = vmatmul.mubr.bf16.gmra.mxu0 %v7008_v22 }
 0x6e4   :  { %6814 = vmatmul.mubr.msk.bf16.vlgmr.msra.gmra.mxu1 %vm415_vm2, %v7010_v8  ;;  %1340 = vmatprep.mubr.bf16.mxu0 %v7013_v9 }
 0x6e5   :  { %6818 = vmatpush3.bf16.msra.mxu1 %v7351_v42  ;;  %6823 = vmatprep.mubr.msk.bf16.mxu1 %vm7198_vm3, %v7197_v24 }
 0x6e6   :  { %6819 = vmatprep.subr.bf16.mxu1 %v7197_v24 }
 0x79b   :  { %v6331_v12 = vpop.f32.mrf.mxu0 }
 0x79d   :  { %v6332_v10 = vpop.f32.mrf.mxu0 }
 0x79e   :  { %v6333_v31 = vadd.f32 %v6332_v10, %v6331_v12 }
 0x79f   :  { %v6334_v15 = vpop.f32.mrf.mxu0 }
 0x7a1   :  { %v6335_v16 = vpop.f32.mrf.mxu0 }
 0x7a2   :  { %v6336_v61 = vadd.f32 %v6335_v16, %v6334_v15 }
 0x7a3   :  { %v6337_v19 = vpop.f32.mrf.mxu0 }
 0x7a4   :  { %v6815_v27 = vpop.f32.mrf.mxu1 }
 0x7a5   :  { %v6338_v32 = vpop.f32.mrf.mxu0 }
 0x7a6   :  { %v6339_v34 = vadd.f32 %v6338_v32, %v6337_v19  ;;  %v1152_v35 = vpop.f32.mrf.mxu1 }
 0x7a7   :  { %v1153_v7 = vadd.f32 %v6333_v31, %v1152_v35  ;;  %v6340_v40 = vpop.f32.mrf.mxu0 }
 0x7a8   :  { %v6816_v29 = vpop.f32.mrf.mxu1  ;;  %v1161_v38 = vadd.f32 %v6815_v27, %v6339_v34 }
 0x7a9   :  { %v7873_v63 = vmax.f32 %v1153_v7, 0.0  ;;  %v6341_v25 = vpop.f32.mrf.mxu0 }
 0x7aa   :  { %v6342_v53 = vadd.f32 %v6341_v25, %v6340_v40  ;;  %v1155_v45 = vpop.f32.mrf.mxu1  ;;  %v7879_v41 = vmax.f32 %v1161_v38, 0.0 }
 0x7ab   :  { %v1156_v46 = vadd.f32 %v6336_v61, %v1155_v45  ;;  %1262 = vrot.lane.b32.xlu0 %v7873_v63, %s7190_s14 }
 0x7ac   :  { %v1164_v48 = vadd.f32 %v6816_v29, %v6342_v53 }
 0x7ad   :  { %v7877_v30 = vmax.f32 %v1156_v46, 0.0 }
 0x7ae   :  { %v7881_v47 = vmax.f32 %v1164_v48, 0.0 }
 0x7af   :  { %1264 = vrot.lane.b32.xlu1 %v7877_v30, %s7190_s14  ;;  %1218 = vrot.lane.b32.xlu0 %v7873_v63, %s7192_s16  ;;  %v1232_v50 = vpack.c.bf16 %v7877_v30, %v7873_v63 }
 0x7b0   :  { %v1233_v55 = vpack.c.bf16 %v7881_v47, %v7879_v41 }
 0x7b3   :  { %1220 = vrot.lane.b32.xlu1 %v7877_v30, %s7192_s16  ;;  %1248 = vrot.lane.b32.xlu0 %v7873_v63, %s7189_s1 }
 0x7b7   :  { %1250 = vrot.lane.b32.xlu1 %v7877_v30, %s7189_s1  ;;  %1204 = vrot.lane.b32.xlu0 %v7873_v63, %s7193_s17 }
 0x7bb   :  { %1206 = vrot.lane.b32.xlu1 %v7877_v30, %s7193_s17  ;;  %1234 = vrot.lane.b32.xlu0 %v7873_v63, %s7191_s15 }
 0x7bf   :  { %1236 = vrot.lane.b32.xlu1 %v7877_v30, %s7191_s15  ;;  %1190 = vrot.lane.b32.xlu0 %v7873_v63, %s7194_s18 }
 0x7c3   :  { %1192 = vrot.lane.b32.xlu1 %v7877_v30, %s7194_s18  ;;  %1266 = vrot.lane.b32.xlu0 %v7879_v41, %s7190_s14 }
 0x7c7   :  { %1268 = vrot.lane.b32.xlu1 %v7881_v47, %s7190_s14  ;;  %1222 = vrot.lane.b32.xlu0 %v7879_v41, %s7192_s16 }
 0x7cb   :  { %1224 = vrot.lane.b32.xlu1 %v7881_v47, %s7192_s16  ;;  %1252 = vrot.lane.b32.xlu0 %v7879_v41, %s7189_s1 }
 0x7cf   :  { %1254 = vrot.lane.b32.xlu1 %v7881_v47, %s7189_s1  ;;  %1208 = vrot.lane.b32.xlu0 %v7879_v41, %s7193_s17 }
 0x7d3   :  { %1210 = vrot.lane.b32.xlu1 %v7881_v47, %s7193_s17  ;;  %1238 = vrot.lane.b32.xlu0 %v7879_v41, %s7191_s15 }
 0x7d7   :  { %1240 = vrot.lane.b32.xlu1 %v7881_v47, %s7191_s15  ;;  %1194 = vrot.lane.b32.xlu0 %v7879_v41, %s7194_s18 }
 0x7db   :  { %1196 = vrot.lane.b32.xlu1 %v7881_v47, %s7194_s18  ;;  %1176 = vrot.lane.b32.xlu0 %v7873_v63, %s7195_s19 }
 0x7df   :  { %1178 = vrot.lane.b32.xlu1 %v7877_v30, %s7195_s19  ;;  %1180 = vrot.lane.b32.xlu0 %v7879_v41, %s7195_s19 }
 0x7e3   :  { %1182 = vrot.lane.b32.xlu1 %v7881_v47, %s7195_s19  ;;  %1280 = vrot.lane.b32.xlu0 %v7879_v41, %s7196_s20 }
 0x7e7   :  { %1282 = vrot.lane.b32.xlu1 %v7881_v47, %s7196_s20  ;;  %1276 = vrot.lane.b32.xlu0 %v7873_v63, %s7196_s20  ;;  %v7011_v47 = vld [vmem:[%s10522_s6 + $0x18] ss:$12 sps:$4 sm:$0xff]   ;;  %v7014_v63 = vld [vmem:[%s10522_s6 + $0x20] ss:$12 sps:$4 sm:$0xff]  }
 0x7eb   :  { %1278 = vrot.lane.b32.xlu1 %v7877_v30, %s7196_s20 }
 0x81d   :  { %v1263_v52 = vpop.permute.xlu0 %1262 }
 0x81e   :  { %v1270_v27 = vmul.f32 %v1263_v52, %v7306_v49 }
 0x821   :  { %v1265_v54 = vpop.permute.xlu1 %1264  ;;  %v1219_v60 = vpop.permute.xlu0 %1218 }
 0x822   :  { %v1271_v12 = vmul.f32 %v1265_v54, %v7306_v49  ;;  %v1226_v40 = vmul.f32 %v1219_v60, %v7319_v5 }
 0x824   :  { %v1274_v34 = vpack.c.bf16 %v1271_v12, %v1270_v27 }
 0x825   :  { %v1221_v33 = vpop.permute.xlu1 %1220  ;;  %v1249_v62 = vpop.permute.xlu0 %1248 }
 0x826   :  { %v1227_v31 = vmul.f32 %v1221_v33, %v7319_v5  ;;  %v1256_v52 = vmul.f32 %v1249_v62, %v7308_v51 }
 0x828   :  { %v1230_v25 = vpack.c.bf16 %v1227_v31, %v1226_v40 }
 0x829   :  { %v1251_v1 = vpop.permute.xlu1 %1250  ;;  %v1205_v44 = vpop.permute.xlu0 %1204 }
 0x82a   :  { %v1257_v53 = vmul.f32 %v1251_v1, %v7308_v51 }
 0x82c   :  { %v1260_v33 = vpack.c.bf16 %v1257_v53, %v1256_v52 }
 0x82d   :  { %v1207_v21 = vpop.permute.xlu1 %1206  ;;  %v1235_v11 = vpop.permute.xlu0 %1234 }
 0x82e   :  { %v1213_v54 = vmul.f32 %v1207_v21, %v7326_v13 }
 0x831   :  { %v1237_v0 = vpop.permute.xlu1 %1236  ;;  %v1191_v2 = vpop.permute.xlu0 %1190 }
 0x832   :  { %v1243_v12 = vmul.f32 %v1237_v0, %v7312_v56 }
 0x835   :  { %v1193_v3 = vpop.permute.xlu1 %1192  ;;  %v1267_v43 = vpop.permute.xlu0 %1266 }
 0x836   :  { %v1272_v6 = vmul.f32 %v1267_v43, %v7306_v49 }
 0x839   :  { %v1269_v4 = vpop.permute.xlu1 %1268  ;;  %v1223_v17 = vpop.permute.xlu0 %1222 }
 0x83a   :  { %v1273_v22 = vmul.f32 %v1269_v4, %v7306_v49  ;;  %v1228_v16 = vmul.f32 %v1223_v17, %v7319_v5  ;;  %v1212_v17 = vmul.f32 %v1205_v44, %v7326_v13  ;;  %v1199_v44 = vmul.f32 %v1193_v3, %v7329_v14 }
 0x83c   :  { %v1275_v8 = vpack.c.bf16 %v1273_v22, %v1272_v6  ;;  %v1216_v22 = vpack.c.bf16 %v1213_v54, %v1212_v17 }
 0x83d   :  { %v1225_v10 = vpop.permute.xlu1 %1224  ;;  %v1253_v15 = vpop.permute.xlu0 %1252 }
 0x83e   :  { %v1229_v19 = vmul.f32 %v1225_v10, %v7319_v5  ;;  %6348 = vmatprep.subr.bf16.mxu0 %v1275_v8  ;;  %v1258_v29 = vmul.f32 %v1253_v15, %v7308_v51 }
 0x840   :  { %v1231_v32 = vpack.c.bf16 %v1229_v19, %v1228_v16  ;;  %v1242_v16 = vmul.f32 %v1235_v11, %v7312_v56 }
 0x841   :  { %v1255_v35 = vpop.permute.xlu1 %1254  ;;  %v1209_v7 = vpop.permute.xlu0 %1208 }
 0x842   :  { %v1259_v61 = vmul.f32 %v1255_v35, %v7308_v51  ;;  %6349 = vmatpush3.bf16.msra.mxu0 %v1231_v32  ;;  %v1214_v48 = vmul.f32 %v1209_v7, %v7326_v13  ;;  %v1246_v27 = vpack.c.bf16 %v1243_v12, %v1242_v16 }
 0x843   :  { %6350 = vmatprep.subr.bf16.mxu0 %v1274_v34  ;;  %v1198_v34 = vmul.f32 %v1191_v2, %v7329_v14 }
 0x844   :  { %v1261_v38 = vpack.c.bf16 %v1259_v61, %v1258_v29 }
 0x845   :  { %v1211_v45 = vpop.permute.xlu1 %1210  ;;  %v1239_v46 = vpop.permute.xlu0 %1238  ;;  %v1202_v0 = vpack.c.bf16 %v1199_v44, %v1198_v34 }
 0x846   :  { %v1215_v9 = vmul.f32 %v1211_v45, %v7326_v13  ;;  %6351 = vmatpush3.bf16.msra.mxu0 %v1230_v25  ;;  %v1244_v1 = vmul.f32 %v1239_v46, %v7312_v56 }
 0x847   :  { %6352 = vmatprep.subr.bf16.mxu0 %v1261_v38 }
 0x848   :  { %v1217_v60 = vpack.c.bf16 %v1215_v9, %v1214_v48 }
 0x849   :  { %v1241_v43 = vpop.permute.xlu1 %1240  ;;  %v1195_v4 = vpop.permute.xlu0 %1194 }
 0x84a   :  { %v1245_v6 = vmul.f32 %v1241_v43, %v7312_v56  ;;  %6353 = vmatpush3.bf16.msra.mxu0 %v1217_v60  ;;  %v1200_v21 = vmul.f32 %v1195_v4, %v7329_v14 }
 0x84b   :  { %6354 = vmatprep.subr.bf16.mxu0 %v1260_v33 }
 0x84c   :  { %v1247_v8 = vpack.c.bf16 %v1245_v6, %v1244_v1 }
 0x84d   :  { %v1197_v62 = vpop.permute.xlu1 %1196  ;;  %v1177_v10 = vpop.permute.xlu0 %1176 }
 0x84e   :  { %v1201_v15 = vmul.f32 %v1197_v62, %v7329_v14  ;;  %6355 = vmatpush3.bf16.msra.mxu0 %v1216_v22  ;;  %v1184_v2 = vmul.f32 %v1177_v10, %v7336_v26  ;;  %v1410_v10 = vstv %s5997_s13  ;;  %s6071_s13 = sld [smem:[#allocation2 + $0x4]] }
 0x84f   :  { %6356 = vmatprep.subr.bf16.mxu0 %v1247_v8  ;;  %v1411_v16 = vadd.f32 %v1410_v10, %v7254_v18 }
 0x850   :  { %v1203_v19 = vpack.c.bf16 %v1201_v15, %v1200_v21 }
 0x851   :  { %v1179_v31 = vpop.permute.xlu1 %1178  ;;  %v1181_v32 = vpop.permute.xlu0 %1180  ;;  %7145 = vrcp.f32 %v1411_v16 }
 0x852   :  { %6357 = vmatpush3.bf16.msra.mxu0 %v1203_v19  ;;  %v1186_v40 = vmul.f32 %v1181_v32, %v7336_v26  ;;  %v1185_v11 = vmul.f32 %v1179_v31, %v7336_v26 }
 0x853   :  { %6358 = vmatprep.subr.bf16.mxu0 %v1246_v27 }
 0x854   :  { %v1188_v45 = vpack.c.bf16 %v1185_v11, %v1184_v2 }
 0x855   :  { %v1183_v35 = vpop.permute.xlu1 %1182  ;;  %v1281_v7 = vpop.permute.xlu0 %1280 }
 0x856   :  { %v1187_v29 = vmul.f32 %v1183_v35, %v7336_v26  ;;  %6359 = vmatpush3.bf16.msra.mxu0 %v1202_v0  ;;  %v1286_v25 = vmul.f32 %v7852_v23, %v1281_v7 }
 0x857   :  { %6360 = vmatprep.subr.bf16.mxu0 %v1233_v55 }
 0x858   :  { %v1189_v3 = vpack.c.bf16 %v1187_v29, %v1186_v40 }
 0x859   :  { %v1283_v61 = vpop.permute.xlu1 %1282  ;;  %v1277_v53 = vpop.permute.xlu0 %1276 }
 0x85a   :  { %v1287_v38 = vmul.f32 %v7852_v23, %v1283_v61  ;;  %6361 = vmatpush3.bf16.msra.mxu0 %v1189_v3  ;;  %v1284_v55 = vmul.f32 %v7852_v23, %v1277_v53 }
 0x85b   :  { %6362 = vmatprep.subr.bf16.mxu0 %v1232_v50 }
 0x85c   :  { %v1289_v46 = vpack.c.bf16 %v1287_v38, %v1286_v25 }
 0x85d   :  { %v1279_v41 = vpop.permute.xlu1 %1278 }
 0x85e   :  { %v1285_v48 = vmul.f32 %v7852_v23, %v1279_v41  ;;  %6363 = vmatpush3.bf16.msra.mxu0 %v1188_v45  ;;  %6820 = vmatpush3.bf16.msra.mxu1 %v1289_v46  ;;  %v7146_v35 = vpop.eup %7145 }
 0x85f   :  { %6821 = vmatprep.subr.bf16.mxu1 %v7197_v24 }
 0x860   :  { %v1288_v9 = vpack.c.bf16 %v1285_v48, %v1284_v55 }
 0x861   :  { %1341 = vmatmul.mubr.bf16.vlgmr.msra.gmra.mxu0 %v7011_v47 }
 0x862   :  { %6822 = vmatpush3.bf16.msra.mxu1 %v1288_v9 }
 0x863   :  { %1506 = vmatprep.subr.bf16.mxu1 %v7188_v36 }
 0x865   :  { %6824 = vmatmul.mubr.msk.bf16.vlgmr.msra.gmra.mxu1 %vm415_vm2, %v7014_v63 }
 0x921   :  { %v6364_v30 = vpop.f32.mrf.mxu0 }
 0x923   :  { %v6365_v50 = vpop.f32.mrf.mxu0 }
 0x924   :  { %v6366_v52 = vadd.f32 %v6365_v50, %v6364_v30 }
 0x925   :  { %v6367_v54 = vpop.f32.mrf.mxu0  ;;  %v1383_v60 = vpop.f32.mrf.mxu1 }
 0x926   :  { %v1384_v33 = vadd.f32 %v6366_v52, %v1383_v60 }
 0x927   :  { %v6368_v43 = vpop.f32.mrf.mxu0  ;;  %v6825_v4 = vpop.f32.mrf.mxu1 }
 0x928   :  { %v1390_v17 = vsub.f32 %v7663_v57, %v1384_v33  ;;  %5995 = vst [vmem:[%s10523_s7 + $0x10] sm:$0xff] %v1384_v33  ;;  %v6369_v1 = vadd.f32 %v6368_v43, %v6367_v54 }
 0x929   :  { %v1386_v6 = vpop.f32.mrf.mxu1 }
 0x92a   :  { %v8004_v22 = vsub.f32 %v7637_v28, %v1390_v17  ;;  %v1387_v8 = vadd.f32 %v6369_v1, %v1386_v6 }
 0x92b   :  { %v6826_v12 = vpop.f32.mrf.mxu1 }
 0x92c   :  { %v1391_v62 = vsub.f32 %v7665_v58, %v1387_v8  ;;  %5996 = vst [vmem:[%s10523_s7 + $0x18] sm:$0xff] %v1387_v8  ;;  %v1398_v57 = vadd.f32 %v8004_v22, %v1384_v33 }
 0x92e   :  { %v8012_v21 = vsub.f32 %v7644_v39, %v1391_v62  ;;  %v1400_v28 = vmul.f32 %v7651_v37, %v1398_v57 }
 0x930   :  { %v1399_v15 = vadd.f32 %v8012_v21, %v1387_v8 }
 0x932   :  { %v1401_v44 = vmul.f32 %v7657_v59, %v1399_v15 }
 0x934   :  { %v1402_v19 = vadd.f32 %v1401_v44, %v1400_v28 }
 0x936   :  { %v1403_v58 = vrot.slane %v1402_v19, 4 }
 0x938   :  { %v1404_v27 = vadd.f32 %v1403_v58, %v1402_v19 }
 0x93a   :  { %v1405_v31 = vrot.slane %v1404_v27, 2 }
 0x93c   :  { %v1406_v32 = vadd.f32 %v1405_v31, %v1404_v27 }
 0x93e   :  { %v1407_v34 = vrot.slane %v1406_v32, 1 }
 0x940   :  { %v1408_v0 = vadd.f32 %v1407_v34, %v1406_v32 }
 0x942   :  { %v1409_v39 = vsub.f32 %v7256_v20, %v1408_v0 }
 0x944   :  { %v1413_v7 = vmul.f32 %v7146_v35, %v1409_v39 }
 0x946   :  { %v1414_v40 = vmul.f32 %v7651_v37, %v1413_v7  ;;  %v1415_v29 = vmul.f32 %v7657_v59, %v1413_v7  ;;  %v7015_v37 = vld [vmem:[%s10520_s4 + $0x44] ss:$8 sps:$4 sm:$0xff]   ;;  %v7017_v7 = vld [vmem:[%s10520_s4 + $0x40] ss:$8 sps:$4 sm:$0xff]  }
 0x947   :  { %6006 = vmatprep.mubr.msk.bf16.mxu1 %vm197_vm0, %v7015_v37 }
 0x948   :  { %v8021_v11 = vadd.f32 %v1414_v40, %v1398_v57  ;;  %v8023_v3 = vadd.f32 %v1415_v29, %v1399_v15  ;;  %v7018_v40 = vld [vmem:[%s10520_s4 + $0x54] ss:$8 sps:$4 sm:$0xff]   ;;  %v7020_v29 = vld [vmem:[%s10520_s4 + $0x50] ss:$8 sps:$4 sm:$0xff]  }
 0x94a   :  { %v1418_v61 = vsub.f32 %v8021_v11, %v8004_v22  ;;  %v1419_v2 = vsub.f32 %v8023_v3, %v8012_v21 }
 0x94c   :  { %1470 = vrot.lane.b32.xlu1 %v1419_v2, %s7190_s14  ;;  %1468 = vrot.lane.b32.xlu0 %v1418_v61, %s7190_s14  ;;  %v1453_v25 = vpack.c.bf16 %v1419_v2, %v1418_v61 }
 0x950   :  { %1463 = vrot.lane.b32.xlu1 %v1419_v2, %s7189_s1  ;;  %1461 = vrot.lane.b32.xlu0 %v1418_v61, %s7189_s1 }
 0x954   :  { %1456 = vrot.lane.b32.xlu1 %v1419_v2, %s7191_s15  ;;  %1454 = vrot.lane.b32.xlu0 %v1418_v61, %s7191_s15 }
 0x958   :  { %1448 = vrot.lane.b32.xlu1 %v1419_v2, %s7192_s16  ;;  %1446 = vrot.lane.b32.xlu0 %v1418_v61, %s7192_s16 }
 0x95c   :  { %1441 = vrot.lane.b32.xlu1 %v1419_v2, %s7193_s17  ;;  %1439 = vrot.lane.b32.xlu0 %v1418_v61, %s7193_s17 }
 0x960   :  { %1434 = vrot.lane.b32.xlu1 %v1419_v2, %s7194_s18  ;;  %1432 = vrot.lane.b32.xlu0 %v1418_v61, %s7194_s18 }
 0x964   :  { %1427 = vrot.lane.b32.xlu1 %v1419_v2, %s7195_s19  ;;  %1425 = vrot.lane.b32.xlu0 %v1418_v61, %s7195_s19 }
 0x968   :  { %1477 = vrot.lane.b32.xlu1 %v1419_v2, %s7196_s20  ;;  %1475 = vrot.lane.b32.xlu0 %v1418_v61, %s7196_s20 }
 0x9be   :  { %v1471_v59 = vpop.permute.xlu1 %1470  ;;  %v1469_v38 = vpop.permute.xlu0 %1468 }
 0x9bf   :  { %v1473_v53 = vmul.f32 %v1471_v59, %v7306_v49  ;;  %v1472_v45 = vmul.f32 %v1469_v38, %v7306_v49 }
 0x9c1   :  { %v1474_v46 = vpack.c.bf16 %v1473_v53, %v1472_v45 }
 0x9c2   :  { %v1464_v41 = vpop.permute.xlu1 %1463  ;;  %v1462_v47 = vpop.permute.xlu0 %1461 }
 0x9c3   :  { %v1466_v55 = vmul.f32 %v1464_v41, %v7308_v51  ;;  %v1465_v48 = vmul.f32 %v1462_v47, %v7308_v51  ;;  %1507 = vmatpush1.bf16.msra.mxu1 %v1474_v46 }
 0x9c4   :  { %1508 = vmatprep.subr.bf16.mxu1 %v7188_v36 }
 0x9c5   :  { %v1467_v9 = vpack.c.bf16 %v1466_v55, %v1465_v48 }
 0x9c6   :  { %v1457_v63 = vpop.permute.xlu1 %1456  ;;  %v1455_v30 = vpop.permute.xlu0 %1454 }
 0x9c7   :  { %v1459_v50 = vmul.f32 %v1457_v63, %v7312_v56  ;;  %v1458_v52 = vmul.f32 %v1455_v30, %v7312_v56  ;;  %1509 = vmatpush1.bf16.msra.mxu1 %v1467_v9  ;;  %v7023_v63 = vld [vmem:[%s10521_s5 + $0x64] ss:$12 sps:$4 sm:$0xff]  }
 0x9c8   :  { %1510 = vmatprep.subr.bf16.mxu1 %v7188_v36  ;;  %1750 = vmatprep.mubr.bf16.mxu0 %v7023_v63 }
 0x9c9   :  { %v1460_v54 = vpack.c.bf16 %v1459_v50, %v1458_v52 }
 0x9ca   :  { %v1449_v60 = vpop.permute.xlu1 %1448  ;;  %v1447_v33 = vpop.permute.xlu0 %1446 }
 0x9cb   :  { %1511 = vmatpush1.bf16.msra.mxu1 %v1460_v54  ;;  %v1451_v43 = vmul.f32 %v1449_v60, %v7319_v5  ;;  %v1450_v4 = vmul.f32 %v1447_v33, %v7319_v5 }
 0x9cc   :  { %1512 = vmatprep.subr.bf16.mxu1 %v7188_v36 }
 0x9cd   :  { %v1452_v6 = vpack.c.bf16 %v1451_v43, %v1450_v4 }
 0x9ce   :  { %v1442_v17 = vpop.permute.xlu1 %1441  ;;  %v1440_v1 = vpop.permute.xlu0 %1439 }
 0x9cf   :  { %1513 = vmatpush1.bf16.msra.mxu1 %v1453_v25  ;;  %v1444_v8 = vmul.f32 %v1442_v17, %v7326_v13  ;;  %v1443_v12 = vmul.f32 %v1440_v1, %v7326_v13 }
 0x9d0   :  { %1514 = vmatprep.subr.bf16.mxu1 %v7188_v36 }
 0x9d1   :  { %v1445_v57 = vpack.c.bf16 %v1444_v8, %v1443_v12 }
 0x9d2   :  { %v1435_v62 = vpop.permute.xlu1 %1434  ;;  %v1433_v10 = vpop.permute.xlu0 %1432 }
 0x9d3   :  { %1515 = vmatpush1.bf16.msra.mxu1 %v1452_v6  ;;  %v1437_v15 = vmul.f32 %v1435_v62, %v7329_v14  ;;  %v1436_v16 = vmul.f32 %v1433_v10, %v7329_v14 }
 0x9d4   :  { %1516 = vmatprep.subr.bf16.mxu1 %v7188_v36 }
 0x9d5   :  { %v1438_v19 = vpack.c.bf16 %v1437_v15, %v1436_v16 }
 0x9d6   :  { %v1428_v28 = vpop.permute.xlu1 %1427  ;;  %v1426_v44 = vpop.permute.xlu0 %1425 }
 0x9d7   :  { %1517 = vmatpush1.bf16.msra.mxu1 %v1445_v57  ;;  %v1430_v58 = vmul.f32 %v1428_v28, %v7336_v26  ;;  %v1429_v27 = vmul.f32 %v1426_v44, %v7336_v26 }
 0x9d8   :  { %1518 = vmatprep.subr.bf16.mxu1 %v7188_v36 }
 0x9d9   :  { %v1431_v31 = vpack.c.bf16 %v1430_v58, %v1429_v27 }
 0x9da   :  { %v1478_v32 = vpop.permute.xlu1 %1477  ;;  %v1476_v34 = vpop.permute.xlu0 %1475 }
 0x9db   :  { %1519 = vmatpush1.bf16.msra.mxu1 %v1438_v19  ;;  %v1480_v0 = vmul.f32 %v7852_v23, %v1478_v32  ;;  %v1479_v35 = vmul.f32 %v7852_v23, %v1476_v34 }
 0x9dc   :  { %1520 = vmatprep.subr.bf16.mxu1 %v7188_v36 }
 0x9dd   :  { %v1481_v39 = vpack.c.bf16 %v1480_v0, %v1479_v35 }
 0x9df   :  { %1521 = vmatpush1.bf16.msra.mxu1 %v1431_v31 }
 0x9e0   :  { %1534 = vmatprep.subr.bf16.mxu1 %v7188_v36 }
 0x9e3   :  { %1535 = vmatpush2.bf16.msra.mxu1 %v7351_v42 }
 0x9e4   :  { %1536 = vmatprep.subr.bf16.mxu1 %v7188_v36 }
 0x9e7   :  { %1537 = vmatpush2.bf16.msra.mxu1 %v1481_v39 }
 0x9ea   :  { %1539 = vmatmul.mubr.bf16.vlgmr.msra.gmra.mxu1 %v7017_v7 }
 0x9eb   :  { %6007 = vmatprep.mubr.msk.bf16.mxu1 %vm197_vm0, %v7018_v40 }
 0x9f2   :  { %1547 = vmatmul.mubr.bf16.gmra.mxu1 %v7020_v29 }
 0xaaa   :  { %v1540_v61 = vpop.f32.mrf.mxu1 }
 0xaab   :  { %v8085_v2 = vmax.f32 %v1540_v61, 0.0 }
 0xaac   :  { %v1542_v25 = vpop.f32.mrf.mxu1 }
 0xaad   :  { %1654 = vrot.lane.b32.xlu0 %v8085_v2, %s7190_s14 }
 0xaae   :  { %v1543_v37 = vpop.f32.mrf.mxu1 }
 0xaaf   :  { %v8089_v59 = vmax.f32 %v1543_v37, 0.0 }
 0xab0   :  { %v1545_v38 = vpop.f32.mrf.mxu1 }
 0xab1   :  { %1610 = vrot.lane.b32.xlu0 %v8085_v2, %s7192_s16  ;;  %1656 = vrot.lane.b32.xlu1 %v8089_v59, %s7190_s14  ;;  %v1624_v53 = vpack.c.bf16 %v8089_v59, %v8085_v2 }
 0xab2   :  { %v1548_v45 = vpop.f32.mrf.mxu1 }
 0xab3   :  { %v8101_v41 = vmax.f32 %v1548_v45, 0.0 }
 0xab4   :  { %v1550_v46 = vpop.f32.mrf.mxu1 }
 0xab5   :  { %1640 = vrot.lane.b32.xlu0 %v8085_v2, %s7189_s1  ;;  %1612 = vrot.lane.b32.xlu1 %v8089_v59, %s7192_s16 }
 0xab6   :  { %v1551_v47 = vpop.f32.mrf.mxu1 }
 0xab7   :  { %v8103_v55 = vmax.f32 %v1551_v47, 0.0 }
 0xab8   :  { %v1553_v48 = vpop.f32.mrf.mxu1 }
 0xab9   :  { %1596 = vrot.lane.b32.xlu0 %v8085_v2, %s7193_s17  ;;  %1642 = vrot.lane.b32.xlu1 %v8089_v59, %s7189_s1  ;;  %v1625_v9 = vpack.c.bf16 %v8103_v55, %v8101_v41 }
 0xabd   :  { %1626 = vrot.lane.b32.xlu0 %v8085_v2, %s7191_s15  ;;  %1598 = vrot.lane.b32.xlu1 %v8089_v59, %s7193_s17 }
 0xac1   :  { %1628 = vrot.lane.b32.xlu1 %v8089_v59, %s7191_s15  ;;  %1658 = vrot.lane.b32.xlu0 %v8101_v41, %s7190_s14 }
 0xac5   :  { %1614 = vrot.lane.b32.xlu0 %v8101_v41, %s7192_s16  ;;  %1660 = vrot.lane.b32.xlu1 %v8103_v55, %s7190_s14 }
 0xac9   :  { %1644 = vrot.lane.b32.xlu0 %v8101_v41, %s7189_s1  ;;  %1616 = vrot.lane.b32.xlu1 %v8103_v55, %s7192_s16 }
 0xacd   :  { %1600 = vrot.lane.b32.xlu0 %v8101_v41, %s7193_s17  ;;  %1646 = vrot.lane.b32.xlu1 %v8103_v55, %s7189_s1 }
 0xad1   :  { %1630 = vrot.lane.b32.xlu0 %v8101_v41, %s7191_s15  ;;  %1602 = vrot.lane.b32.xlu1 %v8103_v55, %s7193_s17 }
 0xad5   :  { %1586 = vrot.lane.b32.xlu0 %v8101_v41, %s7194_s18  ;;  %1632 = vrot.lane.b32.xlu1 %v8103_v55, %s7191_s15 }
 0xad9   :  { %1582 = vrot.lane.b32.xlu0 %v8085_v2, %s7194_s18  ;;  %1588 = vrot.lane.b32.xlu1 %v8103_v55, %s7194_s18 }
 0xadd   :  { %1572 = vrot.lane.b32.xlu0 %v8101_v41, %s7195_s19  ;;  %1584 = vrot.lane.b32.xlu1 %v8089_v59, %s7194_s18 }
 0xae1   :  { %1568 = vrot.lane.b32.xlu0 %v8085_v2, %s7195_s19  ;;  %1574 = vrot.lane.b32.xlu1 %v8103_v55, %s7195_s19 }
 0xae5   :  { %1672 = vrot.lane.b32.xlu0 %v8101_v41, %s7196_s20  ;;  %1570 = vrot.lane.b32.xlu1 %v8089_v59, %s7195_s19 }
 0xae9   :  { %1668 = vrot.lane.b32.xlu0 %v8085_v2, %s7196_s20  ;;  %1674 = vrot.lane.b32.xlu1 %v8103_v55, %s7196_s20 }
 0xaed   :  { %1670 = vrot.lane.b32.xlu1 %v8089_v59, %s7196_s20 }
 0xb1f   :  { %v1655_v30 = vpop.permute.xlu0 %1654 }
 0xb20   :  { %v1662_v58 = vmul.f32 %v1655_v30, %v7306_v49 }
 0xb23   :  { %v1611_v50 = vpop.permute.xlu0 %1610  ;;  %v1657_v52 = vpop.permute.xlu1 %1656 }
 0xb24   :  { %v1663_v15 = vmul.f32 %v1657_v52, %v7306_v49  ;;  %v1618_v35 = vmul.f32 %v1611_v50, %v7319_v5 }
 0xb26   :  { %v1666_v32 = vpack.c.bf16 %v1663_v15, %v1662_v58 }
 0xb27   :  { %v1641_v54 = vpop.permute.xlu0 %1640  ;;  %v1613_v60 = vpop.permute.xlu1 %1612 }
 0xb28   :  { %v1619_v27 = vmul.f32 %v1613_v60, %v7319_v5  ;;  %v1648_v46 = vmul.f32 %v1641_v54, %v7308_v51 }
 0xb2a   :  { %v1622_v40 = vpack.c.bf16 %v1619_v27, %v1618_v35 }
 0xb2b   :  { %v1597_v33 = vpop.permute.xlu0 %1596  ;;  %v1643_v43 = vpop.permute.xlu1 %1642 }
 0xb2c   :  { %v1649_v61 = vmul.f32 %v1643_v43, %v7308_v51  ;;  %v1604_v52 = vmul.f32 %v1597_v33, %v7326_v13 }
 0xb2e   :  { %v1652_v63 = vpack.c.bf16 %v1649_v61, %v1648_v46 }
 0xb2f   :  { %v1627_v4 = vpop.permute.xlu0 %1626  ;;  %v1599_v17 = vpop.permute.xlu1 %1598 }
 0xb30   :  { %v1605_v47 = vmul.f32 %v1599_v17, %v7326_v13 }
 0xb33   :  { %v1629_v1 = vpop.permute.xlu1 %1628  ;;  %v1659_v6 = vpop.permute.xlu0 %1658 }
 0xb34   :  { %v1664_v62 = vmul.f32 %v1659_v6, %v7306_v49  ;;  %v1608_v6 = vpack.c.bf16 %v1605_v47, %v1604_v52 }
 0xb37   :  { %v1615_v8 = vpop.permute.xlu0 %1614  ;;  %v1661_v12 = vpop.permute.xlu1 %1660 }
 0xb38   :  { %v1665_v10 = vmul.f32 %v1661_v12, %v7306_v49  ;;  %v1620_v44 = vmul.f32 %v1615_v8, %v7319_v5  ;;  %v1635_v12 = vmul.f32 %v1629_v1, %v7312_v56 }
 0xb3a   :  { %v1667_v57 = vpack.c.bf16 %v1665_v10, %v1664_v62 }
 0xb3b   :  { %v1645_v16 = vpop.permute.xlu0 %1644  ;;  %v1617_v28 = vpop.permute.xlu1 %1616 }
 0xb3c   :  { %v1621_v19 = vmul.f32 %v1617_v28, %v7319_v5  ;;  %6374 = vmatprep.subr.bf16.mxu0 %v1667_v57  ;;  %v1650_v39 = vmul.f32 %v1645_v16, %v7308_v51  ;;  %v1634_v57 = vmul.f32 %v1627_v4, %v7312_v56 }
 0xb3e   :  { %v1623_v31 = vpack.c.bf16 %v1621_v19, %v1620_v44  ;;  %v1638_v15 = vpack.c.bf16 %v1635_v12, %v1634_v57 }
 0xb3f   :  { %v1601_v34 = vpop.permute.xlu0 %1600  ;;  %v1647_v0 = vpop.permute.xlu1 %1646 }
 0xb40   :  { %v1651_v7 = vmul.f32 %v1647_v0, %v7308_v51  ;;  %6375 = vmatpush3.bf16.msra.mxu0 %v1623_v31  ;;  %v1606_v38 = vmul.f32 %v1601_v34, %v7326_v13 }
 0xb41   :  { %6376 = vmatprep.subr.bf16.mxu0 %v1666_v32 }
 0xb42   :  { %v1653_v29 = vpack.c.bf16 %v1651_v7, %v1650_v39 }
 0xb43   :  { %v1631_v25 = vpop.permute.xlu0 %1630  ;;  %v1603_v37 = vpop.permute.xlu1 %1602 }
 0xb44   :  { %v1607_v45 = vmul.f32 %v1603_v37, %v7326_v13  ;;  %6377 = vmatpush3.bf16.msra.mxu0 %v1622_v40  ;;  %v1636_v60 = vmul.f32 %v1631_v25, %v7312_v56 }
 0xb45   :  { %6378 = vmatprep.subr.bf16.mxu0 %v1653_v29  ;;  %v7021_v29 = vld [vmem:[%s10521_s5 + $0x60] ss:$12 sps:$4 sm:$0xff]  }
 0xb46   :  { %v1609_v48 = vpack.c.bf16 %v1607_v45, %v1606_v38  ;;  %v7026_v38 = vld [vmem:[%s10521_s5 + $0x78] ss:$12 sps:$4 sm:$0xff]   ;;  %v7027_v45 = vld [vmem:[%s10521_s5 + $0x68] ss:$12 sps:$4 sm:$0xff]  }
 0xb47   :  { %v1587_v30 = vpop.permute.xlu0 %1586  ;;  %v1633_v50 = vpop.permute.xlu1 %1632 }
 0xb48   :  { %v1637_v43 = vmul.f32 %v1633_v50, %v7312_v56  ;;  %6379 = vmatpush3.bf16.msra.mxu0 %v1609_v48  ;;  %v1592_v17 = vmul.f32 %v1587_v30, %v7329_v14 }
 0xb49   :  { %6380 = vmatprep.subr.bf16.mxu0 %v1652_v63 }
 0xb4a   :  { %v1639_v8 = vpack.c.bf16 %v1637_v43, %v1636_v60 }
 0xb4b   :  { %v1583_v54 = vpop.permute.xlu0 %1582  ;;  %v1589_v62 = vpop.permute.xlu1 %1588 }
 0xb4c   :  { %v1593_v10 = vmul.f32 %v1589_v62, %v7329_v14  ;;  %6381 = vmatpush3.bf16.msra.mxu0 %v1608_v6  ;;  %v1590_v44 = vmul.f32 %v1583_v54, %v7329_v14 }
 0xb4d   :  { %6382 = vmatprep.subr.bf16.mxu0 %v1639_v8 }
 0xb4e   :  { %v1595_v33 = vpack.c.bf16 %v1593_v10, %v1592_v17 }
 0xb4f   :  { %v1573_v16 = vpop.permute.xlu0 %1572  ;;  %v1585_v28 = vpop.permute.xlu1 %1584 }
 0xb50   :  { %v1591_v19 = vmul.f32 %v1585_v28, %v7329_v14  ;;  %6383 = vmatpush3.bf16.msra.mxu0 %v1595_v33  ;;  %v1578_v31 = vmul.f32 %v1573_v16, %v7336_v26 }
 0xb51   :  { %6384 = vmatprep.subr.bf16.mxu0 %v1638_v15 }
 0xb52   :  { %v1594_v1 = vpack.c.bf16 %v1591_v19, %v1590_v44 }
 0xb53   :  { %v1569_v58 = vpop.permute.xlu0 %1568  ;;  %v1575_v27 = vpop.permute.xlu1 %1574 }
 0xb54   :  { %v1579_v32 = vmul.f32 %v1575_v27, %v7336_v26  ;;  %6385 = vmatpush3.bf16.msra.mxu0 %v1594_v1  ;;  %v1576_v35 = vmul.f32 %v1569_v58, %v7336_v26 }
 0xb55   :  { %6386 = vmatprep.subr.bf16.mxu0 %v1625_v9  ;;  %v7024_v9 = vld [vmem:[%s10521_s5 + $0x7c] ss:$12 sps:$4 sm:$0xff]  }
 0xb56   :  { %v1581_v4 = vpack.c.bf16 %v1579_v32, %v1578_v31  ;;  %v7031_v31 = vld [vmem:[%s10522_s6 + $0x34] ss:$12 sps:$4 sm:$0xff]  }
 0xb57   :  { %v1673_v34 = vpop.permute.xlu0 %1672  ;;  %v1571_v0 = vpop.permute.xlu1 %1570  ;;  %1989 = vmatprep.mubr.bf16.mxu1 %v7031_v31 }
 0xb58   :  { %v1577_v39 = vmul.f32 %v1571_v0, %v7336_v26  ;;  %6387 = vmatpush3.bf16.msra.mxu0 %v1581_v4  ;;  %v1678_v41 = vmul.f32 %v7852_v23, %v1673_v34 }
 0xb59   :  { %6388 = vmatprep.subr.bf16.mxu0 %v1624_v53 }
 0xb5a   :  { %v1580_v7 = vpack.c.bf16 %v1577_v39, %v1576_v35 }
 0xb5b   :  { %v1675_v40 = vpop.permute.xlu1 %1674  ;;  %v1669_v61 = vpop.permute.xlu0 %1668 }
 0xb5c   :  { %v1679_v55 = vmul.f32 %v7852_v23, %v1675_v40  ;;  %6389 = vmatpush3.bf16.msra.mxu0 %v1580_v7  ;;  %v1676_v53 = vmul.f32 %v7852_v23, %v1669_v61 }
 0xb5d   :  { %6827 = vmatprep.subr.bf16.mxu0 %v7351_v42 }
 0xb5e   :  { %v1681_v2 = vpack.c.bf16 %v1679_v55, %v1678_v41 }
 0xb5f   :  { %v1671_v59 = vpop.permute.xlu1 %1670  ;;  %1751 = vmatmul.mubr.bf16.vlgmr.msra.gmra.mxu0 %v7021_v29 }
 0xb60   :  { %v1677_v25 = vmul.f32 %v7852_v23, %v1671_v59  ;;  %6828 = vmatpush3.bf16.msra.mxu0 %v7351_v42  ;;  %1758 = vmatprep.mubr.bf16.mxu0 %v7024_v9  ;;  %v7028_v23 = vld [vmem:[%s10521_s5 + $0x80] ss:$12 sps:$4 sm:$0xff]  }
 0xb61   :  { %6829 = vmatprep.subr.bf16.mxu0 %v1681_v2 }
 0xb62   :  { %v1680_v37 = vpack.c.bf16 %v1677_v25, %v1676_v53 }
 0xb64   :  { %6830 = vmatpush3.bf16.msra.mxu0 %v1681_v2 }
 0xb65   :  { %6831 = vmatprep.subr.bf16.mxu0 %v1680_v37 }
 0xb67   :  { %1759 = vmatmul.mubr.bf16.gmra.mxu0 %v7026_v38 }
 0xb68   :  { %6832 = vmatpush3.bf16.msra.mxu0 %v1680_v37  ;;  %6833 = vmatprep.mubr.msk.bf16.mxu0 %vm415_vm2, %v7027_v45 }
 0xb69   :  { %6837 = vmatprep.subr.bf16.mxu0 %v7197_v24 }
 0xb6f   :  { %6834 = vmatmul.mubr.msk.bf16.vlgmr.msra.gmra.mxu0 %vm415_vm2, %v7028_v23 }
 0xb70   :  { %6838 = vmatpush3.bf16.msra.mxu0 %v7351_v42  ;;  %6843 = vmatprep.mubr.msk.bf16.mxu0 %vm7198_vm3, %v7197_v24 }
 0xb71   :  { %6839 = vmatprep.subr.bf16.mxu0 %v7197_v24 }
 0xc1f   :  { %v6390_v46 = vpop.f32.mrf.mxu0 }
 0xc21   :  { %v6391_v47 = vpop.f32.mrf.mxu0 }
 0xc22   :  { %v6392_v54 = vadd.f32 %v6391_v47, %v6390_v46 }
 0xc23   :  { %v6393_v48 = vpop.f32.mrf.mxu0 }
 0xc25   :  { %v6394_v63 = vpop.f32.mrf.mxu0 }
 0xc26   :  { %v6395_v57 = vadd.f32 %v6394_v63, %v6393_v48 }
 0xc27   :  { %v6396_v30 = vpop.f32.mrf.mxu0 }
 0xc29   :  { %v6397_v50 = vpop.f32.mrf.mxu0 }
 0xc2a   :  { %v6398_v43 = vadd.f32 %v6397_v50, %v6396_v30 }
 0xc2b   :  { %v6399_v52 = vpop.f32.mrf.mxu0 }
 0xc2d   :  { %v6400_v60 = vpop.f32.mrf.mxu0 }
 0xc2e   :  { %v6401_v62 = vadd.f32 %v6400_v60, %v6399_v52 }
 0xc2f   :  { %v6835_v6 = vpop.f32.mrf.mxu0 }
 0xc30   :  { %v1810_v8 = vadd.f32 %v6835_v6, %v6398_v43 }
 0xc31   :  { %v1801_v12 = vpop.f32.mrf.mxu0 }
 0xc32   :  { %v8226_v17 = vmax.f32 %v1810_v8, 0.0  ;;  %v1802_v33 = vadd.f32 %v6392_v54, %v1801_v12 }
 0xc33   :  { %v6836_v10 = vpop.f32.mrf.mxu0 }
 0xc34   :  { %v1813_v15 = vadd.f32 %v6836_v10, %v6401_v62  ;;  %1915 = vrot.lane.b32.xlu0 %v8226_v17, %s7190_s14  ;;  %v8232_v19 = vmax.f32 %v1802_v33, 0.0 }
 0xc35   :  { %v1804_v16 = vpop.f32.mrf.mxu0 }
 0xc36   :  { %v8230_v28 = vmax.f32 %v1813_v15, 0.0  ;;  %v1805_v44 = vadd.f32 %v6395_v57, %v1804_v16 }
 0xc38   :  { %v8234_v1 = vmax.f32 %v1805_v44, 0.0  ;;  %1917 = vrot.lane.b32.xlu1 %v8230_v28, %s7190_s14  ;;  %1871 = vrot.lane.b32.xlu0 %v8226_v17, %s7192_s16  ;;  %v1882_v58 = vpack.c.bf16 %v8230_v28, %v8226_v17 }
 0xc3a   :  { %v1881_v27 = vpack.c.bf16 %v8234_v1, %v8232_v19 }
 0xc3c   :  { %1873 = vrot.lane.b32.xlu1 %v8230_v28, %s7192_s16  ;;  %1901 = vrot.lane.b32.xlu0 %v8226_v17, %s7189_s1 }
 0xc40   :  { %1903 = vrot.lane.b32.xlu1 %v8230_v28, %s7189_s1  ;;  %1857 = vrot.lane.b32.xlu0 %v8226_v17, %s7193_s17 }
 0xc44   :  { %1859 = vrot.lane.b32.xlu1 %v8230_v28, %s7193_s17  ;;  %1887 = vrot.lane.b32.xlu0 %v8226_v17, %s7191_s15 }
 0xc48   :  { %1889 = vrot.lane.b32.xlu1 %v8230_v28, %s7191_s15  ;;  %1843 = vrot.lane.b32.xlu0 %v8226_v17, %s7194_s18 }
 0xc4c   :  { %1845 = vrot.lane.b32.xlu1 %v8230_v28, %s7194_s18  ;;  %1829 = vrot.lane.b32.xlu0 %v8226_v17, %s7195_s19 }
 0xc50   :  { %1831 = vrot.lane.b32.xlu1 %v8230_v28, %s7195_s19  ;;  %1911 = vrot.lane.b32.xlu0 %v8232_v19, %s7190_s14 }
 0xc54   :  { %1913 = vrot.lane.b32.xlu1 %v8234_v1, %s7190_s14  ;;  %1867 = vrot.lane.b32.xlu0 %v8232_v19, %s7192_s16 }
 0xc58   :  { %1869 = vrot.lane.b32.xlu1 %v8234_v1, %s7192_s16  ;;  %1897 = vrot.lane.b32.xlu0 %v8232_v19, %s7189_s1 }
 0xc5c   :  { %1899 = vrot.lane.b32.xlu1 %v8234_v1, %s7189_s1  ;;  %1853 = vrot.lane.b32.xlu0 %v8232_v19, %s7193_s17 }
 0xc60   :  { %1855 = vrot.lane.b32.xlu1 %v8234_v1, %s7193_s17  ;;  %1883 = vrot.lane.b32.xlu0 %v8232_v19, %s7191_s15 }
 0xc64   :  { %1885 = vrot.lane.b32.xlu1 %v8234_v1, %s7191_s15  ;;  %1839 = vrot.lane.b32.xlu0 %v8232_v19, %s7194_s18 }
 0xc68   :  { %1841 = vrot.lane.b32.xlu1 %v8234_v1, %s7194_s18  ;;  %1929 = vrot.lane.b32.xlu0 %v8226_v17, %s7196_s20  ;;  %v7029_v17 = vld [vmem:[%s10522_s6 + $0x30] ss:$12 sps:$4 sm:$0xff]  }
 0xc6c   :  { %1931 = vrot.lane.b32.xlu1 %v8230_v28, %s7196_s20  ;;  %1825 = vrot.lane.b32.xlu0 %v8232_v19, %s7195_s19 }
 0xc70   :  { %1827 = vrot.lane.b32.xlu1 %v8234_v1, %s7195_s19  ;;  %1925 = vrot.lane.b32.xlu0 %v8232_v19, %s7196_s20  ;;  %v7032_v19 = vld [vmem:[%s10522_s6 + $0x38] ss:$12 sps:$4 sm:$0xff]  }
 0xc74   :  { %1927 = vrot.lane.b32.xlu1 %v8234_v1, %s7196_s20 }
 0xca6   :  { %v1916_v32 = vpop.permute.xlu0 %1915 }
 0xca7   :  { %v1921_v0 = vmul.f32 %v1916_v32, %v7306_v49 }
 0xcaa   :  { %v1918_v4 = vpop.permute.xlu1 %1917  ;;  %v1872_v34 = vpop.permute.xlu0 %1871 }
 0xcab   :  { %v1922_v35 = vmul.f32 %v1918_v4, %v7306_v49  ;;  %v1877_v29 = vmul.f32 %v1872_v34, %v7319_v5 }
 0xcad   :  { %v1924_v39 = vpack.c.bf16 %v1922_v35, %v1921_v0 }
 0xcae   :  { %v1874_v7 = vpop.permute.xlu1 %1873  ;;  %v1902_v40 = vpop.permute.xlu0 %1901 }
 0xcaf   :  { %v1878_v41 = vmul.f32 %v1874_v7, %v7319_v5  ;;  %6407 = vmatprep.subr.bf16.mxu1 %v1924_v39  ;;  %v1907_v8 = vmul.f32 %v1902_v40, %v7308_v51 }
 0xcb1   :  { %v1880_v55 = vpack.c.bf16 %v1878_v41, %v1877_v29 }
 0xcb2   :  { %v1904_v9 = vpop.permute.xlu1 %1903  ;;  %v1858_v61 = vpop.permute.xlu0 %1857 }
 0xcb3   :  { %6408 = vmatpush3.bf16.msra.mxu1 %v1880_v55  ;;  %v1908_v50 = vmul.f32 %v1904_v9, %v7308_v51  ;;  %v1863_v33 = vmul.f32 %v1858_v61, %v7326_v13 }
 0xcb5   :  { %v1910_v62 = vpack.c.bf16 %v1908_v50, %v1907_v8 }
 0xcb6   :  { %v1860_v2 = vpop.permute.xlu1 %1859  ;;  %v1888_v59 = vpop.permute.xlu0 %1887 }
 0xcb7   :  { %v1864_v12 = vmul.f32 %v1860_v2, %v7326_v13  ;;  %v1893_v39 = vmul.f32 %v1888_v59, %v7312_v56 }
 0xcb9   :  { %v1866_v44 = vpack.c.bf16 %v1864_v12, %v1863_v33 }
 0xcba   :  { %v1890_v53 = vpop.permute.xlu1 %1889  ;;  %v1844_v25 = vpop.permute.xlu0 %1843 }
 0xcbb   :  { %v1894_v32 = vmul.f32 %v1890_v53, %v7312_v56  ;;  %v1849_v9 = vmul.f32 %v1844_v25, %v7329_v14 }
 0xcbd   :  { %v1896_v29 = vpack.c.bf16 %v1894_v32, %v1893_v39 }
 0xcbe   :  { %v1846_v37 = vpop.permute.xlu1 %1845  ;;  %v1830_v38 = vpop.permute.xlu0 %1829 }
 0xcbf   :  { %v1850_v7 = vmul.f32 %v1846_v37, %v7329_v14  ;;  %v1835_v50 = vmul.f32 %v1830_v38, %v7336_v26 }
 0xcc1   :  { %v1852_v53 = vpack.c.bf16 %v1850_v7, %v1849_v9 }
 0xcc2   :  { %v1832_v45 = vpop.permute.xlu1 %1831  ;;  %v1912_v23 = vpop.permute.xlu0 %1911 }
 0xcc3   :  { %v1919_v48 = vmul.f32 %v1912_v23, %v7306_v49 }
 0xcc6   :  { %v1914_v46 = vpop.permute.xlu1 %1913  ;;  %v1868_v47 = vpop.permute.xlu0 %1867 }
 0xcc7   :  { %v1920_v63 = vmul.f32 %v1914_v46, %v7306_v49  ;;  %v1875_v43 = vmul.f32 %v1868_v47, %v7319_v5 }
 0xcc9   :  { %v1923_v30 = vpack.c.bf16 %v1920_v63, %v1919_v48  ;;  %v1836_v48 = vmul.f32 %v1832_v45, %v7336_v26 }
 0xcca   :  { %v1870_v52 = vpop.permute.xlu1 %1869  ;;  %v1898_v60 = vpop.permute.xlu0 %1897 }
 0xccb   :  { %v1876_v6 = vmul.f32 %v1870_v52, %v7319_v5  ;;  %6409 = vmatprep.subr.bf16.mxu1 %v1923_v30  ;;  %v1905_v15 = vmul.f32 %v1898_v60, %v7308_v51  ;;  %v8334_v52 = vld [vmem:[%s10519_s3 + $0x8] ss:$0 sm:$0xff]  ;;  %v1838_v45 = vpack.c.bf16 %v1836_v48, %v1835_v50 }
 0xccd   :  { %v1879_v54 = vpack.c.bf16 %v1876_v6, %v1875_v43 }
 0xcce   :  { %v1900_v10 = vpop.permute.xlu1 %1899  ;;  %v1854_v57 = vpop.permute.xlu0 %1853 }
 0xccf   :  { %v1906_v16 = vmul.f32 %v1900_v10, %v7308_v51  ;;  %6410 = vmatpush3.bf16.msra.mxu1 %v1879_v54  ;;  %v1861_v0 = vmul.f32 %v1854_v57, %v7326_v13 }
 0xcd0   :  { %6411 = vmatprep.subr.bf16.mxu1 %v1910_v62 }
 0xcd1   :  { %v1909_v31 = vpack.c.bf16 %v1906_v16, %v1905_v15 }
 0xcd2   :  { %v1856_v4 = vpop.permute.xlu1 %1855  ;;  %v1884_v34 = vpop.permute.xlu0 %1883 }
 0xcd3   :  { %v1862_v35 = vmul.f32 %v1856_v4, %v7326_v13  ;;  %6412 = vmatpush3.bf16.msra.mxu1 %v1866_v44  ;;  %v1891_v61 = vmul.f32 %v1884_v34, %v7312_v56 }
 0xcd4   :  { %6413 = vmatprep.subr.bf16.mxu1 %v1909_v31 }
 0xcd5   :  { %v1865_v40 = vpack.c.bf16 %v1862_v35, %v1861_v0 }
 0xcd6   :  { %v1886_v41 = vpop.permute.xlu1 %1885  ;;  %v1840_v55 = vpop.permute.xlu0 %1839 }
 0xcd7   :  { %v1892_v2 = vmul.f32 %v1886_v41, %v7312_v56  ;;  %6414 = vmatpush3.bf16.msra.mxu1 %v1865_v40  ;;  %v1847_v59 = vmul.f32 %v1840_v55, %v7329_v14 }
 0xcd8   :  { %6415 = vmatprep.subr.bf16.mxu1 %v1896_v29  ;;  %v2059_v29 = vstv %s6034_s12  ;;  %s6108_s12 = sld [smem:[#allocation2 + $0x5]] }
 0xcd9   :  { %v1895_v23 = vpack.c.bf16 %v1892_v2, %v1891_v61  ;;  %v2060_v9 = vadd.f32 %v2059_v29, %v7254_v18  ;;  %v8383_v61 = vld [vmem:[%s10518_s2 + $0x8] sm:$0xff] }
 0xcda   :  { %v1842_v46 = vpop.permute.xlu1 %1841  ;;  %v1930_v47 = vpop.permute.xlu0 %1929 }
 0xcdb   :  { %v1848_v37 = vmul.f32 %v1842_v46, %v7329_v14  ;;  %6416 = vmatpush3.bf16.msra.mxu1 %v1852_v53  ;;  %v1935_v60 = vmul.f32 %v8334_v52, %v1930_v47  ;;  %7147 = vrcp.f32 %v2060_v9 }
 0xcdc   :  { %6417 = vmatprep.subr.bf16.mxu1 %v1895_v23 }
 0xcdd   :  { %v1851_v63 = vpack.c.bf16 %v1848_v37, %v1847_v59 }
 0xcde   :  { %v1932_v25 = vpop.permute.xlu1 %1931  ;;  %v1826_v30 = vpop.permute.xlu0 %1825 }
 0xcdf   :  { %v1936_v43 = vmul.f32 %v8334_v52, %v1932_v25  ;;  %6418 = vmatpush3.bf16.msra.mxu1 %v1851_v63  ;;  %v1833_v12 = vmul.f32 %v1826_v30, %v7336_v26 }
 0xce0   :  { %6419 = vmatprep.subr.bf16.mxu1 %v1882_v58 }
 0xce1   :  { %v1938_v6 = vpack.c.bf16 %v1936_v43, %v1935_v60 }
 0xce2   :  { %v1828_v8 = vpop.permute.xlu1 %1827  ;;  %v1926_v54 = vpop.permute.xlu0 %1925 }
 0xce3   :  { %v1834_v38 = vmul.f32 %v1828_v8, %v7336_v26  ;;  %6420 = vmatpush3.bf16.msra.mxu1 %v1838_v45  ;;  %6840 = vmatpush3.bf16.msra.mxu0 %v1938_v6  ;;  %v1933_v28 = vmul.f32 %v8334_v52, %v1926_v54 }
 0xce4   :  { %6421 = vmatprep.subr.bf16.mxu1 %v1881_v27  ;;  %6841 = vmatprep.subr.bf16.mxu0 %v7197_v24 }
 0xce5   :  { %v1837_v62 = vpack.c.bf16 %v1834_v38, %v1833_v12  ;;  %v7033_v12 = vld [vmem:[%s10520_s4 + $0x64] ss:$8 sps:$4 sm:$0xff]  }
 0xce6   :  { %v1928_v10 = vpop.permute.xlu1 %1927 }
 0xce7   :  { %v1934_v58 = vmul.f32 %v8334_v52, %v1928_v10  ;;  %6422 = vmatpush3.bf16.msra.mxu1 %v1837_v62 }
 0xce8   :  { %v7148_v48 = vpop.eup %7147 }
 0xce9   :  { %v1937_v57 = vpack.c.bf16 %v1934_v58, %v1933_v28 }
 0xcea   :  { %1990 = vmatmul.mubr.bf16.vlgmr.msra.gmra.mxu1 %v7029_v17 }
 0xceb   :  { %6842 = vmatpush3.bf16.msra.mxu0 %v1937_v57 }
 0xcec   :  { %2155 = vmatprep.subr.bf16.mxu0 %v7188_v36 }
 0xcee   :  { %6844 = vmatmul.mubr.msk.bf16.vlgmr.msra.gmra.mxu0 %vm415_vm2, %v7032_v19 }
 0xcef   :  { %6043 = vmatprep.mubr.msk.bf16.mxu0 %vm197_vm0, %v7033_v12 }
 0xdaa   :  { %v6423_v1 = vpop.f32.mrf.mxu1 }
 0xdac   :  { %v6424_v27 = vpop.f32.mrf.mxu1 }
 0xdad   :  { %v6425_v33 = vadd.f32 %v6424_v27, %v6423_v1 }
 0xdae   :  { %v6426_v15 = vpop.f32.mrf.mxu1  ;;  %v2032_v16 = vpop.f32.mrf.mxu0 }
 0xdaf   :  { %v2033_v44 = vadd.f32 %v6425_v33, %v2032_v16 }
 0xdb0   :  { %v6427_v31 = vpop.f32.mrf.mxu1  ;;  %v6845_v32 = vpop.f32.mrf.mxu0 }
 0xdb1   :  { %v2039_v4 = vsub.f32 %v8021_v11, %v2033_v44  ;;  %6032 = vst [vmem:[%s10523_s7 + $0x20] sm:$0xff] %v2033_v44  ;;  %v6428_v34 = vadd.f32 %v6427_v31, %v6426_v15 }
 0xdb2   :  { %v2035_v0 = vpop.f32.mrf.mxu0 }
 0xdb3   :  { %v8362_v35 = vsub.f32 %v8004_v22, %v2039_v4  ;;  %v2036_v39 = vadd.f32 %v6428_v34, %v2035_v0  ;;  %v8377_v22 = vld [vmem:[%s10518_s2] sm:$0xff] }
 0xdb4   :  { %v6846_v7 = vpop.f32.mrf.mxu0 }
 0xdb5   :  { %v2040_v40 = vsub.f32 %v8023_v3, %v2036_v39  ;;  %6033 = vst [vmem:[%s10523_s7 + $0x28] sm:$0xff] %v2036_v39  ;;  %v2047_v11 = vadd.f32 %v8362_v35, %v2033_v44 }
 0xdb7   :  { %v8370_v41 = vsub.f32 %v8012_v21, %v2040_v40  ;;  %v2049_v3 = vmul.f32 %v8377_v22, %v2047_v11 }
 0xdb9   :  { %v2048_v55 = vadd.f32 %v8370_v41, %v2036_v39 }
 0xdbb   :  { %v2050_v2 = vmul.f32 %v8383_v61, %v2048_v55 }
 0xdbd   :  { %v2051_v21 = vadd.f32 %v2050_v2, %v2049_v3 }
 0xdbf   :  { %v2052_v53 = vrot.slane %v2051_v21, 4 }
 0xdc1   :  { %v2053_v23 = vadd.f32 %v2052_v53, %v2051_v21 }
 0xdc3   :  { %v2054_v46 = vrot.slane %v2053_v23, 2 }
 0xdc5   :  { %v2055_v47 = vadd.f32 %v2054_v46, %v2053_v23 }
 0xdc7   :  { %v2056_v59 = vrot.slane %v2055_v47, 1 }
 0xdc9   :  { %v2057_v37 = vadd.f32 %v2056_v59, %v2055_v47 }
 0xdcb   :  { %v2058_v63 = vsub.f32 %v7256_v20, %v2057_v37 }
 0xdcd   :  { %v2062_v25 = vmul.f32 %v7148_v48, %v2058_v63 }
 0xdcf   :  { %v2063_v30 = vmul.f32 %v8377_v22, %v2062_v25  ;;  %v2064_v50 = vmul.f32 %v8383_v61, %v2062_v25 }
 0xdd1   :  { %v8389_v60 = vadd.f32 %v2063_v30, %v2047_v11  ;;  %v8391_v43 = vadd.f32 %v2064_v50, %v2048_v55  ;;  %v7035_v50 = vld [vmem:[%s10520_s4 + $0x60] ss:$8 sps:$4 sm:$0xff]  }
 0xdd3   :  { %v2067_v45 = vsub.f32 %v8389_v60, %v8362_v35  ;;  %v2068_v6 = vsub.f32 %v8391_v43, %v8370_v41 }
 0xdd5   :  { %2119 = vrot.lane.b32.xlu1 %v2068_v6, %s7190_s14  ;;  %2117 = vrot.lane.b32.xlu0 %v2067_v45, %s7190_s14  ;;  %v2102_v8 = vpack.c.bf16 %v2068_v6, %v2067_v45 }
 0xdd9   :  { %2112 = vrot.lane.b32.xlu1 %v2068_v6, %s7189_s1  ;;  %2110 = vrot.lane.b32.xlu0 %v2067_v45, %s7189_s1 }
 0xddd   :  { %2105 = vrot.lane.b32.xlu1 %v2068_v6, %s7191_s15  ;;  %2103 = vrot.lane.b32.xlu0 %v2067_v45, %s7191_s15 }
 0xde1   :  { %2097 = vrot.lane.b32.xlu1 %v2068_v6, %s7192_s16  ;;  %2095 = vrot.lane.b32.xlu0 %v2067_v45, %s7192_s16 }
 0xde5   :  { %2090 = vrot.lane.b32.xlu1 %v2068_v6, %s7193_s17  ;;  %2088 = vrot.lane.b32.xlu0 %v2067_v45, %s7193_s17 }
 0xde9   :  { %2083 = vrot.lane.b32.xlu1 %v2068_v6, %s7194_s18  ;;  %2081 = vrot.lane.b32.xlu0 %v2067_v45, %s7194_s18 }
 0xded   :  { %2076 = vrot.lane.b32.xlu1 %v2068_v6, %s7195_s19  ;;  %2074 = vrot.lane.b32.xlu0 %v2067_v45, %s7195_s19 }
 0xdf1   :  { %2126 = vrot.lane.b32.xlu1 %v2068_v6, %s7196_s20  ;;  %2124 = vrot.lane.b32.xlu0 %v2067_v45, %s7196_s20  ;;  %v7036_v45 = vld [vmem:[%s10520_s4 + $0x74] ss:$8 sps:$4 sm:$0xff]   ;;  %v7038_v6 = vld [vmem:[%s10520_s4 + $0x70] ss:$8 sps:$4 sm:$0xff]  }
 0xe47   :  { %v2120_v38 = vpop.permute.xlu1 %2119  ;;  %v2118_v54 = vpop.permute.xlu0 %2117 }
 0xe48   :  { %v2122_v62 = vmul.f32 %v2120_v38, %v7306_v49  ;;  %v2121_v10 = vmul.f32 %v2118_v54, %v7306_v49 }
 0xe4a   :  { %v2123_v17 = vpack.c.bf16 %v2122_v62, %v2121_v10 }
 0xe4b   :  { %v2113_v28 = vpop.permute.xlu1 %2112  ;;  %v2111_v58 = vpop.permute.xlu0 %2110 }
 0xe4c   :  { %v2115_v57 = vmul.f32 %v2113_v28, %v7308_v51  ;;  %v2114_v19 = vmul.f32 %v2111_v58, %v7308_v51  ;;  %2156 = vmatpush1.bf16.msra.mxu0 %v2123_v17 }
 0xe4d   :  { %2157 = vmatprep.subr.bf16.mxu0 %v7188_v36 }
 0xe4e   :  { %v2116_v1 = vpack.c.bf16 %v2115_v57, %v2114_v19 }
 0xe4f   :  { %v2106_v27 = vpop.permute.xlu1 %2105  ;;  %v2104_v33 = vpop.permute.xlu0 %2103 }
 0xe50   :  { %v2108_v15 = vmul.f32 %v2106_v27, %v7312_v56  ;;  %v2107_v16 = vmul.f32 %v2104_v33, %v7312_v56  ;;  %2158 = vmatpush1.bf16.msra.mxu0 %v2116_v1 }
 0xe51   :  { %2159 = vmatprep.subr.bf16.mxu0 %v7188_v36 }
 0xe52   :  { %v2109_v44 = vpack.c.bf16 %v2108_v15, %v2107_v16  ;;  %v7041_v15 = vld [vmem:[%s10521_s5 + $0x94] ss:$12 sps:$4 sm:$0xff]  }
 0xe53   :  { %v2098_v31 = vpop.permute.xlu1 %2097  ;;  %v2096_v32 = vpop.permute.xlu0 %2095  ;;  %2399 = vmatprep.mubr.bf16.mxu1 %v7041_v15 }
 0xe54   :  { %2160 = vmatpush1.bf16.msra.mxu0 %v2109_v44  ;;  %v2100_v4 = vmul.f32 %v2098_v31, %v7319_v5  ;;  %v2099_v34 = vmul.f32 %v2096_v32, %v7319_v5 }
 0xe55   :  { %2161 = vmatprep.subr.bf16.mxu0 %v7188_v36 }
 0xe56   :  { %v2101_v7 = vpack.c.bf16 %v2100_v4, %v2099_v34 }
 0xe57   :  { %v2091_v0 = vpop.permute.xlu1 %2090  ;;  %v2089_v39 = vpop.permute.xlu0 %2088 }
 0xe58   :  { %2162 = vmatpush1.bf16.msra.mxu0 %v2102_v8  ;;  %v2093_v40 = vmul.f32 %v2091_v0, %v7326_v13  ;;  %v2092_v29 = vmul.f32 %v2089_v39, %v7326_v13 }
 0xe59   :  { %2163 = vmatprep.subr.bf16.mxu0 %v7188_v36 }
 0xe5a   :  { %v2094_v9 = vpack.c.bf16 %v2093_v40, %v2092_v29 }
 0xe5b   :  { %v2084_v11 = vpop.permute.xlu1 %2083  ;;  %v2082_v55 = vpop.permute.xlu0 %2081 }
 0xe5c   :  { %2164 = vmatpush1.bf16.msra.mxu0 %v2101_v7  ;;  %v2086_v3 = vmul.f32 %v2084_v11, %v7329_v14  ;;  %v2085_v2 = vmul.f32 %v2082_v55, %v7329_v14 }
 0xe5d   :  { %2165 = vmatprep.subr.bf16.mxu0 %v7188_v36 }
 0xe5e   :  { %v2087_v23 = vpack.c.bf16 %v2086_v3, %v2085_v2 }
 0xe5f   :  { %v2077_v21 = vpop.permute.xlu1 %2076  ;;  %v2075_v53 = vpop.permute.xlu0 %2074 }
 0xe60   :  { %2166 = vmatpush1.bf16.msra.mxu0 %v2094_v9  ;;  %v2079_v46 = vmul.f32 %v2077_v21, %v7336_v26  ;;  %v2078_v47 = vmul.f32 %v2075_v53, %v7336_v26 }
 0xe61   :  { %2167 = vmatprep.subr.bf16.mxu0 %v7188_v36 }
 0xe62   :  { %v2080_v59 = vpack.c.bf16 %v2079_v46, %v2078_v47 }
 0xe63   :  { %v2127_v37 = vpop.permute.xlu1 %2126  ;;  %v2125_v48 = vpop.permute.xlu0 %2124 }
 0xe64   :  { %2168 = vmatpush1.bf16.msra.mxu0 %v2087_v23  ;;  %v2129_v63 = vmul.f32 %v8334_v52, %v2127_v37  ;;  %v2128_v25 = vmul.f32 %v8334_v52, %v2125_v48 }
 0xe65   :  { %2169 = vmatprep.subr.bf16.mxu0 %v7188_v36 }
 0xe66   :  { %v2130_v30 = vpack.c.bf16 %v2129_v63, %v2128_v25 }
 0xe68   :  { %2170 = vmatpush1.bf16.msra.mxu0 %v2080_v59 }
 0xe69   :  { %2183 = vmatprep.subr.bf16.mxu0 %v7188_v36 }
 0xe6c   :  { %2184 = vmatpush2.bf16.msra.mxu0 %v7351_v42 }
 0xe6d   :  { %2185 = vmatprep.subr.bf16.mxu0 %v7188_v36 }
 0xe70   :  { %2186 = vmatpush2.bf16.msra.mxu0 %v2130_v30 }
 0xe73   :  { %2188 = vmatmul.mubr.bf16.vlgmr.msra.gmra.mxu0 %v7035_v50 }
 0xe74   :  { %6044 = vmatprep.mubr.msk.bf16.mxu0 %vm197_vm0, %v7036_v45 }
 0xe7b   :  { %2196 = vmatmul.mubr.bf16.gmra.mxu0 %v7038_v6 }
 0xf33   :  { %v2189_v8 = vpop.f32.mrf.mxu0 }
 0xf34   :  { %v8453_v12 = vmax.f32 %v2189_v8, 0.0 }
 0xf35   :  { %v2191_v38 = vpop.f32.mrf.mxu0 }
 0xf36   :  { %2303 = vrot.lane.b32.xlu0 %v8453_v12, %s7190_s14 }
 0xf37   :  { %v2192_v54 = vpop.f32.mrf.mxu0 }
 0xf38   :  { %v8457_v62 = vmax.f32 %v2192_v54, 0.0 }
 0xf39   :  { %v2194_v10 = vpop.f32.mrf.mxu0 }
 0xf3a   :  { %2259 = vrot.lane.b32.xlu0 %v8453_v12, %s7192_s16  ;;  %2305 = vrot.lane.b32.xlu1 %v8457_v62, %s7190_s14  ;;  %v2273_v17 = vpack.c.bf16 %v8457_v62, %v8453_v12 }
 0xf3b   :  { %v2197_v28 = vpop.f32.mrf.mxu0 }
 0xf3c   :  { %v8469_v57 = vmax.f32 %v2197_v28, 0.0 }
 0xf3d   :  { %v2199_v58 = vpop.f32.mrf.mxu0 }
 0xf3e   :  { %2289 = vrot.lane.b32.xlu0 %v8453_v12, %s7189_s1  ;;  %2261 = vrot.lane.b32.xlu1 %v8457_v62, %s7192_s16 }
 0xf3f   :  { %v2200_v19 = vpop.f32.mrf.mxu0 }
 0xf40   :  { %v8471_v1 = vmax.f32 %v2200_v19, 0.0 }
 0xf41   :  { %v2202_v27 = vpop.f32.mrf.mxu0 }
 0xf42   :  { %2245 = vrot.lane.b32.xlu0 %v8453_v12, %s7193_s17  ;;  %2291 = vrot.lane.b32.xlu1 %v8457_v62, %s7189_s1  ;;  %v2274_v33 = vpack.c.bf16 %v8471_v1, %v8469_v57 }
 0xf46   :  { %2275 = vrot.lane.b32.xlu0 %v8453_v12, %s7191_s15  ;;  %2247 = vrot.lane.b32.xlu1 %v8457_v62, %s7193_s17 }
 0xf4a   :  { %2277 = vrot.lane.b32.xlu1 %v8457_v62, %s7191_s15  ;;  %2307 = vrot.lane.b32.xlu0 %v8469_v57, %s7190_s14 }
 0xf4e   :  { %2263 = vrot.lane.b32.xlu0 %v8469_v57, %s7192_s16  ;;  %2309 = vrot.lane.b32.xlu1 %v8471_v1, %s7190_s14 }
 0xf52   :  { %2293 = vrot.lane.b32.xlu0 %v8469_v57, %s7189_s1  ;;  %2265 = vrot.lane.b32.xlu1 %v8471_v1, %s7192_s16 }
 0xf56   :  { %2249 = vrot.lane.b32.xlu0 %v8469_v57, %s7193_s17  ;;  %2295 = vrot.lane.b32.xlu1 %v8471_v1, %s7189_s1 }
 0xf5a   :  { %2279 = vrot.lane.b32.xlu0 %v8469_v57, %s7191_s15  ;;  %2251 = vrot.lane.b32.xlu1 %v8471_v1, %s7193_s17 }
 0xf5e   :  { %2235 = vrot.lane.b32.xlu0 %v8469_v57, %s7194_s18  ;;  %2281 = vrot.lane.b32.xlu1 %v8471_v1, %s7191_s15 }
 0xf62   :  { %2231 = vrot.lane.b32.xlu0 %v8453_v12, %s7194_s18  ;;  %2237 = vrot.lane.b32.xlu1 %v8471_v1, %s7194_s18 }
 0xf66   :  { %2221 = vrot.lane.b32.xlu0 %v8469_v57, %s7195_s19  ;;  %2233 = vrot.lane.b32.xlu1 %v8457_v62, %s7194_s18 }
 0xf6a   :  { %2217 = vrot.lane.b32.xlu0 %v8453_v12, %s7195_s19  ;;  %2223 = vrot.lane.b32.xlu1 %v8471_v1, %s7195_s19 }
 0xf6e   :  { %2321 = vrot.lane.b32.xlu0 %v8469_v57, %s7196_s20  ;;  %2219 = vrot.lane.b32.xlu1 %v8457_v62, %s7195_s19 }
 0xf72   :  { %2317 = vrot.lane.b32.xlu0 %v8453_v12, %s7196_s20  ;;  %2323 = vrot.lane.b32.xlu1 %v8471_v1, %s7196_s20 }
 0xf76   :  { %2319 = vrot.lane.b32.xlu1 %v8457_v62, %s7196_s20 }
 0xfa8   :  { %v2304_v16 = vpop.permute.xlu0 %2303 }
 0xfa9   :  { %v2311_v59 = vmul.f32 %v2304_v16, %v7306_v49 }
 0xfac   :  { %v2260_v44 = vpop.permute.xlu0 %2259  ;;  %v2306_v31 = vpop.permute.xlu1 %2305 }
 0xfad   :  { %v2312_v21 = vmul.f32 %v2306_v31, %v7306_v49  ;;  %v2267_v50 = vmul.f32 %v2260_v44, %v7319_v5 }
 0xfaf   :  { %v2315_v63 = vpack.c.bf16 %v2312_v21, %v2311_v59 }
 0xfb0   :  { %v2290_v32 = vpop.permute.xlu0 %2289  ;;  %v2262_v4 = vpop.permute.xlu1 %2261 }
 0xfb1   :  { %v2268_v37 = vmul.f32 %v2262_v4, %v7319_v5  ;;  %v2297_v27 = vmul.f32 %v2290_v32, %v7308_v51 }
 0xfb3   :  { %v2271_v8 = vpack.c.bf16 %v2268_v37, %v2267_v50 }
 0xfb4   :  { %v2246_v34 = vpop.permute.xlu0 %2245  ;;  %v2292_v0 = vpop.permute.xlu1 %2291 }
 0xfb5   :  { %v2298_v54 = vmul.f32 %v2292_v0, %v7308_v51 }
 0xfb7   :  { %v2301_v44 = vpack.c.bf16 %v2298_v54, %v2297_v27  ;;  %v7044_v27 = vld [vmem:[%s10521_s5 + $0xa8] ss:$12 sps:$4 sm:$0xff]  }
 0xfb8   :  { %v2276_v39 = vpop.permute.xlu0 %2275  ;;  %v2248_v7 = vpop.permute.xlu1 %2247 }
 0xfb9   :  { %v2254_v15 = vmul.f32 %v2248_v7, %v7326_v13 }
 0xfbc   :  { %v2278_v40 = vpop.permute.xlu1 %2277  ;;  %v2308_v29 = vpop.permute.xlu0 %2307 }
 0xfbd   :  { %v2313_v9 = vmul.f32 %v2308_v29, %v7306_v49  ;;  %v2253_v29 = vmul.f32 %v2246_v34, %v7326_v13 }
 0xfc0   :  { %v2264_v11 = vpop.permute.xlu0 %2263  ;;  %v2310_v55 = vpop.permute.xlu1 %2309 }
 0xfc1   :  { %v2314_v3 = vmul.f32 %v2310_v55, %v7306_v49  ;;  %v2269_v46 = vmul.f32 %v2264_v11, %v7319_v5  ;;  %v2257_v55 = vpack.c.bf16 %v2254_v15, %v2253_v29  ;;  %v7045_v15 = vld [vmem:[%s10521_s5 + $0x98] ss:$12 sps:$4 sm:$0xff]  }
 0xfc3   :  { %v2316_v2 = vpack.c.bf16 %v2314_v3, %v2313_v9  ;;  %v2284_v3 = vmul.f32 %v2278_v40, %v7312_v56 }
 0xfc4   :  { %v2294_v53 = vpop.permute.xlu0 %2293  ;;  %v2266_v23 = vpop.permute.xlu1 %2265 }
 0xfc5   :  { %v2270_v47 = vmul.f32 %v2266_v23, %v7319_v5  ;;  %6433 = vmatprep.subr.bf16.mxu1 %v2316_v2  ;;  %v2299_v45 = vmul.f32 %v2294_v53, %v7308_v51  ;;  %v2283_v53 = vmul.f32 %v2276_v39, %v7312_v56 }
 0xfc7   :  { %v2272_v48 = vpack.c.bf16 %v2270_v47, %v2269_v46  ;;  %v2287_v23 = vpack.c.bf16 %v2284_v3, %v2283_v53 }
 0xfc8   :  { %v2250_v25 = vpop.permute.xlu0 %2249  ;;  %v2296_v30 = vpop.permute.xlu1 %2295 }
 0xfc9   :  { %v2300_v6 = vmul.f32 %v2296_v30, %v7308_v51  ;;  %6434 = vmatpush3.bf16.msra.mxu1 %v2272_v48  ;;  %v2255_v58 = vmul.f32 %v2250_v25, %v7326_v13 }
 0xfca   :  { %6435 = vmatprep.subr.bf16.mxu1 %v2315_v63 }
 0xfcb   :  { %v2302_v38 = vpack.c.bf16 %v2300_v6, %v2299_v45 }
 0xfcc   :  { %v2280_v10 = vpop.permute.xlu0 %2279  ;;  %v2252_v28 = vpop.permute.xlu1 %2251 }
 0xfcd   :  { %v2256_v19 = vmul.f32 %v2252_v28, %v7326_v13  ;;  %6436 = vmatpush3.bf16.msra.mxu1 %v2271_v8  ;;  %v2285_v0 = vmul.f32 %v2280_v10, %v7312_v56  ;;  %v7039_v10 = vld [vmem:[%s10521_s5 + $0x90] ss:$12 sps:$4 sm:$0xff]  }
 0xfce   :  { %6437 = vmatprep.subr.bf16.mxu1 %v2302_v38 }
 0xfcf   :  { %v2258_v16 = vpack.c.bf16 %v2256_v19, %v2255_v58 }
 0xfd0   :  { %v2236_v31 = vpop.permute.xlu0 %2235  ;;  %v2282_v4 = vpop.permute.xlu1 %2281 }
 0xfd1   :  { %v2286_v11 = vmul.f32 %v2282_v4, %v7312_v56  ;;  %6438 = vmatpush3.bf16.msra.mxu1 %v2258_v16  ;;  %v2241_v7 = vmul.f32 %v2236_v31, %v7329_v14  ;;  %v7046_v16 = vld [vmem:[%s10521_s5 + $0xb0] ss:$12 sps:$4 sm:$0xff]  }
 0xfd2   :  { %6439 = vmatprep.subr.bf16.mxu1 %v2301_v44 }
 0xfd3   :  { %v2288_v9 = vpack.c.bf16 %v2286_v11, %v2285_v0 }
 0xfd4   :  { %v2232_v32 = vpop.permute.xlu0 %2231  ;;  %v2238_v2 = vpop.permute.xlu1 %2237 }
 0xfd5   :  { %v2242_v21 = vmul.f32 %v2238_v2, %v7329_v14  ;;  %6440 = vmatpush3.bf16.msra.mxu1 %v2257_v55  ;;  %v2239_v59 = vmul.f32 %v2232_v32, %v7329_v14 }
 0xfd6   :  { %6441 = vmatprep.subr.bf16.mxu1 %v2288_v9 }
 0xfd7   :  { %v2244_v34 = vpack.c.bf16 %v2242_v21, %v2241_v7 }
 0xfd8   :  { %v2222_v46 = vpop.permute.xlu0 %2221  ;;  %v2234_v47 = vpop.permute.xlu1 %2233 }
 0xfd9   :  { %v2240_v37 = vmul.f32 %v2234_v47, %v7329_v14  ;;  %6442 = vmatpush3.bf16.msra.mxu1 %v2244_v34  ;;  %v2227_v25 = vmul.f32 %v2222_v46, %v7336_v26 }
 0xfda   :  { %6443 = vmatprep.subr.bf16.mxu1 %v2287_v23 }
 0xfdb   :  { %v2243_v40 = vpack.c.bf16 %v2240_v37, %v2239_v59 }
 0xfdc   :  { %v2218_v48 = vpop.permute.xlu0 %2217  ;;  %v2224_v63 = vpop.permute.xlu1 %2223 }
 0xfdd   :  { %v2228_v30 = vmul.f32 %v2224_v63, %v7336_v26  ;;  %6444 = vmatpush3.bf16.msra.mxu1 %v2243_v40  ;;  %v2225_v6 = vmul.f32 %v2218_v48, %v7336_v26 }
 0xfde   :  { %6445 = vmatprep.subr.bf16.mxu1 %v2274_v33  ;;  %v7042_v33 = vld [vmem:[%s10521_s5 + $0xac] ss:$12 sps:$4 sm:$0xff]  }
 0xfdf   :  { %v2230_v39 = vpack.c.bf16 %v2228_v30, %v2227_v25 }
 0xfe0   :  { %v2322_v50 = vpop.permute.xlu0 %2321  ;;  %v2220_v45 = vpop.permute.xlu1 %2219 }
 0xfe1   :  { %v2226_v8 = vmul.f32 %v2220_v45, %v7336_v26  ;;  %6446 = vmatpush3.bf16.msra.mxu1 %v2230_v39  ;;  %v2327_v57 = vmul.f32 %v8334_v52, %v2322_v50  ;;  %v7049_v50 = vld [vmem:[%s10522_s6 + $0x4c] ss:$12 sps:$4 sm:$0xff]  }
 0xfe2   :  { %6447 = vmatprep.subr.bf16.mxu1 %v2273_v17  ;;  %2638 = vmatprep.mubr.bf16.mxu0 %v7049_v50 }
 0xfe3   :  { %v2229_v38 = vpack.c.bf16 %v2226_v8, %v2225_v6 }
 0xfe4   :  { %v2324_v54 = vpop.permute.xlu1 %2323  ;;  %v2318_v28 = vpop.permute.xlu0 %2317 }
 0xfe5   :  { %v2328_v1 = vmul.f32 %v8334_v52, %v2324_v54  ;;  %6448 = vmatpush3.bf16.msra.mxu1 %v2229_v38  ;;  %v2325_v17 = vmul.f32 %v8334_v52, %v2318_v28 }
 0xfe6   :  { %6847 = vmatprep.subr.bf16.mxu1 %v7351_v42 }
 0xfe7   :  { %v2330_v12 = vpack.c.bf16 %v2328_v1, %v2327_v57 }
 0xfe8   :  { %v2320_v62 = vpop.permute.xlu1 %2319  ;;  %2400 = vmatmul.mubr.bf16.vlgmr.msra.gmra.mxu1 %v7039_v10 }
 0xfe9   :  { %v2326_v58 = vmul.f32 %v8334_v52, %v2320_v62  ;;  %6848 = vmatpush3.bf16.msra.mxu1 %v7351_v42  ;;  %2407 = vmatprep.mubr.bf16.mxu1 %v7042_v33 }
 0xfea   :  { %6849 = vmatprep.subr.bf16.mxu1 %v2330_v12 }
 0xfeb   :  { %v2329_v19 = vpack.c.bf16 %v2326_v58, %v2325_v17 }
 0xfed   :  { %6850 = vmatpush3.bf16.msra.mxu1 %v2330_v12 }
 0xfee   :  { %6851 = vmatprep.subr.bf16.mxu1 %v2329_v19 }
 0xff0   :  { %2408 = vmatmul.mubr.bf16.gmra.mxu1 %v7044_v27 }
 0xff1   :  { %6852 = vmatpush3.bf16.msra.mxu1 %v2329_v19  ;;  %6853 = vmatprep.mubr.msk.bf16.mxu1 %vm415_vm2, %v7045_v15 }
 0xff2   :  { %6857 = vmatprep.subr.bf16.mxu1 %v7197_v24 }
 0xff8   :  { %6854 = vmatmul.mubr.msk.bf16.vlgmr.msra.gmra.mxu1 %vm415_vm2, %v7046_v16 }
 0xff9   :  { %6858 = vmatpush3.bf16.msra.mxu1 %v7351_v42  ;;  %6863 = vmatprep.mubr.msk.bf16.mxu1 %vm7198_vm3, %v7197_v24 }
 0xffa   :  { %6859 = vmatprep.subr.bf16.mxu1 %v7197_v24 }
0x10a8   :  { %v6449_v44 = vpop.f32.mrf.mxu1 }
0x10aa   :  { %v6450_v31 = vpop.f32.mrf.mxu1 }
0x10ab   :  { %v6451_v21 = vadd.f32 %v6450_v31, %v6449_v44 }
0x10ac   :  { %v6452_v4 = vpop.f32.mrf.mxu1 }
0x10ae   :  { %v6453_v29 = vpop.f32.mrf.mxu1 }
0x10af   :  { %v6454_v46 = vadd.f32 %v6453_v29, %v6452_v4 }
0x10b0   :  { %v6455_v0 = vpop.f32.mrf.mxu1 }
0x10b2   :  { %v6456_v11 = vpop.f32.mrf.mxu1 }
0x10b3   :  { %v6457_v3 = vadd.f32 %v6456_v11, %v6455_v0 }
0x10b4   :  { %v6458_v55 = vpop.f32.mrf.mxu1 }
0x10b6   :  { %v6459_v9 = vpop.f32.mrf.mxu1 }
0x10b7   :  { %v6460_v53 = vadd.f32 %v6459_v9, %v6458_v55 }
0x10b8   :  { %v6855_v32 = vpop.f32.mrf.mxu1 }
0x10b9   :  { %v2459_v2 = vadd.f32 %v6855_v32, %v6457_v3 }
0x10ba   :  { %v2450_v7 = vpop.f32.mrf.mxu1 }
0x10bb   :  { %v8594_v34 = vmax.f32 %v2459_v2, 0.0  ;;  %v2451_v47 = vadd.f32 %v6451_v21, %v2450_v7 }
0x10bc   :  { %v6856_v23 = vpop.f32.mrf.mxu1 }
0x10bd   :  { %v2462_v59 = vadd.f32 %v6856_v23, %v6460_v53  ;;  %2564 = vrot.lane.b32.xlu0 %v8594_v34, %s7190_s14  ;;  %v8600_v63 = vmax.f32 %v2451_v47, 0.0 }
0x10be   :  { %v2453_v37 = vpop.f32.mrf.mxu1 }
0x10bf   :  { %v8598_v40 = vmax.f32 %v2462_v59, 0.0  ;;  %v2454_v48 = vadd.f32 %v6454_v46, %v2453_v37 }
0x10c1   :  { %v8602_v25 = vmax.f32 %v2454_v48, 0.0  ;;  %2566 = vrot.lane.b32.xlu1 %v8598_v40, %s7190_s14  ;;  %2520 = vrot.lane.b32.xlu0 %v8594_v34, %s7192_s16  ;;  %v2531_v30 = vpack.c.bf16 %v8598_v40, %v8594_v34 }
0x10c3   :  { %v2530_v39 = vpack.c.bf16 %v8602_v25, %v8600_v63 }
0x10c5   :  { %2522 = vrot.lane.b32.xlu1 %v8598_v40, %s7192_s16  ;;  %2550 = vrot.lane.b32.xlu0 %v8594_v34, %s7189_s1 }
0x10c9   :  { %2552 = vrot.lane.b32.xlu1 %v8598_v40, %s7189_s1  ;;  %2506 = vrot.lane.b32.xlu0 %v8594_v34, %s7193_s17 }
0x10cd   :  { %2508 = vrot.lane.b32.xlu1 %v8598_v40, %s7193_s17  ;;  %2536 = vrot.lane.b32.xlu0 %v8594_v34, %s7191_s15 }
0x10d1   :  { %2538 = vrot.lane.b32.xlu1 %v8598_v40, %s7191_s15  ;;  %2492 = vrot.lane.b32.xlu0 %v8594_v34, %s7194_s18 }
0x10d5   :  { %2494 = vrot.lane.b32.xlu1 %v8598_v40, %s7194_s18  ;;  %2478 = vrot.lane.b32.xlu0 %v8594_v34, %s7195_s19 }
0x10d9   :  { %2480 = vrot.lane.b32.xlu1 %v8598_v40, %s7195_s19  ;;  %2560 = vrot.lane.b32.xlu0 %v8600_v63, %s7190_s14 }
0x10dd   :  { %2562 = vrot.lane.b32.xlu1 %v8602_v25, %s7190_s14  ;;  %2516 = vrot.lane.b32.xlu0 %v8600_v63, %s7192_s16 }
0x10e1   :  { %2518 = vrot.lane.b32.xlu1 %v8602_v25, %s7192_s16  ;;  %2546 = vrot.lane.b32.xlu0 %v8600_v63, %s7189_s1 }
0x10e5   :  { %2548 = vrot.lane.b32.xlu1 %v8602_v25, %s7189_s1  ;;  %2502 = vrot.lane.b32.xlu0 %v8600_v63, %s7193_s17 }
0x10e9   :  { %2504 = vrot.lane.b32.xlu1 %v8602_v25, %s7193_s17  ;;  %2532 = vrot.lane.b32.xlu0 %v8600_v63, %s7191_s15 }
0x10ed   :  { %2534 = vrot.lane.b32.xlu1 %v8602_v25, %s7191_s15  ;;  %2488 = vrot.lane.b32.xlu0 %v8600_v63, %s7194_s18 }
0x10f1   :  { %2490 = vrot.lane.b32.xlu1 %v8602_v25, %s7194_s18  ;;  %2578 = vrot.lane.b32.xlu0 %v8594_v34, %s7196_s20  ;;  %v7047_v34 = vld [vmem:[%s10522_s6 + $0x48] ss:$12 sps:$4 sm:$0xff]  }
0x10f5   :  { %2580 = vrot.lane.b32.xlu1 %v8598_v40, %s7196_s20  ;;  %2474 = vrot.lane.b32.xlu0 %v8600_v63, %s7195_s19 }
0x10f9   :  { %2476 = vrot.lane.b32.xlu1 %v8602_v25, %s7195_s19  ;;  %2574 = vrot.lane.b32.xlu0 %v8600_v63, %s7196_s20  ;;  %v7050_v63 = vld [vmem:[%s10522_s6 + $0x50] ss:$12 sps:$4 sm:$0xff]  }
0x10fd   :  { %2576 = vrot.lane.b32.xlu1 %v8602_v25, %s7196_s20 }
0x112f   :  { %v2565_v45 = vpop.permute.xlu0 %2564 }
0x1130   :  { %v2570_v38 = vmul.f32 %v2565_v45, %v7306_v49 }
0x1133   :  { %v2567_v6 = vpop.permute.xlu1 %2566  ;;  %v2521_v8 = vpop.permute.xlu0 %2520 }
0x1134   :  { %v2571_v54 = vmul.f32 %v2567_v6, %v7306_v49  ;;  %v2526_v33 = vmul.f32 %v2521_v8, %v7319_v5 }
0x1136   :  { %v2573_v10 = vpack.c.bf16 %v2571_v54, %v2570_v38 }
0x1137   :  { %v2523_v57 = vpop.permute.xlu1 %2522  ;;  %v2551_v1 = vpop.permute.xlu0 %2550 }
0x1138   :  { %v2527_v28 = vmul.f32 %v2523_v57, %v7319_v5  ;;  %6466 = vmatprep.subr.bf16.mxu0 %v2573_v10  ;;  %v2556_v53 = vmul.f32 %v2551_v1, %v7308_v51 }
0x113a   :  { %v2529_v12 = vpack.c.bf16 %v2527_v28, %v2526_v33 }
0x113b   :  { %v2553_v62 = vpop.permute.xlu1 %2552  ;;  %v2507_v17 = vpop.permute.xlu0 %2506 }
0x113c   :  { %6467 = vmatpush3.bf16.msra.mxu0 %v2529_v12  ;;  %v2557_v3 = vmul.f32 %v2553_v62, %v7308_v51  ;;  %v2512_v48 = vmul.f32 %v2507_v17, %v7326_v13 }
0x113e   :  { %v2559_v47 = vpack.c.bf16 %v2557_v3, %v2556_v53 }
0x113f   :  { %v2509_v58 = vpop.permute.xlu1 %2508  ;;  %v2537_v19 = vpop.permute.xlu0 %2536 }
0x1140   :  { %v2513_v23 = vmul.f32 %v2509_v58, %v7326_v13  ;;  %v2542_v33 = vmul.f32 %v2537_v19, %v7312_v56 }
0x1142   :  { %v2515_v6 = vpack.c.bf16 %v2513_v23, %v2512_v48 }
0x1143   :  { %v2539_v27 = vpop.permute.xlu1 %2538  ;;  %v2493_v15 = vpop.permute.xlu0 %2492 }
0x1144   :  { %v2543_v38 = vmul.f32 %v2539_v27, %v7312_v56 }
0x1146   :  { %v2545_v62 = vpack.c.bf16 %v2543_v38, %v2542_v33 }
0x1147   :  { %v2495_v16 = vpop.permute.xlu1 %2494  ;;  %v2479_v44 = vpop.permute.xlu0 %2478 }
0x1148   :  { %v2499_v28 = vmul.f32 %v2495_v16, %v7329_v14 }
0x114b   :  { %v2481_v31 = vpop.permute.xlu1 %2480  ;;  %v2561_v4 = vpop.permute.xlu0 %2560 }
0x114c   :  { %v2568_v11 = vmul.f32 %v2561_v4, %v7306_v49  ;;  %v2498_v4 = vmul.f32 %v2493_v15, %v7329_v14  ;;  %v2485_v3 = vmul.f32 %v2481_v31, %v7336_v26 }
0x114f   :  { %v2563_v29 = vpop.permute.xlu1 %2562  ;;  %v2517_v0 = vpop.permute.xlu0 %2516 }
0x1150   :  { %v2569_v55 = vmul.f32 %v2563_v29, %v7306_v49  ;;  %v2524_v7 = vmul.f32 %v2517_v0, %v7319_v5  ;;  %v2501_v0 = vpack.c.bf16 %v2499_v28, %v2498_v4 }
0x1152   :  { %v2572_v9 = vpack.c.bf16 %v2569_v55, %v2568_v11 }
0x1153   :  { %v2519_v32 = vpop.permute.xlu1 %2518  ;;  %v2547_v2 = vpop.permute.xlu0 %2546 }
0x1154   :  { %v2525_v21 = vmul.f32 %v2519_v32, %v7319_v5  ;;  %6468 = vmatprep.subr.bf16.mxu0 %v2572_v9  ;;  %v2554_v50 = vmul.f32 %v2547_v2, %v7308_v51 }
0x1156   :  { %v2528_v46 = vpack.c.bf16 %v2525_v21, %v2524_v7  ;;  %v2484_v7 = vmul.f32 %v2479_v44, %v7336_v26 }
0x1157   :  { %v2549_v59 = vpop.permute.xlu1 %2548  ;;  %v2503_v37 = vpop.permute.xlu0 %2502 }
0x1158   :  { %v2555_v45 = vmul.f32 %v2549_v59, %v7308_v51  ;;  %6469 = vmatpush3.bf16.msra.mxu0 %v2528_v46  ;;  %v2510_v57 = vmul.f32 %v2503_v37, %v7326_v13  ;;  %v2487_v23 = vpack.c.bf16 %v2485_v3, %v2484_v7 }
0x1159   :  { %6470 = vmatprep.subr.bf16.mxu0 %v2559_v47 }
0x115a   :  { %v2558_v8 = vpack.c.bf16 %v2555_v45, %v2554_v50 }
0x115b   :  { %v2505_v54 = vpop.permute.xlu1 %2504  ;;  %v2533_v10 = vpop.permute.xlu0 %2532 }
0x115c   :  { %v2511_v1 = vmul.f32 %v2505_v54, %v7326_v13  ;;  %6471 = vmatpush3.bf16.msra.mxu0 %v2515_v6  ;;  %v2540_v27 = vmul.f32 %v2533_v10, %v7312_v56 }
0x115d   :  { %6472 = vmatprep.subr.bf16.mxu0 %v2558_v8 }
0x115e   :  { %v2514_v12 = vpack.c.bf16 %v2511_v1, %v2510_v57 }
0x115f   :  { %v2535_v17 = vpop.permute.xlu1 %2534  ;;  %v2489_v58 = vpop.permute.xlu0 %2488 }
0x1160   :  { %v2541_v29 = vmul.f32 %v2535_v17, %v7312_v56  ;;  %6473 = vmatpush3.bf16.msra.mxu0 %v2514_v12  ;;  %v2496_v19 = vmul.f32 %v2489_v58, %v7329_v14  ;;  %v2708_v17 = vstv %s6071_s13  ;;  %s6219_s13 = sld [smem:[#allocation2 + $0x8]] }
0x1161   :  { %6474 = vmatprep.subr.bf16.mxu0 %v2545_v62 }
0x1162   :  { %v2544_v11 = vpack.c.bf16 %v2541_v29, %v2540_v27  ;;  %v2709_v27 = vadd.f32 %v2708_v17, %v7254_v18 }
0x1163   :  { %v2491_v55 = vpop.permute.xlu1 %2490  ;;  %v2579_v9 = vpop.permute.xlu0 %2578 }
0x1164   :  { %v2497_v16 = vmul.f32 %v2491_v55, %v7329_v14  ;;  %6475 = vmatpush3.bf16.msra.mxu0 %v2501_v0  ;;  %v2584_v21 = vmul.f32 %v8334_v52, %v2579_v9  ;;  %7149 = vrcp.f32 %v2709_v27 }
0x1165   :  { %6476 = vmatprep.subr.bf16.mxu0 %v2544_v11 }
0x1166   :  { %v2500_v32 = vpack.c.bf16 %v2497_v16, %v2496_v19 }
0x1167   :  { %v2581_v15 = vpop.permute.xlu1 %2580  ;;  %v2475_v2 = vpop.permute.xlu0 %2474 }
0x1168   :  { %v2585_v53 = vmul.f32 %v8334_v52, %v2581_v15  ;;  %6477 = vmatpush3.bf16.msra.mxu0 %v2500_v32  ;;  %v2482_v59 = vmul.f32 %v2475_v2, %v7336_v26 }
0x1169   :  { %6478 = vmatprep.subr.bf16.mxu0 %v2531_v30 }
0x116a   :  { %v2587_v46 = vpack.c.bf16 %v2585_v53, %v2584_v21 }
0x116b   :  { %v2477_v47 = vpop.permute.xlu1 %2476  ;;  %v2575_v37 = vpop.permute.xlu0 %2574 }
0x116c   :  { %v2483_v31 = vmul.f32 %v2477_v47, %v7336_v26  ;;  %6479 = vmatpush3.bf16.msra.mxu0 %v2487_v23  ;;  %6860 = vmatpush3.bf16.msra.mxu1 %v2587_v46  ;;  %v2582_v40 = vmul.f32 %v8334_v52, %v2575_v37 }
0x116d   :  { %6480 = vmatprep.subr.bf16.mxu0 %v2530_v39  ;;  %6861 = vmatprep.subr.bf16.mxu1 %v7197_v24 }
0x116e   :  { %v2486_v44 = vpack.c.bf16 %v2483_v31, %v2482_v59 }
0x116f   :  { %v2577_v48 = vpop.permute.xlu1 %2576 }
0x1170   :  { %v2583_v30 = vmul.f32 %v8334_v52, %v2577_v48  ;;  %6481 = vmatpush3.bf16.msra.mxu0 %v2486_v44 }
0x1171   :  { %v7150_v3 = vpop.eup %7149 }
0x1172   :  { %v2586_v50 = vpack.c.bf16 %v2583_v30, %v2582_v40 }
0x1173   :  { %2639 = vmatmul.mubr.bf16.vlgmr.msra.gmra.mxu0 %v7047_v34 }
0x1174   :  { %6862 = vmatpush3.bf16.msra.mxu1 %v2586_v50 }
0x1175   :  { %2804 = vmatprep.subr.bf16.mxu1 %v7188_v36 }
0x1177   :  { %6864 = vmatmul.mubr.msk.bf16.vlgmr.msra.gmra.mxu1 %vm415_vm2, %v7050_v63 }
0x1233   :  { %v6482_v25 = vpop.f32.mrf.mxu0 }
0x1235   :  { %v6483_v39 = vpop.f32.mrf.mxu0 }
0x1236   :  { %v6484_v45 = vadd.f32 %v6483_v39, %v6482_v25 }
0x1237   :  { %v6485_v6 = vpop.f32.mrf.mxu0  ;;  %v2681_v8 = vpop.f32.mrf.mxu1 }
0x1238   :  { %v2682_v38 = vadd.f32 %v6484_v45, %v2681_v8 }
0x1239   :  { %v6486_v52 = vpop.f32.mrf.mxu0  ;;  %v6865_v54 = vpop.f32.mrf.mxu1 }
0x123a   :  { %v2688_v10 = vsub.f32 %v8389_v60, %v2682_v38  ;;  %6069 = vst [vmem:[%s10523_s7 + $0x30] sm:$0xff] %v2682_v38  ;;  %v6487_v57 = vadd.f32 %v6486_v52, %v6485_v6 }
0x123b   :  { %v2684_v1 = vpop.f32.mrf.mxu1 }
0x123c   :  { %v8725_v33 = vsub.f32 %v8362_v35, %v2688_v10  ;;  %v2685_v28 = vadd.f32 %v6487_v57, %v2684_v1 }
0x123d   :  { %v6866_v12 = vpop.f32.mrf.mxu1 }
0x123e   :  { %v2689_v62 = vsub.f32 %v8391_v43, %v2685_v28  ;;  %6070 = vst [vmem:[%s10523_s7 + $0x38] sm:$0xff] %v2685_v28  ;;  %v2696_v60 = vadd.f32 %v8725_v33, %v2682_v38 }
0x1240   :  { %v8733_v58 = vsub.f32 %v8370_v41, %v2689_v62  ;;  %v2698_v35 = vmul.f32 %v8377_v22, %v2696_v60 }
0x1242   :  { %v2697_v4 = vadd.f32 %v8733_v58, %v2685_v28 }
0x1244   :  { %v2699_v29 = vmul.f32 %v8383_v61, %v2697_v4 }
0x1246   :  { %v2700_v0 = vadd.f32 %v2699_v29, %v2698_v35 }
0x1248   :  { %v2701_v43 = vrot.slane %v2700_v0, 4 }
0x124a   :  { %v2702_v11 = vadd.f32 %v2701_v43, %v2700_v0 }
0x124c   :  { %v2703_v55 = vrot.slane %v2702_v11, 2 }
0x124e   :  { %v2704_v9 = vadd.f32 %v2703_v55, %v2702_v11 }
0x1250   :  { %v2705_v19 = vrot.slane %v2704_v9, 1 }
0x1252   :  { %v2706_v16 = vadd.f32 %v2705_v19, %v2704_v9  ;;  %v8795_v19 = vld [vmem:[%s10519_s3 + $0x8] ss:$0 sm:$0xff] }
0x1254   :  { %v2707_v41 = vsub.f32 %v7256_v20, %v2706_v16 }
0x1256   :  { %v2711_v32 = vmul.f32 %v7150_v3, %v2707_v41 }
0x1258   :  { %v2712_v15 = vmul.f32 %v8377_v22, %v2711_v32  ;;  %v2713_v2 = vmul.f32 %v8383_v61, %v2711_v32  ;;  %v7051_v22 = vld [vmem:[%s10520_s4 + $0x84] ss:$8 sps:$4 sm:$0xff]   ;;  %v7053_v32 = vld [vmem:[%s10520_s4 + $0x80] ss:$8 sps:$4 sm:$0xff]  }
0x1259   :  { %6080 = vmatprep.mubr.msk.bf16.mxu1 %vm197_vm0, %v7051_v22 }
0x125a   :  { %v8742_v7 = vadd.f32 %v2712_v15, %v2696_v60  ;;  %v8744_v21 = vadd.f32 %v2713_v2, %v2697_v4  ;;  %v7054_v15 = vld [vmem:[%s10520_s4 + $0x94] ss:$8 sps:$4 sm:$0xff]   ;;  %v7056_v2 = vld [vmem:[%s10520_s4 + $0x90] ss:$8 sps:$4 sm:$0xff]  }
0x125c   :  { %v2716_v53 = vsub.f32 %v8742_v7, %v8725_v33  ;;  %v2717_v23 = vsub.f32 %v8744_v21, %v8733_v58 }
0x125e   :  { %2768 = vrot.lane.b32.xlu1 %v2717_v23, %s7190_s14  ;;  %2766 = vrot.lane.b32.xlu0 %v2716_v53, %s7190_s14  ;;  %v2751_v46 = vpack.c.bf16 %v2717_v23, %v2716_v53 }
0x1262   :  { %2761 = vrot.lane.b32.xlu1 %v2717_v23, %s7189_s1  ;;  %2759 = vrot.lane.b32.xlu0 %v2716_v53, %s7189_s1 }
0x1266   :  { %2754 = vrot.lane.b32.xlu1 %v2717_v23, %s7191_s15  ;;  %2752 = vrot.lane.b32.xlu0 %v2716_v53, %s7191_s15 }
0x126a   :  { %2746 = vrot.lane.b32.xlu1 %v2717_v23, %s7192_s16  ;;  %2744 = vrot.lane.b32.xlu0 %v2716_v53, %s7192_s16 }
0x126e   :  { %2739 = vrot.lane.b32.xlu1 %v2717_v23, %s7193_s17  ;;  %2737 = vrot.lane.b32.xlu0 %v2716_v53, %s7193_s17 }
0x1272   :  { %2732 = vrot.lane.b32.xlu1 %v2717_v23, %s7194_s18  ;;  %2730 = vrot.lane.b32.xlu0 %v2716_v53, %s7194_s18 }
0x1276   :  { %2725 = vrot.lane.b32.xlu1 %v2717_v23, %s7195_s19  ;;  %2723 = vrot.lane.b32.xlu0 %v2716_v53, %s7195_s19 }
0x127a   :  { %2775 = vrot.lane.b32.xlu1 %v2717_v23, %s7196_s20  ;;  %2773 = vrot.lane.b32.xlu0 %v2716_v53, %s7196_s20 }
0x12d0   :  { %v2769_v61 = vpop.permute.xlu1 %2768  ;;  %v2767_v47 = vpop.permute.xlu0 %2766 }
0x12d1   :  { %v2771_v59 = vmul.f32 %v2769_v61, %v7306_v49  ;;  %v2770_v31 = vmul.f32 %v2767_v47, %v7306_v49 }
0x12d3   :  { %v2772_v37 = vpack.c.bf16 %v2771_v59, %v2770_v31 }
0x12d4   :  { %v2762_v44 = vpop.permute.xlu1 %2761  ;;  %v2760_v48 = vpop.permute.xlu0 %2759 }
0x12d5   :  { %v2764_v34 = vmul.f32 %v2762_v44, %v7308_v51  ;;  %v2763_v40 = vmul.f32 %v2760_v48, %v7308_v51  ;;  %2805 = vmatpush1.bf16.msra.mxu1 %v2772_v37 }
0x12d6   :  { %2806 = vmatprep.subr.bf16.mxu1 %v7188_v36 }
0x12d7   :  { %v2765_v30 = vpack.c.bf16 %v2764_v34, %v2763_v40 }
0x12d8   :  { %v2755_v50 = vpop.permute.xlu1 %2754  ;;  %v2753_v63 = vpop.permute.xlu0 %2752 }
0x12d9   :  { %v2757_v25 = vmul.f32 %v2755_v50, %v7312_v56  ;;  %v2756_v39 = vmul.f32 %v2753_v63, %v7312_v56  ;;  %2807 = vmatpush1.bf16.msra.mxu1 %v2765_v30  ;;  %v7059_v50 = vld [vmem:[%s10521_s5 + $0xc4] ss:$12 sps:$4 sm:$0xff]  }
0x12da   :  { %2808 = vmatprep.subr.bf16.mxu1 %v7188_v36  ;;  %3048 = vmatprep.mubr.bf16.mxu0 %v7059_v50 }
0x12db   :  { %v2758_v45 = vpack.c.bf16 %v2757_v25, %v2756_v39 }
0x12dc   :  { %v2747_v6 = vpop.permute.xlu1 %2746  ;;  %v2745_v8 = vpop.permute.xlu0 %2744 }
0x12dd   :  { %2809 = vmatpush1.bf16.msra.mxu1 %v2758_v45  ;;  %v2749_v38 = vmul.f32 %v2747_v6, %v7319_v5  ;;  %v2748_v52 = vmul.f32 %v2745_v8, %v7319_v5 }
0x12de   :  { %2810 = vmatprep.subr.bf16.mxu1 %v7188_v36 }
0x12df   :  { %v2750_v57 = vpack.c.bf16 %v2749_v38, %v2748_v52 }
0x12e0   :  { %v2740_v54 = vpop.permute.xlu1 %2739  ;;  %v2738_v10 = vpop.permute.xlu0 %2737 }
0x12e1   :  { %2811 = vmatpush1.bf16.msra.mxu1 %v2751_v46  ;;  %v2742_v1 = vmul.f32 %v2740_v54, %v7326_v13  ;;  %v2741_v28 = vmul.f32 %v2738_v10, %v7326_v13 }
0x12e2   :  { %2812 = vmatprep.subr.bf16.mxu1 %v7188_v36 }
0x12e3   :  { %v2743_v17 = vpack.c.bf16 %v2742_v1, %v2741_v28 }
0x12e4   :  { %v2733_v12 = vpop.permute.xlu1 %2732  ;;  %v2731_v62 = vpop.permute.xlu0 %2730 }
0x12e5   :  { %2813 = vmatpush1.bf16.msra.mxu1 %v2750_v57  ;;  %v2735_v60 = vmul.f32 %v2733_v12, %v7329_v14  ;;  %v2734_v4 = vmul.f32 %v2731_v62, %v7329_v14 }
0x12e6   :  { %2814 = vmatprep.subr.bf16.mxu1 %v7188_v36 }
0x12e7   :  { %v2736_v29 = vpack.c.bf16 %v2735_v60, %v2734_v4 }
0x12e8   :  { %v2726_v27 = vpop.permute.xlu1 %2725  ;;  %v2724_v35 = vpop.permute.xlu0 %2723 }
0x12e9   :  { %2815 = vmatpush1.bf16.msra.mxu1 %v2743_v17  ;;  %v2728_v0 = vmul.f32 %v2726_v27, %v7336_v26  ;;  %v2727_v43 = vmul.f32 %v2724_v35, %v7336_v26 }
0x12ea   :  { %2816 = vmatprep.subr.bf16.mxu1 %v7188_v36 }
0x12eb   :  { %v2729_v11 = vpack.c.bf16 %v2728_v0, %v2727_v43 }
0x12ec   :  { %v2776_v55 = vpop.permute.xlu1 %2775  ;;  %v2774_v9 = vpop.permute.xlu0 %2773 }
0x12ed   :  { %2817 = vmatpush1.bf16.msra.mxu1 %v2736_v29  ;;  %v2778_v16 = vmul.f32 %v8795_v19, %v2776_v55  ;;  %v2777_v3 = vmul.f32 %v8795_v19, %v2774_v9 }
0x12ee   :  { %2818 = vmatprep.subr.bf16.mxu1 %v7188_v36 }
0x12ef   :  { %v2779_v41 = vpack.c.bf16 %v2778_v16, %v2777_v3 }
0x12f1   :  { %2819 = vmatpush1.bf16.msra.mxu1 %v2729_v11 }
0x12f2   :  { %2832 = vmatprep.subr.bf16.mxu1 %v7188_v36 }
0x12f5   :  { %2833 = vmatpush2.bf16.msra.mxu1 %v7351_v42 }
0x12f6   :  { %2834 = vmatprep.subr.bf16.mxu1 %v7188_v36 }
0x12f9   :  { %2835 = vmatpush2.bf16.msra.mxu1 %v2779_v41 }
0x12fc   :  { %2837 = vmatmul.mubr.bf16.vlgmr.msra.gmra.mxu1 %v7053_v32 }
0x12fd   :  { %6081 = vmatprep.mubr.msk.bf16.mxu1 %vm197_vm0, %v7054_v15 }
0x1304   :  { %2845 = vmatmul.mubr.bf16.gmra.mxu1 %v7056_v2 }
0x13bc   :  { %v2838_v53 = vpop.f32.mrf.mxu1 }
0x13bd   :  { %v8811_v23 = vmax.f32 %v2838_v53, 0.0 }
0x13be   :  { %v2840_v46 = vpop.f32.mrf.mxu1 }
0x13bf   :  { %2952 = vrot.lane.b32.xlu0 %v8811_v23, %s7190_s14 }
0x13c0   :  { %v2841_v22 = vpop.f32.mrf.mxu1 }
0x13c1   :  { %v8815_v61 = vmax.f32 %v2841_v22, 0.0 }
0x13c2   :  { %v2843_v47 = vpop.f32.mrf.mxu1 }
0x13c3   :  { %2908 = vrot.lane.b32.xlu0 %v8811_v23, %s7192_s16  ;;  %2954 = vrot.lane.b32.xlu1 %v8815_v61, %s7190_s14  ;;  %v2922_v59 = vpack.c.bf16 %v8815_v61, %v8811_v23 }
0x13c4   :  { %v2846_v31 = vpop.f32.mrf.mxu1 }
0x13c5   :  { %v8827_v44 = vmax.f32 %v2846_v31, 0.0 }
0x13c6   :  { %v2848_v37 = vpop.f32.mrf.mxu1 }
0x13c7   :  { %2938 = vrot.lane.b32.xlu0 %v8811_v23, %s7189_s1  ;;  %2910 = vrot.lane.b32.xlu1 %v8815_v61, %s7192_s16 }
0x13c8   :  { %v2849_v48 = vpop.f32.mrf.mxu1 }
0x13c9   :  { %v8829_v34 = vmax.f32 %v2849_v48, 0.0 }
0x13ca   :  { %v2851_v40 = vpop.f32.mrf.mxu1 }
0x13cb   :  { %2894 = vrot.lane.b32.xlu0 %v8811_v23, %s7193_s17  ;;  %2940 = vrot.lane.b32.xlu1 %v8815_v61, %s7189_s1  ;;  %v2923_v30 = vpack.c.bf16 %v8829_v34, %v8827_v44 }
0x13cf   :  { %2924 = vrot.lane.b32.xlu0 %v8811_v23, %s7191_s15  ;;  %2896 = vrot.lane.b32.xlu1 %v8815_v61, %s7193_s17 }
0x13d3   :  { %2926 = vrot.lane.b32.xlu1 %v8815_v61, %s7191_s15  ;;  %2956 = vrot.lane.b32.xlu0 %v8827_v44, %s7190_s14 }
0x13d7   :  { %2912 = vrot.lane.b32.xlu0 %v8827_v44, %s7192_s16  ;;  %2958 = vrot.lane.b32.xlu1 %v8829_v34, %s7190_s14 }
0x13db   :  { %2942 = vrot.lane.b32.xlu0 %v8827_v44, %s7189_s1  ;;  %2914 = vrot.lane.b32.xlu1 %v8829_v34, %s7192_s16 }
0x13df   :  { %2898 = vrot.lane.b32.xlu0 %v8827_v44, %s7193_s17  ;;  %2944 = vrot.lane.b32.xlu1 %v8829_v34, %s7189_s1 }
0x13e3   :  { %2928 = vrot.lane.b32.xlu0 %v8827_v44, %s7191_s15  ;;  %2900 = vrot.lane.b32.xlu1 %v8829_v34, %s7193_s17 }
0x13e7   :  { %2884 = vrot.lane.b32.xlu0 %v8827_v44, %s7194_s18  ;;  %2930 = vrot.lane.b32.xlu1 %v8829_v34, %s7191_s15 }
0x13eb   :  { %2880 = vrot.lane.b32.xlu0 %v8811_v23, %s7194_s18  ;;  %2886 = vrot.lane.b32.xlu1 %v8829_v34, %s7194_s18 }
0x13ef   :  { %2870 = vrot.lane.b32.xlu0 %v8827_v44, %s7195_s19  ;;  %2882 = vrot.lane.b32.xlu1 %v8815_v61, %s7194_s18 }
0x13f3   :  { %2866 = vrot.lane.b32.xlu0 %v8811_v23, %s7195_s19  ;;  %2872 = vrot.lane.b32.xlu1 %v8829_v34, %s7195_s19 }
0x13f7   :  { %2970 = vrot.lane.b32.xlu0 %v8827_v44, %s7196_s20  ;;  %2868 = vrot.lane.b32.xlu1 %v8815_v61, %s7195_s19 }
0x13fb   :  { %2966 = vrot.lane.b32.xlu0 %v8811_v23, %s7196_s20  ;;  %2972 = vrot.lane.b32.xlu1 %v8829_v34, %s7196_s20 }
0x13ff   :  { %2968 = vrot.lane.b32.xlu1 %v8815_v61, %s7196_s20 }
0x1431   :  { %v2953_v63 = vpop.permute.xlu0 %2952 }
0x1432   :  { %v2960_v0 = vmul.f32 %v2953_v63, %v7306_v49 }
0x1435   :  { %v2909_v25 = vpop.permute.xlu0 %2908  ;;  %v2955_v39 = vpop.permute.xlu1 %2954 }
0x1436   :  { %v2961_v60 = vmul.f32 %v2955_v39, %v7306_v49  ;;  %v2916_v3 = vmul.f32 %v2909_v25, %v7319_v5 }
0x1438   :  { %v2964_v55 = vpack.c.bf16 %v2961_v60, %v2960_v0 }
0x1439   :  { %v2939_v45 = vpop.permute.xlu0 %2938  ;;  %v2911_v6 = vpop.permute.xlu1 %2910 }
0x143a   :  { %v2917_v43 = vmul.f32 %v2911_v6, %v7319_v5  ;;  %v2946_v37 = vmul.f32 %v2939_v45, %v7308_v51 }
0x143c   :  { %v2920_v15 = vpack.c.bf16 %v2917_v43, %v2916_v3 }
0x143d   :  { %v2895_v8 = vpop.permute.xlu0 %2894  ;;  %v2941_v38 = vpop.permute.xlu1 %2940 }
0x143e   :  { %v2947_v53 = vmul.f32 %v2941_v38, %v7308_v51  ;;  %v2902_v39 = vmul.f32 %v2895_v8, %v7326_v13 }
0x1440   :  { %v2950_v50 = vpack.c.bf16 %v2947_v53, %v2946_v37  ;;  %v7064_v37 = vld [vmem:[%s10521_s5 + $0xe0] ss:$12 sps:$4 sm:$0xff]  }
0x1441   :  { %v2925_v52 = vpop.permute.xlu0 %2924  ;;  %v2897_v54 = vpop.permute.xlu1 %2896 }
0x1442   :  { %v2903_v48 = vmul.f32 %v2897_v54, %v7326_v13 }
0x1445   :  { %v2927_v10 = vpop.permute.xlu1 %2926  ;;  %v2957_v57 = vpop.permute.xlu0 %2956 }
0x1446   :  { %v2962_v12 = vmul.f32 %v2957_v57, %v7306_v49  ;;  %v2906_v57 = vpack.c.bf16 %v2903_v48, %v2902_v39 }
0x1449   :  { %v2913_v1 = vpop.permute.xlu0 %2912  ;;  %v2959_v28 = vpop.permute.xlu1 %2958 }
0x144a   :  { %v2963_v62 = vmul.f32 %v2959_v28, %v7306_v49  ;;  %v2918_v35 = vmul.f32 %v2913_v1, %v7319_v5  ;;  %v2933_v28 = vmul.f32 %v2927_v10, %v7312_v56 }
0x144c   :  { %v2965_v17 = vpack.c.bf16 %v2963_v62, %v2962_v12 }
0x144d   :  { %v2943_v4 = vpop.permute.xlu0 %2942  ;;  %v2915_v27 = vpop.permute.xlu1 %2914 }
0x144e   :  { %v2919_v29 = vmul.f32 %v2915_v27, %v7319_v5  ;;  %6492 = vmatprep.subr.bf16.mxu0 %v2965_v17  ;;  %v2948_v41 = vmul.f32 %v2943_v4, %v7308_v51  ;;  %v2932_v17 = vmul.f32 %v2925_v52, %v7312_v56 }
0x1450   :  { %v2921_v11 = vpack.c.bf16 %v2919_v29, %v2918_v35  ;;  %v2936_v60 = vpack.c.bf16 %v2933_v28, %v2932_v17 }
0x1451   :  { %v2899_v9 = vpop.permute.xlu0 %2898  ;;  %v2945_v16 = vpop.permute.xlu1 %2944 }
0x1452   :  { %v2949_v32 = vmul.f32 %v2945_v16, %v7308_v51  ;;  %6493 = vmatpush3.bf16.msra.mxu0 %v2921_v11  ;;  %v2904_v47 = vmul.f32 %v2899_v9, %v7326_v13 }
0x1453   :  { %6494 = vmatprep.subr.bf16.mxu0 %v2964_v55 }
0x1454   :  { %v2951_v2 = vpack.c.bf16 %v2949_v32, %v2948_v41 }
0x1455   :  { %v2929_v46 = vpop.permute.xlu0 %2928  ;;  %v2901_v22 = vpop.permute.xlu1 %2900 }
0x1456   :  { %v2905_v31 = vmul.f32 %v2901_v22, %v7326_v13  ;;  %6495 = vmatpush3.bf16.msra.mxu0 %v2920_v15  ;;  %v2934_v6 = vmul.f32 %v2929_v46, %v7312_v56 }
0x1457   :  { %6496 = vmatprep.subr.bf16.mxu0 %v2951_v2  ;;  %v7057_v2 = vld [vmem:[%s10521_s5 + $0xc0] ss:$12 sps:$4 sm:$0xff]  }
0x1458   :  { %v2907_v40 = vpack.c.bf16 %v2905_v31, %v2904_v47  ;;  %v7062_v47 = vld [vmem:[%s10521_s5 + $0xd8] ss:$12 sps:$4 sm:$0xff]   ;;  %v7063_v31 = vld [vmem:[%s10521_s5 + $0xc8] ss:$12 sps:$4 sm:$0xff]  }
0x1459   :  { %v2885_v63 = vpop.permute.xlu0 %2884  ;;  %v2931_v25 = vpop.permute.xlu1 %2930 }
0x145a   :  { %v2935_v38 = vmul.f32 %v2931_v25, %v7312_v56  ;;  %6497 = vmatpush3.bf16.msra.mxu0 %v2907_v40  ;;  %v2890_v54 = vmul.f32 %v2885_v63, %v7329_v14 }
0x145b   :  { %6498 = vmatprep.subr.bf16.mxu0 %v2950_v50 }
0x145c   :  { %v2937_v1 = vpack.c.bf16 %v2935_v38, %v2934_v6 }
0x145d   :  { %v2881_v45 = vpop.permute.xlu0 %2880  ;;  %v2887_v12 = vpop.permute.xlu1 %2886 }
0x145e   :  { %v2891_v62 = vmul.f32 %v2887_v12, %v7329_v14  ;;  %6499 = vmatpush3.bf16.msra.mxu0 %v2906_v57  ;;  %v2888_v35 = vmul.f32 %v2881_v45, %v7329_v14 }
0x145f   :  { %6500 = vmatprep.subr.bf16.mxu0 %v2937_v1 }
0x1460   :  { %v2893_v8 = vpack.c.bf16 %v2891_v62, %v2890_v54 }
0x1461   :  { %v2871_v4 = vpop.permute.xlu0 %2870  ;;  %v2883_v27 = vpop.permute.xlu1 %2882 }
0x1462   :  { %v2889_v29 = vmul.f32 %v2883_v27, %v7329_v14  ;;  %6501 = vmatpush3.bf16.msra.mxu0 %v2893_v8  ;;  %v2876_v11 = vmul.f32 %v2871_v4, %v7336_v26 }
0x1463   :  { %6502 = vmatprep.subr.bf16.mxu0 %v2936_v60 }
0x1464   :  { %v2892_v10 = vpack.c.bf16 %v2889_v29, %v2888_v35 }
0x1465   :  { %v2867_v0 = vpop.permute.xlu0 %2866  ;;  %v2873_v43 = vpop.permute.xlu1 %2872 }
0x1466   :  { %v2877_v55 = vmul.f32 %v2873_v43, %v7336_v26  ;;  %6503 = vmatpush3.bf16.msra.mxu0 %v2892_v10  ;;  %v2874_v3 = vmul.f32 %v2867_v0, %v7336_v26 }
0x1467   :  { %6504 = vmatprep.subr.bf16.mxu0 %v2923_v30  ;;  %v7060_v30 = vld [vmem:[%s10521_s5 + $0xdc] ss:$12 sps:$4 sm:$0xff]  }
0x1468   :  { %v2879_v52 = vpack.c.bf16 %v2877_v55, %v2876_v11  ;;  %v7067_v55 = vld [vmem:[%s10522_s6 + $0x64] ss:$12 sps:$4 sm:$0xff]  }
0x1469   :  { %v2971_v9 = vpop.permute.xlu0 %2970  ;;  %v2869_v16 = vpop.permute.xlu1 %2868  ;;  %3287 = vmatprep.mubr.bf16.mxu1 %v7067_v55 }
0x146a   :  { %v2875_v41 = vmul.f32 %v2869_v16, %v7336_v26  ;;  %6505 = vmatpush3.bf16.msra.mxu0 %v2879_v52  ;;  %v2976_v44 = vmul.f32 %v8795_v19, %v2971_v9 }
0x146b   :  { %6506 = vmatprep.subr.bf16.mxu0 %v2922_v59 }
0x146c   :  { %v2878_v32 = vpack.c.bf16 %v2875_v41, %v2874_v3 }
0x146d   :  { %v2973_v15 = vpop.permute.xlu1 %2972  ;;  %v2967_v53 = vpop.permute.xlu0 %2966 }
0x146e   :  { %v2977_v34 = vmul.f32 %v8795_v19, %v2973_v15  ;;  %6507 = vmatpush3.bf16.msra.mxu0 %v2878_v32  ;;  %v2974_v59 = vmul.f32 %v8795_v19, %v2967_v53 }
0x146f   :  { %6867 = vmatprep.subr.bf16.mxu0 %v7351_v42 }
0x1470   :  { %v2979_v23 = vpack.c.bf16 %v2977_v34, %v2976_v44 }
0x1471   :  { %v2969_v61 = vpop.permute.xlu1 %2968  ;;  %3049 = vmatmul.mubr.bf16.vlgmr.msra.gmra.mxu0 %v7057_v2 }
0x1472   :  { %v2975_v46 = vmul.f32 %v8795_v19, %v2969_v61  ;;  %6868 = vmatpush3.bf16.msra.mxu0 %v7351_v42  ;;  %3056 = vmatprep.mubr.bf16.mxu0 %v7060_v30 }
0x1473   :  { %6869 = vmatprep.subr.bf16.mxu0 %v2979_v23 }
0x1474   :  { %v2978_v22 = vpack.c.bf16 %v2975_v46, %v2974_v59 }
0x1476   :  { %6870 = vmatpush3.bf16.msra.mxu0 %v2979_v23 }
0x1477   :  { %6871 = vmatprep.subr.bf16.mxu0 %v2978_v22 }
0x1479   :  { %3057 = vmatmul.mubr.bf16.gmra.mxu0 %v7062_v47 }
0x147a   :  { %6872 = vmatpush3.bf16.msra.mxu0 %v2978_v22  ;;  %6873 = vmatprep.mubr.msk.bf16.mxu0 %vm415_vm2, %v7063_v31 }
0x147b   :  { %6877 = vmatprep.subr.bf16.mxu0 %v7197_v24 }
0x1481   :  { %6874 = vmatmul.mubr.msk.bf16.vlgmr.msra.gmra.mxu0 %vm415_vm2, %v7064_v37 }
0x1482   :  { %6878 = vmatpush3.bf16.msra.mxu0 %v7351_v42  ;;  %6883 = vmatprep.mubr.msk.bf16.mxu0 %vm7198_vm3, %v7197_v24 }
0x1483   :  { %6879 = vmatprep.subr.bf16.mxu0 %v7197_v24 }
0x1531   :  { %v6508_v48 = vpop.f32.mrf.mxu0 }
0x1533   :  { %v6509_v40 = vpop.f32.mrf.mxu0 }
0x1534   :  { %v6510_v12 = vadd.f32 %v6509_v40, %v6508_v48 }
0x1535   :  { %v6511_v50 = vpop.f32.mrf.mxu0 }
0x1537   :  { %v6512_v63 = vpop.f32.mrf.mxu0 }
0x1538   :  { %v6513_v8 = vadd.f32 %v6512_v63, %v6511_v50 }
0x1539   :  { %v6514_v25 = vpop.f32.mrf.mxu0 }
0x153b   :  { %v6515_v39 = vpop.f32.mrf.mxu0 }
0x153c   :  { %v6516_v57 = vadd.f32 %v6515_v39, %v6514_v25 }
0x153d   :  { %v6517_v6 = vpop.f32.mrf.mxu0 }
0x153f   :  { %v6518_v38 = vpop.f32.mrf.mxu0 }
0x1540   :  { %v6519_v54 = vadd.f32 %v6518_v38, %v6517_v6 }
0x1541   :  { %v6875_v1 = vpop.f32.mrf.mxu0 }
0x1542   :  { %v3108_v28 = vadd.f32 %v6875_v1, %v6516_v57 }
0x1543   :  { %v3099_v45 = vpop.f32.mrf.mxu0 }
0x1544   :  { %v8952_v62 = vmax.f32 %v3108_v28, 0.0  ;;  %v3100_v60 = vadd.f32 %v6510_v12, %v3099_v45 }
0x1545   :  { %v6876_v17 = vpop.f32.mrf.mxu0 }
0x1546   :  { %v3111_v4 = vadd.f32 %v6876_v17, %v6519_v54  ;;  %3213 = vrot.lane.b32.xlu0 %v8952_v62, %s7190_s14  ;;  %v8958_v10 = vmax.f32 %v3100_v60, 0.0 }
0x1547   :  { %v3102_v27 = vpop.f32.mrf.mxu0 }
0x1548   :  { %v8956_v35 = vmax.f32 %v3111_v4, 0.0  ;;  %v3103_v29 = vadd.f32 %v6513_v8, %v3102_v27 }
0x154a   :  { %v8960_v0 = vmax.f32 %v3103_v29, 0.0  ;;  %3215 = vrot.lane.b32.xlu1 %v8956_v35, %s7190_s14  ;;  %3169 = vrot.lane.b32.xlu0 %v8952_v62, %s7192_s16  ;;  %v3180_v43 = vpack.c.bf16 %v8956_v35, %v8952_v62 }
0x154c   :  { %v3179_v11 = vpack.c.bf16 %v8960_v0, %v8958_v10 }
0x154e   :  { %3171 = vrot.lane.b32.xlu1 %v8956_v35, %s7192_s16  ;;  %3199 = vrot.lane.b32.xlu0 %v8952_v62, %s7189_s1 }
0x1552   :  { %3201 = vrot.lane.b32.xlu1 %v8956_v35, %s7189_s1  ;;  %3155 = vrot.lane.b32.xlu0 %v8952_v62, %s7193_s17 }
0x1556   :  { %3157 = vrot.lane.b32.xlu1 %v8956_v35, %s7193_s17  ;;  %3185 = vrot.lane.b32.xlu0 %v8952_v62, %s7191_s15 }
0x155a   :  { %3187 = vrot.lane.b32.xlu1 %v8956_v35, %s7191_s15  ;;  %3141 = vrot.lane.b32.xlu0 %v8952_v62, %s7194_s18 }
0x155e   :  { %3143 = vrot.lane.b32.xlu1 %v8956_v35, %s7194_s18  ;;  %3127 = vrot.lane.b32.xlu0 %v8952_v62, %s7195_s19 }
0x1562   :  { %3129 = vrot.lane.b32.xlu1 %v8956_v35, %s7195_s19  ;;  %3209 = vrot.lane.b32.xlu0 %v8958_v10, %s7190_s14 }
0x1566   :  { %3211 = vrot.lane.b32.xlu1 %v8960_v0, %s7190_s14  ;;  %3165 = vrot.lane.b32.xlu0 %v8958_v10, %s7192_s16 }
0x156a   :  { %3167 = vrot.lane.b32.xlu1 %v8960_v0, %s7192_s16  ;;  %3195 = vrot.lane.b32.xlu0 %v8958_v10, %s7189_s1 }
0x156e   :  { %3197 = vrot.lane.b32.xlu1 %v8960_v0, %s7189_s1  ;;  %3151 = vrot.lane.b32.xlu0 %v8958_v10, %s7193_s17 }
0x1572   :  { %3153 = vrot.lane.b32.xlu1 %v8960_v0, %s7193_s17  ;;  %3181 = vrot.lane.b32.xlu0 %v8958_v10, %s7191_s15 }
0x1576   :  { %3183 = vrot.lane.b32.xlu1 %v8960_v0, %s7191_s15  ;;  %3137 = vrot.lane.b32.xlu0 %v8958_v10, %s7194_s18 }
0x157a   :  { %3139 = vrot.lane.b32.xlu1 %v8960_v0, %s7194_s18  ;;  %3227 = vrot.lane.b32.xlu0 %v8952_v62, %s7196_s20  ;;  %v7065_v62 = vld [vmem:[%s10522_s6 + $0x60] ss:$12 sps:$4 sm:$0xff]  }
0x157e   :  { %3229 = vrot.lane.b32.xlu1 %v8956_v35, %s7196_s20  ;;  %3123 = vrot.lane.b32.xlu0 %v8958_v10, %s7195_s19 }
0x1582   :  { %3125 = vrot.lane.b32.xlu1 %v8960_v0, %s7195_s19  ;;  %3223 = vrot.lane.b32.xlu0 %v8958_v10, %s7196_s20  ;;  %v7068_v10 = vld [vmem:[%s10522_s6 + $0x68] ss:$12 sps:$4 sm:$0xff]  }
0x1586   :  { %3225 = vrot.lane.b32.xlu1 %v8960_v0, %s7196_s20 }
0x15b8   :  { %v3214_v52 = vpop.permute.xlu0 %3213 }
0x15b9   :  { %v3219_v3 = vmul.f32 %v3214_v52, %v7306_v49 }
0x15bc   :  { %v3216_v9 = vpop.permute.xlu1 %3215  ;;  %v3170_v16 = vpop.permute.xlu0 %3169 }
0x15bd   :  { %v3220_v41 = vmul.f32 %v3216_v9, %v7306_v49  ;;  %v3175_v44 = vmul.f32 %v3170_v16, %v7319_v5 }
0x15bf   :  { %v3222_v32 = vpack.c.bf16 %v3220_v41, %v3219_v3 }
0x15c0   :  { %v3172_v15 = vpop.permute.xlu1 %3171  ;;  %v3200_v2 = vpop.permute.xlu0 %3199 }
0x15c1   :  { %v3176_v34 = vmul.f32 %v3172_v15, %v7319_v5  ;;  %6525 = vmatprep.subr.bf16.mxu1 %v3222_v32  ;;  %v3205_v45 = vmul.f32 %v3200_v2, %v7308_v51 }
0x15c3   :  { %v3178_v30 = vpack.c.bf16 %v3176_v34, %v3175_v44 }
0x15c4   :  { %v3202_v53 = vpop.permute.xlu1 %3201  ;;  %v3156_v23 = vpop.permute.xlu0 %3155 }
0x15c5   :  { %6526 = vmatpush3.bf16.msra.mxu1 %v3178_v30  ;;  %v3206_v6 = vmul.f32 %v3202_v53, %v7308_v51  ;;  %v3161_v4 = vmul.f32 %v3156_v23, %v7326_v13 }
0x15c7   :  { %v3208_v17 = vpack.c.bf16 %v3206_v6, %v3205_v45 }
0x15c8   :  { %v3158_v61 = vpop.permute.xlu1 %3157  ;;  %v3186_v59 = vpop.permute.xlu0 %3185 }
0x15c9   :  { %v3162_v12 = vmul.f32 %v3158_v61, %v7326_v13  ;;  %v3191_v15 = vmul.f32 %v3186_v59, %v7312_v56 }
0x15cb   :  { %v3164_v55 = vpack.c.bf16 %v3162_v12, %v3161_v4 }
0x15cc   :  { %v3188_v46 = vpop.permute.xlu1 %3187  ;;  %v3142_v22 = vpop.permute.xlu0 %3141 }
0x15cd   :  { %v3192_v9 = vmul.f32 %v3188_v46, %v7312_v56  ;;  %v3147_v23 = vmul.f32 %v3142_v22, %v7329_v14 }
0x15cf   :  { %v3194_v34 = vpack.c.bf16 %v3192_v9, %v3191_v15 }
0x15d0   :  { %v3144_v47 = vpop.permute.xlu1 %3143  ;;  %v3128_v31 = vpop.permute.xlu0 %3127 }
0x15d1   :  { %v3148_v2 = vmul.f32 %v3144_v47, %v7329_v14 }
0x15d4   :  { %v3130_v37 = vpop.permute.xlu1 %3129  ;;  %v3210_v48 = vpop.permute.xlu0 %3209 }
0x15d5   :  { %v3217_v63 = vmul.f32 %v3210_v48, %v7306_v49  ;;  %v3150_v48 = vpack.c.bf16 %v3148_v2, %v3147_v23 }
0x15d8   :  { %v3212_v40 = vpop.permute.xlu1 %3211  ;;  %v3166_v50 = vpop.permute.xlu0 %3165 }
0x15d9   :  { %v3218_v25 = vmul.f32 %v3212_v40, %v7306_v49  ;;  %v3173_v1 = vmul.f32 %v3166_v50, %v7319_v5 }
0x15db   :  { %v3221_v39 = vpack.c.bf16 %v3218_v25, %v3217_v63  ;;  %v3134_v25 = vmul.f32 %v3130_v37, %v7336_v26 }
0x15dc   :  { %v3168_v38 = vpop.permute.xlu1 %3167  ;;  %v3196_v57 = vpop.permute.xlu0 %3195 }
0x15dd   :  { %v3174_v28 = vmul.f32 %v3168_v38, %v7319_v5  ;;  %6527 = vmatprep.subr.bf16.mxu1 %v3221_v39  ;;  %v3203_v27 = vmul.f32 %v3196_v57, %v7308_v51  ;;  %v3133_v38 = vmul.f32 %v3128_v31, %v7336_v26 }
0x15df   :  { %v3177_v54 = vpack.c.bf16 %v3174_v28, %v3173_v1  ;;  %v3136_v28 = vpack.c.bf16 %v3134_v25, %v3133_v38 }
0x15e0   :  { %v3198_v8 = vpop.permute.xlu1 %3197  ;;  %v3152_v60 = vpop.permute.xlu0 %3151 }
0x15e1   :  { %v3204_v29 = vmul.f32 %v3198_v8, %v7308_v51  ;;  %6528 = vmatpush3.bf16.msra.mxu1 %v3177_v54  ;;  %v3159_v41 = vmul.f32 %v3152_v60, %v7326_v13 }
0x15e2   :  { %6529 = vmatprep.subr.bf16.mxu1 %v3208_v17 }
0x15e3   :  { %v3207_v52 = vpack.c.bf16 %v3204_v29, %v3203_v27 }
0x15e4   :  { %v3154_v16 = vpop.permute.xlu1 %3153  ;;  %v3182_v3 = vpop.permute.xlu0 %3181 }
0x15e5   :  { %v3160_v32 = vmul.f32 %v3154_v16, %v7326_v13  ;;  %6530 = vmatpush3.bf16.msra.mxu1 %v3164_v55  ;;  %v3189_v61 = vmul.f32 %v3182_v3, %v7312_v56 }
0x15e6   :  { %6531 = vmatprep.subr.bf16.mxu1 %v3207_v52 }
0x15e7   :  { %v3163_v44 = vpack.c.bf16 %v3160_v32, %v3159_v41 }
0x15e8   :  { %v3184_v30 = vpop.permute.xlu1 %3183  ;;  %v3138_v53 = vpop.permute.xlu0 %3137 }
0x15e9   :  { %v3190_v46 = vmul.f32 %v3184_v30, %v7312_v56  ;;  %6532 = vmatpush3.bf16.msra.mxu1 %v3163_v44  ;;  %v3145_v59 = vmul.f32 %v3138_v53, %v7329_v14 }
0x15ea   :  { %6533 = vmatprep.subr.bf16.mxu1 %v3194_v34  ;;  %v3357_v34 = vstv %s6108_s12 }
0x15eb   :  { %v3193_v40 = vpack.c.bf16 %v3190_v46, %v3189_v61  ;;  %v3358_v23 = vadd.f32 %v3357_v34, %v7254_v18  ;;  %v9104_v61 = vld [vmem:[%s10518_s2 + $0x8] sm:$0xff] }
0x15ec   :  { %v3140_v50 = vpop.permute.xlu1 %3139  ;;  %v3228_v63 = vpop.permute.xlu0 %3227 }
0x15ed   :  { %v3146_v47 = vmul.f32 %v3140_v50, %v7329_v14  ;;  %6534 = vmatpush3.bf16.msra.mxu1 %v3150_v48  ;;  %v3233_v57 = vmul.f32 %v8795_v19, %v3228_v63  ;;  %7151 = vrcp.f32 %v3358_v23 }
0x15ee   :  { %6535 = vmatprep.subr.bf16.mxu1 %v3193_v40 }
0x15ef   :  { %v3149_v39 = vpack.c.bf16 %v3146_v47, %v3145_v59 }
0x15f0   :  { %v3230_v22 = vpop.permute.xlu1 %3229  ;;  %v3124_v6 = vpop.permute.xlu0 %3123 }
0x15f1   :  { %v3234_v1 = vmul.f32 %v8795_v19, %v3230_v22  ;;  %6536 = vmatpush3.bf16.msra.mxu1 %v3149_v39  ;;  %v3131_v54 = vmul.f32 %v3124_v6, %v7336_v26 }
0x15f2   :  { %6537 = vmatprep.subr.bf16.mxu1 %v3180_v43 }
0x15f3   :  { %v3236_v45 = vpack.c.bf16 %v3234_v1, %v3233_v57 }
0x15f4   :  { %v3126_v12 = vpop.permute.xlu1 %3125  ;;  %v3224_v17 = vpop.permute.xlu0 %3223 }
0x15f5   :  { %v3132_v37 = vmul.f32 %v3126_v12, %v7336_v26  ;;  %6538 = vmatpush3.bf16.msra.mxu1 %v3136_v28  ;;  %6880 = vmatpush3.bf16.msra.mxu0 %v3236_v45  ;;  %v3231_v35 = vmul.f32 %v8795_v19, %v3224_v17 }
0x15f6   :  { %6539 = vmatprep.subr.bf16.mxu1 %v3179_v11  ;;  %6881 = vmatprep.subr.bf16.mxu0 %v7197_v24 }
0x15f7   :  { %v3135_v31 = vpack.c.bf16 %v3132_v37, %v3131_v54  ;;  %v7069_v54 = vld [vmem:[%s10520_s4 + $0xa4] ss:$8 sps:$4 sm:$0xff]  }
0x15f8   :  { %v3226_v8 = vpop.permute.xlu1 %3225 }
0x15f9   :  { %v3232_v43 = vmul.f32 %v8795_v19, %v3226_v8  ;;  %6540 = vmatpush3.bf16.msra.mxu1 %v3135_v31 }
0x15fa   :  { %v7152_v25 = vpop.eup %7151 }
0x15fb   :  { %v3235_v60 = vpack.c.bf16 %v3232_v43, %v3231_v35 }
0x15fc   :  { %3288 = vmatmul.mubr.bf16.vlgmr.msra.gmra.mxu1 %v7065_v62 }
0x15fd   :  { %6882 = vmatpush3.bf16.msra.mxu0 %v3235_v60 }
0x15fe   :  { %3453 = vmatprep.subr.bf16.mxu0 %v7188_v36 }
0x1600   :  { %6884 = vmatmul.mubr.msk.bf16.vlgmr.msra.gmra.mxu0 %vm415_vm2, %v7068_v10 }
0x1601   :  { %6117 = vmatprep.mubr.msk.bf16.mxu0 %vm197_vm0, %v7069_v54 }
0x16bc   :  { %v6541_v0 = vpop.f32.mrf.mxu1 }
0x16be   :  { %v6542_v11 = vpop.f32.mrf.mxu1 }
0x16bf   :  { %v6543_v4 = vadd.f32 %v6542_v11, %v6541_v0 }
0x16c0   :  { %v6544_v27 = vpop.f32.mrf.mxu1  ;;  %v3330_v29 = vpop.f32.mrf.mxu0 }
0x16c1   :  { %v3331_v55 = vadd.f32 %v6543_v4, %v3330_v29 }
0x16c2   :  { %v6545_v52 = vpop.f32.mrf.mxu1  ;;  %v6885_v9 = vpop.f32.mrf.mxu0 }
0x16c3   :  { %v3337_v16 = vsub.f32 %v8742_v7, %v3331_v55  ;;  %6106 = vst [vmem:[%s10523_s7 + $0x40] sm:$0xff] %v3331_v55  ;;  %v6546_v3 = vadd.f32 %v6545_v52, %v6544_v27 }
0x16c4   :  { %v3333_v41 = vpop.f32.mrf.mxu0 }
0x16c5   :  { %v9083_v32 = vsub.f32 %v8725_v33, %v3337_v16  ;;  %v3334_v15 = vadd.f32 %v6546_v3, %v3333_v41  ;;  %v9098_v33 = vld [vmem:[%s10518_s2] sm:$0xff] }
0x16c6   :  { %v6886_v2 = vpop.f32.mrf.mxu0 }
0x16c7   :  { %v3338_v44 = vsub.f32 %v8744_v21, %v3334_v15  ;;  %6107 = vst [vmem:[%s10523_s7 + $0x48] sm:$0xff] %v3334_v15  ;;  %v3345_v7 = vadd.f32 %v9083_v32, %v3331_v55 }
0x16c9   :  { %v9091_v30 = vsub.f32 %v8733_v58, %v3338_v44  ;;  %v3347_v21 = vmul.f32 %v9098_v33, %v3345_v7 }
0x16cb   :  { %v3346_v53 = vadd.f32 %v9091_v30, %v3334_v15 }
0x16cd   :  { %v3348_v46 = vmul.f32 %v9104_v61, %v3346_v53 }
0x16cf   :  { %v3349_v58 = vadd.f32 %v3348_v46, %v3347_v21 }
0x16d1   :  { %v3350_v48 = vrot.slane %v3349_v58, 4 }
0x16d3   :  { %v3351_v40 = vadd.f32 %v3350_v48, %v3349_v58 }
0x16d5   :  { %v3352_v50 = vrot.slane %v3351_v40, 2 }
0x16d7   :  { %v3353_v63 = vadd.f32 %v3352_v50, %v3351_v40 }
0x16d9   :  { %v3354_v59 = vrot.slane %v3353_v63, 1 }
0x16db   :  { %v3355_v47 = vadd.f32 %v3354_v59, %v3353_v63 }
0x16dd   :  { %v3356_v39 = vsub.f32 %v7256_v20, %v3355_v47 }
0x16df   :  { %v3360_v22 = vmul.f32 %v7152_v25, %v3356_v39 }
0x16e1   :  { %v3361_v6 = vmul.f32 %v9098_v33, %v3360_v22  ;;  %v3362_v38 = vmul.f32 %v9104_v61, %v3360_v22 }
0x16e3   :  { %v9110_v57 = vadd.f32 %v3361_v6, %v3345_v7  ;;  %v9112_v1 = vadd.f32 %v3362_v38, %v3346_v53  ;;  %v7071_v38 = vld [vmem:[%s10520_s4 + $0xa0] ss:$8 sps:$4 sm:$0xff]  }
0x16e5   :  { %v3365_v28 = vsub.f32 %v9110_v57, %v9083_v32  ;;  %v3366_v45 = vsub.f32 %v9112_v1, %v9091_v30 }
0x16e7   :  { %3417 = vrot.lane.b32.xlu1 %v3366_v45, %s7190_s14  ;;  %3415 = vrot.lane.b32.xlu0 %v3365_v28, %s7190_s14  ;;  %v3400_v12 = vpack.c.bf16 %v3366_v45, %v3365_v28 }
0x16eb   :  { %3410 = vrot.lane.b32.xlu1 %v3366_v45, %s7189_s1  ;;  %3408 = vrot.lane.b32.xlu0 %v3365_v28, %s7189_s1 }
0x16ef   :  { %3403 = vrot.lane.b32.xlu1 %v3366_v45, %s7191_s15  ;;  %3401 = vrot.lane.b32.xlu0 %v3365_v28, %s7191_s15 }
0x16f3   :  { %3395 = vrot.lane.b32.xlu1 %v3366_v45, %s7192_s16  ;;  %3393 = vrot.lane.b32.xlu0 %v3365_v28, %s7192_s16 }
0x16f7   :  { %3388 = vrot.lane.b32.xlu1 %v3366_v45, %s7193_s17  ;;  %3386 = vrot.lane.b32.xlu0 %v3365_v28, %s7193_s17 }
0x16fb   :  { %3381 = vrot.lane.b32.xlu1 %v3366_v45, %s7194_s18  ;;  %3379 = vrot.lane.b32.xlu0 %v3365_v28, %s7194_s18 }
0x16ff   :  { %3374 = vrot.lane.b32.xlu1 %v3366_v45, %s7195_s19  ;;  %3372 = vrot.lane.b32.xlu0 %v3365_v28, %s7195_s19 }
0x1703   :  { %3424 = vrot.lane.b32.xlu1 %v3366_v45, %s7196_s20  ;;  %3422 = vrot.lane.b32.xlu0 %v3365_v28, %s7196_s20  ;;  %v7072_v28 = vld [vmem:[%s10520_s4 + $0xb4] ss:$8 sps:$4 sm:$0xff]  }
0x1759   :  { %v3418_v37 = vpop.permute.xlu1 %3417  ;;  %v3416_v17 = vpop.permute.xlu0 %3415 }
0x175a   :  { %v3420_v31 = vmul.f32 %v3418_v37, %v7306_v49  ;;  %v3419_v8 = vmul.f32 %v3416_v17, %v7306_v49 }
0x175c   :  { %v3421_v62 = vpack.c.bf16 %v3420_v31, %v3419_v8 }
0x175d   :  { %v3411_v35 = vpop.permute.xlu1 %3410  ;;  %v3409_v43 = vpop.permute.xlu0 %3408 }
0x175e   :  { %v3413_v60 = vmul.f32 %v3411_v35, %v7308_v51  ;;  %v3412_v10 = vmul.f32 %v3409_v43, %v7308_v51  ;;  %3454 = vmatpush1.bf16.msra.mxu0 %v3421_v62 }
0x175f   :  { %3455 = vmatprep.subr.bf16.mxu0 %v7188_v36 }
0x1760   :  { %v3414_v0 = vpack.c.bf16 %v3413_v60, %v3412_v10 }
0x1761   :  { %v3404_v11 = vpop.permute.xlu1 %3403  ;;  %v3402_v4 = vpop.permute.xlu0 %3401 }
0x1762   :  { %v3406_v27 = vmul.f32 %v3404_v11, %v7312_v56  ;;  %v3405_v29 = vmul.f32 %v3402_v4, %v7312_v56  ;;  %3456 = vmatpush1.bf16.msra.mxu0 %v3414_v0  ;;  %v7077_v4 = vld [vmem:[%s10521_s5 + $0xf4] ss:$12 sps:$4 sm:$0xff]  }
0x1763   :  { %3457 = vmatprep.subr.bf16.mxu0 %v7188_v36  ;;  %3697 = vmatprep.mubr.bf16.mxu1 %v7077_v4 }
0x1764   :  { %v3407_v55 = vpack.c.bf16 %v3406_v27, %v3405_v29 }
0x1765   :  { %v3396_v52 = vpop.permute.xlu1 %3395  ;;  %v3394_v9 = vpop.permute.xlu0 %3393 }
0x1766   :  { %3458 = vmatpush1.bf16.msra.mxu0 %v3407_v55  ;;  %v3398_v16 = vmul.f32 %v3396_v52, %v7319_v5  ;;  %v3397_v3 = vmul.f32 %v3394_v9, %v7319_v5 }
0x1767   :  { %3459 = vmatprep.subr.bf16.mxu0 %v7188_v36 }
0x1768   :  { %v3399_v2 = vpack.c.bf16 %v3398_v16, %v3397_v3 }
0x1769   :  { %v3389_v41 = vpop.permute.xlu1 %3388  ;;  %v3387_v15 = vpop.permute.xlu0 %3386 }
0x176a   :  { %3460 = vmatpush1.bf16.msra.mxu0 %v3400_v12  ;;  %v3391_v44 = vmul.f32 %v3389_v41, %v7326_v13  ;;  %v3390_v34 = vmul.f32 %v3387_v15, %v7326_v13 }
0x176b   :  { %3461 = vmatprep.subr.bf16.mxu0 %v7188_v36 }
0x176c   :  { %v3392_v23 = vpack.c.bf16 %v3391_v44, %v3390_v34 }
0x176d   :  { %v3382_v7 = vpop.permute.xlu1 %3381  ;;  %v3380_v53 = vpop.permute.xlu0 %3379 }
0x176e   :  { %3462 = vmatpush1.bf16.msra.mxu0 %v3399_v2  ;;  %v3384_v21 = vmul.f32 %v3382_v7, %v7329_v14  ;;  %v3383_v46 = vmul.f32 %v3380_v53, %v7329_v14 }
0x176f   :  { %3463 = vmatprep.subr.bf16.mxu0 %v7188_v36 }
0x1770   :  { %v3385_v40 = vpack.c.bf16 %v3384_v21, %v3383_v46 }
0x1771   :  { %v3375_v58 = vpop.permute.xlu1 %3374  ;;  %v3373_v48 = vpop.permute.xlu0 %3372 }
0x1772   :  { %3464 = vmatpush1.bf16.msra.mxu0 %v3392_v23  ;;  %v3377_v50 = vmul.f32 %v3375_v58, %v7336_v26  ;;  %v3376_v63 = vmul.f32 %v3373_v48, %v7336_v26 }
0x1773   :  { %3465 = vmatprep.subr.bf16.mxu0 %v7188_v36 }
0x1774   :  { %v3378_v59 = vpack.c.bf16 %v3377_v50, %v3376_v63 }
0x1775   :  { %v3425_v47 = vpop.permute.xlu1 %3424  ;;  %v3423_v25 = vpop.permute.xlu0 %3422 }
0x1776   :  { %3466 = vmatpush1.bf16.msra.mxu0 %v3385_v40  ;;  %v3427_v39 = vmul.f32 %v8795_v19, %v3425_v47  ;;  %v3426_v22 = vmul.f32 %v8795_v19, %v3423_v25  ;;  %v7074_v19 = vld [vmem:[%s10520_s4 + $0xb0] ss:$8 sps:$4 sm:$0xff]  }
0x1777   :  { %3467 = vmatprep.subr.bf16.mxu0 %v7188_v36 }
0x1778   :  { %v3428_v6 = vpack.c.bf16 %v3427_v39, %v3426_v22 }
0x177a   :  { %3468 = vmatpush1.bf16.msra.mxu0 %v3378_v59 }
0x177b   :  { %3481 = vmatprep.subr.bf16.mxu0 %v7188_v36 }
0x177e   :  { %3482 = vmatpush2.bf16.msra.mxu0 %v7351_v42 }
0x177f   :  { %3483 = vmatprep.subr.bf16.mxu0 %v7188_v36 }
0x1782   :  { %3484 = vmatpush2.bf16.msra.mxu0 %v3428_v6 }
0x1785   :  { %3486 = vmatmul.mubr.bf16.vlgmr.msra.gmra.mxu0 %v7071_v38 }
0x1786   :  { %6118 = vmatprep.mubr.msk.bf16.mxu0 %vm197_vm0, %v7072_v28 }
0x178d   :  { %3494 = vmatmul.mubr.bf16.gmra.mxu0 %v7074_v19 }
0x1845   :  { %v3487_v45 = vpop.f32.mrf.mxu0 }
0x1846   :  { %v9174_v12 = vmax.f32 %v3487_v45, 0.0 }
0x1847   :  { %v3489_v54 = vpop.f32.mrf.mxu0 }
0x1848   :  { %3601 = vrot.lane.b32.xlu0 %v9174_v12, %s7190_s14 }
0x1849   :  { %v3490_v37 = vpop.f32.mrf.mxu0 }
0x184a   :  { %v9178_v17 = vmax.f32 %v3490_v37, 0.0 }
0x184b   :  { %v3492_v31 = vpop.f32.mrf.mxu0 }
0x184c   :  { %3557 = vrot.lane.b32.xlu0 %v9174_v12, %s7192_s16  ;;  %3603 = vrot.lane.b32.xlu1 %v9178_v17, %s7190_s14  ;;  %v3571_v8 = vpack.c.bf16 %v9178_v17, %v9174_v12 }
0x184d   :  { %v3495_v62 = vpop.f32.mrf.mxu0 }
0x184e   :  { %v9190_v43 = vmax.f32 %v3495_v62, 0.0 }
0x184f   :  { %v3497_v35 = vpop.f32.mrf.mxu0 }
0x1850   :  { %3587 = vrot.lane.b32.xlu0 %v9174_v12, %s7189_s1  ;;  %3559 = vrot.lane.b32.xlu1 %v9178_v17, %s7192_s16 }
0x1851   :  { %v3498_v60 = vpop.f32.mrf.mxu0 }
0x1852   :  { %v9192_v10 = vmax.f32 %v3498_v60, 0.0 }
0x1853   :  { %v3500_v0 = vpop.f32.mrf.mxu0 }
0x1854   :  { %3543 = vrot.lane.b32.xlu0 %v9174_v12, %s7193_s17  ;;  %3589 = vrot.lane.b32.xlu1 %v9178_v17, %s7189_s1  ;;  %v3572_v11 = vpack.c.bf16 %v9192_v10, %v9190_v43 }
0x1858   :  { %3573 = vrot.lane.b32.xlu0 %v9174_v12, %s7191_s15  ;;  %3545 = vrot.lane.b32.xlu1 %v9178_v17, %s7193_s17 }
0x185c   :  { %3575 = vrot.lane.b32.xlu1 %v9178_v17, %s7191_s15  ;;  %3605 = vrot.lane.b32.xlu0 %v9190_v43, %s7190_s14 }
0x1860   :  { %3561 = vrot.lane.b32.xlu0 %v9190_v43, %s7192_s16  ;;  %3607 = vrot.lane.b32.xlu1 %v9192_v10, %s7190_s14 }
0x1864   :  { %3591 = vrot.lane.b32.xlu0 %v9190_v43, %s7189_s1  ;;  %3563 = vrot.lane.b32.xlu1 %v9192_v10, %s7192_s16 }
0x1868   :  { %3547 = vrot.lane.b32.xlu0 %v9190_v43, %s7193_s17  ;;  %3593 = vrot.lane.b32.xlu1 %v9192_v10, %s7189_s1 }
0x186c   :  { %3577 = vrot.lane.b32.xlu0 %v9190_v43, %s7191_s15  ;;  %3549 = vrot.lane.b32.xlu1 %v9192_v10, %s7193_s17 }
0x1870   :  { %3533 = vrot.lane.b32.xlu0 %v9190_v43, %s7194_s18  ;;  %3579 = vrot.lane.b32.xlu1 %v9192_v10, %s7191_s15 }
0x1874   :  { %3529 = vrot.lane.b32.xlu0 %v9174_v12, %s7194_s18  ;;  %3535 = vrot.lane.b32.xlu1 %v9192_v10, %s7194_s18 }
0x1878   :  { %3519 = vrot.lane.b32.xlu0 %v9190_v43, %s7195_s19  ;;  %3531 = vrot.lane.b32.xlu1 %v9178_v17, %s7194_s18 }
0x187c   :  { %3515 = vrot.lane.b32.xlu0 %v9174_v12, %s7195_s19  ;;  %3521 = vrot.lane.b32.xlu1 %v9192_v10, %s7195_s19 }
0x1880   :  { %3619 = vrot.lane.b32.xlu0 %v9190_v43, %s7196_s20  ;;  %3517 = vrot.lane.b32.xlu1 %v9178_v17, %s7195_s19  ;;  %v9293_v43 = vld [vmem:[%s10519_s3 + $0x8] ss:$0 sm:$0xff] }
0x1884   :  { %3615 = vrot.lane.b32.xlu0 %v9174_v12, %s7196_s20  ;;  %3621 = vrot.lane.b32.xlu1 %v9192_v10, %s7196_s20  ;;  %v7078_v12 = vld [vmem:[%s10521_s5 + $0x10c] ss:$12 sps:$4 sm:$0xff]  }
0x1888   :  { %3617 = vrot.lane.b32.xlu1 %v9178_v17, %s7196_s20 }
0x18ba   :  { %v3602_v27 = vpop.permute.xlu0 %3601 }
0x18bb   :  { %v3609_v63 = vmul.f32 %v3602_v27, %v7306_v49 }
0x18be   :  { %v3558_v29 = vpop.permute.xlu0 %3557  ;;  %v3604_v55 = vpop.permute.xlu1 %3603 }
0x18bf   :  { %v3610_v46 = vmul.f32 %v3604_v55, %v7306_v49  ;;  %v3565_v6 = vmul.f32 %v3558_v29, %v7319_v5 }
0x18c1   :  { %v3613_v25 = vpack.c.bf16 %v3610_v46, %v3609_v63 }
0x18c2   :  { %v3588_v52 = vpop.permute.xlu0 %3587  ;;  %v3560_v9 = vpop.permute.xlu1 %3559 }
0x18c3   :  { %v3566_v59 = vmul.f32 %v3560_v9, %v7319_v5  ;;  %v3595_v60 = vmul.f32 %v3588_v52, %v7308_v51 }
0x18c5   :  { %v3569_v19 = vpack.c.bf16 %v3566_v59, %v3565_v6 }
0x18c6   :  { %v3544_v16 = vpop.permute.xlu0 %3543  ;;  %v3590_v3 = vpop.permute.xlu1 %3589 }
0x18c7   :  { %v3596_v54 = vmul.f32 %v3590_v3, %v7308_v51  ;;  %v3551_v9 = vmul.f32 %v3544_v16, %v7326_v13 }
0x18c9   :  { %v3599_v27 = vpack.c.bf16 %v3596_v54, %v3595_v60  ;;  %v7075_v54 = vld [vmem:[%s10521_s5 + $0xf0] ss:$12 sps:$4 sm:$0xff]   ;;  %v7080_v60 = vld [vmem:[%s10521_s5 + $0x108] ss:$12 sps:$4 sm:$0xff]  }
0x18ca   :  { %v3574_v41 = vpop.permute.xlu0 %3573  ;;  %v3546_v15 = vpop.permute.xlu1 %3545 }
0x18cb   :  { %v3552_v0 = vmul.f32 %v3546_v15, %v7326_v13  ;;  %v3581_v46 = vmul.f32 %v3574_v41, %v7312_v56 }
0x18ce   :  { %v3576_v2 = vpop.permute.xlu1 %3575  ;;  %v3606_v44 = vpop.permute.xlu0 %3605 }
0x18cf   :  { %v3611_v53 = vmul.f32 %v3606_v44, %v7306_v49 }
0x18d2   :  { %v3562_v34 = vpop.permute.xlu0 %3561  ;;  %v3608_v7 = vpop.permute.xlu1 %3607 }
0x18d3   :  { %v3612_v23 = vmul.f32 %v3608_v7, %v7306_v49  ;;  %v3567_v40 = vmul.f32 %v3562_v34, %v7319_v5  ;;  %v3555_v34 = vpack.c.bf16 %v3552_v0, %v3551_v9  ;;  %v7081_v0 = vld [vmem:[%s10521_s5 + $0xf8] ss:$12 sps:$4 sm:$0xff]  }
0x18d5   :  { %v3614_v21 = vpack.c.bf16 %v3612_v23, %v3611_v53  ;;  %v3582_v53 = vmul.f32 %v3576_v2, %v7312_v56 }
0x18d6   :  { %v3592_v58 = vpop.permute.xlu0 %3591  ;;  %v3564_v48 = vpop.permute.xlu1 %3563 }
0x18d7   :  { %v3568_v50 = vmul.f32 %v3564_v48, %v7319_v5  ;;  %6551 = vmatprep.subr.bf16.mxu1 %v3614_v21  ;;  %v3597_v38 = vmul.f32 %v3592_v58, %v7308_v51  ;;  %v3585_v58 = vpack.c.bf16 %v3582_v53, %v3581_v46 }
0x18d9   :  { %v3570_v47 = vpack.c.bf16 %v3568_v50, %v3567_v40 }
0x18da   :  { %v3548_v39 = vpop.permute.xlu0 %3547  ;;  %v3594_v22 = vpop.permute.xlu1 %3593 }
0x18db   :  { %v3598_v28 = vmul.f32 %v3594_v22, %v7308_v51  ;;  %6552 = vmatpush3.bf16.msra.mxu1 %v3570_v47  ;;  %v3553_v62 = vmul.f32 %v3548_v39, %v7326_v13 }
0x18dc   :  { %6553 = vmatprep.subr.bf16.mxu1 %v3613_v25 }
0x18dd   :  { %v3600_v45 = vpack.c.bf16 %v3598_v28, %v3597_v38 }
0x18de   :  { %v3578_v37 = vpop.permute.xlu0 %3577  ;;  %v3550_v31 = vpop.permute.xlu1 %3549 }
0x18df   :  { %v3554_v35 = vmul.f32 %v3550_v31, %v7326_v13  ;;  %6554 = vmatpush3.bf16.msra.mxu1 %v3569_v19  ;;  %v3583_v3 = vmul.f32 %v3578_v37, %v7312_v56 }
0x18e0   :  { %6555 = vmatprep.subr.bf16.mxu1 %v3600_v45 }
0x18e1   :  { %v3556_v4 = vpack.c.bf16 %v3554_v35, %v3553_v62 }
0x18e2   :  { %v3534_v29 = vpop.permute.xlu0 %3533  ;;  %v3580_v55 = vpop.permute.xlu1 %3579 }
0x18e3   :  { %v3584_v44 = vmul.f32 %v3580_v55, %v7312_v56  ;;  %6556 = vmatpush3.bf16.msra.mxu1 %v3556_v4  ;;  %v3539_v15 = vmul.f32 %v3534_v29, %v7329_v14  ;;  %v7082_v4 = vld [vmem:[%s10521_s5 + $0x110] ss:$12 sps:$4 sm:$0xff]  }
0x18e4   :  { %6557 = vmatprep.subr.bf16.mxu1 %v3599_v27 }
0x18e5   :  { %v3586_v7 = vpack.c.bf16 %v3584_v44, %v3583_v3 }
0x18e6   :  { %v3530_v52 = vpop.permute.xlu0 %3529  ;;  %v3536_v23 = vpop.permute.xlu1 %3535 }
0x18e7   :  { %v3540_v21 = vmul.f32 %v3536_v23, %v7329_v14  ;;  %6558 = vmatpush3.bf16.msra.mxu1 %v3555_v34  ;;  %v3537_v50 = vmul.f32 %v3530_v52, %v7329_v14 }
0x18e8   :  { %6559 = vmatprep.subr.bf16.mxu1 %v3586_v7 }
0x18e9   :  { %v3542_v16 = vpack.c.bf16 %v3540_v21, %v3539_v15 }
0x18ea   :  { %v3520_v48 = vpop.permute.xlu0 %3519  ;;  %v3532_v40 = vpop.permute.xlu1 %3531 }
0x18eb   :  { %v3538_v63 = vmul.f32 %v3532_v40, %v7329_v14  ;;  %6560 = vmatpush3.bf16.msra.mxu1 %v3542_v16  ;;  %v3525_v25 = vmul.f32 %v3520_v48, %v7336_v26 }
0x18ec   :  { %6561 = vmatprep.subr.bf16.mxu1 %v3585_v58 }
0x18ed   :  { %v3541_v2 = vpack.c.bf16 %v3538_v63, %v3537_v50 }
0x18ee   :  { %v3516_v59 = vpop.permute.xlu0 %3515  ;;  %v3522_v47 = vpop.permute.xlu1 %3521 }
0x18ef   :  { %v3526_v39 = vmul.f32 %v3522_v47, %v7336_v26  ;;  %6562 = vmatpush3.bf16.msra.mxu1 %v3541_v2  ;;  %v3523_v38 = vmul.f32 %v3516_v59, %v7336_v26 }
0x18f0   :  { %6563 = vmatprep.subr.bf16.mxu1 %v3572_v11 }
0x18f1   :  { %v3528_v41 = vpack.c.bf16 %v3526_v39, %v3525_v25 }
0x18f2   :  { %v3620_v22 = vpop.permute.xlu0 %3619  ;;  %v3518_v6 = vpop.permute.xlu1 %3517 }
0x18f3   :  { %v3524_v28 = vmul.f32 %v3518_v6, %v7336_v26  ;;  %6564 = vmatpush3.bf16.msra.mxu1 %v3528_v41  ;;  %v3625_v10 = vmul.f32 %v9293_v43, %v3620_v22  ;;  %v7085_v22 = vld [vmem:[%s10522_s6 + $0x7c] ss:$12 sps:$4 sm:$0xff]  }
0x18f4   :  { %6565 = vmatprep.subr.bf16.mxu1 %v3571_v8  ;;  %3936 = vmatprep.mubr.bf16.mxu0 %v7085_v22 }
0x18f5   :  { %v3527_v19 = vpack.c.bf16 %v3524_v28, %v3523_v38 }
0x18f6   :  { %v3622_v45 = vpop.permute.xlu1 %3621  ;;  %v3616_v17 = vpop.permute.xlu0 %3615 }
0x18f7   :  { %v3626_v11 = vmul.f32 %v9293_v43, %v3622_v45  ;;  %6566 = vmatpush3.bf16.msra.mxu1 %v3527_v19  ;;  %v3623_v31 = vmul.f32 %v9293_v43, %v3616_v17 }
0x18f8   :  { %6887 = vmatprep.subr.bf16.mxu1 %v7351_v42 }
0x18f9   :  { %v3628_v8 = vpack.c.bf16 %v3626_v11, %v3625_v10 }
0x18fa   :  { %v3618_v37 = vpop.permute.xlu1 %3617  ;;  %3698 = vmatmul.mubr.bf16.vlgmr.msra.gmra.mxu1 %v7075_v54 }
0x18fb   :  { %v3624_v62 = vmul.f32 %v9293_v43, %v3618_v37  ;;  %6888 = vmatpush3.bf16.msra.mxu1 %v7351_v42  ;;  %3705 = vmatprep.mubr.bf16.mxu1 %v7078_v12 }
0x18fc   :  { %6889 = vmatprep.subr.bf16.mxu1 %v3628_v8 }
0x18fd   :  { %v3627_v35 = vpack.c.bf16 %v3624_v62, %v3623_v31 }
0x18ff   :  { %6890 = vmatpush3.bf16.msra.mxu1 %v3628_v8 }
0x1900   :  { %6891 = vmatprep.subr.bf16.mxu1 %v3627_v35 }
0x1902   :  { %3706 = vmatmul.mubr.bf16.gmra.mxu1 %v7080_v60 }
0x1903   :  { %6892 = vmatpush3.bf16.msra.mxu1 %v3627_v35  ;;  %6893 = vmatprep.mubr.msk.bf16.mxu1 %vm415_vm2, %v7081_v0 }
0x1904   :  { %6897 = vmatprep.subr.bf16.mxu1 %v7197_v24 }
0x190a   :  { %6894 = vmatmul.mubr.msk.bf16.vlgmr.msra.gmra.mxu1 %vm415_vm2, %v7082_v4 }
0x190b   :  { %6898 = vmatpush3.bf16.msra.mxu1 %v7351_v42  ;;  %6903 = vmatprep.mubr.msk.bf16.mxu1 %vm7198_vm3, %v7197_v24 }
0x190c   :  { %6899 = vmatprep.subr.bf16.mxu1 %v7197_v24 }
0x19ba   :  { %v6567_v27 = vpop.f32.mrf.mxu1 }
0x19bc   :  { %v6568_v29 = vpop.f32.mrf.mxu1 }
0x19bd   :  { %v6569_v21 = vadd.f32 %v6568_v29, %v6567_v27 }
0x19be   :  { %v6570_v55 = vpop.f32.mrf.mxu1 }
0x19c0   :  { %v6571_v9 = vpop.f32.mrf.mxu1 }
0x19c1   :  { %v6572_v48 = vadd.f32 %v6571_v9, %v6570_v55 }
0x19c2   :  { %v6573_v3 = vpop.f32.mrf.mxu1 }
0x19c4   :  { %v6574_v44 = vpop.f32.mrf.mxu1 }
0x19c5   :  { %v6575_v53 = vadd.f32 %v6574_v44, %v6573_v3 }
0x19c6   :  { %v6576_v34 = vpop.f32.mrf.mxu1 }
0x19c8   :  { %v6577_v7 = vpop.f32.mrf.mxu1 }
0x19c9   :  { %v6578_v46 = vadd.f32 %v6577_v7, %v6576_v34 }
0x19ca   :  { %v6895_v52 = vpop.f32.mrf.mxu1 }
0x19cb   :  { %v3757_v23 = vadd.f32 %v6895_v52, %v6575_v53 }
0x19cc   :  { %v3748_v15 = vpop.f32.mrf.mxu1 }
0x19cd   :  { %v9320_v16 = vmax.f32 %v3757_v23, 0.0  ;;  %v3749_v40 = vadd.f32 %v6569_v21, %v3748_v15 }
0x19ce   :  { %v6896_v58 = vpop.f32.mrf.mxu1 }
0x19cf   :  { %v3760_v50 = vadd.f32 %v6896_v58, %v6578_v46  ;;  %3862 = vrot.lane.b32.xlu0 %v9320_v16, %s7190_s14  ;;  %v9326_v47 = vmax.f32 %v3749_v40, 0.0 }
0x19d0   :  { %v3751_v63 = vpop.f32.mrf.mxu1 }
0x19d1   :  { %v9324_v2 = vmax.f32 %v3760_v50, 0.0  ;;  %v3752_v59 = vadd.f32 %v6572_v48, %v3751_v63 }
0x19d3   :  { %v9328_v25 = vmax.f32 %v3752_v59, 0.0  ;;  %3864 = vrot.lane.b32.xlu1 %v9324_v2, %s7190_s14  ;;  %3818 = vrot.lane.b32.xlu0 %v9320_v16, %s7192_s16  ;;  %v3829_v39 = vpack.c.bf16 %v9324_v2, %v9320_v16 }
0x19d5   :  { %v3828_v41 = vpack.c.bf16 %v9328_v25, %v9326_v47 }
0x19d7   :  { %3820 = vrot.lane.b32.xlu1 %v9324_v2, %s7192_s16  ;;  %3848 = vrot.lane.b32.xlu0 %v9320_v16, %s7189_s1 }
0x19db   :  { %3850 = vrot.lane.b32.xlu1 %v9324_v2, %s7189_s1  ;;  %3804 = vrot.lane.b32.xlu0 %v9320_v16, %s7193_s17 }
0x19df   :  { %3806 = vrot.lane.b32.xlu1 %v9324_v2, %s7193_s17  ;;  %3834 = vrot.lane.b32.xlu0 %v9320_v16, %s7191_s15 }
0x19e3   :  { %3836 = vrot.lane.b32.xlu1 %v9324_v2, %s7191_s15  ;;  %3790 = vrot.lane.b32.xlu0 %v9320_v16, %s7194_s18 }
0x19e7   :  { %3792 = vrot.lane.b32.xlu1 %v9324_v2, %s7194_s18  ;;  %3776 = vrot.lane.b32.xlu0 %v9320_v16, %s7195_s19 }
0x19eb   :  { %3778 = vrot.lane.b32.xlu1 %v9324_v2, %s7195_s19  ;;  %3858 = vrot.lane.b32.xlu0 %v9326_v47, %s7190_s14 }
0x19ef   :  { %3860 = vrot.lane.b32.xlu1 %v9328_v25, %s7190_s14  ;;  %3814 = vrot.lane.b32.xlu0 %v9326_v47, %s7192_s16 }
0x19f3   :  { %3816 = vrot.lane.b32.xlu1 %v9328_v25, %s7192_s16  ;;  %3844 = vrot.lane.b32.xlu0 %v9326_v47, %s7189_s1 }
0x19f7   :  { %3846 = vrot.lane.b32.xlu1 %v9328_v25, %s7189_s1  ;;  %3800 = vrot.lane.b32.xlu0 %v9326_v47, %s7193_s17 }
0x19fb   :  { %3802 = vrot.lane.b32.xlu1 %v9328_v25, %s7193_s17  ;;  %3830 = vrot.lane.b32.xlu0 %v9326_v47, %s7191_s15 }
0x19ff   :  { %3832 = vrot.lane.b32.xlu1 %v9328_v25, %s7191_s15  ;;  %3786 = vrot.lane.b32.xlu0 %v9326_v47, %s7194_s18 }
0x1a03   :  { %3788 = vrot.lane.b32.xlu1 %v9328_v25, %s7194_s18  ;;  %3876 = vrot.lane.b32.xlu0 %v9320_v16, %s7196_s20  ;;  %v7083_v16 = vld [vmem:[%s10522_s6 + $0x78] ss:$12 sps:$4 sm:$0xff]  }
0x1a07   :  { %3878 = vrot.lane.b32.xlu1 %v9324_v2, %s7196_s20  ;;  %3772 = vrot.lane.b32.xlu0 %v9326_v47, %s7195_s19 }
0x1a0b   :  { %3774 = vrot.lane.b32.xlu1 %v9328_v25, %s7195_s19  ;;  %3872 = vrot.lane.b32.xlu0 %v9326_v47, %s7196_s20  ;;  %v7086_v47 = vld [vmem:[%s10522_s6 + $0x80] ss:$12 sps:$4 sm:$0xff]  }
0x1a0f   :  { %3874 = vrot.lane.b32.xlu1 %v9328_v25, %s7196_s20 }
0x1a41   :  { %v3863_v6 = vpop.permute.xlu0 %3862 }
0x1a42   :  { %v3868_v19 = vmul.f32 %v3863_v6, %v7306_v49 }
0x1a45   :  { %v3865_v38 = vpop.permute.xlu1 %3864  ;;  %v3819_v28 = vpop.permute.xlu0 %3818 }
0x1a46   :  { %v3869_v45 = vmul.f32 %v3865_v38, %v7306_v49  ;;  %v3824_v12 = vmul.f32 %v3819_v28, %v7319_v5 }
0x1a48   :  { %v3871_v54 = vpack.c.bf16 %v3869_v45, %v3868_v19 }
0x1a49   :  { %v3821_v10 = vpop.permute.xlu1 %3820  ;;  %v3849_v11 = vpop.permute.xlu0 %3848 }
0x1a4a   :  { %v3825_v17 = vmul.f32 %v3821_v10, %v7319_v5  ;;  %6584 = vmatprep.subr.bf16.mxu0 %v3871_v54  ;;  %v3854_v46 = vmul.f32 %v3849_v11, %v7308_v51 }
0x1a4c   :  { %v3827_v8 = vpack.c.bf16 %v3825_v17, %v3824_v12 }
0x1a4d   :  { %v3851_v37 = vpop.permute.xlu1 %3850  ;;  %v3805_v31 = vpop.permute.xlu0 %3804 }
0x1a4e   :  { %6585 = vmatpush3.bf16.msra.mxu0 %v3827_v8  ;;  %v3855_v53 = vmul.f32 %v3851_v37, %v7308_v51  ;;  %v3810_v59 = vmul.f32 %v3805_v31, %v7326_v13 }
0x1a50   :  { %v3857_v40 = vpack.c.bf16 %v3855_v53, %v3854_v46 }
0x1a51   :  { %v3807_v62 = vpop.permute.xlu1 %3806  ;;  %v3835_v35 = vpop.permute.xlu0 %3834 }
0x1a52   :  { %v3811_v58 = vmul.f32 %v3807_v62, %v7326_v13  ;;  %v3840_v12 = vmul.f32 %v3835_v35, %v7312_v56 }
0x1a54   :  { %v3813_v38 = vpack.c.bf16 %v3811_v58, %v3810_v59 }
0x1a55   :  { %v3837_v60 = vpop.permute.xlu1 %3836  ;;  %v3791_v0 = vpop.permute.xlu0 %3790 }
0x1a56   :  { %v3841_v19 = vmul.f32 %v3837_v60, %v7312_v56 }
0x1a58   :  { %v3843_v37 = vpack.c.bf16 %v3841_v19, %v3840_v12 }
0x1a59   :  { %v3793_v4 = vpop.permute.xlu1 %3792  ;;  %v3777_v27 = vpop.permute.xlu0 %3776 }
0x1a5a   :  { %v3797_v17 = vmul.f32 %v3793_v4, %v7329_v14 }
0x1a5d   :  { %v3779_v29 = vpop.permute.xlu1 %3778  ;;  %v3859_v55 = vpop.permute.xlu0 %3858 }
0x1a5e   :  { %v3866_v44 = vmul.f32 %v3859_v55, %v7306_v49  ;;  %v3796_v55 = vmul.f32 %v3791_v0, %v7329_v14  ;;  %v3783_v53 = vmul.f32 %v3779_v29, %v7336_v26 }
0x1a61   :  { %v3861_v9 = vpop.permute.xlu1 %3860  ;;  %v3815_v3 = vpop.permute.xlu0 %3814 }
0x1a62   :  { %v3867_v34 = vmul.f32 %v3861_v9, %v7306_v49  ;;  %v3822_v15 = vmul.f32 %v3815_v3, %v7319_v5  ;;  %v3799_v3 = vpack.c.bf16 %v3797_v17, %v3796_v55 }
0x1a64   :  { %v3870_v7 = vpack.c.bf16 %v3867_v34, %v3866_v44 }
0x1a65   :  { %v3817_v52 = vpop.permute.xlu1 %3816  ;;  %v3845_v23 = vpop.permute.xlu0 %3844 }
0x1a66   :  { %v3823_v21 = vmul.f32 %v3817_v52, %v7319_v5  ;;  %6586 = vmatprep.subr.bf16.mxu0 %v3870_v7  ;;  %v3852_v22 = vmul.f32 %v3845_v23, %v7308_v51 }
0x1a68   :  { %v3826_v48 = vpack.c.bf16 %v3823_v21, %v3822_v15  ;;  %v3782_v15 = vmul.f32 %v3777_v27, %v7336_v26 }
0x1a69   :  { %v3847_v50 = vpop.permute.xlu1 %3846  ;;  %v3801_v63 = vpop.permute.xlu0 %3800 }
0x1a6a   :  { %v3853_v6 = vmul.f32 %v3847_v50, %v7308_v51  ;;  %6587 = vmatpush3.bf16.msra.mxu0 %v3826_v48  ;;  %v3808_v10 = vmul.f32 %v3801_v63, %v7326_v13  ;;  %v3785_v58 = vpack.c.bf16 %v3783_v53, %v3782_v15 }
0x1a6b   :  { %6588 = vmatprep.subr.bf16.mxu0 %v3857_v40 }
0x1a6c   :  { %v3856_v28 = vpack.c.bf16 %v3853_v6, %v3852_v22 }
0x1a6d   :  { %v3803_v45 = vpop.permute.xlu1 %3802  ;;  %v3831_v54 = vpop.permute.xlu0 %3830 }
0x1a6e   :  { %v3809_v11 = vmul.f32 %v3803_v45, %v7326_v13  ;;  %6589 = vmatpush3.bf16.msra.mxu0 %v3813_v38  ;;  %v3838_v60 = vmul.f32 %v3831_v54, %v7312_v56 }
0x1a6f   :  { %6590 = vmatprep.subr.bf16.mxu0 %v3856_v28 }
0x1a70   :  { %v3812_v8 = vpack.c.bf16 %v3809_v11, %v3808_v10 }
0x1a71   :  { %v3833_v31 = vpop.permute.xlu1 %3832  ;;  %v3787_v62 = vpop.permute.xlu0 %3786 }
0x1a72   :  { %v3839_v9 = vmul.f32 %v3833_v31, %v7312_v56  ;;  %6591 = vmatpush3.bf16.msra.mxu0 %v3812_v8  ;;  %v3794_v35 = vmul.f32 %v3787_v62, %v7329_v14  ;;  %v4006_v62 = vstv %s6145_s22 }
0x1a73   :  { %6592 = vmatprep.subr.bf16.mxu0 %v3843_v37 }
0x1a74   :  { %v3842_v44 = vpack.c.bf16 %v3839_v9, %v3838_v60  ;;  %v4007_v9 = vadd.f32 %v4006_v62, %v7254_v18 }
0x1a75   :  { %v3789_v34 = vpop.permute.xlu1 %3788  ;;  %v3877_v7 = vpop.permute.xlu0 %3876 }
0x1a76   :  { %v3795_v4 = vmul.f32 %v3789_v34, %v7329_v14  ;;  %6593 = vmatpush3.bf16.msra.mxu0 %v3799_v3  ;;  %v3882_v21 = vmul.f32 %v9293_v43, %v3877_v7  ;;  %7153 = vrcp.f32 %v4007_v9 }
0x1a77   :  { %6594 = vmatprep.subr.bf16.mxu0 %v3842_v44 }
0x1a78   :  { %v3798_v52 = vpack.c.bf16 %v3795_v4, %v3794_v35 }
0x1a79   :  { %v3879_v0 = vpop.permute.xlu1 %3878  ;;  %v3773_v23 = vpop.permute.xlu0 %3772 }
0x1a7a   :  { %v3883_v46 = vmul.f32 %v9293_v43, %v3879_v0  ;;  %6595 = vmatpush3.bf16.msra.mxu0 %v3798_v52  ;;  %v3780_v50 = vmul.f32 %v3773_v23, %v7336_v26 }
0x1a7b   :  { %6596 = vmatprep.subr.bf16.mxu0 %v3829_v39 }
0x1a7c   :  { %v3885_v48 = vpack.c.bf16 %v3883_v46, %v3882_v21 }
0x1a7d   :  { %v3775_v40 = vpop.permute.xlu1 %3774  ;;  %v3873_v63 = vpop.permute.xlu0 %3872 }
0x1a7e   :  { %v3781_v29 = vmul.f32 %v3775_v40, %v7336_v26  ;;  %6597 = vmatpush3.bf16.msra.mxu0 %v3785_v58  ;;  %6900 = vmatpush3.bf16.msra.mxu1 %v3885_v48  ;;  %v3880_v2 = vmul.f32 %v9293_v43, %v3873_v63 }
0x1a7f   :  { %6598 = vmatprep.subr.bf16.mxu0 %v3828_v41  ;;  %6901 = vmatprep.subr.bf16.mxu1 %v7197_v24 }
0x1a80   :  { %v3784_v27 = vpack.c.bf16 %v3781_v29, %v3780_v50 }
0x1a81   :  { %v3875_v59 = vpop.permute.xlu1 %3874 }
0x1a82   :  { %v3881_v39 = vmul.f32 %v9293_v43, %v3875_v59  ;;  %6599 = vmatpush3.bf16.msra.mxu0 %v3784_v27 }
0x1a83   :  { %v7154_v52 = vpop.eup %7153 }
0x1a84   :  { %v3884_v22 = vpack.c.bf16 %v3881_v39, %v3880_v2 }
0x1a85   :  { %3937 = vmatmul.mubr.bf16.vlgmr.msra.gmra.mxu0 %v7083_v16 }
0x1a86   :  { %6902 = vmatpush3.bf16.msra.mxu1 %v3884_v22 }
0x1a87   :  { %4102 = vmatprep.subr.bf16.mxu1 %v7188_v36 }
0x1a89   :  { %6904 = vmatmul.mubr.msk.bf16.vlgmr.msra.gmra.mxu1 %vm415_vm2, %v7086_v47 }
0x1b45   :  { %v6600_v25 = vpop.f32.mrf.mxu0 }
0x1b47   :  { %v6601_v41 = vpop.f32.mrf.mxu0 }
0x1b48   :  { %v6602_v6 = vadd.f32 %v6601_v41, %v6600_v25 }
0x1b49   :  { %v6603_v38 = vpop.f32.mrf.mxu0  ;;  %v3979_v28 = vpop.f32.mrf.mxu1 }
0x1b4a   :  { %v3980_v19 = vadd.f32 %v6602_v6, %v3979_v28 }
0x1b4b   :  { %v6604_v45 = vpop.f32.mrf.mxu0  ;;  %v6905_v54 = vpop.f32.mrf.mxu1 }
0x1b4c   :  { %v3986_v10 = vsub.f32 %v9110_v57, %v3980_v19  ;;  %6143 = vst [vmem:[%s10523_s7 + $0x50] sm:$0xff] %v3980_v19  ;;  %v6605_v11 = vadd.f32 %v6604_v45, %v6603_v38 }
0x1b4d   :  { %v3982_v12 = vpop.f32.mrf.mxu1 }
0x1b4e   :  { %v9451_v17 = vsub.f32 %v9083_v32, %v3986_v10  ;;  %v3983_v8 = vadd.f32 %v6605_v11, %v3982_v12 }
0x1b4f   :  { %v6906_v37 = vpop.f32.mrf.mxu1 }
0x1b50   :  { %v3987_v31 = vsub.f32 %v9112_v1, %v3983_v8  ;;  %6144 = vst [vmem:[%s10523_s7 + $0x58] sm:$0xff] %v3983_v8  ;;  %v3994_v57 = vadd.f32 %v9451_v17, %v3980_v19 }
0x1b52   :  { %v9459_v55 = vsub.f32 %v9091_v30, %v3987_v31  ;;  %v3996_v32 = vmul.f32 %v9098_v33, %v3994_v57 }
0x1b54   :  { %v3995_v60 = vadd.f32 %v9459_v55, %v3983_v8 }
0x1b56   :  { %v3997_v3 = vmul.f32 %v9104_v61, %v3995_v60 }
0x1b58   :  { %v3998_v44 = vadd.f32 %v3997_v3, %v3996_v32 }
0x1b5a   :  { %v3999_v1 = vrot.slane %v3998_v44, 4 }
0x1b5c   :  { %v4000_v34 = vadd.f32 %v3999_v1, %v3998_v44 }
0x1b5e   :  { %v4001_v7 = vrot.slane %v4000_v34, 2 }
0x1b60   :  { %v4002_v35 = vadd.f32 %v4001_v7, %v4000_v34 }
0x1b62   :  { %v4003_v4 = vrot.slane %v4002_v35, 1 }
0x1b64   :  { %v4004_v53 = vadd.f32 %v4003_v4, %v4002_v35 }
0x1b66   :  { %v4005_v30 = vsub.f32 %v7256_v20, %v4004_v53 }
0x1b68   :  { %v4009_v0 = vmul.f32 %v7154_v52, %v4005_v30 }
0x1b6a   :  { %v4010_v23 = vmul.f32 %v9098_v33, %v4009_v0  ;;  %v4011_v15 = vmul.f32 %v9104_v61, %v4009_v0  ;;  %v7087_v33 = vld [vmem:[%s10520_s4 + $0xc4] ss:$8 sps:$4 sm:$0xff]   ;;  %v7089_v0 = vld [vmem:[%s10520_s4 + $0xc0] ss:$8 sps:$4 sm:$0xff]  }
0x1b6b   :  { %6154 = vmatprep.mubr.msk.bf16.mxu1 %vm197_vm0, %v7087_v33 }
0x1b6c   :  { %v9468_v21 = vadd.f32 %v4010_v23, %v3994_v57  ;;  %v9470_v46 = vadd.f32 %v4011_v15, %v3995_v60  ;;  %v7090_v23 = vld [vmem:[%s10520_s4 + $0xd4] ss:$8 sps:$4 sm:$0xff]   ;;  %v7092_v15 = vld [vmem:[%s10520_s4 + $0xd0] ss:$8 sps:$4 sm:$0xff]  }
0x1b6e   :  { %v4014_v58 = vsub.f32 %v9468_v21, %v9451_v17  ;;  %v4015_v48 = vsub.f32 %v9470_v46, %v9459_v55 }
0x1b70   :  { %4066 = vrot.lane.b32.xlu1 %v4015_v48, %s7190_s14  ;;  %4064 = vrot.lane.b32.xlu0 %v4014_v58, %s7190_s14  ;;  %v4049_v40 = vpack.c.bf16 %v4015_v48, %v4014_v58 }
0x1b74   :  { %4059 = vrot.lane.b32.xlu1 %v4015_v48, %s7189_s1  ;;  %4057 = vrot.lane.b32.xlu0 %v4014_v58, %s7189_s1 }
0x1b78   :  { %4052 = vrot.lane.b32.xlu1 %v4015_v48, %s7191_s15  ;;  %4050 = vrot.lane.b32.xlu0 %v4014_v58, %s7191_s15 }
0x1b7c   :  { %4044 = vrot.lane.b32.xlu1 %v4015_v48, %s7192_s16  ;;  %4042 = vrot.lane.b32.xlu0 %v4014_v58, %s7192_s16 }
0x1b80   :  { %4037 = vrot.lane.b32.xlu1 %v4015_v48, %s7193_s17  ;;  %4035 = vrot.lane.b32.xlu0 %v4014_v58, %s7193_s17 }
0x1b84   :  { %4030 = vrot.lane.b32.xlu1 %v4015_v48, %s7194_s18  ;;  %4028 = vrot.lane.b32.xlu0 %v4014_v58, %s7194_s18 }
0x1b88   :  { %4023 = vrot.lane.b32.xlu1 %v4015_v48, %s7195_s19  ;;  %4021 = vrot.lane.b32.xlu0 %v4014_v58, %s7195_s19 }
0x1b8c   :  { %4073 = vrot.lane.b32.xlu1 %v4015_v48, %s7196_s20  ;;  %4071 = vrot.lane.b32.xlu0 %v4014_v58, %s7196_s20 }
0x1be2   :  { %v4067_v61 = vpop.permute.xlu1 %4066  ;;  %v4065_v50 = vpop.permute.xlu0 %4064 }
0x1be3   :  { %v4069_v29 = vmul.f32 %v4067_v61, %v7306_v49  ;;  %v4068_v63 = vmul.f32 %v4065_v50, %v7306_v49 }
0x1be5   :  { %v4070_v27 = vpack.c.bf16 %v4069_v29, %v4068_v63 }
0x1be6   :  { %v4060_v59 = vpop.permute.xlu1 %4059  ;;  %v4058_v16 = vpop.permute.xlu0 %4057 }
0x1be7   :  { %v4062_v2 = vmul.f32 %v4060_v59, %v7308_v51  ;;  %v4061_v39 = vmul.f32 %v4058_v16, %v7308_v51  ;;  %4103 = vmatpush1.bf16.msra.mxu1 %v4070_v27 }
0x1be8   :  { %4104 = vmatprep.subr.bf16.mxu1 %v7188_v36 }
0x1be9   :  { %v4063_v22 = vpack.c.bf16 %v4062_v2, %v4061_v39 }
0x1bea   :  { %v4053_v47 = vpop.permute.xlu1 %4052  ;;  %v4051_v25 = vpop.permute.xlu0 %4050 }
0x1beb   :  { %v4055_v41 = vmul.f32 %v4053_v47, %v7312_v56  ;;  %v4054_v6 = vmul.f32 %v4051_v25, %v7312_v56  ;;  %4105 = vmatpush1.bf16.msra.mxu1 %v4063_v22  ;;  %v7095_v47 = vld [vmem:[%s10521_s5 + $0x124] ss:$12 sps:$4 sm:$0xff]  }
0x1bec   :  { %4106 = vmatprep.subr.bf16.mxu1 %v7188_v36  ;;  %4346 = vmatprep.mubr.bf16.mxu0 %v7095_v47 }
0x1bed   :  { %v4056_v38 = vpack.c.bf16 %v4055_v41, %v4054_v6 }
0x1bee   :  { %v4045_v28 = vpop.permute.xlu1 %4044  ;;  %v4043_v19 = vpop.permute.xlu0 %4042 }
0x1bef   :  { %4107 = vmatpush1.bf16.msra.mxu1 %v4056_v38  ;;  %v4047_v45 = vmul.f32 %v4045_v28, %v7319_v5  ;;  %v4046_v54 = vmul.f32 %v4043_v19, %v7319_v5 }
0x1bf0   :  { %4108 = vmatprep.subr.bf16.mxu1 %v7188_v36 }
0x1bf1   :  { %v4048_v12 = vpack.c.bf16 %v4047_v45, %v4046_v54 }
0x1bf2   :  { %v4038_v10 = vpop.permute.xlu1 %4037  ;;  %v4036_v11 = vpop.permute.xlu0 %4035 }
0x1bf3   :  { %4109 = vmatpush1.bf16.msra.mxu1 %v4049_v40  ;;  %v4040_v8 = vmul.f32 %v4038_v10, %v7326_v13  ;;  %v4039_v37 = vmul.f32 %v4036_v11, %v7326_v13 }
0x1bf4   :  { %4110 = vmatprep.subr.bf16.mxu1 %v7188_v36 }
0x1bf5   :  { %v4041_v57 = vpack.c.bf16 %v4040_v8, %v4039_v37 }
0x1bf6   :  { %v4031_v31 = vpop.permute.xlu1 %4030  ;;  %v4029_v62 = vpop.permute.xlu0 %4028 }
0x1bf7   :  { %4111 = vmatpush1.bf16.msra.mxu1 %v4048_v12  ;;  %v4033_v60 = vmul.f32 %v4031_v31, %v7329_v14  ;;  %v4032_v9 = vmul.f32 %v4029_v62, %v7329_v14 }
0x1bf8   :  { %4112 = vmatprep.subr.bf16.mxu1 %v7188_v36 }
0x1bf9   :  { %v4034_v44 = vpack.c.bf16 %v4033_v60, %v4032_v9 }
0x1bfa   :  { %v4024_v32 = vpop.permute.xlu1 %4023  ;;  %v4022_v3 = vpop.permute.xlu0 %4021 }
0x1bfb   :  { %4113 = vmatpush1.bf16.msra.mxu1 %v4041_v57  ;;  %v4026_v1 = vmul.f32 %v4024_v32, %v7336_v26  ;;  %v4025_v34 = vmul.f32 %v4022_v3, %v7336_v26 }
0x1bfc   :  { %4114 = vmatprep.subr.bf16.mxu1 %v7188_v36 }
0x1bfd   :  { %v4027_v7 = vpack.c.bf16 %v4026_v1, %v4025_v34 }
0x1bfe   :  { %v4074_v35 = vpop.permute.xlu1 %4073  ;;  %v4072_v4 = vpop.permute.xlu0 %4071 }
0x1bff   :  { %4115 = vmatpush1.bf16.msra.mxu1 %v4034_v44  ;;  %v4076_v53 = vmul.f32 %v9293_v43, %v4074_v35  ;;  %v4075_v52 = vmul.f32 %v9293_v43, %v4072_v4 }
0x1c00   :  { %4116 = vmatprep.subr.bf16.mxu1 %v7188_v36 }
0x1c01   :  { %v4077_v30 = vpack.c.bf16 %v4076_v53, %v4075_v52 }
0x1c03   :  { %4117 = vmatpush1.bf16.msra.mxu1 %v4027_v7 }
0x1c04   :  { %4130 = vmatprep.subr.bf16.mxu1 %v7188_v36 }
0x1c07   :  { %4131 = vmatpush2.bf16.msra.mxu1 %v7351_v42 }
0x1c08   :  { %4132 = vmatprep.subr.bf16.mxu1 %v7188_v36 }
0x1c0b   :  { %4133 = vmatpush2.bf16.msra.mxu1 %v4077_v30 }
0x1c0e   :  { %4135 = vmatmul.mubr.bf16.vlgmr.msra.gmra.mxu1 %v7089_v0 }
0x1c0f   :  { %6155 = vmatprep.mubr.msk.bf16.mxu1 %vm197_vm0, %v7090_v23 }
0x1c16   :  { %4143 = vmatmul.mubr.bf16.gmra.mxu1 %v7092_v15 }
0x1cce   :  { %v4136_v58 = vpop.f32.mrf.mxu1 }
0x1ccf   :  { %v9532_v48 = vmax.f32 %v4136_v58, 0.0 }
0x1cd0   :  { %v4138_v40 = vpop.f32.mrf.mxu1 }
0x1cd1   :  { %4250 = vrot.lane.b32.xlu0 %v9532_v48, %s7190_s14 }
0x1cd2   :  { %v4139_v33 = vpop.f32.mrf.mxu1 }
0x1cd3   :  { %v9536_v61 = vmax.f32 %v4139_v33, 0.0 }
0x1cd4   :  { %v4141_v50 = vpop.f32.mrf.mxu1 }
0x1cd5   :  { %4206 = vrot.lane.b32.xlu0 %v9532_v48, %s7192_s16  ;;  %4252 = vrot.lane.b32.xlu1 %v9536_v61, %s7190_s14  ;;  %v4220_v29 = vpack.c.bf16 %v9536_v61, %v9532_v48 }
0x1cd6   :  { %v4144_v63 = vpop.f32.mrf.mxu1 }
0x1cd7   :  { %v9548_v59 = vmax.f32 %v4144_v63, 0.0 }
0x1cd8   :  { %v4146_v27 = vpop.f32.mrf.mxu1 }
0x1cd9   :  { %4236 = vrot.lane.b32.xlu0 %v9532_v48, %s7189_s1  ;;  %4208 = vrot.lane.b32.xlu1 %v9536_v61, %s7192_s16 }
0x1cda   :  { %v4147_v16 = vpop.f32.mrf.mxu1 }
0x1cdb   :  { %v9550_v2 = vmax.f32 %v4147_v16, 0.0 }
0x1cdc   :  { %v4149_v39 = vpop.f32.mrf.mxu1 }
0x1cdd   :  { %4192 = vrot.lane.b32.xlu0 %v9532_v48, %s7193_s17  ;;  %4238 = vrot.lane.b32.xlu1 %v9536_v61, %s7189_s1  ;;  %v4221_v22 = vpack.c.bf16 %v9550_v2, %v9548_v59 }
0x1ce1   :  { %4222 = vrot.lane.b32.xlu0 %v9532_v48, %s7191_s15  ;;  %4194 = vrot.lane.b32.xlu1 %v9536_v61, %s7193_s17 }
0x1ce5   :  { %4224 = vrot.lane.b32.xlu1 %v9536_v61, %s7191_s15  ;;  %4254 = vrot.lane.b32.xlu0 %v9548_v59, %s7190_s14 }
0x1ce9   :  { %4210 = vrot.lane.b32.xlu0 %v9548_v59, %s7192_s16  ;;  %4256 = vrot.lane.b32.xlu1 %v9550_v2, %s7190_s14 }
0x1ced   :  { %4240 = vrot.lane.b32.xlu0 %v9548_v59, %s7189_s1  ;;  %4212 = vrot.lane.b32.xlu1 %v9550_v2, %s7192_s16 }
0x1cf1   :  { %4196 = vrot.lane.b32.xlu0 %v9548_v59, %s7193_s17  ;;  %4242 = vrot.lane.b32.xlu1 %v9550_v2, %s7189_s1 }
0x1cf5   :  { %4226 = vrot.lane.b32.xlu0 %v9548_v59, %s7191_s15  ;;  %4198 = vrot.lane.b32.xlu1 %v9550_v2, %s7193_s17 }
0x1cf9   :  { %4182 = vrot.lane.b32.xlu0 %v9548_v59, %s7194_s18  ;;  %4228 = vrot.lane.b32.xlu1 %v9550_v2, %s7191_s15 }
0x1cfd   :  { %4178 = vrot.lane.b32.xlu0 %v9532_v48, %s7194_s18  ;;  %4184 = vrot.lane.b32.xlu1 %v9550_v2, %s7194_s18 }
0x1d01   :  { %4168 = vrot.lane.b32.xlu0 %v9548_v59, %s7195_s19  ;;  %4180 = vrot.lane.b32.xlu1 %v9536_v61, %s7194_s18 }
0x1d05   :  { %4164 = vrot.lane.b32.xlu0 %v9532_v48, %s7195_s19  ;;  %4170 = vrot.lane.b32.xlu1 %v9550_v2, %s7195_s19 }
0x1d09   :  { %4268 = vrot.lane.b32.xlu0 %v9548_v59, %s7196_s20  ;;  %4166 = vrot.lane.b32.xlu1 %v9536_v61, %s7195_s19 }
0x1d0d   :  { %4264 = vrot.lane.b32.xlu0 %v9532_v48, %s7196_s20  ;;  %4270 = vrot.lane.b32.xlu1 %v9550_v2, %s7196_s20 }
0x1d11   :  { %4266 = vrot.lane.b32.xlu1 %v9536_v61, %s7196_s20 }
0x1d43   :  { %v4251_v25 = vpop.permute.xlu0 %4250 }
0x1d44   :  { %v4258_v1 = vmul.f32 %v4251_v25, %v7306_v49 }
0x1d47   :  { %v4207_v41 = vpop.permute.xlu0 %4206  ;;  %v4253_v6 = vpop.permute.xlu1 %4252 }
0x1d48   :  { %v4259_v60 = vmul.f32 %v4253_v6, %v7306_v49  ;;  %v4214_v52 = vmul.f32 %v4207_v41, %v7319_v5 }
0x1d4a   :  { %v4262_v35 = vpack.c.bf16 %v4259_v60, %v4258_v1 }
0x1d4b   :  { %v4237_v38 = vpop.permute.xlu0 %4236  ;;  %v4209_v28 = vpop.permute.xlu1 %4208 }
0x1d4c   :  { %v4215_v34 = vmul.f32 %v4209_v28, %v7319_v5  ;;  %v4244_v27 = vmul.f32 %v4237_v38, %v7308_v51 }
0x1d4e   :  { %v4218_v23 = vpack.c.bf16 %v4215_v34, %v4214_v52 }
0x1d4f   :  { %v4193_v19 = vpop.permute.xlu0 %4192  ;;  %v4239_v45 = vpop.permute.xlu1 %4238 }
0x1d50   :  { %v4245_v58 = vmul.f32 %v4239_v45, %v7308_v51  ;;  %v4200_v6 = vmul.f32 %v4193_v19, %v7326_v13 }
0x1d52   :  { %v4248_v47 = vpack.c.bf16 %v4245_v58, %v4244_v27 }
0x1d53   :  { %v4223_v54 = vpop.permute.xlu0 %4222  ;;  %v4195_v10 = vpop.permute.xlu1 %4194 }
0x1d54   :  { %v4201_v16 = vmul.f32 %v4195_v10, %v7326_v13 }
0x1d57   :  { %v4225_v11 = vpop.permute.xlu1 %4224  ;;  %v4255_v12 = vpop.permute.xlu0 %4254 }
0x1d58   :  { %v4260_v31 = vmul.f32 %v4255_v12, %v7306_v49  ;;  %v4204_v12 = vpack.c.bf16 %v4201_v16, %v4200_v6 }
0x1d5b   :  { %v4211_v8 = vpop.permute.xlu0 %4210  ;;  %v4257_v37 = vpop.permute.xlu1 %4256 }
0x1d5c   :  { %v4261_v62 = vmul.f32 %v4257_v37, %v7306_v49  ;;  %v4216_v3 = vmul.f32 %v4211_v8, %v7319_v5  ;;  %v4231_v37 = vmul.f32 %v4225_v11, %v7312_v56 }
0x1d5e   :  { %v4263_v57 = vpack.c.bf16 %v4261_v62, %v4260_v31 }
0x1d5f   :  { %v4241_v9 = vpop.permute.xlu0 %4240  ;;  %v4213_v32 = vpop.permute.xlu1 %4212 }
0x1d60   :  { %v4217_v44 = vmul.f32 %v4213_v32, %v7319_v5  ;;  %6610 = vmatprep.subr.bf16.mxu0 %v4263_v57  ;;  %v4246_v30 = vmul.f32 %v4241_v9, %v7308_v51  ;;  %v4230_v57 = vmul.f32 %v4223_v54, %v7312_v56 }
0x1d62   :  { %v4219_v7 = vpack.c.bf16 %v4217_v44, %v4216_v3  ;;  %v4234_v60 = vpack.c.bf16 %v4231_v37, %v4230_v57 }
0x1d63   :  { %v4197_v4 = vpop.permute.xlu0 %4196  ;;  %v4243_v53 = vpop.permute.xlu1 %4242 }
0x1d64   :  { %v4247_v0 = vmul.f32 %v4243_v53, %v7308_v51  ;;  %6611 = vmatpush3.bf16.msra.mxu0 %v4219_v7  ;;  %v4202_v50 = vmul.f32 %v4197_v4, %v7326_v13 }
0x1d65   :  { %6612 = vmatprep.subr.bf16.mxu0 %v4262_v35 }
0x1d66   :  { %v4249_v15 = vpack.c.bf16 %v4247_v0, %v4246_v30 }
0x1d67   :  { %v4227_v40 = vpop.permute.xlu0 %4226  ;;  %v4199_v33 = vpop.permute.xlu1 %4198 }
0x1d68   :  { %v4203_v63 = vmul.f32 %v4199_v33, %v7326_v13  ;;  %6613 = vmatpush3.bf16.msra.mxu0 %v4218_v23  ;;  %v4232_v28 = vmul.f32 %v4227_v40, %v7312_v56 }
0x1d69   :  { %6614 = vmatprep.subr.bf16.mxu0 %v4249_v15  ;;  %v7093_v15 = vld [vmem:[%s10521_s5 + $0x120] ss:$12 sps:$4 sm:$0xff]  }
0x1d6a   :  { %v4205_v39 = vpack.c.bf16 %v4203_v63, %v4202_v50  ;;  %v7098_v50 = vld [vmem:[%s10521_s5 + $0x138] ss:$12 sps:$4 sm:$0xff]   ;;  %v7099_v63 = vld [vmem:[%s10521_s5 + $0x128] ss:$12 sps:$4 sm:$0xff]  }
0x1d6b   :  { %v4183_v25 = vpop.permute.xlu0 %4182  ;;  %v4229_v41 = vpop.permute.xlu1 %4228 }
0x1d6c   :  { %v4233_v45 = vmul.f32 %v4229_v41, %v7312_v56  ;;  %6615 = vmatpush3.bf16.msra.mxu0 %v4205_v39  ;;  %v4188_v10 = vmul.f32 %v4183_v25, %v7329_v14 }
0x1d6d   :  { %6616 = vmatprep.subr.bf16.mxu0 %v4248_v47 }
0x1d6e   :  { %v4235_v8 = vpack.c.bf16 %v4233_v45, %v4232_v28 }
0x1d6f   :  { %v4179_v38 = vpop.permute.xlu0 %4178  ;;  %v4185_v31 = vpop.permute.xlu1 %4184 }
0x1d70   :  { %v4189_v62 = vmul.f32 %v4185_v31, %v7329_v14  ;;  %6617 = vmatpush3.bf16.msra.mxu0 %v4204_v12  ;;  %v4186_v3 = vmul.f32 %v4179_v38, %v7329_v14 }
0x1d71   :  { %6618 = vmatprep.subr.bf16.mxu0 %v4235_v8 }
0x1d72   :  { %v4191_v19 = vpack.c.bf16 %v4189_v62, %v4188_v10 }
0x1d73   :  { %v4169_v9 = vpop.permute.xlu0 %4168  ;;  %v4181_v32 = vpop.permute.xlu1 %4180 }
0x1d74   :  { %v4187_v44 = vmul.f32 %v4181_v32, %v7329_v14  ;;  %6619 = vmatpush3.bf16.msra.mxu0 %v4191_v19  ;;  %v4174_v7 = vmul.f32 %v4169_v9, %v7336_v26 }
0x1d75   :  { %6620 = vmatprep.subr.bf16.mxu0 %v4234_v60 }
0x1d76   :  { %v4190_v11 = vpack.c.bf16 %v4187_v44, %v4186_v3 }
0x1d77   :  { %v4165_v1 = vpop.permute.xlu0 %4164  ;;  %v4171_v34 = vpop.permute.xlu1 %4170 }
0x1d78   :  { %v4175_v35 = vmul.f32 %v4171_v34, %v7336_v26  ;;  %6621 = vmatpush3.bf16.msra.mxu0 %v4190_v11  ;;  %v4172_v52 = vmul.f32 %v4165_v1, %v7336_v26 }
0x1d79   :  { %6622 = vmatprep.subr.bf16.mxu0 %v4221_v22  ;;  %v7096_v22 = vld [vmem:[%s10521_s5 + $0x13c] ss:$12 sps:$4 sm:$0xff]  }
0x1d7a   :  { %v4177_v54 = vpack.c.bf16 %v4175_v35, %v4174_v7  ;;  %v7103_v7 = vld [vmem:[%s10522_s6 + $0x94] ss:$12 sps:$4 sm:$0xff]  }
0x1d7b   :  { %v4269_v4 = vpop.permute.xlu0 %4268  ;;  %v4167_v53 = vpop.permute.xlu1 %4166  ;;  %4585 = vmatprep.mubr.bf16.mxu1 %v7103_v7 }
0x1d7c   :  { %v4173_v30 = vmul.f32 %v4167_v53, %v7336_v26  ;;  %6623 = vmatpush3.bf16.msra.mxu0 %v4177_v54  ;;  %v4274_v59 = vmul.f32 %v9293_v43, %v4269_v4 }
0x1d7d   :  { %6624 = vmatprep.subr.bf16.mxu0 %v4220_v29 }
0x1d7e   :  { %v4176_v0 = vpack.c.bf16 %v4173_v30, %v4172_v52 }
0x1d7f   :  { %v4271_v23 = vpop.permute.xlu1 %4270  ;;  %v4265_v58 = vpop.permute.xlu0 %4264 }
0x1d80   :  { %v4275_v2 = vmul.f32 %v9293_v43, %v4271_v23  ;;  %6625 = vmatpush3.bf16.msra.mxu0 %v4176_v0  ;;  %v4272_v29 = vmul.f32 %v9293_v43, %v4265_v58 }
0x1d81   :  { %6907 = vmatprep.subr.bf16.mxu0 %v7351_v42 }
0x1d82   :  { %v4277_v48 = vpack.c.bf16 %v4275_v2, %v4274_v59 }
0x1d83   :  { %v4267_v61 = vpop.permute.xlu1 %4266  ;;  %4347 = vmatmul.mubr.bf16.vlgmr.msra.gmra.mxu0 %v7093_v15 }
0x1d84   :  { %v4273_v40 = vmul.f32 %v9293_v43, %v4267_v61  ;;  %6908 = vmatpush3.bf16.msra.mxu0 %v7351_v42  ;;  %4354 = vmatprep.mubr.bf16.mxu0 %v7096_v22  ;;  %v7100_v43 = vld [vmem:[%s10521_s5 + $0x140] ss:$12 sps:$4 sm:$0xff]  }
0x1d85   :  { %6909 = vmatprep.subr.bf16.mxu0 %v4277_v48 }
0x1d86   :  { %v4276_v33 = vpack.c.bf16 %v4273_v40, %v4272_v29 }
0x1d88   :  { %6910 = vmatpush3.bf16.msra.mxu0 %v4277_v48 }
0x1d89   :  { %6911 = vmatprep.subr.bf16.mxu0 %v4276_v33 }
0x1d8b   :  { %4355 = vmatmul.mubr.bf16.gmra.mxu0 %v7098_v50 }
0x1d8c   :  { %6912 = vmatpush3.bf16.msra.mxu0 %v4276_v33  ;;  %6913 = vmatprep.mubr.msk.bf16.mxu0 %vm415_vm2, %v7099_v63 }
0x1d8d   :  { %6917 = vmatprep.subr.bf16.mxu0 %v7197_v24 }
0x1d93   :  { %6914 = vmatmul.mubr.msk.bf16.vlgmr.msra.gmra.mxu0 %vm415_vm2, %v7100_v43 }
0x1d94   :  { %6918 = vmatpush3.bf16.msra.mxu0 %v7351_v42  ;;  %6923 = vmatprep.mubr.msk.bf16.mxu0 %vm7198_vm3, %v7197_v24 }
0x1d95   :  { %6919 = vmatprep.subr.bf16.mxu0 %v7197_v24 }
0x1e43   :  { %v6626_v27 = vpop.f32.mrf.mxu0 }
0x1e45   :  { %v6627_v16 = vpop.f32.mrf.mxu0 }
0x1e46   :  { %v6628_v38 = vadd.f32 %v6627_v16, %v6626_v27 }
0x1e47   :  { %v6629_v39 = vpop.f32.mrf.mxu0 }
0x1e49   :  { %v6630_v47 = vpop.f32.mrf.mxu0 }
0x1e4a   :  { %v6631_v57 = vadd.f32 %v6630_v47, %v6629_v39 }
0x1e4b   :  { %v6632_v25 = vpop.f32.mrf.mxu0 }
0x1e4d   :  { %v6633_v41 = vpop.f32.mrf.mxu0 }
0x1e4e   :  { %v6634_v45 = vadd.f32 %v6633_v41, %v6632_v25 }
0x1e4f   :  { %v6635_v6 = vpop.f32.mrf.mxu0 }
0x1e51   :  { %v6636_v28 = vpop.f32.mrf.mxu0 }
0x1e52   :  { %v6637_v31 = vadd.f32 %v6636_v28, %v6635_v6 }
0x1e53   :  { %v6915_v12 = vpop.f32.mrf.mxu0 }
0x1e54   :  { %v4406_v8 = vadd.f32 %v6915_v12, %v6634_v45 }
0x1e55   :  { %v4397_v37 = vpop.f32.mrf.mxu0 }
0x1e56   :  { %v9673_v10 = vmax.f32 %v4406_v8, 0.0  ;;  %v4398_v19 = vadd.f32 %v6628_v38, %v4397_v37 }
0x1e57   :  { %v6916_v62 = vpop.f32.mrf.mxu0 }
0x1e58   :  { %v4409_v60 = vadd.f32 %v6916_v62, %v6637_v31  ;;  %4511 = vrot.lane.b32.xlu0 %v9673_v10, %s7190_s14  ;;  %v9679_v44 = vmax.f32 %v4398_v19, 0.0 }
0x1e59   :  { %v4400_v9 = vpop.f32.mrf.mxu0 }
0x1e5a   :  { %v9677_v32 = vmax.f32 %v4409_v60, 0.0  ;;  %v4401_v3 = vadd.f32 %v6631_v57, %v4400_v9 }
0x1e5c   :  { %v9681_v11 = vmax.f32 %v4401_v3, 0.0  ;;  %4513 = vrot.lane.b32.xlu1 %v9677_v32, %s7190_s14  ;;  %4467 = vrot.lane.b32.xlu0 %v9673_v10, %s7192_s16  ;;  %v4478_v1 = vpack.c.bf16 %v9677_v32, %v9673_v10 }
0x1e5e   :  { %v4477_v34 = vpack.c.bf16 %v9681_v11, %v9679_v44 }
0x1e60   :  { %4469 = vrot.lane.b32.xlu1 %v9677_v32, %s7192_s16  ;;  %4497 = vrot.lane.b32.xlu0 %v9673_v10, %s7189_s1 }
0x1e64   :  { %4499 = vrot.lane.b32.xlu1 %v9677_v32, %s7189_s1  ;;  %4453 = vrot.lane.b32.xlu0 %v9673_v10, %s7193_s17 }
0x1e68   :  { %4455 = vrot.lane.b32.xlu1 %v9677_v32, %s7193_s17  ;;  %4483 = vrot.lane.b32.xlu0 %v9673_v10, %s7191_s15 }
0x1e6c   :  { %4485 = vrot.lane.b32.xlu1 %v9677_v32, %s7191_s15  ;;  %4439 = vrot.lane.b32.xlu0 %v9673_v10, %s7194_s18 }
0x1e70   :  { %4441 = vrot.lane.b32.xlu1 %v9677_v32, %s7194_s18  ;;  %4425 = vrot.lane.b32.xlu0 %v9673_v10, %s7195_s19 }
0x1e74   :  { %4427 = vrot.lane.b32.xlu1 %v9677_v32, %s7195_s19  ;;  %4507 = vrot.lane.b32.xlu0 %v9679_v44, %s7190_s14 }
0x1e78   :  { %4509 = vrot.lane.b32.xlu1 %v9681_v11, %s7190_s14  ;;  %4463 = vrot.lane.b32.xlu0 %v9679_v44, %s7192_s16 }
0x1e7c   :  { %4465 = vrot.lane.b32.xlu1 %v9681_v11, %s7192_s16  ;;  %4493 = vrot.lane.b32.xlu0 %v9679_v44, %s7189_s1 }
0x1e80   :  { %4495 = vrot.lane.b32.xlu1 %v9681_v11, %s7189_s1  ;;  %4449 = vrot.lane.b32.xlu0 %v9679_v44, %s7193_s17 }
0x1e84   :  { %4451 = vrot.lane.b32.xlu1 %v9681_v11, %s7193_s17  ;;  %4479 = vrot.lane.b32.xlu0 %v9679_v44, %s7191_s15 }
0x1e88   :  { %4481 = vrot.lane.b32.xlu1 %v9681_v11, %s7191_s15  ;;  %4435 = vrot.lane.b32.xlu0 %v9679_v44, %s7194_s18 }
0x1e8c   :  { %4437 = vrot.lane.b32.xlu1 %v9681_v11, %s7194_s18  ;;  %4525 = vrot.lane.b32.xlu0 %v9673_v10, %s7196_s20  ;;  %v7101_v10 = vld [vmem:[%s10522_s6 + $0x90] ss:$12 sps:$4 sm:$0xff]  }
0x1e90   :  { %4527 = vrot.lane.b32.xlu1 %v9677_v32, %s7196_s20  ;;  %4421 = vrot.lane.b32.xlu0 %v9679_v44, %s7195_s19 }
0x1e94   :  { %4423 = vrot.lane.b32.xlu1 %v9681_v11, %s7195_s19  ;;  %4521 = vrot.lane.b32.xlu0 %v9679_v44, %s7196_s20  ;;  %v7104_v44 = vld [vmem:[%s10522_s6 + $0x98] ss:$12 sps:$4 sm:$0xff]  }
0x1e98   :  { %4523 = vrot.lane.b32.xlu1 %v9681_v11, %s7196_s20 }
0x1eca   :  { %v4512_v35 = vpop.permute.xlu0 %4511 }
0x1ecb   :  { %v4517_v53 = vmul.f32 %v4512_v35, %v7306_v49 }
0x1ece   :  { %v4514_v54 = vpop.permute.xlu1 %4513  ;;  %v4468_v4 = vpop.permute.xlu0 %4467 }
0x1ecf   :  { %v4518_v52 = vmul.f32 %v4514_v54, %v7306_v49  ;;  %v4473_v15 = vmul.f32 %v4468_v4, %v7319_v5 }
0x1ed1   :  { %v4520_v30 = vpack.c.bf16 %v4518_v52, %v4517_v53 }
0x1ed2   :  { %v4470_v0 = vpop.permute.xlu1 %4469  ;;  %v4498_v23 = vpop.permute.xlu0 %4497 }
0x1ed3   :  { %v4474_v59 = vmul.f32 %v4470_v0, %v7319_v5  ;;  %6643 = vmatprep.subr.bf16.mxu1 %v4520_v30  ;;  %v4503_v8 = vmul.f32 %v4498_v23, %v7308_v51 }
0x1ed5   :  { %v4476_v2 = vpack.c.bf16 %v4474_v59, %v4473_v15 }
0x1ed6   :  { %v4500_v22 = vpop.permute.xlu1 %4499  ;;  %v4454_v58 = vpop.permute.xlu0 %4453 }
0x1ed7   :  { %6644 = vmatpush3.bf16.msra.mxu1 %v4476_v2  ;;  %v4504_v41 = vmul.f32 %v4500_v22, %v7308_v51  ;;  %v4459_v19 = vmul.f32 %v4454_v58, %v7326_v13 }
0x1ed9   :  { %v4506_v31 = vpack.c.bf16 %v4504_v41, %v4503_v8 }
0x1eda   :  { %v4456_v48 = vpop.permute.xlu1 %4455  ;;  %v4484_v61 = vpop.permute.xlu0 %4483 }
0x1edb   :  { %v4460_v37 = vmul.f32 %v4456_v48, %v7326_v13  ;;  %v4489_v30 = vmul.f32 %v4484_v61, %v7312_v56 }
0x1edd   :  { %v4462_v3 = vpack.c.bf16 %v4460_v37, %v4459_v19 }
0x1ede   :  { %v4486_v29 = vpop.permute.xlu1 %4485  ;;  %v4440_v40 = vpop.permute.xlu0 %4439 }
0x1edf   :  { %v4490_v35 = vmul.f32 %v4486_v29, %v7312_v56  ;;  %v4445_v22 = vmul.f32 %v4440_v40, %v7329_v14 }
0x1ee1   :  { %v4492_v15 = vpack.c.bf16 %v4490_v35, %v4489_v30 }
0x1ee2   :  { %v4442_v33 = vpop.permute.xlu1 %4441  ;;  %v4426_v50 = vpop.permute.xlu0 %4425 }
0x1ee3   :  { %v4446_v0 = vmul.f32 %v4442_v33, %v7329_v14  ;;  %v4431_v41 = vmul.f32 %v4426_v50, %v7336_v26 }
0x1ee5   :  { %v4448_v29 = vpack.c.bf16 %v4446_v0, %v4445_v22 }
0x1ee6   :  { %v4428_v63 = vpop.permute.xlu1 %4427  ;;  %v4508_v43 = vpop.permute.xlu0 %4507 }
0x1ee7   :  { %v4515_v39 = vmul.f32 %v4508_v43, %v7306_v49 }
0x1eea   :  { %v4510_v27 = vpop.permute.xlu1 %4509  ;;  %v4464_v16 = vpop.permute.xlu0 %4463 }
0x1eeb   :  { %v4516_v47 = vmul.f32 %v4510_v27, %v7306_v49  ;;  %v4471_v45 = vmul.f32 %v4464_v16, %v7319_v5 }
0x1eed   :  { %v4519_v25 = vpack.c.bf16 %v4516_v47, %v4515_v39  ;;  %v4432_v39 = vmul.f32 %v4428_v63, %v7336_v26 }
0x1eee   :  { %v4466_v6 = vpop.permute.xlu1 %4465  ;;  %v4494_v28 = vpop.permute.xlu0 %4493 }
0x1eef   :  { %v4472_v12 = vmul.f32 %v4466_v6, %v7319_v5  ;;  %6645 = vmatprep.subr.bf16.mxu1 %v4519_v25  ;;  %v4501_v60 = vmul.f32 %v4494_v28, %v7308_v51  ;;  %v9781_v6 = vld [vmem:[%s10519_s3 + $0x8] ss:$0 sm:$0xff]  ;;  %v4434_v63 = vpack.c.bf16 %v4432_v39, %v4431_v41 }
0x1ef1   :  { %v4475_v38 = vpack.c.bf16 %v4472_v12, %v4471_v45 }
0x1ef2   :  { %v4496_v62 = vpop.permute.xlu1 %4495  ;;  %v4450_v57 = vpop.permute.xlu0 %4449 }
0x1ef3   :  { %v4502_v9 = vmul.f32 %v4496_v62, %v7308_v51  ;;  %6646 = vmatpush3.bf16.msra.mxu1 %v4475_v38  ;;  %v4457_v53 = vmul.f32 %v4450_v57, %v7326_v13 }
0x1ef4   :  { %6647 = vmatprep.subr.bf16.mxu1 %v4506_v31 }
0x1ef5   :  { %v4505_v7 = vpack.c.bf16 %v4502_v9, %v4501_v60 }
0x1ef6   :  { %v4452_v54 = vpop.permute.xlu1 %4451  ;;  %v4480_v4 = vpop.permute.xlu0 %4479 }
0x1ef7   :  { %v4458_v52 = vmul.f32 %v4452_v54, %v7326_v13  ;;  %6648 = vmatpush3.bf16.msra.mxu1 %v4462_v3  ;;  %v4487_v58 = vmul.f32 %v4480_v4, %v7312_v56 }
0x1ef8   :  { %6649 = vmatprep.subr.bf16.mxu1 %v4505_v7 }
0x1ef9   :  { %v4461_v23 = vpack.c.bf16 %v4458_v52, %v4457_v53 }
0x1efa   :  { %v4482_v59 = vpop.permute.xlu1 %4481  ;;  %v4436_v2 = vpop.permute.xlu0 %4435 }
0x1efb   :  { %v4488_v48 = vmul.f32 %v4482_v59, %v7312_v56  ;;  %6650 = vmatpush3.bf16.msra.mxu1 %v4461_v23  ;;  %v4443_v61 = vmul.f32 %v4436_v2, %v7329_v14 }
0x1efc   :  { %6651 = vmatprep.subr.bf16.mxu1 %v4492_v15  ;;  %v4655_v15 = vstv %s6182_s21 }
0x1efd   :  { %v4491_v43 = vpack.c.bf16 %v4488_v48, %v4487_v58  ;;  %v4656_v22 = vadd.f32 %v4655_v15, %v7254_v18  ;;  %v9830_v58 = vld [vmem:[%s10518_s2 + $0x8] sm:$0xff] }
0x1efe   :  { %v4438_v27 = vpop.permute.xlu1 %4437  ;;  %v4526_v16 = vpop.permute.xlu0 %4525 }
0x1eff   :  { %v4444_v33 = vmul.f32 %v4438_v27, %v7329_v14  ;;  %6652 = vmatpush3.bf16.msra.mxu1 %v4448_v29  ;;  %v4531_v28 = vmul.f32 %v9781_v6, %v4526_v16  ;;  %7155 = vrcp.f32 %v4656_v22 }
0x1f00   :  { %6653 = vmatprep.subr.bf16.mxu1 %v4491_v43 }
0x1f01   :  { %v4447_v47 = vpack.c.bf16 %v4444_v33, %v4443_v61 }
0x1f02   :  { %v4528_v40 = vpop.permute.xlu1 %4527  ;;  %v4422_v25 = vpop.permute.xlu0 %4421 }
0x1f03   :  { %v4532_v45 = vmul.f32 %v9781_v6, %v4528_v40  ;;  %6654 = vmatpush3.bf16.msra.mxu1 %v4447_v47  ;;  %v4429_v37 = vmul.f32 %v4422_v25, %v7336_v26 }
0x1f04   :  { %6655 = vmatprep.subr.bf16.mxu1 %v4478_v1 }
0x1f05   :  { %v4534_v12 = vpack.c.bf16 %v4532_v45, %v4531_v28 }
0x1f06   :  { %v4424_v8 = vpop.permute.xlu1 %4423  ;;  %v4522_v38 = vpop.permute.xlu0 %4521 }
0x1f07   :  { %v4430_v50 = vmul.f32 %v4424_v8, %v7336_v26  ;;  %6656 = vmatpush3.bf16.msra.mxu1 %v4434_v63  ;;  %6920 = vmatpush3.bf16.msra.mxu0 %v4534_v12  ;;  %v4529_v32 = vmul.f32 %v9781_v6, %v4522_v38 }
0x1f08   :  { %6657 = vmatprep.subr.bf16.mxu1 %v4477_v34  ;;  %6921 = vmatprep.subr.bf16.mxu0 %v7197_v24 }
0x1f09   :  { %v4433_v31 = vpack.c.bf16 %v4430_v50, %v4429_v37  ;;  %v7105_v37 = vld [vmem:[%s10520_s4 + $0xe4] ss:$8 sps:$4 sm:$0xff]  }
0x1f0a   :  { %v4524_v62 = vpop.permute.xlu1 %4523 }
0x1f0b   :  { %v4530_v1 = vmul.f32 %v9781_v6, %v4524_v62  ;;  %6658 = vmatpush3.bf16.msra.mxu1 %v4433_v31 }
0x1f0c   :  { %v7156_v39 = vpop.eup %7155 }
0x1f0d   :  { %v4533_v57 = vpack.c.bf16 %v4530_v1, %v4529_v32 }
0x1f0e   :  { %4586 = vmatmul.mubr.bf16.vlgmr.msra.gmra.mxu1 %v7101_v10 }
0x1f0f   :  { %6922 = vmatpush3.bf16.msra.mxu0 %v4533_v57 }
0x1f10   :  { %4751 = vmatprep.subr.bf16.mxu0 %v7188_v36 }
0x1f12   :  { %6924 = vmatmul.mubr.msk.bf16.vlgmr.msra.gmra.mxu0 %vm415_vm2, %v7104_v44 }
0x1f13   :  { %6191 = vmatprep.mubr.msk.bf16.mxu0 %vm197_vm0, %v7105_v37 }
0x1fce   :  { %v6659_v11 = vpop.f32.mrf.mxu1 }
0x1fd0   :  { %v6660_v34 = vpop.f32.mrf.mxu1 }
0x1fd1   :  { %v6661_v19 = vadd.f32 %v6660_v34, %v6659_v11 }
0x1fd2   :  { %v6662_v60 = vpop.f32.mrf.mxu1  ;;  %v4628_v9 = vpop.f32.mrf.mxu0 }
0x1fd3   :  { %v4629_v3 = vadd.f32 %v6661_v19, %v4628_v9 }
0x1fd4   :  { %v6663_v7 = vpop.f32.mrf.mxu1  ;;  %v6925_v35 = vpop.f32.mrf.mxu0 }
0x1fd5   :  { %v4635_v54 = vsub.f32 %v9468_v21, %v4629_v3  ;;  %6180 = vst [vmem:[%s10523_s7 + $0x60] sm:$0xff] %v4629_v3  ;;  %v6664_v4 = vadd.f32 %v6663_v7, %v6662_v60 }
0x1fd6   :  { %v4631_v53 = vpop.f32.mrf.mxu0 }
0x1fd7   :  { %v9809_v52 = vsub.f32 %v9451_v17, %v4635_v54  ;;  %v4632_v30 = vadd.f32 %v6664_v4, %v4631_v53  ;;  %v9824_v17 = vld [vmem:[%s10518_s2] sm:$0xff] }
0x1fd8   :  { %v6926_v0 = vpop.f32.mrf.mxu0 }
0x1fd9   :  { %v4636_v23 = vsub.f32 %v9470_v46, %v4632_v30  ;;  %6181 = vst [vmem:[%s10523_s7 + $0x68] sm:$0xff] %v4632_v30  ;;  %v4643_v21 = vadd.f32 %v9809_v52, %v4629_v3 }
0x1fdb   :  { %v9817_v59 = vsub.f32 %v9459_v55, %v4636_v23  ;;  %v4645_v46 = vmul.f32 %v9824_v17, %v4643_v21 }
0x1fdd   :  { %v4644_v2 = vadd.f32 %v9817_v59, %v4632_v30 }
0x1fdf   :  { %v4646_v48 = vmul.f32 %v9830_v58, %v4644_v2 }
0x1fe1   :  { %v4647_v55 = vadd.f32 %v4646_v48, %v4645_v46 }
0x1fe3   :  { %v4648_v29 = vrot.slane %v4647_v55, 4 }
0x1fe5   :  { %v4649_v43 = vadd.f32 %v4648_v29, %v4647_v55 }
0x1fe7   :  { %v4650_v27 = vrot.slane %v4649_v43, 2 }
0x1fe9   :  { %v4651_v16 = vadd.f32 %v4650_v27, %v4649_v43 }
0x1feb   :  { %v4652_v61 = vrot.slane %v4651_v16, 1 }
0x1fed   :  { %v4653_v33 = vadd.f32 %v4652_v61, %v4651_v16 }
0x1fef   :  { %v4654_v47 = vsub.f32 %v7256_v20, %v4653_v33 }
0x1ff1   :  { %v4658_v40 = vmul.f32 %v7156_v39, %v4654_v47 }
0x1ff3   :  { %v4659_v25 = vmul.f32 %v9824_v17, %v4658_v40  ;;  %v4660_v41 = vmul.f32 %v9830_v58, %v4658_v40 }
0x1ff5   :  { %v9836_v28 = vadd.f32 %v4659_v25, %v4643_v21  ;;  %v9838_v45 = vadd.f32 %v4660_v41, %v4644_v2  ;;  %v7107_v41 = vld [vmem:[%s10520_s4 + $0xe0] ss:$8 sps:$4 sm:$0xff]  }
0x1ff7   :  { %v4663_v63 = vsub.f32 %v9836_v28, %v9809_v52  ;;  %v4664_v12 = vsub.f32 %v9838_v45, %v9817_v59 }
0x1ff9   :  { %4715 = vrot.lane.b32.xlu1 %v4664_v12, %s7190_s14  ;;  %4713 = vrot.lane.b32.xlu0 %v4663_v63, %s7190_s14  ;;  %v4698_v8 = vpack.c.bf16 %v4664_v12, %v4663_v63 }
0x1ffd   :  { %4708 = vrot.lane.b32.xlu1 %v4664_v12, %s7189_s1  ;;  %4706 = vrot.lane.b32.xlu0 %v4663_v63, %s7189_s1 }
0x2001   :  { %4701 = vrot.lane.b32.xlu1 %v4664_v12, %s7191_s15  ;;  %4699 = vrot.lane.b32.xlu0 %v4663_v63, %s7191_s15 }
0x2005   :  { %4693 = vrot.lane.b32.xlu1 %v4664_v12, %s7192_s16  ;;  %4691 = vrot.lane.b32.xlu0 %v4663_v63, %s7192_s16 }
0x2009   :  { %4686 = vrot.lane.b32.xlu1 %v4664_v12, %s7193_s17  ;;  %4684 = vrot.lane.b32.xlu0 %v4663_v63, %s7193_s17 }
0x200d   :  { %4679 = vrot.lane.b32.xlu1 %v4664_v12, %s7194_s18  ;;  %4677 = vrot.lane.b32.xlu0 %v4663_v63, %s7194_s18 }
0x2011   :  { %4672 = vrot.lane.b32.xlu1 %v4664_v12, %s7195_s19  ;;  %4670 = vrot.lane.b32.xlu0 %v4663_v63, %s7195_s19 }
0x2015   :  { %4722 = vrot.lane.b32.xlu1 %v4664_v12, %s7196_s20  ;;  %4720 = vrot.lane.b32.xlu0 %v4663_v63, %s7196_s20  ;;  %v7108_v63 = vld [vmem:[%s10520_s4 + $0xf4] ss:$8 sps:$4 sm:$0xff]   ;;  %v7110_v12 = vld [vmem:[%s10520_s4 + $0xf0] ss:$8 sps:$4 sm:$0xff]  }
0x206b   :  { %v4716_v50 = vpop.permute.xlu1 %4715  ;;  %v4714_v38 = vpop.permute.xlu0 %4713 }
0x206c   :  { %v4718_v31 = vmul.f32 %v4716_v50, %v7306_v49  ;;  %v4717_v62 = vmul.f32 %v4714_v38, %v7306_v49 }
0x206e   :  { %v4719_v10 = vpack.c.bf16 %v4718_v31, %v4717_v62 }
0x206f   :  { %v4709_v32 = vpop.permute.xlu1 %4708  ;;  %v4707_v1 = vpop.permute.xlu0 %4706 }
0x2070   :  { %v4711_v57 = vmul.f32 %v4709_v32, %v7308_v51  ;;  %v4710_v44 = vmul.f32 %v4707_v1, %v7308_v51  ;;  %4752 = vmatpush1.bf16.msra.mxu0 %v4719_v10 }
0x2071   :  { %4753 = vmatprep.subr.bf16.mxu0 %v7188_v36 }
0x2072   :  { %v4712_v11 = vpack.c.bf16 %v4711_v57, %v4710_v44 }
0x2073   :  { %v4702_v34 = vpop.permute.xlu1 %4701  ;;  %v4700_v19 = vpop.permute.xlu0 %4699 }
0x2074   :  { %v4704_v60 = vmul.f32 %v4702_v34, %v7312_v56  ;;  %v4703_v9 = vmul.f32 %v4700_v19, %v7312_v56  ;;  %4754 = vmatpush1.bf16.msra.mxu0 %v4712_v11 }
0x2075   :  { %4755 = vmatprep.subr.bf16.mxu0 %v7188_v36 }
0x2076   :  { %v4705_v3 = vpack.c.bf16 %v4704_v60, %v4703_v9  ;;  %v7113_v60 = vld [vmem:[%s10521_s5 + $0x154] ss:$12 sps:$4 sm:$0xff]  }
0x2077   :  { %v4694_v7 = vpop.permute.xlu1 %4693  ;;  %v4692_v35 = vpop.permute.xlu0 %4691  ;;  %4995 = vmatprep.mubr.bf16.mxu1 %v7113_v60 }
0x2078   :  { %4756 = vmatpush1.bf16.msra.mxu0 %v4705_v3  ;;  %v4696_v54 = vmul.f32 %v4694_v7, %v7319_v5  ;;  %v4695_v4 = vmul.f32 %v4692_v35, %v7319_v5 }
0x2079   :  { %4757 = vmatprep.subr.bf16.mxu0 %v7188_v36 }
0x207a   :  { %v4697_v0 = vpack.c.bf16 %v4696_v54, %v4695_v4 }
0x207b   :  { %v4687_v53 = vpop.permute.xlu1 %4686  ;;  %v4685_v30 = vpop.permute.xlu0 %4684 }
0x207c   :  { %4758 = vmatpush1.bf16.msra.mxu0 %v4698_v8  ;;  %v4689_v23 = vmul.f32 %v4687_v53, %v7326_v13  ;;  %v4688_v15 = vmul.f32 %v4685_v30, %v7326_v13 }
0x207d   :  { %4759 = vmatprep.subr.bf16.mxu0 %v7188_v36 }
0x207e   :  { %v4690_v22 = vpack.c.bf16 %v4689_v23, %v4688_v15 }
0x207f   :  { %v4680_v21 = vpop.permute.xlu1 %4679  ;;  %v4678_v2 = vpop.permute.xlu0 %4677 }
0x2080   :  { %4760 = vmatpush1.bf16.msra.mxu0 %v4697_v0  ;;  %v4682_v46 = vmul.f32 %v4680_v21, %v7329_v14  ;;  %v4681_v48 = vmul.f32 %v4678_v2, %v7329_v14 }
0x2081   :  { %4761 = vmatprep.subr.bf16.mxu0 %v7188_v36 }
0x2082   :  { %v4683_v43 = vpack.c.bf16 %v4682_v46, %v4681_v48 }
0x2083   :  { %v4673_v55 = vpop.permute.xlu1 %4672  ;;  %v4671_v29 = vpop.permute.xlu0 %4670 }
0x2084   :  { %4762 = vmatpush1.bf16.msra.mxu0 %v4690_v22  ;;  %v4675_v27 = vmul.f32 %v4673_v55, %v7336_v26  ;;  %v4674_v16 = vmul.f32 %v4671_v29, %v7336_v26 }
0x2085   :  { %4763 = vmatprep.subr.bf16.mxu0 %v7188_v36 }
0x2086   :  { %v4676_v61 = vpack.c.bf16 %v4675_v27, %v4674_v16 }
0x2087   :  { %v4723_v33 = vpop.permute.xlu1 %4722  ;;  %v4721_v39 = vpop.permute.xlu0 %4720 }
0x2088   :  { %4764 = vmatpush1.bf16.msra.mxu0 %v4683_v43  ;;  %v4725_v47 = vmul.f32 %v9781_v6, %v4723_v33  ;;  %v4724_v40 = vmul.f32 %v9781_v6, %v4721_v39 }
0x2089   :  { %4765 = vmatprep.subr.bf16.mxu0 %v7188_v36 }
0x208a   :  { %v4726_v25 = vpack.c.bf16 %v4725_v47, %v4724_v40 }
0x208c   :  { %4766 = vmatpush1.bf16.msra.mxu0 %v4676_v61 }
0x208d   :  { %4779 = vmatprep.subr.bf16.mxu0 %v7188_v36 }
0x2090   :  { %4780 = vmatpush2.bf16.msra.mxu0 %v7351_v42 }
0x2091   :  { %4781 = vmatprep.subr.bf16.mxu0 %v7188_v36 }
0x2094   :  { %4782 = vmatpush2.bf16.msra.mxu0 %v4726_v25 }
0x2097   :  { %4784 = vmatmul.mubr.bf16.vlgmr.msra.gmra.mxu0 %v7107_v41 }
0x2098   :  { %6192 = vmatprep.mubr.msk.bf16.mxu0 %vm197_vm0, %v7108_v63 }
0x209f   :  { %4792 = vmatmul.mubr.bf16.gmra.mxu0 %v7110_v12 }
0x2157   :  { %v4785_v8 = vpop.f32.mrf.mxu0 }
0x2158   :  { %v9900_v37 = vmax.f32 %v4785_v8, 0.0 }
0x2159   :  { %v4787_v50 = vpop.f32.mrf.mxu0 }
0x215a   :  { %4899 = vrot.lane.b32.xlu0 %v9900_v37, %s7190_s14 }
0x215b   :  { %v4788_v38 = vpop.f32.mrf.mxu0 }
0x215c   :  { %v9904_v31 = vmax.f32 %v4788_v38, 0.0 }
0x215d   :  { %v4790_v62 = vpop.f32.mrf.mxu0 }
0x215e   :  { %4855 = vrot.lane.b32.xlu0 %v9900_v37, %s7192_s16  ;;  %4901 = vrot.lane.b32.xlu1 %v9904_v31, %s7190_s14  ;;  %v4869_v10 = vpack.c.bf16 %v9904_v31, %v9900_v37 }
0x215f   :  { %v4793_v32 = vpop.f32.mrf.mxu0 }
0x2160   :  { %v9916_v57 = vmax.f32 %v4793_v32, 0.0 }
0x2161   :  { %v4795_v1 = vpop.f32.mrf.mxu0 }
0x2162   :  { %4885 = vrot.lane.b32.xlu0 %v9900_v37, %s7189_s1  ;;  %4857 = vrot.lane.b32.xlu1 %v9904_v31, %s7192_s16 }
0x2163   :  { %v4796_v44 = vpop.f32.mrf.mxu0 }
0x2164   :  { %v9918_v11 = vmax.f32 %v4796_v44, 0.0 }
0x2165   :  { %v4798_v34 = vpop.f32.mrf.mxu0 }
0x2166   :  { %4841 = vrot.lane.b32.xlu0 %v9900_v37, %s7193_s17  ;;  %4887 = vrot.lane.b32.xlu1 %v9904_v31, %s7189_s1  ;;  %v4870_v19 = vpack.c.bf16 %v9918_v11, %v9916_v57 }
0x216a   :  { %4871 = vrot.lane.b32.xlu0 %v9900_v37, %s7191_s15  ;;  %4843 = vrot.lane.b32.xlu1 %v9904_v31, %s7193_s17 }
0x216e   :  { %4873 = vrot.lane.b32.xlu1 %v9904_v31, %s7191_s15  ;;  %4903 = vrot.lane.b32.xlu0 %v9916_v57, %s7190_s14 }
0x2172   :  { %4859 = vrot.lane.b32.xlu0 %v9916_v57, %s7192_s16  ;;  %4905 = vrot.lane.b32.xlu1 %v9918_v11, %s7190_s14 }
0x2176   :  { %4889 = vrot.lane.b32.xlu0 %v9916_v57, %s7189_s1  ;;  %4861 = vrot.lane.b32.xlu1 %v9918_v11, %s7192_s16 }
0x217a   :  { %4845 = vrot.lane.b32.xlu0 %v9916_v57, %s7193_s17  ;;  %4891 = vrot.lane.b32.xlu1 %v9918_v11, %s7189_s1 }
0x217e   :  { %4875 = vrot.lane.b32.xlu0 %v9916_v57, %s7191_s15  ;;  %4847 = vrot.lane.b32.xlu1 %v9918_v11, %s7193_s17 }
0x2182   :  { %4831 = vrot.lane.b32.xlu0 %v9916_v57, %s7194_s18  ;;  %4877 = vrot.lane.b32.xlu1 %v9918_v11, %s7191_s15 }
0x2186   :  { %4827 = vrot.lane.b32.xlu0 %v9900_v37, %s7194_s18  ;;  %4833 = vrot.lane.b32.xlu1 %v9918_v11, %s7194_s18 }
0x218a   :  { %4817 = vrot.lane.b32.xlu0 %v9916_v57, %s7195_s19  ;;  %4829 = vrot.lane.b32.xlu1 %v9904_v31, %s7194_s18 }
0x218e   :  { %4813 = vrot.lane.b32.xlu0 %v9900_v37, %s7195_s19  ;;  %4819 = vrot.lane.b32.xlu1 %v9918_v11, %s7195_s19 }
0x2192   :  { %4917 = vrot.lane.b32.xlu0 %v9916_v57, %s7196_s20  ;;  %4815 = vrot.lane.b32.xlu1 %v9904_v31, %s7195_s19 }
0x2196   :  { %4913 = vrot.lane.b32.xlu0 %v9900_v37, %s7196_s20  ;;  %4919 = vrot.lane.b32.xlu1 %v9918_v11, %s7196_s20 }
0x219a   :  { %4915 = vrot.lane.b32.xlu1 %v9904_v31, %s7196_s20 }
0x21cc   :  { %v4900_v9 = vpop.permute.xlu0 %4899 }
0x21cd   :  { %v4907_v61 = vmul.f32 %v4900_v9, %v7306_v49 }
0x21d0   :  { %v4856_v3 = vpop.permute.xlu0 %4855  ;;  %v4902_v7 = vpop.permute.xlu1 %4901 }
0x21d1   :  { %v4908_v55 = vmul.f32 %v4902_v7, %v7306_v49  ;;  %v4863_v41 = vmul.f32 %v4856_v3, %v7319_v5 }
0x21d3   :  { %v4911_v47 = vpack.c.bf16 %v4908_v55, %v4907_v61 }
0x21d4   :  { %v4886_v35 = vpop.permute.xlu0 %4885  ;;  %v4858_v54 = vpop.permute.xlu1 %4857 }
0x21d5   :  { %v4864_v33 = vmul.f32 %v4858_v54, %v7319_v5  ;;  %v4893_v34 = vmul.f32 %v4886_v35, %v7308_v51 }
0x21d7   :  { %v4867_v8 = vpack.c.bf16 %v4864_v33, %v4863_v41 }
0x21d8   :  { %v4842_v4 = vpop.permute.xlu0 %4841  ;;  %v4888_v53 = vpop.permute.xlu1 %4887 }
0x21d9   :  { %v4894_v38 = vmul.f32 %v4888_v53, %v7308_v51 }
0x21db   :  { %v4897_v3 = vpack.c.bf16 %v4894_v38, %v4893_v34  ;;  %v7116_v34 = vld [vmem:[%s10521_s5 + $0x168] ss:$12 sps:$4 sm:$0xff]  }
0x21dc   :  { %v4872_v30 = vpop.permute.xlu0 %4871  ;;  %v4844_v0 = vpop.permute.xlu1 %4843 }
0x21dd   :  { %v4850_v60 = vmul.f32 %v4844_v0, %v7326_v13 }
0x21e0   :  { %v4874_v23 = vpop.permute.xlu1 %4873  ;;  %v4904_v15 = vpop.permute.xlu0 %4903 }
0x21e1   :  { %v4909_v22 = vmul.f32 %v4904_v15, %v7306_v49  ;;  %v4849_v15 = vmul.f32 %v4842_v4, %v7326_v13 }
0x21e4   :  { %v4860_v21 = vpop.permute.xlu0 %4859  ;;  %v4906_v2 = vpop.permute.xlu1 %4905 }
0x21e5   :  { %v4910_v46 = vmul.f32 %v4906_v2, %v7306_v49  ;;  %v4865_v27 = vmul.f32 %v4860_v21, %v7319_v5  ;;  %v4853_v2 = vpack.c.bf16 %v4850_v60, %v4849_v15  ;;  %v7117_v60 = vld [vmem:[%s10521_s5 + $0x158] ss:$12 sps:$4 sm:$0xff]  }
0x21e7   :  { %v4912_v48 = vpack.c.bf16 %v4910_v46, %v4909_v22  ;;  %v4880_v46 = vmul.f32 %v4874_v23, %v7312_v56 }
0x21e8   :  { %v4890_v29 = vpop.permute.xlu0 %4889  ;;  %v4862_v43 = vpop.permute.xlu1 %4861 }
0x21e9   :  { %v4866_v16 = vmul.f32 %v4862_v43, %v7319_v5  ;;  %6669 = vmatprep.subr.bf16.mxu1 %v4912_v48  ;;  %v4895_v63 = vmul.f32 %v4890_v29, %v7308_v51  ;;  %v4879_v29 = vmul.f32 %v4872_v30, %v7312_v56 }
0x21eb   :  { %v4868_v39 = vpack.c.bf16 %v4866_v16, %v4865_v27  ;;  %v4883_v43 = vpack.c.bf16 %v4880_v46, %v4879_v29 }
0x21ec   :  { %v4846_v40 = vpop.permute.xlu0 %4845  ;;  %v4892_v25 = vpop.permute.xlu1 %4891 }
0x21ed   :  { %v4896_v12 = vmul.f32 %v4892_v25, %v7308_v51  ;;  %6670 = vmatpush3.bf16.msra.mxu1 %v4868_v39  ;;  %v4851_v1 = vmul.f32 %v4846_v40, %v7326_v13 }
0x21ee   :  { %6671 = vmatprep.subr.bf16.mxu1 %v4911_v47 }
0x21ef   :  { %v4898_v50 = vpack.c.bf16 %v4896_v12, %v4895_v63 }
0x21f0   :  { %v4876_v62 = vpop.permute.xlu0 %4875  ;;  %v4848_v32 = vpop.permute.xlu1 %4847 }
0x21f1   :  { %v4852_v44 = vmul.f32 %v4848_v32, %v7326_v13  ;;  %6672 = vmatpush3.bf16.msra.mxu1 %v4867_v8  ;;  %v4881_v53 = vmul.f32 %v4876_v62, %v7312_v56  ;;  %v7111_v62 = vld [vmem:[%s10521_s5 + $0x150] ss:$12 sps:$4 sm:$0xff]  }
0x21f2   :  { %6673 = vmatprep.subr.bf16.mxu1 %v4898_v50 }
0x21f3   :  { %v4854_v9 = vpack.c.bf16 %v4852_v44, %v4851_v1 }
0x21f4   :  { %v4832_v7 = vpop.permute.xlu0 %4831  ;;  %v4878_v54 = vpop.permute.xlu1 %4877 }
0x21f5   :  { %v4882_v21 = vmul.f32 %v4878_v54, %v7312_v56  ;;  %6674 = vmatpush3.bf16.msra.mxu1 %v4854_v9  ;;  %v4837_v0 = vmul.f32 %v4832_v7, %v7329_v14  ;;  %v7118_v9 = vld [vmem:[%s10521_s5 + $0x170] ss:$12 sps:$4 sm:$0xff]  }
0x21f6   :  { %6675 = vmatprep.subr.bf16.mxu1 %v4897_v3 }
0x21f7   :  { %v4884_v22 = vpack.c.bf16 %v4882_v21, %v4881_v53 }
0x21f8   :  { %v4828_v35 = vpop.permute.xlu0 %4827  ;;  %v4834_v48 = vpop.permute.xlu1 %4833 }
0x21f9   :  { %v4838_v55 = vmul.f32 %v4834_v48, %v7329_v14  ;;  %6676 = vmatpush3.bf16.msra.mxu1 %v4853_v2  ;;  %v4835_v61 = vmul.f32 %v4828_v35, %v7329_v14 }
0x21fa   :  { %6677 = vmatprep.subr.bf16.mxu1 %v4884_v22 }
0x21fb   :  { %v4840_v4 = vpack.c.bf16 %v4838_v55, %v4837_v0 }
0x21fc   :  { %v4818_v27 = vpop.permute.xlu0 %4817  ;;  %v4830_v16 = vpop.permute.xlu1 %4829 }
0x21fd   :  { %v4836_v33 = vmul.f32 %v4830_v16, %v7329_v14  ;;  %6678 = vmatpush3.bf16.msra.mxu1 %v4840_v4  ;;  %v4823_v40 = vmul.f32 %v4818_v27, %v7336_v26 }
0x21fe   :  { %6679 = vmatprep.subr.bf16.mxu1 %v4883_v43 }
0x21ff   :  { %v4839_v23 = vpack.c.bf16 %v4836_v33, %v4835_v61 }
0x2200   :  { %v4814_v39 = vpop.permute.xlu0 %4813  ;;  %v4820_v47 = vpop.permute.xlu1 %4819 }
0x2201   :  { %v4824_v25 = vmul.f32 %v4820_v47, %v7336_v26  ;;  %6680 = vmatpush3.bf16.msra.mxu1 %v4839_v23  ;;  %v4821_v12 = vmul.f32 %v4814_v39, %v7336_v26 }
0x2202   :  { %6681 = vmatprep.subr.bf16.mxu1 %v4870_v19  ;;  %v7114_v19 = vld [vmem:[%s10521_s5 + $0x16c] ss:$12 sps:$4 sm:$0xff]  }
0x2203   :  { %v4826_v30 = vpack.c.bf16 %v4824_v25, %v4823_v40 }
0x2204   :  { %v4918_v41 = vpop.permute.xlu0 %4917  ;;  %v4816_v63 = vpop.permute.xlu1 %4815 }
0x2205   :  { %v4822_v8 = vmul.f32 %v4816_v63, %v7336_v26  ;;  %6682 = vmatpush3.bf16.msra.mxu1 %v4826_v30  ;;  %v4923_v57 = vmul.f32 %v9781_v6, %v4918_v41  ;;  %v7121_v41 = vld [vmem:[%s10522_s6 + $0xac] ss:$12 sps:$4 sm:$0xff]  }
0x2206   :  { %6683 = vmatprep.subr.bf16.mxu1 %v4869_v10  ;;  %5234 = vmatprep.mubr.bf16.mxu0 %v7121_v41 }
0x2207   :  { %v4825_v50 = vpack.c.bf16 %v4822_v8, %v4821_v12 }
0x2208   :  { %v4920_v38 = vpop.permute.xlu1 %4919  ;;  %v4914_v32 = vpop.permute.xlu0 %4913 }
0x2209   :  { %v4924_v11 = vmul.f32 %v9781_v6, %v4920_v38  ;;  %6684 = vmatpush3.bf16.msra.mxu1 %v4825_v50  ;;  %v4921_v10 = vmul.f32 %v9781_v6, %v4914_v32 }
0x220a   :  { %6927 = vmatprep.subr.bf16.mxu1 %v7351_v42 }
0x220b   :  { %v4926_v37 = vpack.c.bf16 %v4924_v11, %v4923_v57 }
0x220c   :  { %v4916_v31 = vpop.permute.xlu1 %4915  ;;  %4996 = vmatmul.mubr.bf16.vlgmr.msra.gmra.mxu1 %v7111_v62 }
0x220d   :  { %v4922_v1 = vmul.f32 %v9781_v6, %v4916_v31  ;;  %6928 = vmatpush3.bf16.msra.mxu1 %v7351_v42  ;;  %5003 = vmatprep.mubr.bf16.mxu1 %v7114_v19 }
0x220e   :  { %6929 = vmatprep.subr.bf16.mxu1 %v4926_v37 }
0x220f   :  { %v4925_v44 = vpack.c.bf16 %v4922_v1, %v4921_v10 }
0x2211   :  { %6930 = vmatpush3.bf16.msra.mxu1 %v4926_v37 }
0x2212   :  { %6931 = vmatprep.subr.bf16.mxu1 %v4925_v44 }
0x2214   :  { %5004 = vmatmul.mubr.bf16.gmra.mxu1 %v7116_v34 }
0x2215   :  { %6932 = vmatpush3.bf16.msra.mxu1 %v4925_v44  ;;  %6933 = vmatprep.mubr.msk.bf16.mxu1 %vm415_vm2, %v7117_v60 }
0x2216   :  { %6937 = vmatprep.subr.bf16.mxu1 %v7197_v24 }
0x221c   :  { %6934 = vmatmul.mubr.msk.bf16.vlgmr.msra.gmra.mxu1 %vm415_vm2, %v7118_v9 }
0x221d   :  { %6938 = vmatpush3.bf16.msra.mxu1 %v7351_v42  ;;  %6943 = vmatprep.mubr.msk.bf16.mxu1 %vm7198_vm3, %v7197_v24 }
0x221e   :  { %6939 = vmatprep.subr.bf16.mxu1 %v7197_v24 }
0x22cc   :  { %v6685_v3 = vpop.f32.mrf.mxu1 }
0x22ce   :  { %v6686_v7 = vpop.f32.mrf.mxu1 }
0x22cf   :  { %v6687_v55 = vadd.f32 %v6686_v7, %v6685_v3 }
0x22d0   :  { %v6688_v54 = vpop.f32.mrf.mxu1 }
0x22d2   :  { %v6689_v15 = vpop.f32.mrf.mxu1 }
0x22d3   :  { %v6690_v27 = vadd.f32 %v6689_v15, %v6688_v54 }
0x22d4   :  { %v6691_v53 = vpop.f32.mrf.mxu1 }
0x22d6   :  { %v6692_v21 = vpop.f32.mrf.mxu1 }
0x22d7   :  { %v6693_v46 = vadd.f32 %v6692_v21, %v6691_v53 }
0x22d8   :  { %v6694_v2 = vpop.f32.mrf.mxu1 }
0x22da   :  { %v6695_v22 = vpop.f32.mrf.mxu1 }
0x22db   :  { %v6696_v29 = vadd.f32 %v6695_v22, %v6694_v2 }
0x22dc   :  { %v6935_v35 = vpop.f32.mrf.mxu1 }
0x22dd   :  { %v5055_v48 = vadd.f32 %v6935_v35, %v6693_v46 }
0x22de   :  { %v5046_v0 = vpop.f32.mrf.mxu1 }
0x22df   :  { %v10041_v4 = vmax.f32 %v5055_v48, 0.0  ;;  %v5047_v16 = vadd.f32 %v6687_v55, %v5046_v0 }
0x22e0   :  { %v6936_v43 = vpop.f32.mrf.mxu1 }
0x22e1   :  { %v5058_v61 = vadd.f32 %v6936_v43, %v6696_v29  ;;  %5160 = vrot.lane.b32.xlu0 %v10041_v4, %s7190_s14  ;;  %v10047_v47 = vmax.f32 %v5047_v16, 0.0 }
0x22e2   :  { %v5049_v33 = vpop.f32.mrf.mxu1 }
0x22e3   :  { %v10045_v23 = vmax.f32 %v5058_v61, 0.0  ;;  %v5050_v39 = vadd.f32 %v6690_v27, %v5049_v33 }
0x22e5   :  { %v10049_v40 = vmax.f32 %v5050_v39, 0.0  ;;  %5162 = vrot.lane.b32.xlu1 %v10045_v23, %s7190_s14  ;;  %5116 = vrot.lane.b32.xlu0 %v10041_v4, %s7192_s16  ;;  %v5127_v25 = vpack.c.bf16 %v10045_v23, %v10041_v4 }
0x22e7   :  { %v5126_v30 = vpack.c.bf16 %v10049_v40, %v10047_v47 }
0x22e9   :  { %5118 = vrot.lane.b32.xlu1 %v10045_v23, %s7192_s16  ;;  %5146 = vrot.lane.b32.xlu0 %v10041_v4, %s7189_s1 }
0x22ed   :  { %5148 = vrot.lane.b32.xlu1 %v10045_v23, %s7189_s1  ;;  %5102 = vrot.lane.b32.xlu0 %v10041_v4, %s7193_s17 }
0x22f1   :  { %5104 = vrot.lane.b32.xlu1 %v10045_v23, %s7193_s17  ;;  %5132 = vrot.lane.b32.xlu0 %v10041_v4, %s7191_s15 }
0x22f5   :  { %5134 = vrot.lane.b32.xlu1 %v10045_v23, %s7191_s15  ;;  %5088 = vrot.lane.b32.xlu0 %v10041_v4, %s7194_s18 }
0x22f9   :  { %5090 = vrot.lane.b32.xlu1 %v10045_v23, %s7194_s18  ;;  %5074 = vrot.lane.b32.xlu0 %v10041_v4, %s7195_s19 }
0x22fd   :  { %5076 = vrot.lane.b32.xlu1 %v10045_v23, %s7195_s19  ;;  %5156 = vrot.lane.b32.xlu0 %v10047_v47, %s7190_s14 }
0x2301   :  { %5158 = vrot.lane.b32.xlu1 %v10049_v40, %s7190_s14  ;;  %5112 = vrot.lane.b32.xlu0 %v10047_v47, %s7192_s16 }
0x2305   :  { %5114 = vrot.lane.b32.xlu1 %v10049_v40, %s7192_s16  ;;  %5142 = vrot.lane.b32.xlu0 %v10047_v47, %s7189_s1 }
0x2309   :  { %5144 = vrot.lane.b32.xlu1 %v10049_v40, %s7189_s1  ;;  %5098 = vrot.lane.b32.xlu0 %v10047_v47, %s7193_s17 }
0x230d   :  { %5100 = vrot.lane.b32.xlu1 %v10049_v40, %s7193_s17  ;;  %5128 = vrot.lane.b32.xlu0 %v10047_v47, %s7191_s15 }
0x2311   :  { %5130 = vrot.lane.b32.xlu1 %v10049_v40, %s7191_s15  ;;  %5084 = vrot.lane.b32.xlu0 %v10047_v47, %s7194_s18 }
0x2315   :  { %5086 = vrot.lane.b32.xlu1 %v10049_v40, %s7194_s18  ;;  %5174 = vrot.lane.b32.xlu0 %v10041_v4, %s7196_s20  ;;  %v7119_v4 = vld [vmem:[%s10522_s6 + $0xa8] ss:$12 sps:$4 sm:$0xff]  }
0x2319   :  { %5176 = vrot.lane.b32.xlu1 %v10045_v23, %s7196_s20  ;;  %5070 = vrot.lane.b32.xlu0 %v10047_v47, %s7195_s19 }
0x231d   :  { %5072 = vrot.lane.b32.xlu1 %v10049_v40, %s7195_s19  ;;  %5170 = vrot.lane.b32.xlu0 %v10047_v47, %s7196_s20  ;;  %v7122_v47 = vld [vmem:[%s10522_s6 + $0xb0] ss:$12 sps:$4 sm:$0xff]  }
0x2321   :  { %5172 = vrot.lane.b32.xlu1 %v10049_v40, %s7196_s20 }
0x2353   :  { %v5161_v63 = vpop.permute.xlu0 %5160 }
0x2354   :  { %v5166_v50 = vmul.f32 %v5161_v63, %v7306_v49 }
0x2357   :  { %v5163_v12 = vpop.permute.xlu1 %5162  ;;  %v5117_v8 = vpop.permute.xlu0 %5116 }
0x2358   :  { %v5167_v38 = vmul.f32 %v5163_v12, %v7306_v49  ;;  %v5122_v19 = vmul.f32 %v5117_v8, %v7319_v5 }
0x235a   :  { %v5169_v62 = vpack.c.bf16 %v5167_v38, %v5166_v50 }
0x235b   :  { %v5119_v57 = vpop.permute.xlu1 %5118  ;;  %v5147_v11 = vpop.permute.xlu0 %5146 }
0x235c   :  { %v5123_v32 = vmul.f32 %v5119_v57, %v7319_v5  ;;  %6702 = vmatprep.subr.bf16.mxu0 %v5169_v62  ;;  %v5152_v29 = vmul.f32 %v5147_v11, %v7308_v51 }
0x235e   :  { %v5125_v37 = vpack.c.bf16 %v5123_v32, %v5122_v19 }
0x235f   :  { %v5149_v31 = vpop.permute.xlu1 %5148  ;;  %v5103_v10 = vpop.permute.xlu0 %5102 }
0x2360   :  { %6703 = vmatpush3.bf16.msra.mxu0 %v5125_v37  ;;  %v5153_v46 = vmul.f32 %v5149_v31, %v7308_v51  ;;  %v5108_v39 = vmul.f32 %v5103_v10, %v7326_v13 }
0x2362   :  { %v5155_v16 = vpack.c.bf16 %v5153_v46, %v5152_v29 }
0x2363   :  { %v5105_v1 = vpop.permute.xlu1 %5104  ;;  %v5133_v44 = vpop.permute.xlu0 %5132 }
0x2364   :  { %v5109_v43 = vmul.f32 %v5105_v1, %v7326_v13  ;;  %v5138_v19 = vmul.f32 %v5133_v44, %v7312_v56 }
0x2366   :  { %v5111_v12 = vpack.c.bf16 %v5109_v43, %v5108_v39 }
0x2367   :  { %v5135_v34 = vpop.permute.xlu1 %5134  ;;  %v5089_v60 = vpop.permute.xlu0 %5088 }
0x2368   :  { %v5139_v50 = vmul.f32 %v5135_v34, %v7312_v56 }
0x236a   :  { %v5141_v31 = vpack.c.bf16 %v5139_v50, %v5138_v19 }
0x236b   :  { %v5091_v9 = vpop.permute.xlu1 %5090  ;;  %v5075_v3 = vpop.permute.xlu0 %5074 }
0x236c   :  { %v5095_v32 = vmul.f32 %v5091_v9, %v7329_v14 }
0x236f   :  { %v5077_v7 = vpop.permute.xlu1 %5076  ;;  %v5157_v54 = vpop.permute.xlu0 %5156 }
0x2370   :  { %v5164_v21 = vmul.f32 %v5157_v54, %v7306_v49  ;;  %v5094_v54 = vmul.f32 %v5089_v60, %v7329_v14  ;;  %v5081_v46 = vmul.f32 %v5077_v7, %v7336_v26 }
0x2373   :  { %v5159_v15 = vpop.permute.xlu1 %5158  ;;  %v5113_v53 = vpop.permute.xlu0 %5112 }
0x2374   :  { %v5165_v2 = vmul.f32 %v5159_v15, %v7306_v49  ;;  %v5120_v0 = vmul.f32 %v5113_v53, %v7319_v5  ;;  %v5097_v53 = vpack.c.bf16 %v5095_v32, %v5094_v54 }
0x2376   :  { %v5168_v22 = vpack.c.bf16 %v5165_v2, %v5164_v21 }
0x2377   :  { %v5115_v35 = vpop.permute.xlu1 %5114  ;;  %v5143_v48 = vpop.permute.xlu0 %5142 }
0x2378   :  { %v5121_v55 = vmul.f32 %v5115_v35, %v7319_v5  ;;  %6704 = vmatprep.subr.bf16.mxu0 %v5168_v22  ;;  %v5150_v41 = vmul.f32 %v5143_v48, %v7308_v51 }
0x237a   :  { %v5124_v27 = vpack.c.bf16 %v5121_v55, %v5120_v0  ;;  %v5080_v0 = vmul.f32 %v5075_v3, %v7336_v26 }
0x237b   :  { %v5145_v61 = vpop.permute.xlu1 %5144  ;;  %v5099_v33 = vpop.permute.xlu0 %5098 }
0x237c   :  { %v5151_v63 = vmul.f32 %v5145_v61, %v7308_v51  ;;  %6705 = vmatpush3.bf16.msra.mxu0 %v5124_v27  ;;  %v5106_v57 = vmul.f32 %v5099_v33, %v7326_v13  ;;  %v5083_v43 = vpack.c.bf16 %v5081_v46, %v5080_v0 }
0x237d   :  { %6706 = vmatprep.subr.bf16.mxu0 %v5155_v16 }
0x237e   :  { %v5154_v8 = vpack.c.bf16 %v5151_v63, %v5150_v41 }
0x237f   :  { %v5101_v38 = vpop.permute.xlu1 %5100  ;;  %v5129_v62 = vpop.permute.xlu0 %5128 }
0x2380   :  { %v5107_v11 = vmul.f32 %v5101_v38, %v7326_v13  ;;  %6707 = vmatpush3.bf16.msra.mxu0 %v5111_v12  ;;  %v5136_v34 = vmul.f32 %v5129_v62, %v7312_v56 }
0x2381   :  { %6708 = vmatprep.subr.bf16.mxu0 %v5154_v8 }
0x2382   :  { %v5110_v37 = vpack.c.bf16 %v5107_v11, %v5106_v57 }
0x2383   :  { %v5131_v10 = vpop.permute.xlu1 %5130  ;;  %v5085_v1 = vpop.permute.xlu0 %5084 }
0x2384   :  { %v5137_v15 = vmul.f32 %v5131_v10, %v7312_v56  ;;  %6709 = vmatpush3.bf16.msra.mxu0 %v5110_v37  ;;  %v5092_v44 = vmul.f32 %v5085_v1, %v7329_v14  ;;  %v5304_v10 = vstv %s6219_s13 }
0x2385   :  { %6710 = vmatprep.subr.bf16.mxu0 %v5141_v31 }
0x2386   :  { %v5140_v21 = vpack.c.bf16 %v5137_v15, %v5136_v34  ;;  %v5305_v34 = vadd.f32 %v5304_v10, %v7254_v18 }
0x2387   :  { %v5087_v2 = vpop.permute.xlu1 %5086  ;;  %v5175_v22 = vpop.permute.xlu0 %5174 }
0x2388   :  { %v5093_v9 = vmul.f32 %v5087_v2, %v7329_v14  ;;  %6711 = vmatpush3.bf16.msra.mxu0 %v5097_v53  ;;  %v5180_v55 = vmul.f32 %v9781_v6, %v5175_v22  ;;  %7157 = vrcp.f32 %v5305_v34 }
0x2389   :  { %6712 = vmatprep.subr.bf16.mxu0 %v5140_v21 }
0x238a   :  { %v5096_v35 = vpack.c.bf16 %v5093_v9, %v5092_v44 }
0x238b   :  { %v5177_v60 = vpop.permute.xlu1 %5176  ;;  %v5071_v48 = vpop.permute.xlu0 %5070 }
0x238c   :  { %v5181_v29 = vmul.f32 %v9781_v6, %v5177_v60  ;;  %6713 = vmatpush3.bf16.msra.mxu0 %v5096_v35  ;;  %v5078_v61 = vmul.f32 %v5071_v48, %v7336_v26 }
0x238d   :  { %6714 = vmatprep.subr.bf16.mxu0 %v5127_v25 }
0x238e   :  { %v5183_v27 = vpack.c.bf16 %v5181_v29, %v5180_v55 }
0x238f   :  { %v5073_v16 = vpop.permute.xlu1 %5072  ;;  %v5171_v33 = vpop.permute.xlu0 %5170 }
0x2390   :  { %v5079_v7 = vmul.f32 %v5073_v16, %v7336_v26  ;;  %6715 = vmatpush3.bf16.msra.mxu0 %v5083_v43  ;;  %6940 = vmatpush3.bf16.msra.mxu1 %v5183_v27  ;;  %v5178_v23 = vmul.f32 %v9781_v6, %v5171_v33 }
0x2391   :  { %6716 = vmatprep.subr.bf16.mxu0 %v5126_v30  ;;  %6941 = vmatprep.subr.bf16.mxu1 %v7197_v24 }
0x2392   :  { %v5082_v3 = vpack.c.bf16 %v5079_v7, %v5078_v61 }
0x2393   :  { %v5173_v39 = vpop.permute.xlu1 %5172 }
0x2394   :  { %v5179_v25 = vmul.f32 %v9781_v6, %v5173_v39  ;;  %6717 = vmatpush3.bf16.msra.mxu0 %v5082_v3 }
0x2395   :  { %v7158_v46 = vpop.eup %7157 }
0x2396   :  { %v5182_v41 = vpack.c.bf16 %v5179_v25, %v5178_v23 }
0x2397   :  { %5235 = vmatmul.mubr.bf16.vlgmr.msra.gmra.mxu0 %v7119_v4 }
0x2398   :  { %6942 = vmatpush3.bf16.msra.mxu1 %v5182_v41 }
0x2399   :  { %5400 = vmatprep.subr.bf16.mxu1 %v7188_v36 }
0x239b   :  { %6944 = vmatmul.mubr.msk.bf16.vlgmr.msra.gmra.mxu1 %vm415_vm2, %v7122_v47 }
0x2457   :  { %v6718_v40 = vpop.f32.mrf.mxu0 }
0x2459   :  { %v6719_v30 = vpop.f32.mrf.mxu0 }
0x245a   :  { %v6720_v63 = vadd.f32 %v6719_v30, %v6718_v40 }
0x245b   :  { %v6721_v12 = vpop.f32.mrf.mxu0  ;;  %v5277_v8 = vpop.f32.mrf.mxu1 }
0x245c   :  { %v5278_v50 = vadd.f32 %v6720_v63, %v5277_v8 }
0x245d   :  { %v6722_v6 = vpop.f32.mrf.mxu0  ;;  %v6945_v38 = vpop.f32.mrf.mxu1 }
0x245e   :  { %v5284_v62 = vsub.f32 %v9836_v28, %v5278_v50  ;;  %6217 = vst [vmem:[%s10523_s7 + $0x70] sm:$0xff] %v5278_v50  ;;  %v6723_v57 = vadd.f32 %v6722_v6, %v6721_v12 }
0x245f   :  { %v5280_v11 = vpop.f32.mrf.mxu1 }
0x2460   :  { %v5286_v19 = vsub.f32 %v9809_v52, %v5284_v62  ;;  %v5281_v32 = vadd.f32 %v6723_v57, %v5280_v11 }
0x2461   :  { %v6946_v37 = vpop.f32.mrf.mxu1 }
0x2462   :  { %v5285_v31 = vsub.f32 %v9838_v45, %v5281_v32  ;;  %6218 = vst [vmem:[%s10523_s7 + $0x78] sm:$0xff] %v5281_v32  ;;  %v5292_v1 = vadd.f32 %v5286_v19, %v5278_v50 }
0x2464   :  { %v5287_v28 = vsub.f32 %v9817_v59, %v5285_v31  ;;  %v5294_v15 = vmul.f32 %v9824_v17, %v5292_v1 }
0x2466   :  { %v5293_v54 = vadd.f32 %v5287_v28, %v5281_v32 }
0x2468   :  { %v5295_v53 = vmul.f32 %v9830_v58, %v5293_v54 }
0x246a   :  { %v5296_v52 = vadd.f32 %v5295_v53, %v5294_v15 }
0x246c   :  { %v5297_v21 = vrot.slane %v5296_v52, 4 }
0x246e   :  { %v5298_v2 = vadd.f32 %v5297_v21, %v5296_v52  ;;  %v10228_v21 = vld [vmem:[%s10519_s3 + $0x8] ss:$0 sm:$0xff] }
0x2470   :  { %v5299_v45 = vrot.slane %v5298_v2, 2 }
0x2472   :  { %v5300_v22 = vadd.f32 %v5299_v45, %v5298_v2 }
0x2474   :  { %v5301_v44 = vrot.slane %v5300_v22, 1 }
0x2476   :  { %v5302_v9 = vadd.f32 %v5301_v44, %v5300_v22  ;;  %v7123_v44 = vld [vmem:[%s10520_s4 + $0x100] ss:$8 sps:$4 sm:$0xff]  }
0x2478   :  { %v5303_v35 = vsub.f32 %v7256_v20, %v5302_v9  ;;  %v7125_v20 = vld [vmem:[%s10520_s4 + $0x104] ss:$8 sps:$4 sm:$0xff]   ;;  %v7126_v9 = vld [vmem:[%s10520_s4 + $0x114] ss:$8 sps:$4 sm:$0xff]  }
0x2479   :  { %6228 = vmatprep.mubr.msk.bf16.mxu1 %vm197_vm0, %v7125_v20 }
0x247a   :  { %v5307_v60 = vmul.f32 %v7158_v46, %v5303_v35  ;;  %v7128_v46 = vld [vmem:[%s10520_s4 + $0x110] ss:$8 sps:$4 sm:$0xff]  }
0x247c   :  { %v5308_v59 = vmul.f32 %v9824_v17, %v5307_v60  ;;  %v5309_v18 = vmul.f32 %v9830_v58, %v5307_v60 }
0x247e   :  { %v5310_v48 = vadd.f32 %v5308_v59, %v5292_v1  ;;  %v5311_v0 = vadd.f32 %v5309_v18, %v5293_v54 }
0x2480   :  { %v5312_v55 = vsub.f32 %v5310_v48, %v5286_v19  ;;  %v5313_v29 = vsub.f32 %v5311_v0, %v5287_v28 }
0x2482   :  { %5364 = vrot.lane.b32.xlu1 %v5313_v29, %s7190_s14  ;;  %5362 = vrot.lane.b32.xlu0 %v5312_v55, %s7190_s14  ;;  %v5347_v43 = vpack.c.bf16 %v5313_v29, %v5312_v55 }
0x2486   :  { %5357 = vrot.lane.b32.xlu1 %v5313_v29, %s7189_s1  ;;  %5355 = vrot.lane.b32.xlu0 %v5312_v55, %s7189_s1 }
0x248a   :  { %5350 = vrot.lane.b32.xlu1 %v5313_v29, %s7191_s15  ;;  %5348 = vrot.lane.b32.xlu0 %v5312_v55, %s7191_s15 }
0x248e   :  { %5342 = vrot.lane.b32.xlu1 %v5313_v29, %s7192_s16  ;;  %5340 = vrot.lane.b32.xlu0 %v5312_v55, %s7192_s16 }
0x2492   :  { %5335 = vrot.lane.b32.xlu1 %v5313_v29, %s7193_s17  ;;  %5333 = vrot.lane.b32.xlu0 %v5312_v55, %s7193_s17 }
0x2496   :  { %5328 = vrot.lane.b32.xlu1 %v5313_v29, %s7194_s18  ;;  %5326 = vrot.lane.b32.xlu0 %v5312_v55, %s7194_s18 }
0x249a   :  { %5321 = vrot.lane.b32.xlu1 %v5313_v29, %s7195_s19  ;;  %5319 = vrot.lane.b32.xlu0 %v5312_v55, %s7195_s19 }
0x249e   :  { %5371 = vrot.lane.b32.xlu1 %v5313_v29, %s7196_s20  ;;  %5369 = vrot.lane.b32.xlu0 %v5312_v55, %s7196_s20 }
0x24f4   :  { %v5365_v17 = vpop.permute.xlu1 %5364  ;;  %v5363_v58 = vpop.permute.xlu0 %5362 }
0x24f5   :  { %v5367_v27 = vmul.f32 %v5365_v17, %v7306_v49  ;;  %v5366_v16 = vmul.f32 %v5363_v58, %v7306_v49 }
0x24f7   :  { %v5368_v61 = vpack.c.bf16 %v5367_v27, %v5366_v16  ;;  %v7131_v16 = vld [vmem:[%s10521_s5 + $0x184] ss:$12 sps:$4 sm:$0xff]  }
0x24f8   :  { %v5358_v7 = vpop.permute.xlu1 %5357  ;;  %v5356_v33 = vpop.permute.xlu0 %5355  ;;  %5644 = vmatprep.mubr.bf16.mxu0 %v7131_v16 }
0x24f9   :  { %v5360_v3 = vmul.f32 %v5358_v7, %v7308_v51  ;;  %v5359_v39 = vmul.f32 %v5356_v33, %v7308_v51  ;;  %5401 = vmatpush1.bf16.msra.mxu1 %v5368_v61 }
0x24fa   :  { %5402 = vmatprep.subr.bf16.mxu1 %v7188_v36 }
0x24fb   :  { %v5361_v4 = vpack.c.bf16 %v5360_v3, %v5359_v39 }
0x24fc   :  { %v5351_v23 = vpop.permute.xlu1 %5350  ;;  %v5349_v25 = vpop.permute.xlu0 %5348 }
0x24fd   :  { %v5353_v41 = vmul.f32 %v5351_v23, %v7312_v56  ;;  %v5352_v47 = vmul.f32 %v5349_v25, %v7312_v56  ;;  %5403 = vmatpush1.bf16.msra.mxu1 %v5361_v4 }
0x24fe   :  { %5404 = vmatprep.subr.bf16.mxu1 %v7188_v36 }
0x24ff   :  { %v5354_v40 = vpack.c.bf16 %v5353_v41, %v5352_v47 }
0x2500   :  { %v5343_v30 = vpop.permute.xlu1 %5342  ;;  %v5341_v63 = vpop.permute.xlu0 %5340 }
0x2501   :  { %5405 = vmatpush1.bf16.msra.mxu1 %v5354_v40  ;;  %v5345_v12 = vmul.f32 %v5343_v30, %v7319_v5  ;;  %v5344_v8 = vmul.f32 %v5341_v63, %v7319_v5 }
0x2502   :  { %5406 = vmatprep.subr.bf16.mxu1 %v7188_v36 }
0x2503   :  { %v5346_v38 = vpack.c.bf16 %v5345_v12, %v5344_v8 }
0x2504   :  { %v5336_v50 = vpop.permute.xlu1 %5335  ;;  %v5334_v6 = vpop.permute.xlu0 %5333 }
0x2505   :  { %5407 = vmatpush1.bf16.msra.mxu1 %v5347_v43  ;;  %v5338_v62 = vmul.f32 %v5336_v50, %v7326_v13  ;;  %v5337_v57 = vmul.f32 %v5334_v6, %v7326_v13 }
0x2506   :  { %5408 = vmatprep.subr.bf16.mxu1 %v7188_v36 }
0x2507   :  { %v5339_v32 = vpack.c.bf16 %v5338_v62, %v5337_v57 }
0x2508   :  { %v5329_v11 = vpop.permute.xlu1 %5328  ;;  %v5327_v19 = vpop.permute.xlu0 %5326 }
0x2509   :  { %5409 = vmatpush1.bf16.msra.mxu1 %v5346_v38  ;;  %v5331_v37 = vmul.f32 %v5329_v11, %v7329_v14  ;;  %v5330_v31 = vmul.f32 %v5327_v19, %v7329_v14 }
0x250a   :  { %5410 = vmatprep.subr.bf16.mxu1 %v7188_v36 }
0x250b   :  { %v5332_v28 = vpack.c.bf16 %v5331_v37, %v5330_v31 }
0x250c   :  { %v5322_v10 = vpop.permute.xlu1 %5321  ;;  %v5320_v1 = vpop.permute.xlu0 %5319 }
0x250d   :  { %5411 = vmatpush1.bf16.msra.mxu1 %v5339_v32  ;;  %v5324_v54 = vmul.f32 %v5322_v10, %v7336_v26  ;;  %v5323_v34 = vmul.f32 %v5320_v1, %v7336_v26 }
0x250e   :  { %5412 = vmatprep.subr.bf16.mxu1 %v7188_v36 }
0x250f   :  { %v5325_v15 = vpack.c.bf16 %v5324_v54, %v5323_v34 }
0x2510   :  { %v5372_v53 = vpop.permute.xlu1 %5371  ;;  %v5370_v52 = vpop.permute.xlu0 %5369 }
0x2511   :  { %5413 = vmatpush1.bf16.msra.mxu1 %v5332_v28  ;;  %v5374_v2 = vmul.f32 %v10228_v21, %v5372_v53  ;;  %v5373_v45 = vmul.f32 %v10228_v21, %v5370_v52 }
0x2512   :  { %5414 = vmatprep.subr.bf16.mxu1 %v7188_v36 }
0x2513   :  { %v5375_v22 = vpack.c.bf16 %v5374_v2, %v5373_v45 }
0x2515   :  { %5415 = vmatpush1.bf16.msra.mxu1 %v5325_v15 }
0x2516   :  { %5428 = vmatprep.subr.bf16.mxu1 %v7188_v36 }
0x2519   :  { %5429 = vmatpush2.bf16.msra.mxu1 %v7351_v42 }
0x251a   :  { %5430 = vmatprep.subr.bf16.mxu1 %v7188_v36 }
0x251d   :  { %5431 = vmatpush2.bf16.msra.mxu1 %v5375_v22 }
0x2520   :  { %5433 = vmatmul.mubr.bf16.vlgmr.msra.gmra.mxu1 %v7123_v44 }
0x2521   :  { %6229 = vmatprep.mubr.msk.bf16.mxu1 %vm197_vm0, %v7126_v9 }
0x2528   :  { %5441 = vmatmul.mubr.bf16.gmra.mxu1 %v7128_v46 }
0x25e0   :  { %v5434_v35 = vpop.f32.mrf.mxu1 }
0x25e1   :  { %v10244_v36 = vmax.f32 %v5434_v35, 0.0 }
0x25e2   :  { %v5436_v60 = vpop.f32.mrf.mxu1 }
0x25e3   :  { %5548 = vrot.lane.b32.xlu0 %v10244_v36, %s7190_s14 }
0x25e4   :  { %v5437_v59 = vpop.f32.mrf.mxu1 }
0x25e5   :  { %v10248_v18 = vmax.f32 %v5437_v59, 0.0 }
0x25e6   :  { %v5439_v48 = vpop.f32.mrf.mxu1 }
0x25e7   :  { %5504 = vrot.lane.b32.xlu0 %v10244_v36, %s7192_s16  ;;  %5550 = vrot.lane.b32.xlu1 %v10248_v18, %s7190_s14  ;;  %v5518_v0 = vpack.c.bf16 %v10248_v18, %v10244_v36 }
0x25e8   :  { %v5442_v55 = vpop.f32.mrf.mxu1 }
0x25e9   :  { %v10260_v43 = vmax.f32 %v5442_v55, 0.0 }
0x25ea   :  { %v5444_v29 = vpop.f32.mrf.mxu1 }
0x25eb   :  { %5534 = vrot.lane.b32.xlu0 %v10244_v36, %s7189_s1  ;;  %5506 = vrot.lane.b32.xlu1 %v10248_v18, %s7192_s16 }
0x25ec   :  { %v5445_v20 = vpop.f32.mrf.mxu1 }
0x25ed   :  { %v10262_v17 = vmax.f32 %v5445_v20, 0.0 }
0x25ee   :  { %v5447_v58 = vpop.f32.mrf.mxu1 }
0x25ef   :  { %5490 = vrot.lane.b32.xlu0 %v10244_v36, %s7193_s17  ;;  %5536 = vrot.lane.b32.xlu1 %v10248_v18, %s7189_s1  ;;  %v5519_v27 = vpack.c.bf16 %v10262_v17, %v10260_v43 }
0x25f3   :  { %5520 = vrot.lane.b32.xlu0 %v10244_v36, %s7191_s15  ;;  %5492 = vrot.lane.b32.xlu1 %v10248_v18, %s7193_s17 }
0x25f7   :  { %5522 = vrot.lane.b32.xlu1 %v10248_v18, %s7191_s15  ;;  %5552 = vrot.lane.b32.xlu0 %v10260_v43, %s7190_s14 }
0x25fb   :  { %5508 = vrot.lane.b32.xlu0 %v10260_v43, %s7192_s16  ;;  %5554 = vrot.lane.b32.xlu1 %v10262_v17, %s7190_s14 }
0x25ff   :  { %5538 = vrot.lane.b32.xlu0 %v10260_v43, %s7189_s1  ;;  %5510 = vrot.lane.b32.xlu1 %v10262_v17, %s7192_s16 }
0x2603   :  { %5494 = vrot.lane.b32.xlu0 %v10260_v43, %s7193_s17  ;;  %5540 = vrot.lane.b32.xlu1 %v10262_v17, %s7189_s1 }
0x2607   :  { %5524 = vrot.lane.b32.xlu0 %v10260_v43, %s7191_s15  ;;  %5496 = vrot.lane.b32.xlu1 %v10262_v17, %s7193_s17 }
0x260b   :  { %5480 = vrot.lane.b32.xlu0 %v10260_v43, %s7194_s18  ;;  %5526 = vrot.lane.b32.xlu1 %v10262_v17, %s7191_s15 }
0x260f   :  { %5476 = vrot.lane.b32.xlu0 %v10244_v36, %s7194_s18  ;;  %5482 = vrot.lane.b32.xlu1 %v10262_v17, %s7194_s18 }
0x2613   :  { %5466 = vrot.lane.b32.xlu0 %v10260_v43, %s7195_s19  ;;  %5478 = vrot.lane.b32.xlu1 %v10248_v18, %s7194_s18 }
0x2617   :  { %5462 = vrot.lane.b32.xlu0 %v10244_v36, %s7195_s19  ;;  %5468 = vrot.lane.b32.xlu1 %v10262_v17, %s7195_s19 }
0x261b   :  { %5566 = vrot.lane.b32.xlu0 %v10260_v43, %s7196_s20  ;;  %5464 = vrot.lane.b32.xlu1 %v10248_v18, %s7195_s19 }
0x261f   :  { %5562 = vrot.lane.b32.xlu0 %v10244_v36, %s7196_s20  ;;  %5568 = vrot.lane.b32.xlu1 %v10262_v17, %s7196_s20 }
0x2623   :  { %5564 = vrot.lane.b32.xlu1 %v10248_v18, %s7196_s20 }
0x2655   :  { %v5549_v61 = vpop.permute.xlu0 %5548 }
0x2656   :  { %v5556_v19 = vmul.f32 %v5549_v61, %v7306_v49 }
0x2659   :  { %v5505_v7 = vpop.permute.xlu0 %5504  ;;  %v5551_v33 = vpop.permute.xlu1 %5550 }
0x265a   :  { %v5557_v6 = vmul.f32 %v5551_v33, %v7306_v49  ;;  %v5512_v28 = vmul.f32 %v5505_v7, %v7319_v5 }
0x265c   :  { %v5560_v31 = vpack.c.bf16 %v5557_v6, %v5556_v19 }
0x265d   :  { %v5535_v3 = vpop.permute.xlu0 %5534  ;;  %v5507_v39 = vpop.permute.xlu1 %5506 }
0x265e   :  { %v5513_v32 = vmul.f32 %v5507_v39, %v7319_v5  ;;  %v5542_v9 = vmul.f32 %v5535_v3, %v7308_v51 }
0x2660   :  { %v5516_v15 = vpack.c.bf16 %v5513_v32, %v5512_v28 }
0x2661   :  { %v5491_v4 = vpop.permute.xlu0 %5490  ;;  %v5537_v23 = vpop.permute.xlu1 %5536 }
0x2662   :  { %v5543_v52 = vmul.f32 %v5537_v23, %v7308_v51  ;;  %v5498_v55 = vmul.f32 %v5491_v4, %v7326_v13 }
0x2664   :  { %v5546_v60 = vpack.c.bf16 %v5543_v52, %v5542_v9 }
0x2665   :  { %v5521_v25 = vpop.permute.xlu0 %5520  ;;  %v5493_v41 = vpop.permute.xlu1 %5492 }
0x2666   :  { %v5499_v46 = vmul.f32 %v5493_v41, %v7326_v13  ;;  %v5528_v23 = vmul.f32 %v5521_v25, %v7312_v56 }
0x2668   :  { %v5502_v58 = vpack.c.bf16 %v5499_v46, %v5498_v55 }
0x2669   :  { %v5523_v47 = vpop.permute.xlu1 %5522  ;;  %v5553_v40 = vpop.permute.xlu0 %5552 }
0x266a   :  { %v5558_v12 = vmul.f32 %v5553_v40, %v7306_v49  ;;  %v5529_v61 = vmul.f32 %v5523_v47, %v7312_v56 }
0x266c   :  { %v5532_v41 = vpack.c.bf16 %v5529_v61, %v5528_v23 }
0x266d   :  { %v5509_v30 = vpop.permute.xlu0 %5508  ;;  %v5555_v63 = vpop.permute.xlu1 %5554 }
0x266e   :  { %v5559_v8 = vmul.f32 %v5555_v63, %v7306_v49  ;;  %v5514_v57 = vmul.f32 %v5509_v30, %v7319_v5 }
0x2670   :  { %v5561_v50 = vpack.c.bf16 %v5559_v8, %v5558_v12 }
0x2671   :  { %v5539_v38 = vpop.permute.xlu0 %5538  ;;  %v5511_v62 = vpop.permute.xlu1 %5510 }
0x2672   :  { %v5515_v11 = vmul.f32 %v5511_v62, %v7319_v5  ;;  %6728 = vmatprep.subr.bf16.mxu0 %v5561_v50  ;;  %v5544_v54 = vmul.f32 %v5539_v38, %v7308_v51 }
0x2674   :  { %v5517_v37 = vpack.c.bf16 %v5515_v11, %v5514_v57 }
0x2675   :  { %v5495_v10 = vpop.permute.xlu0 %5494  ;;  %v5541_v1 = vpop.permute.xlu1 %5540 }
0x2676   :  { %v5545_v34 = vmul.f32 %v5541_v1, %v7308_v51  ;;  %6729 = vmatpush3.bf16.msra.mxu0 %v5517_v37  ;;  %v5500_v22 = vmul.f32 %v5495_v10, %v7326_v13 }
0x2677   :  { %6730 = vmatprep.subr.bf16.mxu0 %v5560_v31  ;;  %v7129_v31 = vld [vmem:[%s10521_s5 + $0x180] ss:$12 sps:$4 sm:$0xff]  }
0x2678   :  { %v5547_v53 = vpack.c.bf16 %v5545_v34, %v5544_v54  ;;  %v7132_v54 = vld [vmem:[%s10521_s5 + $0x198] ss:$12 sps:$4 sm:$0xff]   ;;  %v7135_v34 = vld [vmem:[%s10521_s5 + $0x188] ss:$12 sps:$4 sm:$0xff]  }
0x2679   :  { %v5525_v2 = vpop.permute.xlu0 %5524  ;;  %v5497_v45 = vpop.permute.xlu1 %5496 }
0x267a   :  { %v5501_v44 = vmul.f32 %v5497_v45, %v7326_v13  ;;  %6731 = vmatpush3.bf16.msra.mxu0 %v5516_v15  ;;  %v5530_v29 = vmul.f32 %v5525_v2, %v7312_v56  ;;  %v7136_v15 = vld [vmem:[%s10521_s5 + $0x1a0] ss:$12 sps:$4 sm:$0xff]  }
0x267b   :  { %6732 = vmatprep.subr.bf16.mxu0 %v5547_v53 }
0x267c   :  { %v5503_v35 = vpack.c.bf16 %v5501_v44, %v5500_v22 }
0x267d   :  { %v5481_v59 = vpop.permute.xlu0 %5480  ;;  %v5527_v48 = vpop.permute.xlu1 %5526 }
0x267e   :  { %v5531_v20 = vmul.f32 %v5527_v48, %v7312_v56  ;;  %6733 = vmatpush3.bf16.msra.mxu0 %v5503_v35  ;;  %v5486_v3 = vmul.f32 %v5481_v59, %v7329_v14 }
0x267f   :  { %6734 = vmatprep.subr.bf16.mxu0 %v5546_v60 }
0x2680   :  { %v5533_v16 = vpack.c.bf16 %v5531_v20, %v5530_v29 }
0x2681   :  { %v5477_v7 = vpop.permute.xlu0 %5476  ;;  %v5483_v33 = vpop.permute.xlu1 %5482 }
0x2682   :  { %v5487_v39 = vmul.f32 %v5483_v33, %v7329_v14  ;;  %6735 = vmatpush3.bf16.msra.mxu0 %v5502_v58  ;;  %v5484_v63 = vmul.f32 %v5477_v7, %v7329_v14 }
0x2683   :  { %6736 = vmatprep.subr.bf16.mxu0 %v5533_v16 }
0x2684   :  { %v5489_v4 = vpack.c.bf16 %v5487_v39, %v5486_v3 }
0x2685   :  { %v5467_v40 = vpop.permute.xlu0 %5466  ;;  %v5479_v30 = vpop.permute.xlu1 %5478 }
0x2686   :  { %v5485_v12 = vmul.f32 %v5479_v30, %v7329_v14  ;;  %6737 = vmatpush3.bf16.msra.mxu0 %v5489_v4  ;;  %v5472_v6 = vmul.f32 %v5467_v40, %v7336_v26  ;;  %v7139_v40 = vld [vmem:[%s10522_s6 + $0xc4] ss:$12 sps:$4 sm:$0xff]  }
0x2687   :  { %6738 = vmatprep.subr.bf16.mxu0 %v5532_v41  ;;  %5883 = vmatprep.mubr.bf16.mxu1 %v7139_v40 }
0x2688   :  { %v5488_v47 = vpack.c.bf16 %v5485_v12, %v5484_v63 }
0x2689   :  { %v5463_v8 = vpop.permute.xlu0 %5462  ;;  %v5469_v50 = vpop.permute.xlu1 %5468 }
0x268a   :  { %v5473_v38 = vmul.f32 %v5469_v50, %v7336_v26  ;;  %6739 = vmatpush3.bf16.msra.mxu0 %v5488_v47  ;;  %v5470_v11 = vmul.f32 %v5463_v8, %v7336_v26 }
0x268b   :  { %6740 = vmatprep.subr.bf16.mxu0 %v5519_v27  ;;  %v7134_v27 = vld [vmem:[%s10521_s5 + $0x19c] ss:$12 sps:$4 sm:$0xff]  }
0x268c   :  { %v5475_v25 = vpack.c.bf16 %v5473_v38, %v5472_v6 }
0x268d   :  { %v5567_v62 = vpop.permute.xlu0 %5566  ;;  %v5465_v57 = vpop.permute.xlu1 %5464 }
0x268e   :  { %v5471_v19 = vmul.f32 %v5465_v57, %v7336_v26  ;;  %6741 = vmatpush3.bf16.msra.mxu0 %v5475_v25  ;;  %v5572_v43 = vmul.f32 %v10228_v21, %v5567_v62 }
0x268f   :  { %6742 = vmatprep.subr.bf16.mxu0 %v5518_v0 }
0x2690   :  { %v5474_v32 = vpack.c.bf16 %v5471_v19, %v5470_v11 }
0x2691   :  { %v5569_v37 = vpop.permute.xlu1 %5568  ;;  %v5563_v10 = vpop.permute.xlu0 %5562 }
0x2692   :  { %v5573_v17 = vmul.f32 %v10228_v21, %v5569_v37  ;;  %6743 = vmatpush3.bf16.msra.mxu0 %v5474_v32  ;;  %v5570_v0 = vmul.f32 %v10228_v21, %v5563_v10 }
0x2693   :  { %6947 = vmatprep.subr.bf16.mxu0 %v7351_v42 }
0x2694   :  { %v5575_v36 = vpack.c.bf16 %v5573_v17, %v5572_v43 }
0x2695   :  { %v5565_v18 = vpop.permute.xlu1 %5564  ;;  %5645 = vmatmul.mubr.bf16.vlgmr.msra.gmra.mxu0 %v7129_v31 }
0x2696   :  { %v5571_v1 = vmul.f32 %v10228_v21, %v5565_v18  ;;  %6948 = vmatpush3.bf16.msra.mxu0 %v7351_v42  ;;  %5652 = vmatprep.mubr.bf16.mxu0 %v7134_v27 }
0x2697   :  { %6949 = vmatprep.subr.bf16.mxu0 %v5575_v36 }
0x2698   :  { %v5574_v28 = vpack.c.bf16 %v5571_v1, %v5570_v0 }
0x269a   :  { %6950 = vmatpush3.bf16.msra.mxu0 %v5575_v36 }
0x269b   :  { %6951 = vmatprep.subr.bf16.mxu0 %v5574_v28 }
0x269d   :  { %5653 = vmatmul.mubr.bf16.gmra.mxu0 %v7132_v54 }
0x269e   :  { %6952 = vmatpush3.bf16.msra.mxu0 %v5574_v28  ;;  %6953 = vmatprep.mubr.msk.bf16.mxu0 %vm415_vm2, %v7135_v34 }
0x269f   :  { %6957 = vmatprep.subr.bf16.mxu0 %v7197_v24 }
0x26a5   :  { %6954 = vmatmul.mubr.msk.bf16.vlgmr.msra.gmra.mxu0 %vm415_vm2, %v7136_v15 }
0x26a6   :  { %6958 = vmatpush3.bf16.msra.mxu0 %v7351_v42  ;;  %6963 = vmatprep.mubr.msk.bf16.mxu0 %vm7198_vm3, %v7197_v24 }
0x26a7   :  { %6959 = vmatprep.subr.bf16.mxu0 %v7197_v24 }
0x2755   :  { %v6744_v53 = vpop.f32.mrf.mxu0 }
0x2757   :  { %v6745_v52 = vpop.f32.mrf.mxu0 }
0x2758   :  { %v6746_v55 = vadd.f32 %v6745_v52, %v6744_v53 }
0x2759   :  { %v6747_v2 = vpop.f32.mrf.mxu0 }
0x275b   :  { %v6748_v45 = vpop.f32.mrf.mxu0 }
0x275c   :  { %v6749_v58 = vadd.f32 %v6748_v45, %v6747_v2 }
0x275d   :  { %v6750_v22 = vpop.f32.mrf.mxu0 }
0x275f   :  { %v6751_v44 = vpop.f32.mrf.mxu0 }
0x2760   :  { %v6752_v35 = vadd.f32 %v6751_v44, %v6750_v22 }
0x2761   :  { %v6753_v9 = vpop.f32.mrf.mxu0 }
0x2763   :  { %v6754_v46 = vpop.f32.mrf.mxu0 }
0x2764   :  { %v6755_v29 = vadd.f32 %v6754_v46, %v6753_v9 }
0x2765   :  { %v6955_v60 = vpop.f32.mrf.mxu0 }
0x2766   :  { %v5704_v59 = vadd.f32 %v6955_v60, %v6752_v35 }
0x2767   :  { %v5695_v48 = vpop.f32.mrf.mxu0 }
0x2768   :  { %v10385_v42 = vmax.f32 %v5704_v59, 0.0  ;;  %v5696_v16 = vadd.f32 %v6746_v55, %v5695_v48 }
0x2769   :  { %v6956_v20 = vpop.f32.mrf.mxu0 }
0x276a   :  { %v5707_v61 = vadd.f32 %v6956_v20, %v6755_v29  ;;  %5809 = vrot.lane.b32.xlu0 %v10385_v42, %s7190_s14  ;;  %v10391_v39 = vmax.f32 %v5696_v16, 0.0 }
0x276b   :  { %v5698_v7 = vpop.f32.mrf.mxu0 }
0x276c   :  { %v10389_v33 = vmax.f32 %v5707_v61, 0.0  ;;  %v5699_v3 = vadd.f32 %v6749_v58, %v5698_v7 }
0x276e   :  { %v10393_v23 = vmax.f32 %v5699_v3, 0.0  ;;  %5811 = vrot.lane.b32.xlu1 %v10389_v33, %s7190_s14  ;;  %5765 = vrot.lane.b32.xlu0 %v10385_v42, %s7192_s16  ;;  %v5776_v4 = vpack.c.bf16 %v10389_v33, %v10385_v42 }
0x2770   :  { %v5775_v41 = vpack.c.bf16 %v10393_v23, %v10391_v39 }
0x2772   :  { %5767 = vrot.lane.b32.xlu1 %v10389_v33, %s7192_s16  ;;  %5795 = vrot.lane.b32.xlu0 %v10385_v42, %s7189_s1 }
0x2776   :  { %5797 = vrot.lane.b32.xlu1 %v10389_v33, %s7189_s1  ;;  %5751 = vrot.lane.b32.xlu0 %v10385_v42, %s7193_s17 }
0x277a   :  { %5753 = vrot.lane.b32.xlu1 %v10389_v33, %s7193_s17  ;;  %5781 = vrot.lane.b32.xlu0 %v10385_v42, %s7191_s15 }
0x277e   :  { %5783 = vrot.lane.b32.xlu1 %v10389_v33, %s7191_s15  ;;  %5737 = vrot.lane.b32.xlu0 %v10385_v42, %s7194_s18 }
0x2782   :  { %5739 = vrot.lane.b32.xlu1 %v10389_v33, %s7194_s18  ;;  %5723 = vrot.lane.b32.xlu0 %v10385_v42, %s7195_s19 }
0x2786   :  { %5725 = vrot.lane.b32.xlu1 %v10389_v33, %s7195_s19  ;;  %5805 = vrot.lane.b32.xlu0 %v10391_v39, %s7190_s14 }
0x278a   :  { %5807 = vrot.lane.b32.xlu1 %v10393_v23, %s7190_s14  ;;  %5761 = vrot.lane.b32.xlu0 %v10391_v39, %s7192_s16 }
0x278e   :  { %5763 = vrot.lane.b32.xlu1 %v10393_v23, %s7192_s16  ;;  %5791 = vrot.lane.b32.xlu0 %v10391_v39, %s7189_s1 }
0x2792   :  { %5793 = vrot.lane.b32.xlu1 %v10393_v23, %s7189_s1  ;;  %5747 = vrot.lane.b32.xlu0 %v10391_v39, %s7193_s17 }
0x2796   :  { %5749 = vrot.lane.b32.xlu1 %v10393_v23, %s7193_s17  ;;  %5777 = vrot.lane.b32.xlu0 %v10391_v39, %s7191_s15 }
0x279a   :  { %5779 = vrot.lane.b32.xlu1 %v10393_v23, %s7191_s15  ;;  %5733 = vrot.lane.b32.xlu0 %v10391_v39, %s7194_s18 }
0x279e   :  { %5735 = vrot.lane.b32.xlu1 %v10393_v23, %s7194_s18  ;;  %5823 = vrot.lane.b32.xlu0 %v10385_v42, %s7196_s20  ;;  %v7137_v42 = vld [vmem:[%s10522_s6 + $0xc0] ss:$12 sps:$4 sm:$0xff]  }
0x27a2   :  { %5825 = vrot.lane.b32.xlu1 %v10389_v33, %s7196_s20  ;;  %5719 = vrot.lane.b32.xlu0 %v10391_v39, %s7195_s19 }
0x27a6   :  { %5721 = vrot.lane.b32.xlu1 %v10393_v23, %s7195_s19  ;;  %5819 = vrot.lane.b32.xlu0 %v10391_v39, %s7196_s20  ;;  %v7140_v39 = vld [vmem:[%s10522_s6 + $0xc8] ss:$12 sps:$4 sm:$0xff]  }
0x27aa   :  { %5821 = vrot.lane.b32.xlu1 %v10393_v23, %s7196_s20 }
0x27dc   :  { %v5810_v30 = vpop.permute.xlu0 %5809 }
0x27dd   :  { %v5815_v47 = vmul.f32 %v5810_v30, %v7306_v49 }
0x27e0   :  { %v5812_v63 = vpop.permute.xlu1 %5811  ;;  %v5766_v12 = vpop.permute.xlu0 %5765 }
0x27e1   :  { %v5816_v8 = vmul.f32 %v5812_v63, %v7306_v49  ;;  %v5771_v25 = vmul.f32 %v5766_v12, %v7319_v5 }
0x27e3   :  { %v5818_v50 = vpack.c.bf16 %v5816_v8, %v5815_v47 }
0x27e4   :  { %v5768_v6 = vpop.permute.xlu1 %5767  ;;  %v5796_v38 = vpop.permute.xlu0 %5795 }
0x27e5   :  { %v5772_v62 = vmul.f32 %v5768_v6, %v7319_v5  ;;  %6761 = vmatprep.subr.bf16.mxu1 %v5818_v50  ;;  %v5801_v45 = vmul.f32 %v5796_v38, %v7308_v51 }
0x27e7   :  { %v5774_v57 = vpack.c.bf16 %v5772_v62, %v5771_v25 }
0x27e8   :  { %v5798_v11 = vpop.permute.xlu1 %5797  ;;  %v5752_v19 = vpop.permute.xlu0 %5751 }
0x27e9   :  { %6762 = vmatpush3.bf16.msra.mxu1 %v5774_v57  ;;  %v5802_v34 = vmul.f32 %v5798_v11, %v7308_v51 }
0x27eb   :  { %v5804_v9 = vpack.c.bf16 %v5802_v34, %v5801_v45 }
0x27ec   :  { %v5754_v32 = vpop.permute.xlu1 %5753  ;;  %v5782_v37 = vpop.permute.xlu0 %5781 }
0x27ed   :  { %v5758_v22 = vmul.f32 %v5754_v32, %v7326_v13  ;;  %v5787_v61 = vmul.f32 %v5782_v37, %v7312_v56 }
0x27f0   :  { %v5784_v31 = vpop.permute.xlu1 %5783  ;;  %v5738_v43 = vpop.permute.xlu0 %5737 }
0x27f1   :  { %v5743_v63 = vmul.f32 %v5738_v43, %v7329_v14 }
0x27f4   :  { %v5740_v17 = vpop.permute.xlu1 %5739  ;;  %v5724_v27 = vpop.permute.xlu0 %5723 }
0x27f5   :  { %v5744_v7 = vmul.f32 %v5740_v17, %v7329_v14  ;;  %v5729_v32 = vmul.f32 %v5724_v27, %v7336_v26 }
0x27f7   :  { %v5746_v8 = vpack.c.bf16 %v5744_v7, %v5743_v63 }
0x27f8   :  { %v5726_v10 = vpop.permute.xlu1 %5725  ;;  %v5806_v36 = vpop.permute.xlu0 %5805 }
0x27f9   :  { %v5813_v1 = vmul.f32 %v5806_v36, %v7306_v49  ;;  %v5730_v62 = vmul.f32 %v5726_v10, %v7336_v26 }
0x27fc   :  { %v5808_v18 = vpop.permute.xlu1 %5807  ;;  %v5762_v0 = vpop.permute.xlu0 %5761 }
0x27fd   :  { %v5814_v28 = vmul.f32 %v5808_v18, %v7306_v49  ;;  %v5769_v52 = vmul.f32 %v5762_v0, %v7319_v5  ;;  %v5757_v49 = vmul.f32 %v5752_v19, %v7326_v13 }
0x27ff   :  { %v5817_v54 = vpack.c.bf16 %v5814_v28, %v5813_v1  ;;  %v5760_v48 = vpack.c.bf16 %v5758_v22, %v5757_v49 }
0x2800   :  { %v5764_v15 = vpop.permute.xlu1 %5763  ;;  %v5792_v53 = vpop.permute.xlu0 %5791 }
0x2801   :  { %v5770_v2 = vmul.f32 %v5764_v15, %v7319_v5  ;;  %6763 = vmatprep.subr.bf16.mxu1 %v5817_v54  ;;  %v5799_v60 = vmul.f32 %v5792_v53, %v7308_v51  ;;  %v5788_v5 = vmul.f32 %v5784_v31, %v7312_v56  ;;  %v5732_v31 = vpack.c.bf16 %v5730_v62, %v5729_v32 }
0x2803   :  { %v5773_v44 = vpack.c.bf16 %v5770_v2, %v5769_v52 }
0x2804   :  { %v5794_v46 = vpop.permute.xlu1 %5793  ;;  %v5748_v35 = vpop.permute.xlu0 %5747 }
0x2805   :  { %v5800_v59 = vmul.f32 %v5794_v46, %v7308_v51  ;;  %6764 = vmatpush3.bf16.msra.mxu1 %v5773_v44  ;;  %v5755_v58 = vmul.f32 %v5748_v35, %v7326_v13  ;;  %v5790_v51 = vpack.c.bf16 %v5788_v5, %v5787_v61 }
0x2806   :  { %6765 = vmatprep.subr.bf16.mxu1 %v5804_v9 }
0x2807   :  { %v5803_v55 = vpack.c.bf16 %v5800_v59, %v5799_v60 }
0x2808   :  { %v5750_v29 = vpop.permute.xlu1 %5749  ;;  %v5778_v20 = vpop.permute.xlu0 %5777 }
0x2809   :  { %v5756_v16 = vmul.f32 %v5750_v29, %v7326_v13  ;;  %6766 = vmatpush3.bf16.msra.mxu1 %v5760_v48  ;;  %v5785_v12 = vmul.f32 %v5778_v20, %v7312_v56 }
0x280a   :  { %6767 = vmatprep.subr.bf16.mxu1 %v5803_v55 }
0x280b   :  { %v5759_v3 = vpack.c.bf16 %v5756_v16, %v5755_v58 }
0x280c   :  { %v5780_v40 = vpop.permute.xlu1 %5779  ;;  %v5734_v30 = vpop.permute.xlu0 %5733 }
0x280d   :  { %v5786_v47 = vmul.f32 %v5780_v40, %v7312_v56  ;;  %6768 = vmatpush3.bf16.msra.mxu1 %v5759_v3  ;;  %v5741_v38 = vmul.f32 %v5734_v30, %v7329_v14 }
0x280e   :  { %6769 = vmatprep.subr.bf16.mxu1 %v5790_v51 }
0x280f   :  { %v5789_v13 = vpack.c.bf16 %v5786_v47, %v5785_v12 }
0x2810   :  { %v5736_v50 = vpop.permute.xlu1 %5735  ;;  %v5824_v6 = vpop.permute.xlu0 %5823 }
0x2811   :  { %v5742_v25 = vmul.f32 %v5736_v50, %v7329_v14  ;;  %6770 = vmatpush3.bf16.msra.mxu1 %v5746_v8  ;;  %v5829_v56 = vmul.f32 %v10228_v21, %v5824_v6 }
0x2812   :  { %6771 = vmatprep.subr.bf16.mxu1 %v5789_v13 }
0x2813   :  { %v5745_v57 = vpack.c.bf16 %v5742_v25, %v5741_v38 }
0x2814   :  { %v5826_v11 = vpop.permute.xlu1 %5825  ;;  %v5720_v19 = vpop.permute.xlu0 %5719 }
0x2815   :  { %v5830_v37 = vmul.f32 %v10228_v21, %v5826_v11  ;;  %6772 = vmatpush3.bf16.msra.mxu1 %v5745_v57  ;;  %v5727_v17 = vmul.f32 %v5720_v19, %v7336_v26 }
0x2816   :  { %6773 = vmatprep.subr.bf16.mxu1 %v5776_v4 }
0x2817   :  { %v5832_v14 = vpack.c.bf16 %v5830_v37, %v5829_v56 }
0x2818   :  { %v5722_v43 = vpop.permute.xlu1 %5721  ;;  %v5820_v36 = vpop.permute.xlu0 %5819 }
0x2819   :  { %v5728_v10 = vmul.f32 %v5722_v43, %v7336_v26  ;;  %6774 = vmatpush3.bf16.msra.mxu1 %v5732_v31  ;;  %6960 = vmatpush3.bf16.msra.mxu0 %v5832_v14  ;;  %v5827_v33 = vmul.f32 %v10228_v21, %v5820_v36 }
0x281a   :  { %6775 = vmatprep.subr.bf16.mxu1 %v5775_v41  ;;  %6961 = vmatprep.subr.bf16.mxu0 %v7197_v24 }
0x281b   :  { %v5731_v27 = vpack.c.bf16 %v5728_v10, %v5727_v17 }
0x281c   :  { %v5822_v18 = vpop.permute.xlu1 %5821 }
0x281d   :  { %v5828_v4 = vmul.f32 %v10228_v21, %v5822_v18  ;;  %6776 = vmatpush3.bf16.msra.mxu1 %v5731_v27 }
0x281f   :  { %v5831_v26 = vpack.c.bf16 %v5828_v4, %v5827_v33 }
0x2820   :  { %5884 = vmatmul.mubr.bf16.vlgmr.msra.gmra.mxu1 %v7137_v42 }
0x2821   :  { %6962 = vmatpush3.bf16.msra.mxu0 %v5831_v26 }
0x2824   :  { %6964 = vmatmul.mubr.msk.bf16.vlgmr.msra.gmra.mxu0 %vm415_vm2, %v7140_v39 }
0x28e0   :  { %v6777_v24 = vpop.f32.mrf.mxu1 }
0x28e2   :  { %v6778_v23 = vpop.f32.mrf.mxu1 }
0x28e3   :  { %v6779_v41 = vadd.f32 %v6778_v23, %v6777_v24 }
0x28e4   :  { %v6780_v0 = vpop.f32.mrf.mxu1  ;;  %v5926_v1 = vpop.f32.mrf.mxu0 }
0x28e5   :  { %v5927_v28 = vadd.f32 %v6779_v41, %v5926_v1 }
0x28e6   :  { %v6781_v54 = vpop.f32.mrf.mxu1  ;;  %v6965_v34 = vpop.f32.mrf.mxu0 }
0x28e7   :  { %6254 = vst [vmem:[%s10523_s7 + $0x80] sm:$0xff] %v5927_v28  ;;  %v6782_v21 = vadd.f32 %v6781_v54, %v6780_v0 }
0x28e8   :  { %v5929_v15 = vpop.f32.mrf.mxu0 }
0x28e9   :  { %v5930_v53 = vadd.f32 %v6782_v21, %v5929_v15 }
0x28ea   :  { %v6966_v52 = vpop.f32.mrf.mxu0 }
0x28eb   :  { %6255 = vst [vmem:[%s10523_s7 + $0x88] sm:$0xff] %v5930_v53 }
0x28ec   :  { %5940 = vsyncpa [#allocation3], 1 }

</bundles_post_ra>
